<compile_context>
chip_gen: v5e
topology: v5e:2x2
jax: 0.10.0
libtpu: 0.0.40
codegen_flags: <defaults>
</compile_context>

<pallas_src>
import functools

import numpy as np
import jax
import jax.numpy as jnp
from jax.experimental import pallas as pl
from jax.experimental.pallas import tpu as pltpu


# ----------------------------------------------------------------------------
# Pallas kernel: one folded-contraction conv tile.
#   refs = [taps_0, w_0, ..., taps_{P-1}, w_{P-1}, bias, out]
#   taps_p : (27*Cin_p, tn)      w_p : (Cout, 27*Cin_p)
#   bias   : (Cout, 1)           out : (Cout, tn)
# ----------------------------------------------------------------------------
def _conv_kernel(*refs, n_parts, slope):
    b_ref = refs[2 * n_parts]
    o_ref = refs[2 * n_parts + 1]

    acc = jnp.dot(refs[1][...], refs[0][...],
                  preferred_element_type=jnp.float32)
    for i in range(1, n_parts):                      # fused skip-concat halves
        acc += jnp.dot(refs[2 * i + 1][...], refs[2 * i][...],
                       preferred_element_type=jnp.float32)

    y = acc + b_ref[...]                             # (Cout,1) lane-broadcast
    if slope is not None:                            # fused LeakyReLU(0.2)
        y = jnp.where(y >= 0, y, slope * y)
    o_ref[...] = y.astype(o_ref.dtype)


# ----------------------------------------------------------------------------
# im2col (layout glue): (C, D, H, W) -> (C*27, N) tap matrix, stride applied
# in the window-start slicing.  Tap order along axis 0 is (cin, kd, kh, kw),
# matching a (Cout, Cin, 3, 3, 3) weight reshaped to (Cout, Cin*27).
# ----------------------------------------------------------------------------
def _im2col(x, s, Do, Ho, Wo):
    C = x.shape[0]
    xp = jnp.pad(x, ((0, 0), (1, 1), (1, 1), (1, 1)))
    cols = []
    for kd in range(3):
        for kh in range(3):
            for kw in range(3):
                p = xp[:, kd:kd + s * Do:s, kh:kh + s * Ho:s, kw:kw + s * Wo:s]
                cols.append(p.reshape(C, Do * Ho * Wo))
    return jnp.stack(cols, axis=1).reshape(C * 27, Do * Ho * Wo)


def conv3d(xs, w, b, *, stride=1, slope=0.2):
    """3D conv, K=3, pad=1, optional fused LeakyReLU.

    xs: (C,D,H,W) array or tuple of such (treated as channel-concatenated,
        in order — fuses the skip-connection concat into the kernel).
    w : (Cout, Cin_total, 3, 3, 3)   (PyTorch layout)
    b : (Cout,)
    """
    if not isinstance(xs, (tuple, list)):
        xs = (xs,)
    Cout = w.shape[0]
    D, H, W = xs[0].shape[1:]
    s = stride
    Do, Ho, Wo = (D - 1) // s + 1, (H - 1) // s + 1, (W - 1) // s + 1
    N = Do * Ho * Wo
    Npad = ((N + 127) // 128) * 128                  # lane-dense output stores

    taps, wmats, cins = [], [], []
    c0 = 0
    for xi in xs:
        Ci = xi.shape[0]
        t = _im2col(xi, s, Do, Ho, Wo)               # (27*Ci, N)
        if Npad != N:
            t = jnp.pad(t, ((0, 0), (0, Npad - N)))
        taps.append(t)
        wmats.append(w[:, c0:c0 + Ci].reshape(Cout, Ci * 27))
        cins.append(Ci)
        c0 += Ci
    bm = b.reshape(Cout, 1)

    # N-tile axis: 256-wide tiles when possible (sharded across v7x's 2 TCs).
    tn = 256 if (Npad % 256 == 0) else Npad
    grid = (Npad // tn,)

    in_specs, operands = [], []
    for t, wm, Ci in zip(taps, wmats, cins):
        in_specs.append(pl.BlockSpec((27 * Ci, tn), lambda n: (0, n)))
        in_specs.append(pl.BlockSpec((Cout, 27 * Ci), lambda n: (0, 0)))
        operands += [t, wm]
    in_specs.append(pl.BlockSpec((Cout, 1), lambda n: (0, 0)))
    operands.append(bm)

    out = pl.pallas_call(
        functools.partial(_conv_kernel, n_parts=len(xs), slope=slope),
        out_shape=jax.ShapeDtypeStruct((Cout, Npad), jnp.float32),
        grid=grid,
        in_specs=in_specs,
        out_specs=pl.BlockSpec((Cout, tn), lambda n: (0, n)),
        compiler_params=pltpu.CompilerParams(
            dimension_semantics=("parallel",)),
    )(*operands)

    return out[:, :N].reshape(Cout, Do, Ho, Wo)


# ----------------------------------------------------------------------------
# Trilinear upsample x2, align_corners=True (separable per-axis interp).
# TODO(synk): kept as plain-JAX glue (tiny linear interp, not the hot path).
# ----------------------------------------------------------------------------
def _interp_matrix(n_in):
    n_out = 2 * n_in
    Wm = np.zeros((n_out, n_in), np.float32)
    if n_in == 1:
        Wm[:, 0] = 1.0
    else:
        scale = (n_in - 1) / (n_out - 1)
        for i in range(n_out):
            src = i * scale
            i0 = min(int(np.floor(src)), n_in - 1)
            i1 = min(i0 + 1, n_in - 1)
            f = src - i0
            Wm[i, i0] += 1.0 - f
            Wm[i, i1] += f
    return jnp.asarray(Wm)


def upsample2x(x):
    C, D, H, W = x.shape
    x = jnp.einsum('ad,cdhw->cahw', _interp_matrix(D), x)
    x = jnp.einsum('bh,cdhw->cdbw', _interp_matrix(H), x)
    x = jnp.einsum('ow,cdhw->cdho', _interp_matrix(W), x)
    return x


# ----------------------------------------------------------------------------
# Parameters (deterministic synthetic init; flow heads ~ N(0, 1e-5), bias 0).
# Weights stored in PyTorch layout (Cout, Cin, K, K, K).
# ----------------------------------------------------------------------------
def init_params(key, C_in=1, C_hid=(16, 32, 32, 32, 32), M=2, K=3):
    specs = {
        'conv1': (C_in, C_hid[0]),
        'conv2': (C_hid[0], C_hid[1]),
        'conv3': (C_hid[1], C_hid[2]),
        'conv4': (C_hid[2], C_hid[3]),
        'conv5': (C_hid[3], C_hid[4]),
        'deconv4': (C_hid[4] + C_hid[3], C_hid[3]),
        'deconv3': (C_hid[3] + C_hid[2], C_hid[2]),
        'deconv2': (C_hid[2] + C_hid[1], C_hid[1]),
        'deconv1': (C_hid[1] + C_hid[0], C_hid[0]),
        'flow1': (C_hid[2], 3 * M),
        'flow2': (C_hid[1], 3 * M),
        'flow3': (C_hid[0], 3 * M),
    }
    params = {}
    for i, (name, (cin, cout)) in enumerate(specs.items()):
        kw, kb = jax.random.split(jax.random.fold_in(key, i))
        if name.startswith('flow'):
            w = 1e-5 * jax.random.normal(kw, (cout, cin, K, K, K), jnp.float32)
            b = jnp.zeros((cout,), jnp.float32)
        else:
            bound = 1.0 / np.sqrt(cin * K ** 3)
            w = jax.random.uniform(kw, (cout, cin, K, K, K), jnp.float32,
                                   minval=-bound, maxval=bound)
            b = jax.random.uniform(kb, (cout,), jnp.float32,
                                   minval=-bound, maxval=bound)
        params[name] = (w, b)
    return params


# ----------------------------------------------------------------------------
# VFNet forward (B=1, channels-first (C, D, H, W) inside).
# ----------------------------------------------------------------------------
def vfnet_forward(x, params, M=2, R=3):
    lr = 0.2
    x1 = conv3d(x, *params['conv1'], stride=1, slope=lr)
    x2 = conv3d(x1, *params['conv2'], stride=2, slope=lr)
    x3 = conv3d(x2, *params['conv3'], stride=2, slope=lr)
    x4 = conv3d(x3, *params['conv4'], stride=2, slope=lr)
    x = conv3d(x4, *params['conv5'], stride=1, slope=lr)

    x = conv3d((x, x4), *params['deconv4'], slope=lr)       # concat fused
    x = upsample2x(x)
    x = conv3d((x, x3), *params['deconv3'], slope=lr)       # concat fused

    vf1 = upsample2x(upsample2x(conv3d(x, *params['flow1'], slope=None)))
    vf1 = vf1.reshape(M, 3, *vf1.shape[1:])

    x = upsample2x(x)
    x = conv3d((x, x2), *params['deconv2'], slope=lr)       # concat fused
    vf2 = upsample2x(conv3d(x, *params['flow2'], slope=None))
    vf2 = vf2.reshape(M, 3, *vf2.shape[1:])

    x = upsample2x(x)
    x = conv3d((x, x1), *params['deconv1'], slope=lr)       # concat fused
    vf3 = conv3d(x, *params['flow3'], slope=None)
    vf3 = vf3.reshape(M, 3, *vf3.shape[1:])

    if R == 3:
        vf = jnp.concatenate([vf1, vf2, vf3], axis=0)
    elif R == 2:
        vf = jnp.concatenate([vf2, vf3], axis=0)
    else:
        vf = vf3
    return vf


if __name__ == "__main__":
    M, R = 2, 3
    key = jax.random.PRNGKey(0)
    # PyTorch-style input: (B=1, C_in=1, D1=8, D2=8, D3=8)
    x_ncdhw = jax.random.normal(key, (1, 1, 8, 8, 8), jnp.float32)
    params = init_params(jax.random.PRNGKey(1), M=M)

    x_cdhw = x_ncdhw[0]                                      # (1, 8, 8, 8)

    fwd = jax.jit(lambda xx: vfnet_forward(xx, params, M=M, R=R))
    vf = fwd(x_cdhw)
    jax.block_until_ready(vf)

    assert vf.shape == (M * R, 3, 8, 8, 8), vf.shape
    assert vf.dtype == jnp.float32
    assert bool(jnp.all(jnp.isfinite(vf)))
    print("KERNEL_OK")
</pallas_src>

<mosaic_0001>
module attributes {stable_mosaic.version = 11 : i64} {
  func.func @_conv_kernel(%arg0: i32, %arg1: memref<27x256xf32, #tpu.memory_space<vmem>>, %arg2: memref<16x27xf32, #tpu.memory_space<vmem>>, %arg3: memref<16x1xf32, #tpu.memory_space<vmem>>, %arg4: memref<16x256xf32, #tpu.memory_space<vmem>>) attributes {dimension_semantics = [#tpu.dimension_semantics<parallel>], iteration_bounds = array<i64: 2>, scalar_prefetch = 0 : i64, scratch_operands = 0 : i64, tpu.core_type = #tpu.core_type<tc>, window_params = [{transform_indices = @transform_0, window_bounds = array<i64: 27, 256>}, {pipeline_mode = #tpu.pipeline_mode<synchronous>, transform_indices = @transform_1, window_bounds = array<i64: 16, 27>}, {pipeline_mode = #tpu.pipeline_mode<synchronous>, transform_indices = @transform_2, window_bounds = array<i64: 16, 1>}, {transform_indices = @transform_3, window_bounds = array<i64: 16, 256>}]} {
    %c0 = arith.constant 0 : index
    %c0_0 = arith.constant 0 : index
    %0 = vector.load %arg2[%c0, %c0_0] : memref<16x27xf32, #tpu.memory_space<vmem>>, vector<16x27xf32>
    %c0_1 = arith.constant 0 : index
    %c0_2 = arith.constant 0 : index
    %1 = vector.load %arg1[%c0_1, %c0_2] : memref<27x256xf32, #tpu.memory_space<vmem>>, vector<27x256xf32>
    %cst = arith.constant dense<0.000000e+00> : vector<16x256xf32>
    %2 = tpu.matmul %0, %1, %cst {dimension_numbers = #tpu.dot_dimension_numbers<[1], [0], [0], [1], [0, 0, 1, 1], [], []>} : vector<16x27xf32>, vector<27x256xf32>, vector<16x256xf32> -> vector<16x256xf32>
    %c0_3 = arith.constant 0 : index
    %c0_4 = arith.constant 0 : index
    %3 = vector.load %arg3[%c0_3, %c0_4] : memref<16x1xf32, #tpu.memory_space<vmem>>, vector<16x1xf32>
    %4 = vector.broadcast %3 : vector<16x1xf32> to vector<16x256xf32>
    %5 = arith.addf %2, %4 : vector<16x256xf32>
    %cst_5 = arith.constant 0.000000e+00 : f32
    %6 = vector.broadcast %cst_5 : f32 to vector<16x256xf32>
    %7 = arith.cmpf oge, %5, %6 : vector<16x256xf32>
    %cst_6 = arith.constant 2.000000e-01 : f32
    %8 = vector.broadcast %cst_6 : f32 to vector<16x256xf32>
    %9 = arith.mulf %8, %5 : vector<16x256xf32>
    %10 = arith.select %7, %5, %9 : vector<16x256xi1>, vector<16x256xf32>
    %c0_7 = arith.constant 0 : index
    %c0_8 = arith.constant 0 : index
    %11 = vector.load %arg4[%c0_7, %c0_8] : memref<16x256xf32, #tpu.memory_space<vmem>>, vector<16x256xf32>
    tpu.vector_store %arg4[%c0_7, %c0_8], %10 {strides = array<i32>} : memref<16x256xf32, #tpu.memory_space<vmem>>, vector<16x256xf32>,
    return
  }
  func.func @transform_0(%arg0: i32) -> (i32, i32) {
    %c0_i32 = arith.constant 0 : i32
    %c0_i32_0 = arith.constant 0 : i32
    return %c0_i32, %arg0 : i32, i32
  }
  func.func @transform_1(%arg0: i32) -> (i32, i32) {
    %c0_i32 = arith.constant 0 : i32
    %c0_i32_0 = arith.constant 0 : i32
    %c0_i32_1 = arith.constant 0 : i32
    return %c0_i32, %c0_i32_0 : i32, i32
  }
  func.func @transform_2(%arg0: i32) -> (i32, i32) {
    %c0_i32 = arith.constant 0 : i32
    %c0_i32_0 = arith.constant 0 : i32
    %c0_i32_1 = arith.constant 0 : i32
    return %c0_i32, %c0_i32_0 : i32, i32
  }
  func.func @transform_3(%arg0: i32) -> (i32, i32) {
    %c0_i32 = arith.constant 0 : i32
    %c0_i32_0 = arith.constant 0 : i32
    return %c0_i32, %arg0 : i32, i32
  }
}

module attributes {stable_mosaic.version = 11 : i64} {
  func.func @_conv_kernel(%arg0: i32, %arg1: memref<432x128xf32, #tpu.memory_space<vmem>>, %arg2: memref<32x432xf32, #tpu.memory_space<vmem>>, %arg3: memref<32x1xf32, #tpu.memory_space<vmem>>, %arg4: memref<32x128xf32, #tpu.memory_space<vmem>>) attributes {dimension_semantics = [#tpu.dimension_semantics<parallel>], iteration_bounds = array<i64: 1>, scalar_prefetch = 0 : i64, scratch_operands = 0 : i64, tpu.core_type = #tpu.core_type<tc>, window_params = [{transform_indices = @transform_0, window_bounds = array<i64: 432, 128>}, {pipeline_mode = #tpu.pipeline_mode<synchronous>, transform_indices = @transform_1, window_bounds = array<i64: 32, 432>}, {pipeline_mode = #tpu.pipeline_mode<synchronous>, transform_indices = @transform_2, window_bounds = array<i64: 32, 1>}, {transform_indices = @transform_3, window_bounds = array<i64: 32, 128>}]} {
    %c0 = arith.constant 0 : index
    %c0_0 = arith.constant 0 : index
    %0 = vector.load %arg2[%c0, %c0_0] : memref<32x432xf32, #tpu.memory_space<vmem>>, vector<32x432xf32>
    %c0_1 = arith.constant 0 : index
    %c0_2 = arith.constant 0 : index
    %1 = vector.load %arg1[%c0_1, %c0_2] : memref<432x128xf32, #tpu.memory_space<vmem>>, vector<432x128xf32>
    %cst = arith.constant dense<0.000000e+00> : vector<32x128xf32>
    %2 = tpu.matmul %0, %1, %cst {dimension_numbers = #tpu.dot_dimension_numbers<[1], [0], [0], [1], [0, 0, 1, 1], [], []>} : vector<32x432xf32>, vector<432x128xf32>, vector<32x128xf32> -> vector<32x128xf32>
    %c0_3 = arith.constant 0 : index
    %c0_4 = arith.constant 0 : index
    %3 = vector.load %arg3[%c0_3, %c0_4] : memref<32x1xf32, #tpu.memory_space<vmem>>, vector<32x1xf32>
    %4 = vector.broadcast %3 : vector<32x1xf32> to vector<32x128xf32>
    %5 = arith.addf %2, %4 : vector<32x128xf32>
    %cst_5 = arith.constant 0.000000e+00 : f32
    %6 = vector.broadcast %cst_5 : f32 to vector<32x128xf32>
    %7 = arith.cmpf oge, %5, %6 : vector<32x128xf32>
    %cst_6 = arith.constant 2.000000e-01 : f32
    %8 = vector.broadcast %cst_6 : f32 to vector<32x128xf32>
    %9 = arith.mulf %8, %5 : vector<32x128xf32>
    %10 = arith.select %7, %5, %9 : vector<32x128xi1>, vector<32x128xf32>
    %c0_7 = arith.constant 0 : index
    %c0_8 = arith.constant 0 : index
    %11 = vector.load %arg4[%c0_7, %c0_8] : memref<32x128xf32, #tpu.memory_space<vmem>>, vector<32x128xf32>
    tpu.vector_store %arg4[%c0_7, %c0_8], %10 {strides = array<i32>} : memref<32x128xf32, #tpu.memory_space<vmem>>, vector<32x128xf32>,
    return
  }
  func.func @transform_0(%arg0: i32) -> (i32, i32) {
    %c0_i32 = arith.constant 0 : i32
    %c0_i32_0 = arith.constant 0 : i32
    return %c0_i32, %arg0 : i32, i32
  }
  func.func @transform_1(%arg0: i32) -> (i32, i32) {
    %c0_i32 = arith.constant 0 : i32
    %c0_i32_0 = arith.constant 0 : i32
    %c0_i32_1 = arith.constant 0 : i32
    return %c0_i32, %c0_i32_0 : i32, i32
  }
  func.func @transform_2(%arg0: i32) -> (i32, i32) {
    %c0_i32 = arith.constant 0 : i32
    %c0_i32_0 = arith.constant 0 : i32
    %c0_i32_1 = arith.constant 0 : i32
    return %c0_i32, %c0_i32_0 : i32, i32
  }
  func.func @transform_3(%arg0: i32) -> (i32, i32) {
    %c0_i32 = arith.constant 0 : i32
    %c0_i32_0 = arith.constant 0 : i32
    return %c0_i32, %arg0 : i32, i32
  }
}

module attributes {stable_mosaic.version = 11 : i64} {
  func.func @_conv_kernel(%arg0: i32, %arg1: memref<864x128xf32, #tpu.memory_space<vmem>>, %arg2: memref<32x864xf32, #tpu.memory_space<vmem>>, %arg3: memref<32x1xf32, #tpu.memory_space<vmem>>, %arg4: memref<32x128xf32, #tpu.memory_space<vmem>>) attributes {dimension_semantics = [#tpu.dimension_semantics<parallel>], iteration_bounds = array<i64: 1>, scalar_prefetch = 0 : i64, scratch_operands = 0 : i64, tpu.core_type = #tpu.core_type<tc>, window_params = [{transform_indices = @transform_0, window_bounds = array<i64: 864, 128>}, {pipeline_mode = #tpu.pipeline_mode<synchronous>, transform_indices = @transform_1, window_bounds = array<i64: 32, 864>}, {pipeline_mode = #tpu.pipeline_mode<synchronous>, transform_indices = @transform_2, window_bounds = array<i64: 32, 1>}, {transform_indices = @transform_3, window_bounds = array<i64: 32, 128>}]} {
    %c0 = arith.constant 0 : index
    %c0_0 = arith.constant 0 : index
    %0 = vector.load %arg2[%c0, %c0_0] : memref<32x864xf32, #tpu.memory_space<vmem>>, vector<32x864xf32>
    %c0_1 = arith.constant 0 : index
    %c0_2 = arith.constant 0 : index
    %1 = vector.load %arg1[%c0_1, %c0_2] : memref<864x128xf32, #tpu.memory_space<vmem>>, vector<864x128xf32>
    %cst = arith.constant dense<0.000000e+00> : vector<32x128xf32>
    %2 = tpu.matmul %0, %1, %cst {dimension_numbers = #tpu.dot_dimension_numbers<[1], [0], [0], [1], [0, 0, 1, 1], [], []>} : vector<32x864xf32>, vector<864x128xf32>, vector<32x128xf32> -> vector<32x128xf32>
    %c0_3 = arith.constant 0 : index
    %c0_4 = arith.constant 0 : index
    %3 = vector.load %arg3[%c0_3, %c0_4] : memref<32x1xf32, #tpu.memory_space<vmem>>, vector<32x1xf32>
    %4 = vector.broadcast %3 : vector<32x1xf32> to vector<32x128xf32>
    %5 = arith.addf %2, %4 : vector<32x128xf32>
    %cst_5 = arith.constant 0.000000e+00 : f32
    %6 = vector.broadcast %cst_5 : f32 to vector<32x128xf32>
    %7 = arith.cmpf oge, %5, %6 : vector<32x128xf32>
    %cst_6 = arith.constant 2.000000e-01 : f32
    %8 = vector.broadcast %cst_6 : f32 to vector<32x128xf32>
    %9 = arith.mulf %8, %5 : vector<32x128xf32>
    %10 = arith.select %7, %5, %9 : vector<32x128xi1>, vector<32x128xf32>
    %c0_7 = arith.constant 0 : index
    %c0_8 = arith.constant 0 : index
    %11 = vector.load %arg4[%c0_7, %c0_8] : memref<32x128xf32, #tpu.memory_space<vmem>>, vector<32x128xf32>
    tpu.vector_store %arg4[%c0_7, %c0_8], %10 {strides = array<i32>} : memref<32x128xf32, #tpu.memory_space<vmem>>, vector<32x128xf32>,
    return
  }
  func.func @transform_0(%arg0: i32) -> (i32, i32) {
    %c0_i32 = arith.constant 0 : i32
    %c0_i32_0 = arith.constant 0 : i32
    return %c0_i32, %arg0 : i32, i32
  }
  func.func @transform_1(%arg0: i32) -> (i32, i32) {
    %c0_i32 = arith.constant 0 : i32
    %c0_i32_0 = arith.constant 0 : i32
    %c0_i32_1 = arith.constant 0 : i32
    return %c0_i32, %c0_i32_0 : i32, i32
  }
  func.func @transform_2(%arg0: i32) -> (i32, i32) {
    %c0_i32 = arith.constant 0 : i32
    %c0_i32_0 = arith.constant 0 : i32
    %c0_i32_1 = arith.constant 0 : i32
    return %c0_i32, %c0_i32_0 : i32, i32
  }
  func.func @transform_3(%arg0: i32) -> (i32, i32) {
    %c0_i32 = arith.constant 0 : i32
    %c0_i32_0 = arith.constant 0 : i32
    return %c0_i32, %arg0 : i32, i32
  }
}

module attributes {stable_mosaic.version = 11 : i64} {
  func.func @_conv_kernel(%arg0: i32, %arg1: memref<864x128xf32, #tpu.memory_space<vmem>>, %arg2: memref<32x864xf32, #tpu.memory_space<vmem>>, %arg3: memref<864x128xf32, #tpu.memory_space<vmem>>, %arg4: memref<32x864xf32, #tpu.memory_space<vmem>>, %arg5: memref<32x1xf32, #tpu.memory_space<vmem>>, %arg6: memref<32x128xf32, #tpu.memory_space<vmem>>) attributes {dimension_semantics = [#tpu.dimension_semantics<parallel>], iteration_bounds = array<i64: 1>, scalar_prefetch = 0 : i64, scratch_operands = 0 : i64, tpu.core_type = #tpu.core_type<tc>, window_params = [{transform_indices = @transform_0, window_bounds = array<i64: 864, 128>}, {pipeline_mode = #tpu.pipeline_mode<synchronous>, transform_indices = @transform_1, window_bounds = array<i64: 32, 864>}, {transform_indices = @transform_2, window_bounds = array<i64: 864, 128>}, {pipeline_mode = #tpu.pipeline_mode<synchronous>, transform_indices = @transform_3, window_bounds = array<i64: 32, 864>}, {pipeline_mode = #tpu.pipeline_mode<synchronous>, transform_indices = @transform_4, window_bounds = array<i64: 32, 1>}, {transform_indices = @transform_5, window_bounds = array<i64: 32, 128>}]} {
    %c0 = arith.constant 0 : index
    %c0_0 = arith.constant 0 : index
    %0 = vector.load %arg2[%c0, %c0_0] : memref<32x864xf32, #tpu.memory_space<vmem>>, vector<32x864xf32>
    %c0_1 = arith.constant 0 : index
    %c0_2 = arith.constant 0 : index
    %1 = vector.load %arg1[%c0_1, %c0_2] : memref<864x128xf32, #tpu.memory_space<vmem>>, vector<864x128xf32>
    %cst = arith.constant dense<0.000000e+00> : vector<32x128xf32>
    %2 = tpu.matmul %0, %1, %cst {dimension_numbers = #tpu.dot_dimension_numbers<[1], [0], [0], [1], [0, 0, 1, 1], [], []>} : vector<32x864xf32>, vector<864x128xf32>, vector<32x128xf32> -> vector<32x128xf32>
    %c0_3 = arith.constant 0 : index
    %c0_4 = arith.constant 0 : index
    %3 = vector.load %arg4[%c0_3, %c0_4] : memref<32x864xf32, #tpu.memory_space<vmem>>, vector<32x864xf32>
    %c0_5 = arith.constant 0 : index
    %c0_6 = arith.constant 0 : index
    %4 = vector.load %arg3[%c0_5, %c0_6] : memref<864x128xf32, #tpu.memory_space<vmem>>, vector<864x128xf32>
    %cst_7 = arith.constant dense<0.000000e+00> : vector<32x128xf32>
    %5 = tpu.matmul %3, %4, %cst_7 {dimension_numbers = #tpu.dot_dimension_numbers<[1], [0], [0], [1], [0, 0, 1, 1], [], []>} : vector<32x864xf32>, vector<864x128xf32>, vector<32x128xf32> -> vector<32x128xf32>
    %6 = arith.addf %2, %5 : vector<32x128xf32>
    %c0_8 = arith.constant 0 : index
    %c0_9 = arith.constant 0 : index
    %7 = vector.load %arg5[%c0_8, %c0_9] : memref<32x1xf32, #tpu.memory_space<vmem>>, vector<32x1xf32>
    %8 = vector.broadcast %7 : vector<32x1xf32> to vector<32x128xf32>
    %9 = arith.addf %6, %8 : vector<32x128xf32>
    %cst_10 = arith.constant 0.000000e+00 : f32
    %10 = vector.broadcast %cst_10 : f32 to vector<32x128xf32>
    %11 = arith.cmpf oge, %9, %10 : vector<32x128xf32>
    %cst_11 = arith.constant 2.000000e-01 : f32
    %12 = vector.broadcast %cst_11 : f32 to vector<32x128xf32>
    %13 = arith.mulf %12, %9 : vector<32x128xf32>
    %14 = arith.select %11, %9, %13 : vector<32x128xi1>, vector<32x128xf32>
    %c0_12 = arith.constant 0 : index
    %c0_13 = arith.constant 0 : index
    %15 = vector.load %arg6[%c0_12, %c0_13] : memref<32x128xf32, #tpu.memory_space<vmem>>, vector<32x128xf32>
    tpu.vector_store %arg6[%c0_12, %c0_13], %14 {strides = array<i32>} : memref<32x128xf32, #tpu.memory_space<vmem>>, vector<32x128xf32>,
    return
  }
  func.func @transform_0(%arg0: i32) -> (i32, i32) {
    %c0_i32 = arith.constant 0 : i32
    %c0_i32_0 = arith.constant 0 : i32
    return %c0_i32, %arg0 : i32, i32
  }
  func.func @transform_1(%arg0: i32) -> (i32, i32) {
    %c0_i32 = arith.constant 0 : i32
    %c0_i32_0 = arith.constant 0 : i32
    %c0_i32_1 = arith.constant 0 : i32
    return %c0_i32, %c0_i32_0 : i32, i32
  }
  func.func @transform_2(%arg0: i32) -> (i32, i32) {
    %c0_i32 = arith.constant 0 : i32
    %c0_i32_0 = arith.constant 0 : i32
    return %c0_i32, %arg0 : i32, i32
  }
  func.func @transform_3(%arg0: i32) -> (i32, i32) {
    %c0_i32 = arith.constant 0 : i32
    %c0_i32_0 = arith.constant 0 : i32
    %c0_i32_1 = arith.constant 0 : i32
    return %c0_i32, %c0_i32_0 : i32, i32
  }
  func.func @transform_4(%arg0: i32) -> (i32, i32) {
    %c0_i32 = arith.constant 0 : i32
    %c0_i32_0 = arith.constant 0 : i32
    %c0_i32_1 = arith.constant 0 : i32
    return %c0_i32, %c0_i32_0 : i32, i32
  }
  func.func @transform_5(%arg0: i32) -> (i32, i32) {
    %c0_i32 = arith.constant 0 : i32
    %c0_i32_0 = arith.constant 0 : i32
    return %c0_i32, %arg0 : i32, i32
  }
}

module attributes {stable_mosaic.version = 11 : i64} {
  func.func @_conv_kernel(%arg0: i32, %arg1: memref<864x128xf32, #tpu.memory_space<vmem>>, %arg2: memref<6x864xf32, #tpu.memory_space<vmem>>, %arg3: memref<6x1xf32, #tpu.memory_space<vmem>>, %arg4: memref<6x128xf32, #tpu.memory_space<vmem>>) attributes {dimension_semantics = [#tpu.dimension_semantics<parallel>], iteration_bounds = array<i64: 1>, scalar_prefetch = 0 : i64, scratch_operands = 0 : i64, tpu.core_type = #tpu.core_type<tc>, window_params = [{transform_indices = @transform_0, window_bounds = array<i64: 864, 128>}, {pipeline_mode = #tpu.pipeline_mode<synchronous>, transform_indices = @transform_1, window_bounds = array<i64: 6, 864>}, {pipeline_mode = #tpu.pipeline_mode<synchronous>, transform_indices = @transform_2, window_bounds = array<i64: 6, 1>}, {transform_indices = @transform_3, window_bounds = array<i64: 6, 128>}]} {
    %c0 = arith.constant 0 : index
    %c0_0 = arith.constant 0 : index
    %0 = vector.load %arg2[%c0, %c0_0] : memref<6x864xf32, #tpu.memory_space<vmem>>, vector<6x864xf32>
    %c0_1 = arith.constant 0 : index
    %c0_2 = arith.constant 0 : index
    %1 = vector.load %arg1[%c0_1, %c0_2] : memref<864x128xf32, #tpu.memory_space<vmem>>, vector<864x128xf32>
    %cst = arith.constant dense<0.000000e+00> : vector<6x128xf32>
    %2 = tpu.matmul %0, %1, %cst {dimension_numbers = #tpu.dot_dimension_numbers<[1], [0], [0], [1], [0, 0, 1, 1], [], []>} : vector<6x864xf32>, vector<864x128xf32>, vector<6x128xf32> -> vector<6x128xf32>
    %c0_3 = arith.constant 0 : index
    %c0_4 = arith.constant 0 : index
    %3 = vector.load %arg3[%c0_3, %c0_4] : memref<6x1xf32, #tpu.memory_space<vmem>>, vector<6x1xf32>
    %4 = vector.broadcast %3 : vector<6x1xf32> to vector<6x128xf32>
    %5 = arith.addf %2, %4 : vector<6x128xf32>
    %c0_5 = arith.constant 0 : index
    %c0_6 = arith.constant 0 : index
    %6 = vector.load %arg4[%c0_5, %c0_6] : memref<6x128xf32, #tpu.memory_space<vmem>>, vector<6x128xf32>
    tpu.vector_store %arg4[%c0_5, %c0_6], %5 {strides = array<i32>} : memref<6x128xf32, #tpu.memory_space<vmem>>, vector<6x128xf32>,
    return
  }
  func.func @transform_0(%arg0: i32) -> (i32, i32) {
    %c0_i32 = arith.constant 0 : i32
    %c0_i32_0 = arith.constant 0 : i32
    return %c0_i32, %arg0 : i32, i32
  }
  func.func @transform_1(%arg0: i32) -> (i32, i32) {
    %c0_i32 = arith.constant 0 : i32
    %c0_i32_0 = arith.constant 0 : i32
    %c0_i32_1 = arith.constant 0 : i32
    return %c0_i32, %c0_i32_0 : i32, i32
  }
  func.func @transform_2(%arg0: i32) -> (i32, i32) {
    %c0_i32 = arith.constant 0 : i32
    %c0_i32_0 = arith.constant 0 : i32
    %c0_i32_1 = arith.constant 0 : i32
    return %c0_i32, %c0_i32_0 : i32, i32
  }
  func.func @transform_3(%arg0: i32) -> (i32, i32) {
    %c0_i32 = arith.constant 0 : i32
    %c0_i32_0 = arith.constant 0 : i32
    return %c0_i32, %arg0 : i32, i32
  }
}

module attributes {stable_mosaic.version = 11 : i64} {
  func.func @_conv_kernel(%arg0: i32, %arg1: memref<864x256xf32, #tpu.memory_space<vmem>>, %arg2: memref<16x864xf32, #tpu.memory_space<vmem>>, %arg3: memref<432x256xf32, #tpu.memory_space<vmem>>, %arg4: memref<16x432xf32, #tpu.memory_space<vmem>>, %arg5: memref<16x1xf32, #tpu.memory_space<vmem>>, %arg6: memref<16x256xf32, #tpu.memory_space<vmem>>) attributes {dimension_semantics = [#tpu.dimension_semantics<parallel>], iteration_bounds = array<i64: 2>, scalar_prefetch = 0 : i64, scratch_operands = 0 : i64, tpu.core_type = #tpu.core_type<tc>, window_params = [{transform_indices = @transform_0, window_bounds = array<i64: 864, 256>}, {pipeline_mode = #tpu.pipeline_mode<synchronous>, transform_indices = @transform_1, window_bounds = array<i64: 16, 864>}, {transform_indices = @transform_2, window_bounds = array<i64: 432, 256>}, {pipeline_mode = #tpu.pipeline_mode<synchronous>, transform_indices = @transform_3, window_bounds = array<i64: 16, 432>}, {pipeline_mode = #tpu.pipeline_mode<synchronous>, transform_indices = @transform_4, window_bounds = array<i64: 16, 1>}, {transform_indices = @transform_5, window_bounds = array<i64: 16, 256>}]} {
    %c0 = arith.constant 0 : index
    %c0_0 = arith.constant 0 : index
    %0 = vector.load %arg2[%c0, %c0_0] : memref<16x864xf32, #tpu.memory_space<vmem>>, vector<16x864xf32>
    %c0_1 = arith.constant 0 : index
    %c0_2 = arith.constant 0 : index
    %1 = vector.load %arg1[%c0_1, %c0_2] : memref<864x256xf32, #tpu.memory_space<vmem>>, vector<864x256xf32>
    %cst = arith.constant dense<0.000000e+00> : vector<16x256xf32>
    %2 = tpu.matmul %0, %1, %cst {dimension_numbers = #tpu.dot_dimension_numbers<[1], [0], [0], [1], [0, 0, 1, 1], [], []>} : vector<16x864xf32>, vector<864x256xf32>, vector<16x256xf32> -> vector<16x256xf32>
    %c0_3 = arith.constant 0 : index
    %c0_4 = arith.constant 0 : index
    %3 = vector.load %arg4[%c0_3, %c0_4] : memref<16x432xf32, #tpu.memory_space<vmem>>, vector<16x432xf32>
    %c0_5 = arith.constant 0 : index
    %c0_6 = arith.constant 0 : index
    %4 = vector.load %arg3[%c0_5, %c0_6] : memref<432x256xf32, #tpu.memory_space<vmem>>, vector<432x256xf32>
    %cst_7 = arith.constant dense<0.000000e+00> : vector<16x256xf32>
    %5 = tpu.matmul %3, %4, %cst_7 {dimension_numbers = #tpu.dot_dimension_numbers<[1], [0], [0], [1], [0, 0, 1, 1], [], []>} : vector<16x432xf32>, vector<432x256xf32>, vector<16x256xf32> -> vector<16x256xf32>
    %6 = arith.addf %2, %5 : vector<16x256xf32>
    %c0_8 = arith.constant 0 : index
    %c0_9 = arith.constant 0 : index
    %7 = vector.load %arg5[%c0_8, %c0_9] : memref<16x1xf32, #tpu.memory_space<vmem>>, vector<16x1xf32>
    %8 = vector.broadcast %7 : vector<16x1xf32> to vector<16x256xf32>
    %9 = arith.addf %6, %8 : vector<16x256xf32>
    %cst_10 = arith.constant 0.000000e+00 : f32
    %10 = vector.broadcast %cst_10 : f32 to vector<16x256xf32>
    %11 = arith.cmpf oge, %9, %10 : vector<16x256xf32>
    %cst_11 = arith.constant 2.000000e-01 : f32
    %12 = vector.broadcast %cst_11 : f32 to vector<16x256xf32>
    %13 = arith.mulf %12, %9 : vector<16x256xf32>
    %14 = arith.select %11, %9, %13 : vector<16x256xi1>, vector<16x256xf32>
    %c0_12 = arith.constant 0 : index
    %c0_13 = arith.constant 0 : index
    %15 = vector.load %arg6[%c0_12, %c0_13] : memref<16x256xf32, #tpu.memory_space<vmem>>, vector<16x256xf32>
    tpu.vector_store %arg6[%c0_12, %c0_13], %14 {strides = array<i32>} : memref<16x256xf32, #tpu.memory_space<vmem>>, vector<16x256xf32>,
    return
  }
  func.func @transform_0(%arg0: i32) -> (i32, i32) {
    %c0_i32 = arith.constant 0 : i32
    %c0_i32_0 = arith.constant 0 : i32
    return %c0_i32, %arg0 : i32, i32
  }
  func.func @transform_1(%arg0: i32) -> (i32, i32) {
    %c0_i32 = arith.constant 0 : i32
    %c0_i32_0 = arith.constant 0 : i32
    %c0_i32_1 = arith.constant 0 : i32
    return %c0_i32, %c0_i32_0 : i32, i32
  }
  func.func @transform_2(%arg0: i32) -> (i32, i32) {
    %c0_i32 = arith.constant 0 : i32
    %c0_i32_0 = arith.constant 0 : i32
    return %c0_i32, %arg0 : i32, i32
  }
  func.func @transform_3(%arg0: i32) -> (i32, i32) {
    %c0_i32 = arith.constant 0 : i32
    %c0_i32_0 = arith.constant 0 : i32
    %c0_i32_1 = arith.constant 0 : i32
    return %c0_i32, %c0_i32_0 : i32, i32
  }
  func.func @transform_4(%arg0: i32) -> (i32, i32) {
    %c0_i32 = arith.constant 0 : i32
    %c0_i32_0 = arith.constant 0 : i32
    %c0_i32_1 = arith.constant 0 : i32
    return %c0_i32, %c0_i32_0 : i32, i32
  }
  func.func @transform_5(%arg0: i32) -> (i32, i32) {
    %c0_i32 = arith.constant 0 : i32
    %c0_i32_0 = arith.constant 0 : i32
    return %c0_i32, %arg0 : i32, i32
  }
}

module attributes {stable_mosaic.version = 11 : i64} {
  func.func @_conv_kernel(%arg0: i32, %arg1: memref<432x256xf32, #tpu.memory_space<vmem>>, %arg2: memref<6x432xf32, #tpu.memory_space<vmem>>, %arg3: memref<6x1xf32, #tpu.memory_space<vmem>>, %arg4: memref<6x256xf32, #tpu.memory_space<vmem>>) attributes {dimension_semantics = [#tpu.dimension_semantics<parallel>], iteration_bounds = array<i64: 2>, scalar_prefetch = 0 : i64, scratch_operands = 0 : i64, tpu.core_type = #tpu.core_type<tc>, window_params = [{transform_indices = @transform_0, window_bounds = array<i64: 432, 256>}, {pipeline_mode = #tpu.pipeline_mode<synchronous>, transform_indices = @transform_1, window_bounds = array<i64: 6, 432>}, {pipeline_mode = #tpu.pipeline_mode<synchronous>, transform_indices = @transform_2, window_bounds = array<i64: 6, 1>}, {transform_indices = @transform_3, window_bounds = array<i64: 6, 256>}]} {
    %c0 = arith.constant 0 : index
    %c0_0 = arith.constant 0 : index
    %0 = vector.load %arg2[%c0, %c0_0] : memref<6x432xf32, #tpu.memory_space<vmem>>, vector<6x432xf32>
    %c0_1 = arith.constant 0 : index
    %c0_2 = arith.constant 0 : index
    %1 = vector.load %arg1[%c0_1, %c0_2] : memref<432x256xf32, #tpu.memory_space<vmem>>, vector<432x256xf32>
    %cst = arith.constant dense<0.000000e+00> : vector<6x256xf32>
    %2 = tpu.matmul %0, %1, %cst {dimension_numbers = #tpu.dot_dimension_numbers<[1], [0], [0], [1], [0, 0, 1, 1], [], []>} : vector<6x432xf32>, vector<432x256xf32>, vector<6x256xf32> -> vector<6x256xf32>
    %c0_3 = arith.constant 0 : index
    %c0_4 = arith.constant 0 : index
    %3 = vector.load %arg3[%c0_3, %c0_4] : memref<6x1xf32, #tpu.memory_space<vmem>>, vector<6x1xf32>
    %4 = vector.broadcast %3 : vector<6x1xf32> to vector<6x256xf32>
    %5 = arith.addf %2, %4 : vector<6x256xf32>
    %c0_5 = arith.constant 0 : index
    %c0_6 = arith.constant 0 : index
    %6 = vector.load %arg4[%c0_5, %c0_6] : memref<6x256xf32, #tpu.memory_space<vmem>>, vector<6x256xf32>
    tpu.vector_store %arg4[%c0_5, %c0_6], %5 {strides = array<i32>} : memref<6x256xf32, #tpu.memory_space<vmem>>, vector<6x256xf32>,
    return
  }
  func.func @transform_0(%arg0: i32) -> (i32, i32) {
    %c0_i32 = arith.constant 0 : i32
    %c0_i32_0 = arith.constant 0 : i32
    return %c0_i32, %arg0 : i32, i32
  }
  func.func @transform_1(%arg0: i32) -> (i32, i32) {
    %c0_i32 = arith.constant 0 : i32
    %c0_i32_0 = arith.constant 0 : i32
    %c0_i32_1 = arith.constant 0 : i32
    return %c0_i32, %c0_i32_0 : i32, i32
  }
  func.func @transform_2(%arg0: i32) -> (i32, i32) {
    %c0_i32 = arith.constant 0 : i32
    %c0_i32_0 = arith.constant 0 : i32
    %c0_i32_1 = arith.constant 0 : i32
    return %c0_i32, %c0_i32_0 : i32, i32
  }
  func.func @transform_3(%arg0: i32) -> (i32, i32) {
    %c0_i32 = arith.constant 0 : i32
    %c0_i32_0 = arith.constant 0 : i32
    return %c0_i32, %arg0 : i32, i32
  }
}

</mosaic_0001>

<bundles_post_ra>
// kernel: _lambda_.12
= control target key start
LH: loop header
LB: loop body
LE: loop exit
PB: predicated region body
PF: predicated region fallthrough
CT: control target
= control target key end

     0   :  { %8 = vsyncpa [#allocation4], 0  ;;  %s740_s0 = inlined_call_operand.vmem [shape: f32[27,512], index: 0, kind: input, shape index: {}]   ;;  %s741_s1 = inlined_call_operand.hbm [shape: f32[16,27], index: 1, kind: input, shape index: {}]   ;;  %s742_s2 = inlined_call_operand.hbm [shape: f32[16,1], index: 2, kind: input, shape index: {}]   ;;  %s743_s3 = inlined_call_operand.vmem [shape: f32[16,512], index: 3, kind: output, shape index: {}]  }
   0x1   :  { %9 = vsyncpa [#allocation6], 0  ;;  %s645_s12 = smov 0   ;;  %s647_s13 = smov 0  }
   0x2   :  { %s649_s14 = smov 0  }
   0x3 LB: > { %s661_s15 = sadd.s32 4294967295, %s618_s14   ;;  %s664_s16 = sadd.s32 1, %s618_s14   ;;  %s618_s14 = sphi %s649_s14, %s749_s14   ;;  %s614_s13 = sphi %s647_s13, %s748_s13   ;;  %s610_s12 = sphi %s645_s12, %s747_s12  }
   0x4   : > { %s19_s17 = ssub.s32 %s618_s14, %s664_s16  ;;  %s22_s18 = sadd.s32 1, %s614_s13 }
   0x5   : > { %p20_p0 = scmp.eq.s32.totalorder %s19_s17, 0  ;;  %p29_p1 = scmp.ne.s32.totalorder %s614_s13, %s610_s12 }
   0x6   : > { %p30_p2 = scmp.eq.s32.totalorder %s618_s14, 0  ;;  %p101_p3 = scmp.eq.s32.totalorder %s661_s15, 1 }
   0x7   : > { %s674_s19 = scalar_select %p20_p0, %s614_s13, %s22_s18  }
   0x8   : > { %p676_p4 = por %p30_p2, %p29_p1  ;;  %p680_p5 = por %p101_p3, %p29_p1 }
   0x9   : > { %p446_p6 = scmp.ge.s32.totalorder %s618_s14, 1  ;;  %p114_p7 = scmp.lt.s32.totalorder %s618_s14, 3 }
   0xa   : > { %p494_p8 = scmp.eq.s32.totalorder %s661_s15, 0  ;;  %s125_s25 = sshll.u32 %s741_s1, 4  ;;  %s126_s25 = int_to_ptr.hbm [resolvable:$true] %s125_s25 }
   0xb   : > { %p687_p9 = pnand %p446_p6, %p114_p7  ;;  %s620_s26 = smov [#allocation3]  }
   0xc   : > { %s127_s27 = sshll.u32 %s620_s26, 4  ;;  %s139_s30 = sshll.u32 %s742_s2, 4  ;;  %s128_s27 = int_to_ptr.vmem [resolvable:$true] %s127_s27  ;;  %s140_s30 = int_to_ptr.hbm [resolvable:$true] %s139_s30 }
   0xd   : > { %p487_p10 = pneg %p687_p9  ;;  %s621_s4 = smov 128  }
   0xe   : > { %s622_s5 = smov 8   ;;  %s623_s6 = smov [#allocation5]  }
   0xf   : > { %p488_p11 = pnand %p494_p8, %p487_p10  ;;  %s141_s7 = sshll.u32 %s623_s6, 4  ;;  %s142_s7 = int_to_ptr.vmem [resolvable:$true] %s141_s7 }
  0x10   : > { %p449_p12 = scmp.ge.s32.totalorder %s618_s14, 2 }
  0x11   : > { %490 = dma.hbm_to_vmem [thread:$0]  (!%p488_p11), %s126_s25, 256, %s128_s27, [#allocation4], %s621_s4, %s621_s4, %s622_s5  }
  0x12   : > { %493 = dma.hbm_to_vmem [thread:$0]  (!%p488_p11), %s140_s30, 256, %s142_s7, [#allocation6], %s621_s4, %s621_s4, %s622_s5  }
  0x13   : > { %151 = sbr.rel (%p449_p12) target bundleno = 36 (0x24), region = 24 }
  0x18   : > { %154 = sbr.rel (!%p676_p4) target bundleno = 36 (0x24), region = 28  ;;  %s156_s8 = sand.u32 (%p676_p4), 1, %s614_s13  }
  0x19   : > { %s469_s9 = sshll.u32 (%p676_p4), %s618_s14, 4  ;;  %s450_s10 = sshll.u32 (%p676_p4), %s156_s8, 6 }
  0x1a   : > { %s161_s18 = scalar_lea.vmem (%p676_p4), %s740_s0, %s469_s9  ;;  %s158_s23 = scalar_lea.vmem (%p676_p4), [#allocation2], %s450_s10 }
  0x1b   : > { %v174_v0 = vld [vmem:[%s161_s18] sm:$0xff] (%p676_p4)  ;;  %v176_v1 = vld [vmem:[%s161_s18 + $0x8] sm:$0xff] (%p676_p4) }
  0x1c   : > { %v178_v2 = vld [vmem:[%s161_s18 + $0x20] sm:$0xff] (%p676_p4)  ;;  %175 = vst [vmem:[%s158_s23] sm:$0xff] (%p676_p4), %v174_v0  ;;  %v180_v3 = vld [vmem:[%s161_s18 + $0x28] sm:$0xff] (%p676_p4) }
  0x1d   : > { %177 = vst [vmem:[%s158_s23 + $0x8] sm:$0xff] %v176_v1  ;;  %v182_v4 = vld [vmem:[%s161_s18 + $0x40] sm:$0xff]  ;;  %v184_v5 = vld [vmem:[%s161_s18 + $0x48] sm:$0xff] }
  0x1e   : > { %179 = vst [vmem:[%s158_s23 + $0x10] sm:$0xff] %v178_v2  ;;  %v186_v6 = vld [vmem:[%s161_s18 + $0x60] sm:$0xff]  ;;  %v188_v7 = vld [vmem:[%s161_s18 + $0x68] sm:$0xff] }
  0x1f   : > { %181 = vst [vmem:[%s158_s23 + $0x18] sm:$0xff] %v180_v3 }
  0x20   : > { %183 = vst [vmem:[%s158_s23 + $0x20] sm:$0xff] %v182_v4 }
  0x21   : > { %185 = vst [vmem:[%s158_s23 + $0x28] sm:$0xff] %v184_v5 }
  0x22   : > { %187 = vst [vmem:[%s158_s23 + $0x30] sm:$0xff] %v186_v6 }
  0x23   : > { %189 = vst [vmem:[%s158_s23 + $0x38] sm:$0xff] %v188_v7 }
  0x24 PF: > { %198 = sbr.rel (%p687_p9) target bundleno = 201 (0xc9), region = 51  ;;  %s201_s14 = sand.u32 (!%p687_p9), 1, %s610_s12  }
  0x25   : > { %s454_s20 = sshll.u32 (!%p687_p9), %s201_s14, 6 }
  0x26   : > { %s203_s24 = scalar_lea.vmem (!%p687_p9), [#allocation2], %s454_s20 }
  0x29   : > { %601 = dma.done.wait (%p494_p8), [#allocation4], 256  }
  0x2a   : > { %603 = vsyncadd (%p494_p8), [#allocation4], 4294967040 }
  0x2b   : > { %605 = dma.done.wait (%p494_p8), [#allocation6], 256  }
  0x2c   : > { %607 = vsyncadd (%p494_p8), [#allocation6], 4294967040  ;;  %v624_v8 = vmov 0   ;;  %vm264_vm0 = vcmask 1042432   ;;  %v243_v9 = vld [vmem:[%s203_s24 + $0x30] sm:$0x7] }
  0x2d   : > { %527 = vset.pattern.permute.xlu0 %v624_v8  ;;  %v244_v10 = vld [vmem:[%s203_s24 + $0x38] sm:$0x7]  ;;  %v241_v11 = vld [vmem:[%s203_s24 + $0x20] sm:$0xff]  ;;  %458 = vmatpush.msk.msra.mxu0 %vm264_vm0, %v243_v9  ;;  %v242_v12 = vld [vmem:[%s203_s24 + $0x28] sm:$0xff]  ;;  %vm257_vm1 = vcmask 220160   ;;  %s457_s22 = sshll.u32 %s201_s14, 5 }
  0x2e   : > { %471 = vmatpush.msk.msra.mxu2 %vm264_vm0, %v243_v9  ;;  %461 = vmatpush.msk.msra.mxu1 %vm264_vm0, %v244_v10  ;;  %v239_v13 = vld [vmem:[%s203_s24 + $0x10] sm:$0xff]  ;;  %v240_v14 = vld [vmem:[%s203_s24 + $0x18] sm:$0xff]  ;;  %v237_v15 = vld [vmem:[%s203_s24] sm:$0xff]  ;;  %s232_s25 = scalar_lea.vmem [#allocation7], %s457_s22  ;;  %s470_s12 = sshll.u32 (%p680_p5), %s661_s15, 4 }
  0x2f   : > { %475 = vmatpush.msk.msra.mxu3 %vm264_vm0, %v244_v10  ;;  %284 = vmatpush.msra.mxu0 %v241_v11  ;;  %v238_v16 = vld [vmem:[%s203_s24 + $0x8] sm:$0xff]  ;;  %v235_v17 = vld [vmem:[#allocation3] sm:$0xff]  ;;  %v245_v19 = vld [vmem:[#allocation5] sm:$0xff]  ;;  %s342_s28 = scalar_lea.vmem (%p680_p5), %s743_s3, %s470_s12 }
  0x30   : > { %472 = vmatpush.msra.mxu2 %v241_v11  ;;  %307 = vmatpush.msra.mxu1 %v242_v12  ;;  %v236_v18 = vld [vmem:[#allocation3 + $0x8] sm:$0xff]  ;;  %v246_v20 = vld [vmem:[#allocation5 + $0x8] sm:$0xff] }
  0x31   : > { %476 = vmatpush.msra.mxu3 %v242_v12  ;;  %285 = vmatpush.msra.mxu0 %v239_v13 }
  0x32   : > { %473 = vmatpush.msra.mxu2 %v239_v13  ;;  %308 = vmatpush.msra.mxu1 %v240_v14 }
  0x33   : > { %477 = vmatpush.msra.mxu3 %v240_v14  ;;  %286 = vmatpush.msra.mxu0 %v237_v15 }
  0x34   : > { %474 = vmatpush.msra.mxu2 %v237_v15  ;;  %309 = vmatpush.msra.mxu1 %v238_v16 }
  0x35   : > { %478 = vmatpush.msra.mxu3 %v238_v16  ;;  %459 = vmatmul.msk.f32.vlgmr.msra.gmra.mxu0 %vm257_vm1, %v235_v17 }
  0x36   : > { %460 = vmatmul.msk.f32.vlgmr.msra.gmra.mxu2 %vm257_vm1, %v236_v18  ;;  %462 = vmatmul.msk.f32.vlgmr.msra.gmra.mxu1 %vm257_vm1, %v235_v17 }
  0x37   : > { %463 = vmatmul.msk.f32.vlgmr.msra.gmra.mxu3 %vm257_vm1, %v236_v18  ;;  %249 = vperm.xlu0 %527, %v245_v19  }
  0x3f   : > { %254 = vperm.xlu0 %527, %v246_v20  }
  0xa9   : > { %v250_v21 = vpop.permute.xlu0 %249 }
  0xb1   : > { %v255_v29 = vpop.permute.xlu0 %254 }
  0xb2   : > { %v288_v22 = vpop.f32.mrf.mxu0 }
  0xb3   : > { %v289_v23 = vadd.f32 %v288_v22, %v250_v21  ;;  %v311_v24 = vpop.f32.mrf.mxu1 }
  0xb4   : > { %v312_v25 = vadd.f32 %v311_v24, %v250_v21 }
  0xb5   : > { %vm317_vm2 = vcmp.ge.f32.partialorder %v289_v23, 0.0  ;;  %v321_v26 = vmul.f32 0.2, %v289_v23 }
  0xb6   : > { %vm318_vm3 = vcmp.ge.f32.partialorder %v312_v25, 0.0  ;;  %v322_v27 = vmul.f32 0.2, %v312_v25 }
  0xb7   : > { %v325_v28 = vsel %vm317_vm2, %v289_v23, %v321_v26 }
  0xb8   : > { %329 = vst [vmem:[%s232_s25] sm:$0xff] %v325_v28  ;;  %v326_v30 = vsel %vm318_vm3, %v312_v25, %v322_v27 }
  0xb9   : > { %v291_v31 = vpop.f32.mrf.mxu2  ;;  %330 = vst [vmem:[%s232_s25 + $0x8] sm:$0xff] %v326_v30 }
  0xba   : > { %v292_v32 = vadd.f32 %v291_v31, %v255_v29  ;;  %v314_v33 = vpop.f32.mrf.mxu3 }
  0xbb   : > { %v315_v34 = vadd.f32 %v314_v33, %v255_v29 }
  0xbc   : > { %vm319_vm4 = vcmp.ge.f32.partialorder %v292_v32, 0.0  ;;  %v323_v35 = vmul.f32 0.2, %v292_v32  ;;  %339 = sbr.rel (!%p680_p5) target bundleno = 201 (0xc9), region = 67 }
  0xbd   : > { %vm320_vm5 = vcmp.ge.f32.partialorder %v315_v34, 0.0  ;;  %v324_v36 = vmul.f32 0.2, %v315_v34 }
  0xbe   : > { %v327_v37 = vsel %vm319_vm4, %v292_v32, %v323_v35 }
  0xbf   : > { %331 = vst [vmem:[%s232_s25 + $0x10] sm:$0xff] %v327_v37  ;;  %v328_v38 = vsel %vm320_vm5, %v315_v34, %v324_v36  ;;  %v355_v39 = vld [vmem:[%s232_s25] sm:$0xff] (%p680_p5) }
  0xc0   : > { %332 = vst [vmem:[%s232_s25 + $0x18] sm:$0xff] %v328_v38  ;;  %v357_v40 = vld [vmem:[%s232_s25 + $0x8] sm:$0xff] (%p680_p5) }
  0xc1   : > { %356 = vst [vmem:[%s342_s28] sm:$0xff] %v355_v39 }
  0xc2   : > { %358 = vst [vmem:[%s342_s28 + $0x8] sm:$0xff] %v357_v40 }
  0xc6   : > { %v359_v41 = vld [vmem:[%s232_s25 + $0x10] sm:$0xff] }
  0xc7   : > { %v361_v42 = vld [vmem:[%s232_s25 + $0x18] sm:$0xff]  ;;  %360 = vst [vmem:[%s342_s28 + $0x20] sm:$0xff] %v359_v41 }
  0xc8   : > { %362 = vst [vmem:[%s342_s28 + $0x28] sm:$0xff] %v361_v42 }
  0xc9 PF: > { %p12_p13 = scmp.ge.s32.totalorder %s664_s16, 4   ;;  %s747_s12 = smov %s614_s13 }
  0xca   : > { %s748_s13 = smov %s674_s19  ;;  %s749_s14 = smov %s664_s16 }
  0xcb   :  { %14 = sbr.rel (!%p12_p13) target bundleno = 3 (0x3), region = 122 }
  0xd0   :  { %378 = vsyncpa [#allocation4], 1 }
  0xd1   :  { %380 = vsyncpa [#allocation4 + $0x1], 1 }
  0xd2   :  { %381 = vsyncpa [#allocation6], 1 }

// kernel: _lambda_.13
= control target key start
LH: loop header
LB: loop body
LE: loop exit
PB: predicated region body
PF: predicated region fallthrough
CT: control target
= control target key end

     0   :  { %vm108_vm0 = vcmask 392192   ;;  %v264_v52 = vmov 0   ;;  %s523_s0 = inlined_call_operand.vmem [shape: f32[432,128], index: 0, kind: input, shape index: {}]   ;;  %s524_s1 = inlined_call_operand.vmem [shape: f32[32,432], index: 1, kind: input, shape index: {}]   ;;  %s525_s2 = inlined_call_operand.vmem [shape: f32[32,1], index: 2, kind: input, shape index: {}]   ;;  %s526_s3 = inlined_call_operand.vmem [shape: f32[32,128], index: 3, kind: output, shape index: {}]  }
   0x1   :  { %v45_v0 = vld [vmem:[%s523_s0 + $0x78] sm:$0xff]  ;;  %v44_v2 = vld [vmem:[%s523_s0 + $0x70] sm:$0xff]  ;;  %v43_v5 = vld [vmem:[%s523_s0 + $0x68] sm:$0xff]  ;;  %262 = vset.pattern.permute.xlu0 %v264_v52  ;;  %263 = vset.pattern.permute.xlu1 %v264_v52 }
   0x2   :  { %v77_v1 = vld [vmem:[%s523_s0 + $0x178] sm:$0xff]  ;;  %121 = vmatpush.msra.mxu0 %v45_v0  ;;  %v76_v4 = vld [vmem:[%s523_s0 + $0x170] sm:$0xff]  ;;  %v75_v7 = vld [vmem:[%s523_s0 + $0x168] sm:$0xff] }
   0x3   :  { %179 = vmatpush.msra.mxu2 %v77_v1  ;;  %v61_v3 = vld [vmem:[%s523_s0 + $0xf8] sm:$0xff]  ;;  %v60_v6 = vld [vmem:[%s523_s0 + $0xf0] sm:$0xff]  ;;  %v59_v8 = vld [vmem:[%s523_s0 + $0xe8] sm:$0xff] }
   0x4   :  { %150 = vmatpush.msra.mxu1 %v61_v3  ;;  %122 = vmatpush.msra.mxu0 %v44_v2  ;;  %v42_v9 = vld [vmem:[%s523_s0 + $0x60] sm:$0xff]  ;;  %v41_v12 = vld [vmem:[%s523_s0 + $0x58] sm:$0xff]  ;;  %v40_v15 = vld [vmem:[%s523_s0 + $0x50] sm:$0xff] }
   0x5   :  { %180 = vmatpush.msra.mxu2 %v76_v4  ;;  %v74_v10 = vld [vmem:[%s523_s0 + $0x160] sm:$0xff]  ;;  %v73_v13 = vld [vmem:[%s523_s0 + $0x158] sm:$0xff]  ;;  %v72_v16 = vld [vmem:[%s523_s0 + $0x150] sm:$0xff] }
   0x6   :  { %151 = vmatpush.msra.mxu1 %v60_v6  ;;  %123 = vmatpush.msra.mxu0 %v43_v5  ;;  %v58_v11 = vld [vmem:[%s523_s0 + $0xe0] sm:$0xff]  ;;  %v57_v14 = vld [vmem:[%s523_s0 + $0xd8] sm:$0xff]  ;;  %v56_v17 = vld [vmem:[%s523_s0 + $0xd0] sm:$0xff] }
   0x7   :  { %181 = vmatpush.msra.mxu2 %v75_v7  ;;  %v39_v18 = vld [vmem:[%s523_s0 + $0x48] sm:$0xff]  ;;  %v38_v22 = vld [vmem:[%s523_s0 + $0x40] sm:$0xff]  ;;  %v37_v26 = vld [vmem:[%s523_s0 + $0x38] sm:$0xff] }
   0x8   :  { %152 = vmatpush.msra.mxu1 %v59_v8  ;;  %124 = vmatpush.msra.mxu0 %v42_v9  ;;  %v71_v19 = vld [vmem:[%s523_s0 + $0x148] sm:$0xff]  ;;  %v70_v23 = vld [vmem:[%s523_s0 + $0x140] sm:$0xff]  ;;  %v69_v27 = vld [vmem:[%s523_s0 + $0x138] sm:$0xff] }
   0x9   :  { %182 = vmatpush.msra.mxu2 %v74_v10  ;;  %v55_v20 = vld [vmem:[%s523_s0 + $0xc8] sm:$0xff]  ;;  %v54_v24 = vld [vmem:[%s523_s0 + $0xc0] sm:$0xff]  ;;  %v81_v28 = vld [vmem:[%s523_s0 + $0x198] sm:$0xff] }
   0xa   :  { %153 = vmatpush.msra.mxu1 %v58_v11  ;;  %125 = vmatpush.msra.mxu0 %v41_v12  ;;  %v83_v21 = vld [vmem:[%s523_s0 + $0x1a8] sm:$0xff]  ;;  %v82_v25 = vld [vmem:[%s523_s0 + $0x1a0] sm:$0xff]  ;;  %v53_v29 = vld [vmem:[%s523_s0 + $0xb8] sm:$0xff] }
   0xb   :  { %183 = vmatpush.msra.mxu2 %v73_v13  ;;  %218 = vmatpush.msra.mxu3 %v83_v21  ;;  %v80_v30 = vld [vmem:[%s523_s0 + $0x190] sm:$0xff]  ;;  %v79_v34 = vld [vmem:[%s523_s0 + $0x188] sm:$0xff]  ;;  %v78_v38 = vld [vmem:[%s523_s0 + $0x180] sm:$0xff] }
   0xc   :  { %154 = vmatpush.msra.mxu1 %v57_v14  ;;  %126 = vmatpush.msra.mxu0 %v40_v15  ;;  %v36_v31 = vld [vmem:[%s523_s0 + $0x30] sm:$0xff]  ;;  %v35_v35 = vld [vmem:[%s523_s0 + $0x28] sm:$0xff]  ;;  %v34_v39 = vld [vmem:[%s523_s0 + $0x20] sm:$0xff] }
   0xd   :  { %184 = vmatpush.msra.mxu2 %v72_v16  ;;  %219 = vmatpush.msra.mxu3 %v82_v25  ;;  %v68_v32 = vld [vmem:[%s523_s0 + $0x130] sm:$0xff]  ;;  %v67_v36 = vld [vmem:[%s523_s0 + $0x128] sm:$0xff]  ;;  %v66_v40 = vld [vmem:[%s523_s0 + $0x120] sm:$0xff] }
   0xe   :  { %155 = vmatpush.msra.mxu1 %v56_v17  ;;  %127 = vmatpush.msra.mxu0 %v39_v18  ;;  %v52_v33 = vld [vmem:[%s523_s0 + $0xb0] sm:$0xff]  ;;  %v51_v37 = vld [vmem:[%s523_s0 + $0xa8] sm:$0xff]  ;;  %v50_v41 = vld [vmem:[%s523_s0 + $0xa0] sm:$0xff] }
   0xf   :  { %185 = vmatpush.msra.mxu2 %v71_v19  ;;  %220 = vmatpush.msra.mxu3 %v81_v28  ;;  %v17_v42 = vld [vmem:[%s524_s1 + $0x18] sm:$0xff]  ;;  %v32_v46 = vld [vmem:[%s523_s0 + $0x10] sm:$0xff]  ;;  %v84_v49 = vld [vmem:[%s525_s2] sm:$0xff] }
  0x10   :  { %156 = vmatpush.msra.mxu1 %v55_v20  ;;  %128 = vmatpush.msra.mxu0 %v38_v22  ;;  %v33_v43 = vld [vmem:[%s523_s0 + $0x18] sm:$0xff]  ;;  %v64_v47 = vld [vmem:[%s523_s0 + $0x110] sm:$0xff]  ;;  %v31_v50 = vld [vmem:[%s523_s0 + $0x8] sm:$0xff] }
  0x11   :  { %186 = vmatpush.msra.mxu2 %v70_v23  ;;  %221 = vmatpush.msra.mxu3 %v80_v30  ;;  %v65_v44 = vld [vmem:[%s523_s0 + $0x118] sm:$0xff]  ;;  %v48_v48 = vld [vmem:[%s523_s0 + $0x90] sm:$0xff]  ;;  %v63_v51 = vld [vmem:[%s523_s0 + $0x108] sm:$0xff] }
  0x12   :  { %157 = vmatpush.msra.mxu1 %v54_v24  ;;  %129 = vmatpush.msra.mxu0 %v37_v26  ;;  %v49_v45 = vld [vmem:[%s523_s0 + $0x98] sm:$0xff]  ;;  %v47_v53 = vld [vmem:[%s523_s0 + $0x88] sm:$0xff]  ;;  %v30_v54 = vld [vmem:[%s523_s0] sm:$0xff] }
  0x13   :  { %187 = vmatpush.msra.mxu2 %v69_v27  ;;  %222 = vmatpush.msra.mxu3 %v79_v34  ;;  %v62_v55 = vld [vmem:[%s523_s0 + $0x100] sm:$0xff]  ;;  %v16_v57 = vld [vmem:[%s524_s1 + $0x10] sm:$0xff]  ;;  %v21_v59 = vld [vmem:[%s524_s1 + $0x38] sm:$0xff] }
  0x14   :  { %158 = vmatpush.msra.mxu1 %v53_v29  ;;  %130 = vmatpush.msra.mxu0 %v36_v31  ;;  %v14_v56 = vld [vmem:[%s524_s1] sm:$0xff]  ;;  %v15_v60 = vld [vmem:[%s524_s1 + $0x8] sm:$0xff]  ;;  %v86_v61 = vld [vmem:[%s525_s2 + $0x10] sm:$0xff] }
  0x15   :  { %188 = vmatpush.msra.mxu2 %v68_v32  ;;  %223 = vmatpush.msra.mxu3 %v78_v38  ;;  %v46_v58 = vld [vmem:[%s523_s0 + $0x80] sm:$0xff]  ;;  %v85_v62 = vld [vmem:[%s525_s2 + $0x8] sm:$0xff]  ;;  %v20_v0 = vld [vmem:[%s524_s1 + $0x30] sm:$0xff] }
  0x16   :  { %159 = vmatpush.msra.mxu1 %v52_v33  ;;  %131 = vmatpush.msra.mxu0 %v35_v35  ;;  %v18_v63 = vld [vmem:[%s524_s1 + $0x20] sm:$0xff]  ;;  %v25_v1 = vld [vmem:[%s524_s1 + $0x58] sm:$0xff]  ;;  %v19_v2 = vld [vmem:[%s524_s1 + $0x28] sm:$0xff] }
  0x17   :  { %189 = vmatpush.msra.mxu2 %v67_v36  ;;  %257 = vmatmul.msk.f32.vlgmr.msra.gmra.mxu3 %vm108_vm0, %v17_v42  ;;  %v87_v3 = vld [vmem:[%s525_s2 + $0x18] sm:$0xff]  ;;  %v22_v4 = vld [vmem:[%s524_s1 + $0x40] sm:$0xff]  ;;  %v24_v5 = vld [vmem:[%s524_s1 + $0x50] sm:$0xff] }
  0x18   :  { %160 = vmatpush.msra.mxu1 %v51_v37  ;;  %132 = vmatpush.msra.mxu0 %v34_v39  ;;  %v29_v6 = vld [vmem:[%s524_s1 + $0x78] sm:$0xff]  ;;  %v23_v7 = vld [vmem:[%s524_s1 + $0x48] sm:$0xff]  ;;  %v26_v8 = vld [vmem:[%s524_s1 + $0x60] sm:$0xff] }
  0x19   :  { %190 = vmatpush.msra.mxu2 %v66_v40  ;;  %90 = vperm.xlu0 %262, %v84_v49   ;;  %v28_v9 = vld [vmem:[%s524_s1 + $0x70] sm:$0xff]  ;;  %v27_v10 = vld [vmem:[%s524_s1 + $0x68] sm:$0xff] }
  0x1a   :  { %161 = vmatpush.msra.mxu1 %v50_v41  ;;  %133 = vmatpush.msra.mxu0 %v33_v43 }
  0x1b   :  { %191 = vmatpush.msra.mxu2 %v65_v44  ;;  %100 = vperm.xlu1 %263, %v86_v61  }
  0x1c   :  { %162 = vmatpush.msra.mxu1 %v49_v45  ;;  %134 = vmatpush.msra.mxu0 %v32_v46 }
  0x1d   :  { %192 = vmatpush.msra.mxu2 %v64_v47 }
  0x1e   :  { %163 = vmatpush.msra.mxu1 %v48_v48  ;;  %135 = vmatpush.msra.mxu0 %v31_v50 }
  0x1f   :  { %193 = vmatpush.msra.mxu2 %v63_v51  ;;  %258 = vmatmul.msk.f32.gmra.mxu3 %vm108_vm0, %v21_v59 }
  0x20   :  { %164 = vmatpush.msra.mxu1 %v47_v53  ;;  %136 = vmatpush.msra.mxu0 %v30_v54 }
  0x21   :  { %194 = vmatpush.msra.mxu2 %v62_v55  ;;  %137 = vmatmul.f32.vlgmr.msra.gmra.mxu0 %v14_v56 }
  0x22   :  { %195 = vmatmul.f32.vlgmr.msra.gmra.mxu2 %v16_v57  ;;  %165 = vmatpush.msra.mxu1 %v46_v58 }
  0x23   :  { %166 = vmatmul.f32.vlgmr.msra.gmra.mxu1 %v15_v60  ;;  %95 = vperm.xlu0 %262, %v85_v62  }
  0x24   :  { %105 = vperm.xlu1 %263, %v87_v3  }
  0x27   :  { %259 = vmatmul.msk.f32.gmra.mxu3 %vm108_vm0, %v25_v1 }
  0x29   :  { %140 = vmatmul.f32.gmra.mxu0 %v18_v63 }
  0x2a   :  { %198 = vmatmul.f32.gmra.mxu2 %v20_v0 }
  0x2b   :  { %169 = vmatmul.f32.gmra.mxu1 %v19_v2 }
  0x2f   :  { %260 = vmatmul.msk.f32.gmra.mxu3 %vm108_vm0, %v29_v6 }
  0x31   :  { %143 = vmatmul.f32.gmra.mxu0 %v22_v4 }
  0x32   :  { %201 = vmatmul.f32.gmra.mxu2 %v24_v5 }
  0x33   :  { %172 = vmatmul.f32.gmra.mxu1 %v23_v7 }
  0x39   :  { %146 = vmatmul.f32.gmra.mxu0 %v26_v8 }
  0x3a   :  { %204 = vmatmul.f32.gmra.mxu2 %v28_v9 }
  0x3b   :  { %175 = vmatmul.f32.gmra.mxu1 %v27_v10 }
  0x8b   :  { %v91_v11 = vpop.permute.xlu0 %90 }
  0x8d   :  { %v101_v28 = vpop.permute.xlu1 %100 }
  0x95   :  { %v96_v18 = vpop.permute.xlu0 %95 }
  0x96   :  { %v106_v41 = vpop.permute.xlu1 %105 }
  0x9a   :  { %v225_v13 = vpop.f32.mrf.mxu3 }
  0x9e   :  { %v138_v12 = vpop.f32.mrf.mxu0 }
  0x9f   :  { %v139_v14 = vadd.f32 %v138_v12, %v91_v11 }
  0xa0   :  { %v167_v15 = vpop.f32.mrf.mxu1 }
  0xa1   :  { %v168_v16 = vadd.f32 %v167_v15, %v139_v14 }
  0xa2   :  { %v228_v24 = vpop.f32.mrf.mxu3 }
  0xa5   :  { %v196_v17 = vpop.f32.mrf.mxu2 }
  0xa6   :  { %v197_v19 = vadd.f32 %v196_v17, %v168_v16  ;;  %v141_v20 = vpop.f32.mrf.mxu0 }
  0xa7   :  { %v142_v22 = vadd.f32 %v141_v20, %v96_v18 }
  0xa8   :  { %v226_v21 = vadd.f32 %v225_v13, %v197_v19  ;;  %v170_v23 = vpop.f32.mrf.mxu1 }
  0xa9   :  { %v171_v26 = vadd.f32 %v170_v23, %v142_v22 }
  0xaa   :  { %vm237_vm1 = vcmp.ge.f32.partialorder %v226_v21, 0.0  ;;  %v241_v25 = vmul.f32 0.2, %v226_v21  ;;  %v231_v37 = vpop.f32.mrf.mxu3 }
  0xac   :  { %v245_v27 = vsel %vm237_vm1, %v226_v21, %v241_v25 }
  0xad   :  { %249 = vst [vmem:[%s526_s3] sm:$0xff] %v245_v27  ;;  %v199_v29 = vpop.f32.mrf.mxu2 }
  0xae   :  { %v200_v30 = vadd.f32 %v199_v29, %v171_v26  ;;  %v144_v31 = vpop.f32.mrf.mxu0 }
  0xaf   :  { %v145_v32 = vadd.f32 %v144_v31, %v101_v28 }
  0xb0   :  { %v229_v33 = vadd.f32 %v228_v24, %v200_v30  ;;  %v173_v34 = vpop.f32.mrf.mxu1 }
  0xb1   :  { %v174_v36 = vadd.f32 %v173_v34, %v145_v32 }
  0xb2   :  { %vm238_vm2 = vcmp.ge.f32.partialorder %v229_v33, 0.0  ;;  %v242_v35 = vmul.f32 0.2, %v229_v33  ;;  %v234_v50 = vpop.f32.mrf.mxu3 }
  0xb4   :  { %v246_v38 = vsel %vm238_vm2, %v229_v33, %v242_v35 }
  0xb5   :  { %250 = vst [vmem:[%s526_s3 + $0x8] sm:$0xff] %v246_v38  ;;  %v202_v39 = vpop.f32.mrf.mxu2 }
  0xb6   :  { %v203_v40 = vadd.f32 %v202_v39, %v174_v36  ;;  %v147_v42 = vpop.f32.mrf.mxu0 }
  0xb7   :  { %v148_v43 = vadd.f32 %v147_v42, %v106_v41 }
  0xb8   :  { %v232_v44 = vadd.f32 %v231_v37, %v203_v40  ;;  %v176_v45 = vpop.f32.mrf.mxu1 }
  0xb9   :  { %v177_v48 = vadd.f32 %v176_v45, %v148_v43 }
  0xba   :  { %vm239_vm3 = vcmp.ge.f32.partialorder %v232_v44, 0.0  ;;  %v243_v46 = vmul.f32 0.2, %v232_v44 }
  0xbc   :  { %v247_v47 = vsel %vm239_vm3, %v232_v44, %v243_v46 }
  0xbd   :  { %251 = vst [vmem:[%s526_s3 + $0x10] sm:$0xff] %v247_v47  ;;  %v205_v49 = vpop.f32.mrf.mxu2 }
  0xbe   :  { %v206_v51 = vadd.f32 %v205_v49, %v177_v48 }
  0xc0   :  { %v235_v52 = vadd.f32 %v234_v50, %v206_v51 }
  0xc2   :  { %vm240_vm4 = vcmp.ge.f32.partialorder %v235_v52, 0.0  ;;  %v244_v53 = vmul.f32 0.2, %v235_v52 }
  0xc4   :  { %v248_v54 = vsel %vm240_vm4, %v235_v52, %v244_v53 }
  0xc5   :  { %252 = vst [vmem:[%s526_s3 + $0x18] sm:$0xff] %v248_v54 }

// kernel: _lambda_.14
= control target key start
LH: loop header
LB: loop body
LE: loop exit
PB: predicated region body
PF: predicated region fallthrough
CT: control target
= control target key end

     0   :  { %vm174_vm0 = vcmask 785408   ;;  %s892_s0 = inlined_call_operand.vmem [shape: f32[864,128], index: 0, kind: input, shape index: {}]   ;;  %s893_s1 = inlined_call_operand.vmem [shape: f32[32,864], index: 1, kind: input, shape index: {}]   ;;  %s894_s2 = inlined_call_operand.vmem [shape: f32[32,1], index: 2, kind: input, shape index: {}]   ;;  %s895_s3 = inlined_call_operand.vmem [shape: f32[32,128], index: 3, kind: output, shape index: {}]  }
   0x1   :  { %v57_v0 = vld [vmem:[%s892_s0 + $0x78] sm:$0xff]  ;;  %v56_v4 = vld [vmem:[%s892_s0 + $0x70] sm:$0xff]  ;;  %v55_v8 = vld [vmem:[%s892_s0 + $0x68] sm:$0xff] }
   0x2   :  { %v73_v1 = vld [vmem:[%s892_s0 + $0xf8] sm:$0xff]  ;;  %187 = vmatpush.msra.mxu0 %v57_v0  ;;  %v72_v5 = vld [vmem:[%s892_s0 + $0xf0] sm:$0xff]  ;;  %v71_v9 = vld [vmem:[%s892_s0 + $0xe8] sm:$0xff] }
   0x3   :  { %v89_v2 = vld [vmem:[%s892_s0 + $0x178] sm:$0xff]  ;;  %216 = vmatpush.msra.mxu1 %v73_v1  ;;  %v88_v6 = vld [vmem:[%s892_s0 + $0x170] sm:$0xff]  ;;  %v87_v10 = vld [vmem:[%s892_s0 + $0x168] sm:$0xff] }
   0x4   :  { %v105_v3 = vld [vmem:[%s892_s0 + $0x1f8] sm:$0xff]  ;;  %245 = vmatpush.msra.mxu2 %v89_v2  ;;  %v104_v7 = vld [vmem:[%s892_s0 + $0x1f0] sm:$0xff]  ;;  %188 = vmatpush.msra.mxu0 %v56_v4  ;;  %v103_v11 = vld [vmem:[%s892_s0 + $0x1e8] sm:$0xff] }
   0x5   :  { %274 = vmatpush.msra.mxu3 %v105_v3  ;;  %217 = vmatpush.msra.mxu1 %v72_v5  ;;  %v54_v12 = vld [vmem:[%s892_s0 + $0x60] sm:$0xff]  ;;  %v53_v16 = vld [vmem:[%s892_s0 + $0x58] sm:$0xff]  ;;  %v52_v20 = vld [vmem:[%s892_s0 + $0x50] sm:$0xff] }
   0x6   :  { %246 = vmatpush.msra.mxu2 %v88_v6  ;;  %v70_v13 = vld [vmem:[%s892_s0 + $0xe0] sm:$0xff]  ;;  %189 = vmatpush.msra.mxu0 %v55_v8  ;;  %v69_v17 = vld [vmem:[%s892_s0 + $0xd8] sm:$0xff]  ;;  %v68_v21 = vld [vmem:[%s892_s0 + $0xd0] sm:$0xff] }
   0x7   :  { %275 = vmatpush.msra.mxu3 %v104_v7  ;;  %218 = vmatpush.msra.mxu1 %v71_v9  ;;  %v86_v14 = vld [vmem:[%s892_s0 + $0x160] sm:$0xff]  ;;  %v85_v18 = vld [vmem:[%s892_s0 + $0x158] sm:$0xff]  ;;  %v84_v22 = vld [vmem:[%s892_s0 + $0x150] sm:$0xff] }
   0x8   :  { %v102_v15 = vld [vmem:[%s892_s0 + $0x1e0] sm:$0xff]  ;;  %247 = vmatpush.msra.mxu2 %v87_v10  ;;  %190 = vmatpush.msra.mxu0 %v54_v12  ;;  %v101_v19 = vld [vmem:[%s892_s0 + $0x1d8] sm:$0xff]  ;;  %v100_v23 = vld [vmem:[%s892_s0 + $0x1d0] sm:$0xff] }
   0x9   :  { %276 = vmatpush.msra.mxu3 %v103_v11  ;;  %219 = vmatpush.msra.mxu1 %v70_v13  ;;  %v51_v24 = vld [vmem:[%s892_s0 + $0x48] sm:$0xff]  ;;  %v50_v28 = vld [vmem:[%s892_s0 + $0x40] sm:$0xff]  ;;  %v49_v32 = vld [vmem:[%s892_s0 + $0x38] sm:$0xff] }
   0xa   :  { %248 = vmatpush.msra.mxu2 %v86_v14  ;;  %191 = vmatpush.msra.mxu0 %v53_v16  ;;  %v67_v25 = vld [vmem:[%s892_s0 + $0xc8] sm:$0xff]  ;;  %v66_v29 = vld [vmem:[%s892_s0 + $0xc0] sm:$0xff]  ;;  %v65_v33 = vld [vmem:[%s892_s0 + $0xb8] sm:$0xff] }
   0xb   :  { %277 = vmatpush.msra.mxu3 %v102_v15  ;;  %220 = vmatpush.msra.mxu1 %v69_v17  ;;  %v83_v26 = vld [vmem:[%s892_s0 + $0x148] sm:$0xff]  ;;  %v82_v30 = vld [vmem:[%s892_s0 + $0x140] sm:$0xff]  ;;  %v81_v34 = vld [vmem:[%s892_s0 + $0x138] sm:$0xff] }
   0xc   :  { %249 = vmatpush.msra.mxu2 %v85_v18  ;;  %192 = vmatpush.msra.mxu0 %v52_v20  ;;  %v99_v27 = vld [vmem:[%s892_s0 + $0x1c8] sm:$0xff]  ;;  %v98_v31 = vld [vmem:[%s892_s0 + $0x1c0] sm:$0xff]  ;;  %v97_v35 = vld [vmem:[%s892_s0 + $0x1b8] sm:$0xff] }
   0xd   :  { %278 = vmatpush.msra.mxu3 %v101_v19  ;;  %221 = vmatpush.msra.mxu1 %v68_v21  ;;  %v48_v36 = vld [vmem:[%s892_s0 + $0x30] sm:$0xff]  ;;  %v47_v40 = vld [vmem:[%s892_s0 + $0x28] sm:$0xff]  ;;  %v46_v44 = vld [vmem:[%s892_s0 + $0x20] sm:$0xff] }
   0xe   :  { %250 = vmatpush.msra.mxu2 %v84_v22  ;;  %193 = vmatpush.msra.mxu0 %v51_v24  ;;  %v64_v37 = vld [vmem:[%s892_s0 + $0xb0] sm:$0xff]  ;;  %v63_v41 = vld [vmem:[%s892_s0 + $0xa8] sm:$0xff]  ;;  %v62_v45 = vld [vmem:[%s892_s0 + $0xa0] sm:$0xff] }
   0xf   :  { %279 = vmatpush.msra.mxu3 %v100_v23  ;;  %222 = vmatpush.msra.mxu1 %v67_v25  ;;  %v80_v38 = vld [vmem:[%s892_s0 + $0x130] sm:$0xff]  ;;  %v79_v42 = vld [vmem:[%s892_s0 + $0x128] sm:$0xff]  ;;  %v78_v46 = vld [vmem:[%s892_s0 + $0x120] sm:$0xff] }
  0x10   :  { %251 = vmatpush.msra.mxu2 %v83_v26  ;;  %194 = vmatpush.msra.mxu0 %v50_v28  ;;  %v96_v39 = vld [vmem:[%s892_s0 + $0x1b0] sm:$0xff]  ;;  %v95_v43 = vld [vmem:[%s892_s0 + $0x1a8] sm:$0xff]  ;;  %v94_v47 = vld [vmem:[%s892_s0 + $0x1a0] sm:$0xff]  ;;  %v433_v28 = vmov 0  }
  0x11   :  { %280 = vmatpush.msra.mxu3 %v99_v27  ;;  %223 = vmatpush.msra.mxu1 %v66_v29  ;;  %v45_v48 = vld [vmem:[%s892_s0 + $0x18] sm:$0xff]  ;;  %v44_v52 = vld [vmem:[%s892_s0 + $0x10] sm:$0xff]  ;;  %v43_v56 = vld [vmem:[%s892_s0 + $0x8] sm:$0xff] }
  0x12   :  { %252 = vmatpush.msra.mxu2 %v82_v30  ;;  %195 = vmatpush.msra.mxu0 %v49_v32  ;;  %v61_v49 = vld [vmem:[%s892_s0 + $0x98] sm:$0xff]  ;;  %v60_v53 = vld [vmem:[%s892_s0 + $0x90] sm:$0xff]  ;;  %v59_v57 = vld [vmem:[%s892_s0 + $0x88] sm:$0xff] }
  0x13   :  { %281 = vmatpush.msra.mxu3 %v98_v31  ;;  %224 = vmatpush.msra.mxu1 %v65_v33  ;;  %v77_v50 = vld [vmem:[%s892_s0 + $0x118] sm:$0xff]  ;;  %v76_v54 = vld [vmem:[%s892_s0 + $0x110] sm:$0xff]  ;;  %v75_v58 = vld [vmem:[%s892_s0 + $0x108] sm:$0xff] }
  0x14   :  { %253 = vmatpush.msra.mxu2 %v81_v34  ;;  %196 = vmatpush.msra.mxu0 %v48_v36  ;;  %v93_v51 = vld [vmem:[%s892_s0 + $0x198] sm:$0xff]  ;;  %v92_v55 = vld [vmem:[%s892_s0 + $0x190] sm:$0xff]  ;;  %v91_v59 = vld [vmem:[%s892_s0 + $0x188] sm:$0xff] }
  0x15   :  { %282 = vmatpush.msra.mxu3 %v97_v35  ;;  %225 = vmatpush.msra.mxu1 %v64_v37  ;;  %v42_v60 = vld [vmem:[%s892_s0] sm:$0xff]  ;;  %v15_v1 = vld [vmem:[%s893_s1 + $0x8] sm:$0xff]  ;;  %v16_v2 = vld [vmem:[%s893_s1 + $0x10] sm:$0xff] }
  0x16   :  { %254 = vmatpush.msra.mxu2 %v80_v38  ;;  %197 = vmatpush.msra.mxu0 %v47_v40  ;;  %v58_v61 = vld [vmem:[%s892_s0 + $0x80] sm:$0xff]  ;;  %v17_v3 = vld [vmem:[%s893_s1 + $0x18] sm:$0xff]  ;;  %v120_v7 = vld [vmem:[%s892_s0 + $0x270] sm:$0xff] }
  0x17   :  { %283 = vmatpush.msra.mxu3 %v96_v39  ;;  %226 = vmatpush.msra.mxu1 %v63_v41  ;;  %v74_v62 = vld [vmem:[%s892_s0 + $0x100] sm:$0xff]  ;;  %v149_v4 = vld [vmem:[%s892_s0 + $0x358] sm:$0xff]  ;;  %v148_v8 = vld [vmem:[%s892_s0 + $0x350] sm:$0xff] }
  0x18   :  { %255 = vmatpush.msra.mxu2 %v79_v42  ;;  %198 = vmatpush.msra.mxu0 %v46_v44  ;;  %v90_v63 = vld [vmem:[%s892_s0 + $0x180] sm:$0xff]  ;;  %v121_v5 = vld [vmem:[%s892_s0 + $0x278] sm:$0xff]  ;;  %v136_v9 = vld [vmem:[%s892_s0 + $0x2f0] sm:$0xff] }
  0x19   :  { %284 = vmatpush.msra.mxu3 %v95_v43  ;;  %227 = vmatpush.msra.mxu1 %v62_v45  ;;  %v14_v0 = vld [vmem:[%s893_s1] sm:$0xff]  ;;  %v137_v6 = vld [vmem:[%s892_s0 + $0x2f8] sm:$0xff]  ;;  %v119_v10 = vld [vmem:[%s892_s0 + $0x268] sm:$0xff] }
  0x1a   :  { %256 = vmatpush.msra.mxu2 %v78_v46  ;;  %199 = vmatpush.msra.mxu0 %v45_v48  ;;  %v147_v11 = vld [vmem:[%s892_s0 + $0x348] sm:$0xff]  ;;  %v118_v13 = vld [vmem:[%s892_s0 + $0x260] sm:$0xff]  ;;  %v21_v16 = vld [vmem:[%s893_s1 + $0x38] sm:$0xff] }
  0x1b   :  { %285 = vmatpush.msra.mxu3 %v94_v47  ;;  %228 = vmatpush.msra.mxu1 %v61_v49  ;;  %v135_v12 = vld [vmem:[%s892_s0 + $0x2e8] sm:$0xff]  ;;  %v22_v14 = vld [vmem:[%s893_s1 + $0x40] sm:$0xff]  ;;  %v24_v18 = vld [vmem:[%s893_s1 + $0x50] sm:$0xff] }
  0x1c   :  { %257 = vmatpush.msra.mxu2 %v77_v50  ;;  %200 = vmatpush.msra.mxu0 %v44_v52  ;;  %v134_v15 = vld [vmem:[%s892_s0 + $0x2e0] sm:$0xff]  ;;  %v23_v17 = vld [vmem:[%s893_s1 + $0x48] sm:$0xff]  ;;  %v117_v20 = vld [vmem:[%s892_s0 + $0x258] sm:$0xff] }
  0x1d   :  { %286 = vmatpush.msra.mxu3 %v93_v51  ;;  %229 = vmatpush.msra.mxu1 %v60_v53  ;;  %v146_v19 = vld [vmem:[%s892_s0 + $0x340] sm:$0xff]  ;;  %v133_v21 = vld [vmem:[%s892_s0 + $0x2d8] sm:$0xff]  ;;  %v116_v23 = vld [vmem:[%s892_s0 + $0x250] sm:$0xff] }
  0x1e   :  { %258 = vmatpush.msra.mxu2 %v76_v54  ;;  %201 = vmatpush.msra.mxu0 %v43_v56  ;;  %v145_v22 = vld [vmem:[%s892_s0 + $0x338] sm:$0xff]  ;;  %v132_v24 = vld [vmem:[%s892_s0 + $0x2d0] sm:$0xff]  ;;  %v150_v25 = vld [vmem:[%s894_s2] sm:$0xff] }
  0x1f   :  { %287 = vmatpush.msra.mxu3 %v92_v55  ;;  %230 = vmatpush.msra.mxu1 %v59_v57  ;;  %v115_v26 = vld [vmem:[%s892_s0 + $0x248] sm:$0xff]  ;;  %v144_v29 = vld [vmem:[%s892_s0 + $0x330] sm:$0xff]  ;;  %v114_v30 = vld [vmem:[%s892_s0 + $0x240] sm:$0xff] }
  0x20   :  { %259 = vmatpush.msra.mxu2 %v75_v58  ;;  %202 = vmatpush.msra.mxu0 %v42_v60  ;;  %v131_v27 = vld [vmem:[%s892_s0 + $0x2c8] sm:$0xff]  ;;  %v130_v31 = vld [vmem:[%s892_s0 + $0x2c0] sm:$0xff]  ;;  %v28_v32 = vld [vmem:[%s893_s1 + $0x70] sm:$0xff] }
  0x21   :  { %288 = vmatpush.msra.mxu3 %v91_v59  ;;  %231 = vmatpush.msra.mxu1 %v58_v61  ;;  %v29_v33 = vld [vmem:[%s893_s1 + $0x78] sm:$0xff]  ;;  %v30_v34 = vld [vmem:[%s893_s1 + $0x80] sm:$0xff]  ;;  %v31_v35 = vld [vmem:[%s893_s1 + $0x88] sm:$0xff] }
  0x22   :  { %260 = vmatpush.msra.mxu2 %v74_v62  ;;  %203 = vmatmul.f32.vlgmr.msra.gmra.mxu0 %v14_v0  ;;  %v143_v36 = vld [vmem:[%s892_s0 + $0x328] sm:$0xff]  ;;  %v113_v37 = vld [vmem:[%s892_s0 + $0x238] sm:$0xff]  ;;  %v112_v39 = vld [vmem:[%s892_s0 + $0x230] sm:$0xff] }
  0x23   :  { %289 = vmatpush.msra.mxu3 %v90_v63  ;;  %232 = vmatmul.f32.vlgmr.msra.gmra.mxu1 %v15_v1  ;;  %v129_v38 = vld [vmem:[%s892_s0 + $0x2b8] sm:$0xff]  ;;  %v142_v40 = vld [vmem:[%s892_s0 + $0x320] sm:$0xff]  ;;  %v128_v41 = vld [vmem:[%s892_s0 + $0x2b0] sm:$0xff] }
  0x24   :  { %261 = vmatmul.f32.vlgmr.msra.gmra.mxu2 %v16_v2  ;;  %290 = vmatmul.f32.vlgmr.msra.gmra.mxu3 %v17_v3  ;;  %v151_v42 = vld [vmem:[%s894_s2 + $0x8] sm:$0xff]  ;;  %v141_v45 = vld [vmem:[%s892_s0 + $0x318] sm:$0xff]  ;;  %v110_v46 = vld [vmem:[%s892_s0 + $0x220] sm:$0xff] }
  0x25   :  { %365 = vmatpush.msrb.mxu2 %v149_v4  ;;  %303 = vmatpush.msrb.mxu0 %v121_v5  ;;  %v111_v43 = vld [vmem:[%s892_s0 + $0x228] sm:$0xff]  ;;  %v126_v47 = vld [vmem:[%s892_s0 + $0x2a0] sm:$0xff]  ;;  %v36_v49 = vld [vmem:[%s893_s1 + $0xb0] sm:$0xff] }
  0x26   :  { %414 = vmatpush.msrb.mxu3 %v121_v5  ;;  %332 = vmatpush.msrb.mxu1 %v137_v6  ;;  %v127_v44 = vld [vmem:[%s892_s0 + $0x2a8] sm:$0xff]  ;;  %v37_v50 = vld [vmem:[%s893_s1 + $0xb8] sm:$0xff]  ;;  %v38_v51 = vld [vmem:[%s893_s1 + $0xc0] sm:$0xff] }
  0x27   :  { %304 = vmatpush.msrb.mxu0 %v120_v7  ;;  %366 = vmatpush.msrb.mxu2 %v148_v8  ;;  %v35_v48 = vld [vmem:[%s893_s1 + $0xa8] sm:$0xff]  ;;  %v140_v52 = vld [vmem:[%s892_s0 + $0x310] sm:$0xff]  ;;  %v109_v53 = vld [vmem:[%s892_s0 + $0x218] sm:$0xff] }
  0x28   :  { %415 = vmatpush.msrb.mxu3 %v120_v7  ;;  %333 = vmatpush.msrb.mxu1 %v136_v9  ;;  %v125_v54 = vld [vmem:[%s892_s0 + $0x298] sm:$0xff]  ;;  %v108_v55 = vld [vmem:[%s892_s0 + $0x210] sm:$0xff]  ;;  %v139_v56 = vld [vmem:[%s892_s0 + $0x308] sm:$0xff] }
  0x29   :  { %305 = vmatpush.msrb.mxu0 %v119_v10  ;;  %367 = vmatpush.msrb.mxu2 %v147_v11  ;;  %v124_v57 = vld [vmem:[%s892_s0 + $0x290] sm:$0xff]  ;;  %v107_v58 = vld [vmem:[%s892_s0 + $0x208] sm:$0xff]  ;;  %v138_v61 = vld [vmem:[%s892_s0 + $0x300] sm:$0xff] }
  0x2a   :  { %416 = vmatpush.msrb.mxu3 %v119_v10  ;;  %334 = vmatpush.msrb.mxu1 %v135_v12  ;;  %v152_v59 = vld [vmem:[%s894_s2 + $0x10] sm:$0xff]  ;;  %v123_v60 = vld [vmem:[%s892_s0 + $0x288] sm:$0xff]  ;;  %v106_v62 = vld [vmem:[%s892_s0 + $0x200] sm:$0xff] }
  0x2b   :  { %306 = vmatpush.msrb.mxu0 %v118_v13  ;;  %235 = vmatmul.f32.gmra.mxu1 %v22_v14  ;;  %v122_v63 = vld [vmem:[%s892_s0 + $0x280] sm:$0xff]  ;;  %v25_v1 = vld [vmem:[%s893_s1 + $0x58] sm:$0xff]  ;;  %v19_v2 = vld [vmem:[%s893_s1 + $0x28] sm:$0xff] }
  0x2c   :  { %417 = vmatpush.msrb.mxu3 %v118_v13  ;;  %335 = vmatpush.msrb.mxu1 %v134_v15  ;;  %v18_v0 = vld [vmem:[%s893_s1 + $0x20] sm:$0xff]  ;;  %v20_v3 = vld [vmem:[%s893_s1 + $0x30] sm:$0xff]  ;;  %v153_v4 = vld [vmem:[%s894_s2 + $0x18] sm:$0xff] }
  0x2d   :  { %206 = vmatmul.f32.gmra.mxu0 %v21_v16  ;;  %264 = vmatmul.f32.gmra.mxu2 %v23_v17  ;;  %v32_v5 = vld [vmem:[%s893_s1 + $0x90] sm:$0xff]  ;;  %v26_v6 = vld [vmem:[%s893_s1 + $0x60] sm:$0xff]  ;;  %v27_v7 = vld [vmem:[%s893_s1 + $0x68] sm:$0xff] }
  0x2e   :  { %293 = vmatmul.f32.gmra.mxu3 %v24_v18  ;;  %368 = vmatpush.msrb.mxu2 %v146_v19  ;;  %v39_v8 = vld [vmem:[%s893_s1 + $0xc8] sm:$0xff]  ;;  %v33_v9 = vld [vmem:[%s893_s1 + $0x98] sm:$0xff]  ;;  %v34_v10 = vld [vmem:[%s893_s1 + $0xa0] sm:$0xff] }
  0x2f   :  { %307 = vmatpush.msrb.mxu0 %v117_v20  ;;  %418 = vmatpush.msrb.mxu3 %v117_v20  ;;  %v40_v11 = vld [vmem:[%s893_s1 + $0xd0] sm:$0xff]  ;;  %v41_v12 = vld [vmem:[%s893_s1 + $0xd8] sm:$0xff] }
  0x30   :  { %336 = vmatpush.msrb.mxu1 %v133_v21  ;;  %369 = vmatpush.msrb.mxu2 %v145_v22 }
  0x31   :  { %308 = vmatpush.msrb.mxu0 %v116_v23  ;;  %419 = vmatpush.msrb.mxu3 %v116_v23 }
  0x32   :  { %337 = vmatpush.msrb.mxu1 %v132_v24  ;;  %431 = vset.pattern.permute.xlu0 %v433_v28 }
  0x33   :  { %156 = vperm.xlu0 %431, %v150_v25   ;;  %309 = vmatpush.msrb.mxu0 %v115_v26 }
  0x34   :  { %420 = vmatpush.msrb.mxu3 %v115_v26  ;;  %338 = vmatpush.msrb.mxu1 %v131_v27 }
  0x35   :  { %370 = vmatpush.msrb.mxu2 %v144_v29  ;;  %310 = vmatpush.msrb.mxu0 %v114_v30 }
  0x36   :  { %421 = vmatpush.msrb.mxu3 %v114_v30  ;;  %339 = vmatpush.msrb.mxu1 %v130_v31 }
  0x37   :  { %209 = vmatmul.f32.gmra.mxu0 %v28_v32  ;;  %238 = vmatmul.f32.gmra.mxu1 %v29_v33 }
  0x38   :  { %267 = vmatmul.f32.gmra.mxu2 %v30_v34  ;;  %296 = vmatmul.f32.gmra.mxu3 %v31_v35 }
  0x39   :  { %371 = vmatpush.msrb.mxu2 %v143_v36  ;;  %311 = vmatpush.msrb.mxu0 %v113_v37 }
  0x3a   :  { %422 = vmatpush.msrb.mxu3 %v113_v37  ;;  %340 = vmatpush.msrb.mxu1 %v129_v38 }
  0x3b   :  { %312 = vmatpush.msrb.mxu0 %v112_v39  ;;  %372 = vmatpush.msrb.mxu2 %v142_v40 }
  0x3c   :  { %423 = vmatpush.msrb.mxu3 %v112_v39  ;;  %341 = vmatpush.msrb.mxu1 %v128_v41 }
  0x3d   :  { %161 = vperm.xlu0 %431, %v151_v42   ;;  %313 = vmatpush.msrb.mxu0 %v111_v43 }
  0x3e   :  { %424 = vmatpush.msrb.mxu3 %v111_v43  ;;  %342 = vmatpush.msrb.mxu1 %v127_v44 }
  0x3f   :  { %373 = vmatpush.msrb.mxu2 %v141_v45  ;;  %314 = vmatpush.msrb.mxu0 %v110_v46 }
  0x40   :  { %425 = vmatpush.msrb.mxu3 %v110_v46  ;;  %343 = vmatpush.msrb.mxu1 %v126_v47 }
  0x41   :  { %212 = vmatmul.f32.gmra.mxu0 %v35_v48  ;;  %241 = vmatmul.f32.gmra.mxu1 %v36_v49 }
  0x42   :  { %270 = vmatmul.f32.gmra.mxu2 %v37_v50  ;;  %299 = vmatmul.f32.gmra.mxu3 %v38_v51 }
  0x43   :  { %374 = vmatpush.msrb.mxu2 %v140_v52  ;;  %315 = vmatpush.msrb.mxu0 %v109_v53 }
  0x44   :  { %426 = vmatpush.msrb.mxu3 %v109_v53  ;;  %344 = vmatpush.msrb.mxu1 %v125_v54 }
  0x45   :  { %316 = vmatpush.msrb.mxu0 %v108_v55  ;;  %375 = vmatpush.msrb.mxu2 %v139_v56 }
  0x46   :  { %427 = vmatpush.msrb.mxu3 %v108_v55  ;;  %345 = vmatpush.msrb.mxu1 %v124_v57 }
  0x47   :  { %432 = vset.pattern.permute.xlu1 %v433_v28  ;;  %317 = vmatpush.msrb.mxu0 %v107_v58 }
  0x48   :  { %166 = vperm.xlu1 %432, %v152_v59   ;;  %428 = vmatpush.msrb.mxu3 %v107_v58 }
  0x49   :  { %346 = vmatpush.msrb.mxu1 %v123_v60  ;;  %376 = vmatpush.msrb.mxu2 %v138_v61 }
  0x4a   :  { %318 = vmatpush.msrb.mxu0 %v106_v62  ;;  %429 = vmatpush.msrb.mxu3 %v106_v62 }
  0x4b   :  { %347 = vmatpush.msrb.mxu1 %v122_v63  ;;  %319 = vmatmul.f32.vlgmr.msrb.gmra.mxu0 %v18_v0 }
  0x4c   :  { %322 = vmatmul.f32.vlgmr.msrb.gmra.mxu3 %v25_v1  ;;  %348 = vmatmul.f32.vlgmr.msrb.gmra.mxu1 %v19_v2 }
  0x4d   :  { %410 = vmatmul.msk.f32.vlgmr.msrb.gmra.mxu2 %vm174_vm0, %v20_v3 }
  0x50   :  { %171 = vperm.xlu1 %432, %v153_v4  }
  0x54   :  { %325 = vmatmul.f32.gmra.mxu3 %v32_v5  ;;  %351 = vmatmul.f32.gmra.mxu1 %v26_v6 }
  0x55   :  { %411 = vmatmul.msk.f32.gmra.mxu2 %vm174_vm0, %v27_v7 }
  0x5c   :  { %328 = vmatmul.f32.gmra.mxu3 %v39_v8  ;;  %354 = vmatmul.f32.gmra.mxu1 %v33_v9 }
  0x5d   :  { %412 = vmatmul.msk.f32.gmra.mxu2 %vm174_vm0, %v34_v10 }
  0x64   :  { %357 = vmatmul.f32.gmra.mxu1 %v40_v11 }
  0x65   :  { %413 = vmatmul.msk.f32.gmra.mxu2 %vm174_vm0, %v41_v12 }
  0x9f   :  { %v204_v13 = vpop.f32.mrf.mxu0 }
  0xa0   :  { %v233_v14 = vpop.f32.mrf.mxu1 }
  0xa5   :  { %v157_v23 = vpop.permute.xlu0 %156 }
  0xa6   :  { %v205_v26 = vadd.f32 %v204_v13, %v157_v23 }
  0xa7   :  { %v291_v15 = vpop.f32.mrf.mxu3  ;;  %v262_v16 = vpop.f32.mrf.mxu2 }
  0xa8   :  { %v236_v18 = vpop.f32.mrf.mxu1  ;;  %v234_v29 = vadd.f32 %v233_v14, %v205_v26 }
  0xaa   :  { %v207_v17 = vpop.f32.mrf.mxu0  ;;  %v263_v31 = vadd.f32 %v262_v16, %v234_v29 }
  0xac   :  { %v292_v37 = vadd.f32 %v291_v15, %v263_v31 }
  0xaf   :  { %v162_v30 = vpop.permute.xlu0 %161 }
  0xb0   :  { %v265_v20 = vpop.f32.mrf.mxu2  ;;  %v208_v32 = vadd.f32 %v207_v17, %v162_v30 }
  0xb1   :  { %v294_v19 = vpop.f32.mrf.mxu3 }
  0xb2   :  { %v237_v38 = vadd.f32 %v236_v18, %v208_v32 }
  0xb4   :  { %v210_v21 = vpop.f32.mrf.mxu0  ;;  %v239_v22 = vpop.f32.mrf.mxu1  ;;  %v266_v41 = vadd.f32 %v265_v20, %v237_v38 }
  0xb6   :  { %v295_v46 = vadd.f32 %v294_v19, %v266_v41 }
  0xba   :  { %v167_v35 = vpop.permute.xlu1 %166 }
  0xbb   :  { %v297_v24 = vpop.f32.mrf.mxu3  ;;  %v268_v25 = vpop.f32.mrf.mxu2  ;;  %v211_v42 = vadd.f32 %v210_v21, %v167_v35 }
  0xbd   :  { %v240_v47 = vadd.f32 %v239_v22, %v211_v42 }
  0xbe   :  { %v213_v27 = vpop.f32.mrf.mxu0  ;;  %v242_v28 = vpop.f32.mrf.mxu1 }
  0xbf   :  { %v269_v53 = vadd.f32 %v268_v25, %v240_v47 }
  0xc1   :  { %v298_v59 = vadd.f32 %v297_v24, %v269_v53 }
  0xc2   :  { %v172_v50 = vpop.permute.xlu1 %171 }
  0xc3   :  { %v214_v54 = vadd.f32 %v213_v27, %v172_v50 }
  0xc5   :  { %v300_v33 = vpop.f32.mrf.mxu3  ;;  %v271_v34 = vpop.f32.mrf.mxu2  ;;  %v243_v60 = vadd.f32 %v242_v28, %v214_v54 }
  0xc7   :  { %v272_v1 = vadd.f32 %v271_v34, %v243_v60 }
  0xc8   :  { %v320_v36 = vpop.f32.mrf.mxu0 }
  0xc9   :  { %v349_v39 = vpop.f32.mrf.mxu1  ;;  %v321_v40 = vadd.f32 %v320_v36, %v292_v37  ;;  %v301_v6 = vadd.f32 %v300_v33, %v272_v1 }
  0xcb   :  { %v350_v43 = vadd.f32 %v349_v39, %v321_v40 }
  0xcf   :  { %v323_v44 = vpop.f32.mrf.mxu3 }
  0xd0   :  { %v378_v45 = vpop.f32.mrf.mxu2  ;;  %v324_v51 = vadd.f32 %v323_v44, %v295_v46 }
  0xd1   :  { %v379_v48 = vadd.f32 %v378_v45, %v350_v43  ;;  %v352_v49 = vpop.f32.mrf.mxu1 }
  0xd2   :  { %v353_v56 = vadd.f32 %v352_v49, %v324_v51 }
  0xd3   :  { %vm390_vm1 = vcmp.ge.f32.partialorder %v379_v48, 0.0  ;;  %v394_v52 = vmul.f32 0.2, %v379_v48 }
  0xd5   :  { %v398_v55 = vsel %vm390_vm1, %v379_v48, %v394_v52 }
  0xd6   :  { %402 = vst [vmem:[%s895_s3] sm:$0xff] %v398_v55 }
  0xd7   :  { %v326_v57 = vpop.f32.mrf.mxu3 }
  0xd8   :  { %v381_v58 = vpop.f32.mrf.mxu2  ;;  %v327_v63 = vadd.f32 %v326_v57, %v298_v59 }
  0xd9   :  { %v382_v61 = vadd.f32 %v381_v58, %v353_v56  ;;  %v355_v62 = vpop.f32.mrf.mxu1 }
  0xda   :  { %v356_v3 = vadd.f32 %v355_v62, %v327_v63 }
  0xdb   :  { %vm391_vm2 = vcmp.ge.f32.partialorder %v382_v61, 0.0  ;;  %v395_v0 = vmul.f32 0.2, %v382_v61 }
  0xdd   :  { %v399_v2 = vsel %vm391_vm2, %v382_v61, %v395_v0 }
  0xde   :  { %403 = vst [vmem:[%s895_s3 + $0x8] sm:$0xff] %v399_v2 }
  0xdf   :  { %v329_v4 = vpop.f32.mrf.mxu3 }
  0xe0   :  { %v384_v5 = vpop.f32.mrf.mxu2  ;;  %v330_v8 = vadd.f32 %v329_v4, %v301_v6 }
  0xe1   :  { %v385_v7 = vadd.f32 %v384_v5, %v356_v3  ;;  %v358_v10 = vpop.f32.mrf.mxu1 }
  0xe2   :  { %v359_v12 = vadd.f32 %v358_v10, %v330_v8 }
  0xe3   :  { %vm392_vm3 = vcmp.ge.f32.partialorder %v385_v7, 0.0  ;;  %v396_v9 = vmul.f32 0.2, %v385_v7 }
  0xe5   :  { %v400_v11 = vsel %vm392_vm3, %v385_v7, %v396_v9 }
  0xe6   :  { %404 = vst [vmem:[%s895_s3 + $0x10] sm:$0xff] %v400_v11 }
  0xe8   :  { %v387_v13 = vpop.f32.mrf.mxu2 }
  0xe9   :  { %v388_v14 = vadd.f32 %v387_v13, %v359_v12 }
  0xeb   :  { %vm393_vm4 = vcmp.ge.f32.partialorder %v388_v14, 0.0  ;;  %v397_v15 = vmul.f32 0.2, %v388_v14 }
  0xed   :  { %v401_v16 = vsel %vm393_vm4, %v388_v14, %v397_v15 }
  0xee   :  { %405 = vst [vmem:[%s895_s3 + $0x18] sm:$0xff] %v401_v16 }

// kernel: _lambda_.17
= control target key start
LH: loop header
LB: loop body
LE: loop exit
PB: predicated region body
PF: predicated region fallthrough
CT: control target
= control target key end

     0   :  { %vm292_vm0 = vcmask 785408   ;;  %s1689_s2 = inlined_call_operand.vmem [shape: f32[864,128], index: 2, kind: input, shape index: {}]   ;;  %s1690_s3 = inlined_call_operand.vmem [shape: f32[32,864], index: 3, kind: input, shape index: {}]   ;;  %s1691_s0 = inlined_call_operand.vmem [shape: f32[864,128], index: 0, kind: input, shape index: {}]   ;;  %s1692_s1 = inlined_call_operand.vmem [shape: f32[32,864], index: 1, kind: input, shape index: {}]   ;;  %s1693_s4 = inlined_call_operand.vmem [shape: f32[32,1], index: 4, kind: input, shape index: {}]   ;;  %s1694_s5 = inlined_call_operand.vmem [shape: f32[32,128], index: 5, kind: output, shape index: {}]  }
   0x1   :  { %v199_v0 = vld [vmem:[%s1689_s2 + $0x78] sm:$0xff]  ;;  %v198_v2 = vld [vmem:[%s1689_s2 + $0x70] sm:$0xff]  ;;  %v197_v6 = vld [vmem:[%s1689_s2 + $0x68] sm:$0xff] }
   0x2   :  { %v231_v1 = vld [vmem:[%s1689_s2 + $0x178] sm:$0xff]  ;;  %305 = vmatpush.msra.mxu0 %v199_v0  ;;  %v230_v4 = vld [vmem:[%s1689_s2 + $0x170] sm:$0xff]  ;;  %v229_v8 = vld [vmem:[%s1689_s2 + $0x168] sm:$0xff] }
   0x3   :  { %363 = vmatpush.msra.mxu2 %v231_v1  ;;  %v215_v3 = vld [vmem:[%s1689_s2 + $0xf8] sm:$0xff]  ;;  %v214_v7 = vld [vmem:[%s1689_s2 + $0xf0] sm:$0xff]  ;;  %v213_v10 = vld [vmem:[%s1689_s2 + $0xe8] sm:$0xff] }
   0x4   :  { %v247_v5 = vld [vmem:[%s1689_s2 + $0x1f8] sm:$0xff]  ;;  %334 = vmatpush.msra.mxu1 %v215_v3  ;;  %306 = vmatpush.msra.mxu0 %v198_v2  ;;  %v246_v9 = vld [vmem:[%s1689_s2 + $0x1f0] sm:$0xff]  ;;  %v196_v11 = vld [vmem:[%s1689_s2 + $0x60] sm:$0xff] }
   0x5   :  { %392 = vmatpush.msra.mxu3 %v247_v5  ;;  %364 = vmatpush.msra.mxu2 %v230_v4  ;;  %v228_v12 = vld [vmem:[%s1689_s2 + $0x160] sm:$0xff]  ;;  %v245_v13 = vld [vmem:[%s1689_s2 + $0x1e8] sm:$0xff]  ;;  %v195_v16 = vld [vmem:[%s1689_s2 + $0x58] sm:$0xff] }
   0x6   :  { %335 = vmatpush.msra.mxu1 %v214_v7  ;;  %307 = vmatpush.msra.mxu0 %v197_v6  ;;  %v212_v14 = vld [vmem:[%s1689_s2 + $0xe0] sm:$0xff]  ;;  %v227_v17 = vld [vmem:[%s1689_s2 + $0x158] sm:$0xff]  ;;  %v194_v20 = vld [vmem:[%s1689_s2 + $0x50] sm:$0xff] }
   0x7   :  { %393 = vmatpush.msra.mxu3 %v246_v9  ;;  %365 = vmatpush.msra.mxu2 %v229_v8  ;;  %v244_v15 = vld [vmem:[%s1689_s2 + $0x1e0] sm:$0xff]  ;;  %v211_v18 = vld [vmem:[%s1689_s2 + $0xd8] sm:$0xff]  ;;  %v226_v21 = vld [vmem:[%s1689_s2 + $0x150] sm:$0xff] }
   0x8   :  { %336 = vmatpush.msra.mxu1 %v213_v10  ;;  %308 = vmatpush.msra.mxu0 %v196_v11  ;;  %v243_v19 = vld [vmem:[%s1689_s2 + $0x1d8] sm:$0xff]  ;;  %v210_v22 = vld [vmem:[%s1689_s2 + $0xd0] sm:$0xff]  ;;  %v193_v24 = vld [vmem:[%s1689_s2 + $0x48] sm:$0xff] }
   0x9   :  { %394 = vmatpush.msra.mxu3 %v245_v13  ;;  %366 = vmatpush.msra.mxu2 %v228_v12  ;;  %v242_v23 = vld [vmem:[%s1689_s2 + $0x1d0] sm:$0xff]  ;;  %v225_v25 = vld [vmem:[%s1689_s2 + $0x148] sm:$0xff]  ;;  %v192_v28 = vld [vmem:[%s1689_s2 + $0x40] sm:$0xff] }
   0xa   :  { %337 = vmatpush.msra.mxu1 %v212_v14  ;;  %309 = vmatpush.msra.mxu0 %v195_v16  ;;  %v209_v26 = vld [vmem:[%s1689_s2 + $0xc8] sm:$0xff]  ;;  %v224_v29 = vld [vmem:[%s1689_s2 + $0x140] sm:$0xff]  ;;  %v191_v32 = vld [vmem:[%s1689_s2 + $0x38] sm:$0xff] }
   0xb   :  { %395 = vmatpush.msra.mxu3 %v244_v15  ;;  %367 = vmatpush.msra.mxu2 %v227_v17  ;;  %v241_v27 = vld [vmem:[%s1689_s2 + $0x1c8] sm:$0xff]  ;;  %v208_v30 = vld [vmem:[%s1689_s2 + $0xc0] sm:$0xff]  ;;  %v223_v33 = vld [vmem:[%s1689_s2 + $0x138] sm:$0xff] }
   0xc   :  { %338 = vmatpush.msra.mxu1 %v211_v18  ;;  %310 = vmatpush.msra.mxu0 %v194_v20  ;;  %v240_v31 = vld [vmem:[%s1689_s2 + $0x1c0] sm:$0xff]  ;;  %v207_v34 = vld [vmem:[%s1689_s2 + $0xb8] sm:$0xff]  ;;  %v190_v36 = vld [vmem:[%s1689_s2 + $0x30] sm:$0xff] }
   0xd   :  { %396 = vmatpush.msra.mxu3 %v243_v19  ;;  %368 = vmatpush.msra.mxu2 %v226_v21  ;;  %v239_v35 = vld [vmem:[%s1689_s2 + $0x1b8] sm:$0xff]  ;;  %v222_v37 = vld [vmem:[%s1689_s2 + $0x130] sm:$0xff]  ;;  %v189_v40 = vld [vmem:[%s1689_s2 + $0x28] sm:$0xff] }
   0xe   :  { %339 = vmatpush.msra.mxu1 %v210_v22  ;;  %311 = vmatpush.msra.mxu0 %v193_v24  ;;  %v206_v38 = vld [vmem:[%s1689_s2 + $0xb0] sm:$0xff]  ;;  %v221_v41 = vld [vmem:[%s1689_s2 + $0x128] sm:$0xff]  ;;  %v188_v44 = vld [vmem:[%s1689_s2 + $0x20] sm:$0xff] }
   0xf   :  { %397 = vmatpush.msra.mxu3 %v242_v23  ;;  %369 = vmatpush.msra.mxu2 %v225_v25  ;;  %v238_v39 = vld [vmem:[%s1689_s2 + $0x1b0] sm:$0xff]  ;;  %v205_v42 = vld [vmem:[%s1689_s2 + $0xa8] sm:$0xff]  ;;  %v220_v45 = vld [vmem:[%s1689_s2 + $0x120] sm:$0xff] }
  0x10   :  { %340 = vmatpush.msra.mxu1 %v209_v26  ;;  %312 = vmatpush.msra.mxu0 %v192_v28  ;;  %v237_v43 = vld [vmem:[%s1689_s2 + $0x1a8] sm:$0xff]  ;;  %v204_v46 = vld [vmem:[%s1689_s2 + $0xa0] sm:$0xff]  ;;  %v187_v48 = vld [vmem:[%s1689_s2 + $0x18] sm:$0xff] }
  0x11   :  { %398 = vmatpush.msra.mxu3 %v241_v27  ;;  %370 = vmatpush.msra.mxu2 %v224_v29  ;;  %v236_v47 = vld [vmem:[%s1689_s2 + $0x1a0] sm:$0xff]  ;;  %v219_v49 = vld [vmem:[%s1689_s2 + $0x118] sm:$0xff]  ;;  %v186_v52 = vld [vmem:[%s1689_s2 + $0x10] sm:$0xff] }
  0x12   :  { %341 = vmatpush.msra.mxu1 %v208_v30  ;;  %313 = vmatpush.msra.mxu0 %v191_v32  ;;  %v203_v50 = vld [vmem:[%s1689_s2 + $0x98] sm:$0xff]  ;;  %v218_v53 = vld [vmem:[%s1689_s2 + $0x110] sm:$0xff]  ;;  %v185_v56 = vld [vmem:[%s1689_s2 + $0x8] sm:$0xff] }
  0x13   :  { %399 = vmatpush.msra.mxu3 %v240_v31  ;;  %371 = vmatpush.msra.mxu2 %v223_v33  ;;  %v235_v51 = vld [vmem:[%s1689_s2 + $0x198] sm:$0xff]  ;;  %v202_v54 = vld [vmem:[%s1689_s2 + $0x90] sm:$0xff]  ;;  %v217_v57 = vld [vmem:[%s1689_s2 + $0x108] sm:$0xff] }
  0x14   :  { %342 = vmatpush.msra.mxu1 %v207_v34  ;;  %314 = vmatpush.msra.mxu0 %v190_v36  ;;  %v234_v55 = vld [vmem:[%s1689_s2 + $0x190] sm:$0xff]  ;;  %v201_v58 = vld [vmem:[%s1689_s2 + $0x88] sm:$0xff]  ;;  %v184_v60 = vld [vmem:[%s1689_s2] sm:$0xff] }
  0x15   :  { %400 = vmatpush.msra.mxu3 %v239_v35  ;;  %372 = vmatpush.msra.mxu2 %v222_v37  ;;  %v233_v59 = vld [vmem:[%s1689_s2 + $0x188] sm:$0xff]  ;;  %v216_v61 = vld [vmem:[%s1689_s2 + $0x100] sm:$0xff]  ;;  %v158_v63 = vld [vmem:[%s1690_s3 + $0x10] sm:$0xff] }
  0x16   :  { %343 = vmatpush.msra.mxu1 %v206_v38  ;;  %315 = vmatpush.msra.mxu0 %v189_v40  ;;  %v156_v62 = vld [vmem:[%s1690_s3] sm:$0xff]  ;;  %v291_v0 = vld [vmem:[%s1689_s2 + $0x358] sm:$0xff]  ;;  %v157_v4 = vld [vmem:[%s1690_s3 + $0x8] sm:$0xff] }
  0x17   :  { %401 = vmatpush.msra.mxu3 %v238_v39  ;;  %373 = vmatpush.msra.mxu2 %v221_v41  ;;  %v200_v1 = vld [vmem:[%s1689_s2 + $0x80] sm:$0xff]  ;;  %v263_v3 = vld [vmem:[%s1689_s2 + $0x278] sm:$0xff]  ;;  %v262_v7 = vld [vmem:[%s1689_s2 + $0x270] sm:$0xff] }
  0x18   :  { %344 = vmatpush.msra.mxu1 %v205_v42  ;;  %316 = vmatpush.msra.mxu0 %v188_v44  ;;  %v232_v2 = vld [vmem:[%s1689_s2 + $0x180] sm:$0xff]  ;;  %v159_v5 = vld [vmem:[%s1690_s3 + $0x18] sm:$0xff]  ;;  %v290_v9 = vld [vmem:[%s1689_s2 + $0x350] sm:$0xff] }
  0x19   :  { %402 = vmatpush.msra.mxu3 %v237_v43  ;;  %374 = vmatpush.msra.mxu2 %v220_v45  ;;  %v63_v6 = vld [vmem:[%s1691_s0 + $0x78] sm:$0xff]  ;;  %v62_v10 = vld [vmem:[%s1691_s0 + $0x70] sm:$0xff]  ;;  %v261_v11 = vld [vmem:[%s1689_s2 + $0x268] sm:$0xff] }
  0x1a   :  { %345 = vmatpush.msra.mxu1 %v204_v46  ;;  %317 = vmatpush.msra.mxu0 %v187_v48  ;;  %v279_v8 = vld [vmem:[%s1689_s2 + $0x2f8] sm:$0xff]  ;;  %v278_v12 = vld [vmem:[%s1689_s2 + $0x2f0] sm:$0xff]  ;;  %v289_v13 = vld [vmem:[%s1689_s2 + $0x348] sm:$0xff] }
  0x1b   :  { %403 = vmatpush.msra.mxu3 %v236_v47  ;;  %375 = vmatpush.msra.mxu2 %v219_v49  ;;  %v61_v14 = vld [vmem:[%s1691_s0 + $0x68] sm:$0xff]  ;;  %v260_v15 = vld [vmem:[%s1689_s2 + $0x260] sm:$0xff]  ;;  %v163_v17 = vld [vmem:[%s1690_s3 + $0x38] sm:$0xff] }
  0x1c   :  { %346 = vmatpush.msra.mxu1 %v203_v50  ;;  %318 = vmatpush.msra.mxu0 %v186_v52  ;;  %v277_v16 = vld [vmem:[%s1689_s2 + $0x2e8] sm:$0xff]  ;;  %v60_v19 = vld [vmem:[%s1691_s0 + $0x60] sm:$0xff]  ;;  %v259_v21 = vld [vmem:[%s1689_s2 + $0x258] sm:$0xff] }
  0x1d   :  { %404 = vmatpush.msra.mxu3 %v235_v51  ;;  %376 = vmatpush.msra.mxu2 %v218_v53  ;;  %v165_v18 = vld [vmem:[%s1690_s3 + $0x48] sm:$0xff]  ;;  %v288_v20 = vld [vmem:[%s1689_s2 + $0x340] sm:$0xff]  ;;  %v166_v23 = vld [vmem:[%s1690_s3 + $0x50] sm:$0xff] }
  0x1e   :  { %347 = vmatpush.msra.mxu1 %v202_v54  ;;  %319 = vmatpush.msra.mxu0 %v185_v56  ;;  %v276_v22 = vld [vmem:[%s1689_s2 + $0x2e0] sm:$0xff]  ;;  %v59_v25 = vld [vmem:[%s1691_s0 + $0x58] sm:$0xff]  ;;  %v258_v26 = vld [vmem:[%s1689_s2 + $0x250] sm:$0xff] }
  0x1f   :  { %405 = vmatpush.msra.mxu3 %v234_v55  ;;  %377 = vmatpush.msra.mxu2 %v217_v57  ;;  %v164_v24 = vld [vmem:[%s1690_s3 + $0x40] sm:$0xff]  ;;  %v275_v27 = vld [vmem:[%s1689_s2 + $0x2d8] sm:$0xff]  ;;  %v58_v29 = vld [vmem:[%s1691_s0 + $0x50] sm:$0xff] }
  0x20   :  { %348 = vmatpush.msra.mxu1 %v201_v58  ;;  %320 = vmatpush.msra.mxu0 %v184_v60  ;;  %v287_v28 = vld [vmem:[%s1689_s2 + $0x338] sm:$0xff]  ;;  %v257_v30 = vld [vmem:[%s1689_s2 + $0x248] sm:$0xff]  ;;  %v274_v31 = vld [vmem:[%s1689_s2 + $0x2d0] sm:$0xff] }
  0x21   :  { %406 = vmatpush.msra.mxu3 %v233_v59  ;;  %378 = vmatpush.msra.mxu2 %v216_v61  ;;  %v286_v32 = vld [vmem:[%s1689_s2 + $0x330] sm:$0xff]  ;;  %v57_v33 = vld [vmem:[%s1691_s0 + $0x48] sm:$0xff]  ;;  %v256_v34 = vld [vmem:[%s1689_s2 + $0x240] sm:$0xff] }
  0x22   :  { %321 = vmatmul.f32.vlgmr.msra.gmra.mxu0 %v156_v62  ;;  %379 = vmatmul.f32.vlgmr.msra.gmra.mxu2 %v158_v63  ;;  %v273_v35 = vld [vmem:[%s1689_s2 + $0x2c8] sm:$0xff]  ;;  %v170_v36 = vld [vmem:[%s1690_s3 + $0x70] sm:$0xff]  ;;  %v172_v37 = vld [vmem:[%s1690_s3 + $0x80] sm:$0xff] }
  0x23   :  { %483 = vmatpush.msrb.mxu2 %v291_v0  ;;  %349 = vmatpush.msra.mxu1 %v200_v1  ;;  %v285_v38 = vld [vmem:[%s1689_s2 + $0x328] sm:$0xff]  ;;  %v56_v39 = vld [vmem:[%s1691_s0 + $0x40] sm:$0xff]  ;;  %v255_v40 = vld [vmem:[%s1689_s2 + $0x238] sm:$0xff] }
  0x24   :  { %407 = vmatpush.msra.mxu3 %v232_v2  ;;  %421 = vmatpush.msrb.mxu0 %v263_v3  ;;  %v272_v41 = vld [vmem:[%s1689_s2 + $0x2c0] sm:$0xff]  ;;  %v171_v42 = vld [vmem:[%s1690_s3 + $0x78] sm:$0xff]  ;;  %v173_v43 = vld [vmem:[%s1690_s3 + $0x88] sm:$0xff] }
  0x25   :  { %350 = vmatmul.f32.vlgmr.msra.gmra.mxu1 %v157_v4  ;;  %408 = vmatmul.f32.vlgmr.msra.gmra.mxu3 %v159_v5  ;;  %v55_v44 = vld [vmem:[%s1691_s0 + $0x38] sm:$0xff]  ;;  %v254_v45 = vld [vmem:[%s1689_s2 + $0x230] sm:$0xff]  ;;  %v284_v47 = vld [vmem:[%s1689_s2 + $0x320] sm:$0xff] }
  0x26   :  { %520 = vmatpush.msrb.mxu3 %v63_v6  ;;  %422 = vmatpush.msrb.mxu0 %v262_v7  ;;  %v271_v46 = vld [vmem:[%s1689_s2 + $0x2b8] sm:$0xff]  ;;  %v54_v48 = vld [vmem:[%s1691_s0 + $0x30] sm:$0xff]  ;;  %v253_v49 = vld [vmem:[%s1689_s2 + $0x228] sm:$0xff] }
  0x27   :  { %450 = vmatpush.msrb.mxu1 %v279_v8  ;;  %484 = vmatpush.msrb.mxu2 %v290_v9  ;;  %v270_v50 = vld [vmem:[%s1689_s2 + $0x2b0] sm:$0xff]  ;;  %v283_v51 = vld [vmem:[%s1689_s2 + $0x318] sm:$0xff]  ;;  %v53_v52 = vld [vmem:[%s1691_s0 + $0x28] sm:$0xff] }
  0x28   :  { %521 = vmatpush.msrb.mxu3 %v62_v10  ;;  %423 = vmatpush.msrb.mxu0 %v261_v11  ;;  %v252_v53 = vld [vmem:[%s1689_s2 + $0x220] sm:$0xff]  ;;  %v269_v54 = vld [vmem:[%s1689_s2 + $0x2a8] sm:$0xff]  ;;  %v179_v56 = vld [vmem:[%s1690_s3 + $0xb8] sm:$0xff] }
  0x29   :  { %451 = vmatpush.msrb.mxu1 %v278_v12  ;;  %485 = vmatpush.msrb.mxu2 %v289_v13  ;;  %v177_v55 = vld [vmem:[%s1690_s3 + $0xa8] sm:$0xff]  ;;  %v52_v57 = vld [vmem:[%s1691_s0 + $0x20] sm:$0xff]  ;;  %v282_v58 = vld [vmem:[%s1689_s2 + $0x310] sm:$0xff] }
  0x2a   :  { %522 = vmatpush.msrb.mxu3 %v61_v14  ;;  %424 = vmatpush.msrb.mxu0 %v260_v15  ;;  %v251_v59 = vld [vmem:[%s1689_s2 + $0x218] sm:$0xff]  ;;  %v268_v60 = vld [vmem:[%s1689_s2 + $0x2a0] sm:$0xff]  ;;  %v178_v62 = vld [vmem:[%s1690_s3 + $0xb0] sm:$0xff] }
  0x2b   :  { %452 = vmatpush.msrb.mxu1 %v277_v16  ;;  %324 = vmatmul.f32.gmra.mxu0 %v163_v17  ;;  %v180_v61 = vld [vmem:[%s1690_s3 + $0xc0] sm:$0xff]  ;;  %v51_v63 = vld [vmem:[%s1691_s0 + $0x18] sm:$0xff]  ;;  %v250_v0 = vld [vmem:[%s1689_s2 + $0x210] sm:$0xff] }
  0x2c   :  { %382 = vmatmul.f32.gmra.mxu2 %v165_v18  ;;  %523 = vmatpush.msrb.mxu3 %v60_v19  ;;  %v267_v1 = vld [vmem:[%s1689_s2 + $0x298] sm:$0xff]  ;;  %v281_v2 = vld [vmem:[%s1689_s2 + $0x308] sm:$0xff]  ;;  %v50_v3 = vld [vmem:[%s1691_s0 + $0x10] sm:$0xff] }
  0x2d   :  { %486 = vmatpush.msrb.mxu2 %v288_v20  ;;  %425 = vmatpush.msrb.mxu0 %v259_v21  ;;  %v249_v4 = vld [vmem:[%s1689_s2 + $0x208] sm:$0xff]  ;;  %v266_v5 = vld [vmem:[%s1689_s2 + $0x290] sm:$0xff]  ;;  %v280_v6 = vld [vmem:[%s1689_s2 + $0x300] sm:$0xff] }
  0x2e   :  { %453 = vmatpush.msrb.mxu1 %v276_v22  ;;  %411 = vmatmul.f32.gmra.mxu3 %v166_v23  ;;  %v49_v7 = vld [vmem:[%s1691_s0 + $0x8] sm:$0xff]  ;;  %v248_v8 = vld [vmem:[%s1689_s2 + $0x200] sm:$0xff]  ;;  %v162_v11 = vld [vmem:[%s1690_s3 + $0x30] sm:$0xff] }
  0x2f   :  { %353 = vmatmul.f32.gmra.mxu1 %v164_v24  ;;  %524 = vmatpush.msrb.mxu3 %v59_v25  ;;  %v265_v9 = vld [vmem:[%s1689_s2 + $0x288] sm:$0xff]  ;;  %v160_v10 = vld [vmem:[%s1690_s3 + $0x20] sm:$0xff]  ;;  %v111_v13 = vld [vmem:[%s1691_s0 + $0x1f8] sm:$0xff] }
  0x30   :  { %426 = vmatpush.msrb.mxu0 %v258_v26  ;;  %454 = vmatpush.msrb.mxu1 %v275_v27  ;;  %v48_v12 = vld [vmem:[%s1691_s0] sm:$0xff]  ;;  %v79_v15 = vld [vmem:[%s1691_s0 + $0xf8] sm:$0xff]  ;;  %v161_v16 = vld [vmem:[%s1690_s3 + $0x28] sm:$0xff] }
  0x31   :  { %487 = vmatpush.msrb.mxu2 %v287_v28  ;;  %525 = vmatpush.msrb.mxu3 %v58_v29  ;;  %v264_v14 = vld [vmem:[%s1689_s2 + $0x280] sm:$0xff]  ;;  %v110_v18 = vld [vmem:[%s1691_s0 + $0x1f0] sm:$0xff]  ;;  %v127_v19 = vld [vmem:[%s1691_s0 + $0x278] sm:$0xff] }
  0x32   :  { %427 = vmatpush.msrb.mxu0 %v257_v30  ;;  %455 = vmatpush.msrb.mxu1 %v274_v31  ;;  %v20_v17 = vld [vmem:[%s1692_s1] sm:$0xff]  ;;  %v78_v20 = vld [vmem:[%s1691_s0 + $0xf0] sm:$0xff]  ;;  %v95_v21 = vld [vmem:[%s1691_s0 + $0x178] sm:$0xff] }
  0x33   :  { %488 = vmatpush.msrb.mxu2 %v286_v32  ;;  %526 = vmatpush.msrb.mxu3 %v57_v33  ;;  %v109_v22 = vld [vmem:[%s1691_s0 + $0x1e8] sm:$0xff]  ;;  %v126_v23 = vld [vmem:[%s1691_s0 + $0x270] sm:$0xff]  ;;  %v108_v26 = vld [vmem:[%s1691_s0 + $0x1e0] sm:$0xff] }
  0x34   :  { %428 = vmatpush.msrb.mxu0 %v256_v34  ;;  %456 = vmatpush.msrb.mxu1 %v273_v35  ;;  %v77_v24 = vld [vmem:[%s1691_s0 + $0xe8] sm:$0xff]  ;;  %v94_v25 = vld [vmem:[%s1691_s0 + $0x170] sm:$0xff]  ;;  %v76_v28 = vld [vmem:[%s1691_s0 + $0xe0] sm:$0xff] }
  0x35   :  { %327 = vmatmul.f32.gmra.mxu0 %v170_v36  ;;  %385 = vmatmul.f32.gmra.mxu2 %v172_v37  ;;  %v125_v27 = vld [vmem:[%s1691_s0 + $0x268] sm:$0xff]  ;;  %v167_v30 = vld [vmem:[%s1690_s3 + $0x58] sm:$0xff]  ;;  %v124_v33 = vld [vmem:[%s1691_s0 + $0x260] sm:$0xff] }
  0x36   :  { %489 = vmatpush.msrb.mxu2 %v285_v38  ;;  %527 = vmatpush.msrb.mxu3 %v56_v39  ;;  %v93_v29 = vld [vmem:[%s1691_s0 + $0x168] sm:$0xff]  ;;  %v107_v32 = vld [vmem:[%s1691_s0 + $0x1d8] sm:$0xff]  ;;  %v92_v35 = vld [vmem:[%s1691_s0 + $0x160] sm:$0xff] }
  0x37   :  { %429 = vmatpush.msrb.mxu0 %v255_v40  ;;  %457 = vmatpush.msrb.mxu1 %v272_v41  ;;  %v169_v31 = vld [vmem:[%s1690_s3 + $0x68] sm:$0xff]  ;;  %v75_v34 = vld [vmem:[%s1691_s0 + $0xd8] sm:$0xff]  ;;  %v168_v36 = vld [vmem:[%s1690_s3 + $0x60] sm:$0xff] }
  0x38   :  { %356 = vmatmul.f32.gmra.mxu1 %v171_v42  ;;  %414 = vmatmul.f32.gmra.mxu3 %v173_v43  ;;  %v27_v37 = vld [vmem:[%s1692_s1 + $0x38] sm:$0xff]  ;;  %v106_v38 = vld [vmem:[%s1691_s0 + $0x1d0] sm:$0xff]  ;;  %v105_v42 = vld [vmem:[%s1691_s0 + $0x1c8] sm:$0xff] }
  0x39   :  { %528 = vmatpush.msrb.mxu3 %v55_v44  ;;  %430 = vmatpush.msrb.mxu0 %v254_v45  ;;  %v123_v39 = vld [vmem:[%s1691_s0 + $0x258] sm:$0xff]  ;;  %v74_v40 = vld [vmem:[%s1691_s0 + $0xd0] sm:$0xff]  ;;  %v73_v44 = vld [vmem:[%s1691_s0 + $0xc8] sm:$0xff] }
  0x3a   :  { %458 = vmatpush.msrb.mxu1 %v271_v46  ;;  %490 = vmatpush.msrb.mxu2 %v284_v47  ;;  %v91_v41 = vld [vmem:[%s1691_s0 + $0x158] sm:$0xff]  ;;  %v122_v43 = vld [vmem:[%s1691_s0 + $0x250] sm:$0xff]  ;;  %v104_v46 = vld [vmem:[%s1691_s0 + $0x1c0] sm:$0xff] }
  0x3b   :  { %529 = vmatpush.msrb.mxu3 %v54_v48  ;;  %431 = vmatpush.msrb.mxu0 %v253_v49  ;;  %v90_v45 = vld [vmem:[%s1691_s0 + $0x150] sm:$0xff]  ;;  %v121_v47 = vld [vmem:[%s1691_s0 + $0x248] sm:$0xff]  ;;  %v72_v48 = vld [vmem:[%s1691_s0 + $0xc0] sm:$0xff] }
  0x3c   :  { %459 = vmatpush.msrb.mxu1 %v270_v50  ;;  %491 = vmatpush.msrb.mxu2 %v283_v51  ;;  %v89_v49 = vld [vmem:[%s1691_s0 + $0x148] sm:$0xff]  ;;  %v174_v50 = vld [vmem:[%s1690_s3 + $0x90] sm:$0xff]  ;;  %v176_v51 = vld [vmem:[%s1690_s3 + $0xa0] sm:$0xff] }
  0x3d   :  { %530 = vmatpush.msrb.mxu3 %v53_v52  ;;  %432 = vmatpush.msrb.mxu0 %v252_v53  ;;  %v103_v52 = vld [vmem:[%s1691_s0 + $0x1b8] sm:$0xff]  ;;  %v120_v53 = vld [vmem:[%s1691_s0 + $0x240] sm:$0xff] }
  0x3e   :  { %460 = vmatpush.msrb.mxu1 %v269_v54  ;;  %330 = vmatmul.f32.gmra.mxu0 %v177_v55  ;;  %v71_v54 = vld [vmem:[%s1691_s0 + $0xb8] sm:$0xff]  ;;  %v88_v55 = vld [vmem:[%s1691_s0 + $0x140] sm:$0xff] }
  0x3f   :  { %388 = vmatmul.f32.gmra.mxu2 %v179_v56  ;;  %531 = vmatpush.msrb.mxu3 %v52_v57  ;;  %v175_v56 = vld [vmem:[%s1690_s3 + $0x98] sm:$0xff]  ;;  %v34_v57 = vld [vmem:[%s1692_s1 + $0x70] sm:$0xff] }
  0x40   :  { %492 = vmatpush.msrb.mxu2 %v282_v58  ;;  %433 = vmatpush.msrb.mxu0 %v251_v59  ;;  %v102_v58 = vld [vmem:[%s1691_s0 + $0x1b0] sm:$0xff]  ;;  %v119_v59 = vld [vmem:[%s1691_s0 + $0x238] sm:$0xff] }
  0x41   :  { %461 = vmatpush.msrb.mxu1 %v268_v60  ;;  %417 = vmatmul.f32.gmra.mxu3 %v180_v61  ;;  %v70_v60 = vld [vmem:[%s1691_s0 + $0xb0] sm:$0xff]  ;;  %v87_v61 = vld [vmem:[%s1691_s0 + $0x138] sm:$0xff] }
  0x42   :  { %359 = vmatmul.f32.gmra.mxu1 %v178_v62  ;;  %532 = vmatpush.msrb.mxu3 %v51_v63  ;;  %v101_v62 = vld [vmem:[%s1691_s0 + $0x1a8] sm:$0xff]  ;;  %v118_v63 = vld [vmem:[%s1691_s0 + $0x230] sm:$0xff] }
  0x43   :  { %434 = vmatpush.msrb.mxu0 %v250_v0  ;;  %462 = vmatpush.msrb.mxu1 %v267_v1  ;;  %v69_v0 = vld [vmem:[%s1691_s0 + $0xa8] sm:$0xff]  ;;  %v86_v1 = vld [vmem:[%s1691_s0 + $0x130] sm:$0xff] }
  0x44   :  { %493 = vmatpush.msrb.mxu2 %v281_v2  ;;  %533 = vmatpush.msrb.mxu3 %v50_v3  ;;  %v100_v2 = vld [vmem:[%s1691_s0 + $0x1a0] sm:$0xff]  ;;  %v117_v3 = vld [vmem:[%s1691_s0 + $0x228] sm:$0xff] }
  0x45   :  { %435 = vmatpush.msrb.mxu0 %v249_v4  ;;  %463 = vmatpush.msrb.mxu1 %v266_v5  ;;  %v68_v4 = vld [vmem:[%s1691_s0 + $0xa0] sm:$0xff]  ;;  %v85_v5 = vld [vmem:[%s1691_s0 + $0x128] sm:$0xff] }
  0x46   :  { %494 = vmatpush.msrb.mxu2 %v280_v6  ;;  %534 = vmatpush.msrb.mxu3 %v49_v7  ;;  %v181_v6 = vld [vmem:[%s1690_s3 + $0xc8] sm:$0xff]  ;;  %v183_v7 = vld [vmem:[%s1690_s3 + $0xd8] sm:$0xff] }
  0x47   :  { %436 = vmatpush.msrb.mxu0 %v248_v8  ;;  %464 = vmatpush.msrb.mxu1 %v265_v9  ;;  %v99_v8 = vld [vmem:[%s1691_s0 + $0x198] sm:$0xff]  ;;  %v116_v9 = vld [vmem:[%s1691_s0 + $0x220] sm:$0xff] }
  0x48   :  { %437 = vmatmul.f32.vlgmr.msrb.gmra.mxu0 %v160_v10  ;;  %771 = vmatmul.msk.f32.vlgmr.msrb.gmra.mxu2 %vm292_vm0, %v162_v11  ;;  %v67_v10 = vld [vmem:[%s1691_s0 + $0x98] sm:$0xff]  ;;  %v84_v11 = vld [vmem:[%s1691_s0 + $0x120] sm:$0xff] }
  0x49   :  { %535 = vmatpush.msrb.mxu3 %v48_v12  ;;  %607 = vmatpush.msra.mxu2 %v111_v13  ;;  %v182_v12 = vld [vmem:[%s1690_s3 + $0xd0] sm:$0xff]  ;;  %v41_v13 = vld [vmem:[%s1692_s1 + $0xa8] sm:$0xff] }
  0x4a   :  { %465 = vmatpush.msrb.mxu1 %v264_v14  ;;  %549 = vmatpush.msra.mxu0 %v79_v15  ;;  %v98_v14 = vld [vmem:[%s1691_s0 + $0x190] sm:$0xff]  ;;  %v115_v15 = vld [vmem:[%s1691_s0 + $0x218] sm:$0xff] }
  0x4b   :  { %466 = vmatmul.f32.vlgmr.msrb.gmra.mxu1 %v161_v16  ;;  %536 = vmatmul.f32.vlgmr.msrb.gmra.mxu3 %v20_v17  ;;  %v66_v16 = vld [vmem:[%s1691_s0 + $0x90] sm:$0xff]  ;;  %v83_v17 = vld [vmem:[%s1691_s0 + $0x118] sm:$0xff] }
  0x4c   :  { %608 = vmatpush.msra.mxu2 %v110_v18  ;;  %636 = vmatpush.msra.mxu3 %v127_v19  ;;  %v97_v18 = vld [vmem:[%s1691_s0 + $0x188] sm:$0xff]  ;;  %v114_v19 = vld [vmem:[%s1691_s0 + $0x210] sm:$0xff] }
  0x4d   :  { %550 = vmatpush.msra.mxu0 %v78_v20  ;;  %578 = vmatpush.msra.mxu1 %v95_v21  ;;  %v65_v20 = vld [vmem:[%s1691_s0 + $0x88] sm:$0xff]  ;;  %v82_v21 = vld [vmem:[%s1691_s0 + $0x110] sm:$0xff] }
  0x4e   :  { %609 = vmatpush.msra.mxu2 %v109_v22  ;;  %637 = vmatpush.msra.mxu3 %v126_v23  ;;  %v96_v22 = vld [vmem:[%s1691_s0 + $0x180] sm:$0xff]  ;;  %v113_v23 = vld [vmem:[%s1691_s0 + $0x208] sm:$0xff] }
  0x4f   :  { %551 = vmatpush.msra.mxu0 %v77_v24  ;;  %579 = vmatpush.msra.mxu1 %v94_v25  ;;  %v64_v24 = vld [vmem:[%s1691_s0 + $0x80] sm:$0xff]  ;;  %v81_v25 = vld [vmem:[%s1691_s0 + $0x108] sm:$0xff] }
  0x50   :  { %610 = vmatpush.msra.mxu2 %v108_v26  ;;  %638 = vmatpush.msra.mxu3 %v125_v27  ;;  %v21_v26 = vld [vmem:[%s1692_s1 + $0x8] sm:$0xff]  ;;  %v23_v27 = vld [vmem:[%s1692_s1 + $0x18] sm:$0xff] }
  0x51   :  { %552 = vmatpush.msra.mxu0 %v76_v28  ;;  %580 = vmatpush.msra.mxu1 %v93_v29  ;;  %v112_v28 = vld [vmem:[%s1691_s0 + $0x200] sm:$0xff]  ;;  %v143_v29 = vld [vmem:[%s1691_s0 + $0x2f8] sm:$0xff] }
  0x52   :  { %440 = vmatmul.f32.gmra.mxu0 %v167_v30  ;;  %772 = vmatmul.msk.f32.gmra.mxu2 %vm292_vm0, %v169_v31  ;;  %v80_v30 = vld [vmem:[%s1691_s0 + $0x100] sm:$0xff]  ;;  %v22_v31 = vld [vmem:[%s1692_s1 + $0x10] sm:$0xff] }
  0x53   :  { %611 = vmatpush.msra.mxu2 %v107_v32  ;;  %639 = vmatpush.msra.mxu3 %v124_v33  ;;  %v24_v32 = vld [vmem:[%s1692_s1 + $0x20] sm:$0xff]  ;;  %v142_v33 = vld [vmem:[%s1691_s0 + $0x2f0] sm:$0xff] }
  0x54   :  { %553 = vmatpush.msra.mxu0 %v75_v34  ;;  %581 = vmatpush.msra.mxu1 %v92_v35  ;;  %v155_v34 = vld [vmem:[%s1691_s0 + $0x358] sm:$0xff]  ;;  %v141_v35 = vld [vmem:[%s1691_s0 + $0x2e8] sm:$0xff] }
  0x55   :  { %469 = vmatmul.f32.gmra.mxu1 %v168_v36  ;;  %539 = vmatmul.f32.gmra.mxu3 %v27_v37  ;;  %v154_v36 = vld [vmem:[%s1691_s0 + $0x350] sm:$0xff]  ;;  %v140_v37 = vld [vmem:[%s1691_s0 + $0x2e0] sm:$0xff] }
  0x56   :  { %612 = vmatpush.msra.mxu2 %v106_v38  ;;  %640 = vmatpush.msra.mxu3 %v123_v39  ;;  %v28_v38 = vld [vmem:[%s1692_s1 + $0x40] sm:$0xff]  ;;  %v30_v39 = vld [vmem:[%s1692_s1 + $0x50] sm:$0xff] }
  0x57   :  { %554 = vmatpush.msra.mxu0 %v74_v40  ;;  %582 = vmatpush.msra.mxu1 %v91_v41  ;;  %v139_v40 = vld [vmem:[%s1691_s0 + $0x2d8] sm:$0xff]  ;;  %v153_v41 = vld [vmem:[%s1691_s0 + $0x348] sm:$0xff] }
  0x58   :  { %613 = vmatpush.msra.mxu2 %v105_v42  ;;  %641 = vmatpush.msra.mxu3 %v122_v43  ;;  %v29_v42 = vld [vmem:[%s1692_s1 + $0x48] sm:$0xff]  ;;  %v31_v43 = vld [vmem:[%s1692_s1 + $0x58] sm:$0xff] }
  0x59   :  { %555 = vmatpush.msra.mxu0 %v73_v44  ;;  %583 = vmatpush.msra.mxu1 %v90_v45  ;;  %v138_v44 = vld [vmem:[%s1691_s0 + $0x2d0] sm:$0xff]  ;;  %v152_v45 = vld [vmem:[%s1691_s0 + $0x340] sm:$0xff] }
  0x5a   :  { %614 = vmatpush.msra.mxu2 %v104_v46  ;;  %642 = vmatpush.msra.mxu3 %v121_v47  ;;  %v137_v46 = vld [vmem:[%s1691_s0 + $0x2c8] sm:$0xff]  ;;  %v151_v47 = vld [vmem:[%s1691_s0 + $0x338] sm:$0xff] }
  0x5b   :  { %556 = vmatpush.msra.mxu0 %v72_v48  ;;  %584 = vmatpush.msra.mxu1 %v89_v49  ;;  %v136_v48 = vld [vmem:[%s1691_s0 + $0x2c0] sm:$0xff]  ;;  %v35_v49 = vld [vmem:[%s1692_s1 + $0x78] sm:$0xff] }
  0x5c   :  { %443 = vmatmul.f32.gmra.mxu0 %v174_v50  ;;  %773 = vmatmul.msk.f32.gmra.mxu2 %vm292_vm0, %v176_v51  ;;  %v37_v50 = vld [vmem:[%s1692_s1 + $0x88] sm:$0xff]  ;;  %v135_v51 = vld [vmem:[%s1691_s0 + $0x2b8] sm:$0xff] }
  0x5d   :  { %615 = vmatpush.msra.mxu2 %v103_v52  ;;  %643 = vmatpush.msra.mxu3 %v120_v53  ;;  %v150_v52 = vld [vmem:[%s1691_s0 + $0x330] sm:$0xff]  ;;  %v36_v53 = vld [vmem:[%s1692_s1 + $0x80] sm:$0xff] }
  0x5e   :  { %557 = vmatpush.msra.mxu0 %v71_v54  ;;  %585 = vmatpush.msra.mxu1 %v88_v55  ;;  %v38_v54 = vld [vmem:[%s1692_s1 + $0x90] sm:$0xff] }
  0x5f   :  { %472 = vmatmul.f32.gmra.mxu1 %v175_v56  ;;  %542 = vmatmul.f32.gmra.mxu3 %v34_v57  ;;  %v134_v55 = vld [vmem:[%s1691_s0 + $0x2b0] sm:$0xff]  ;;  %v149_v56 = vld [vmem:[%s1691_s0 + $0x328] sm:$0xff] }
  0x60   :  { %616 = vmatpush.msra.mxu2 %v102_v58  ;;  %644 = vmatpush.msra.mxu3 %v119_v59  ;;  %v133_v57 = vld [vmem:[%s1691_s0 + $0x2a8] sm:$0xff]  ;;  %v148_v58 = vld [vmem:[%s1691_s0 + $0x320] sm:$0xff] }
  0x61   :  { %558 = vmatpush.msra.mxu0 %v70_v60  ;;  %586 = vmatpush.msra.mxu1 %v87_v61  ;;  %v132_v59 = vld [vmem:[%s1691_s0 + $0x2a0] sm:$0xff]  ;;  %v42_v60 = vld [vmem:[%s1692_s1 + $0xb0] sm:$0xff] }
  0x62   :  { %617 = vmatpush.msra.mxu2 %v101_v62  ;;  %645 = vmatpush.msra.mxu3 %v118_v63  ;;  %v44_v61 = vld [vmem:[%s1692_s1 + $0xc0] sm:$0xff]  ;;  %v147_v62 = vld [vmem:[%s1691_s0 + $0x318] sm:$0xff] }
  0x63   :  { %559 = vmatpush.msra.mxu0 %v69_v0  ;;  %587 = vmatpush.msra.mxu1 %v86_v1  ;;  %v131_v63 = vld [vmem:[%s1691_s0 + $0x298] sm:$0xff]  ;;  %v45_v0 = vld [vmem:[%s1692_s1 + $0xc8] sm:$0xff] }
  0x64   :  { %618 = vmatpush.msra.mxu2 %v100_v2  ;;  %646 = vmatpush.msra.mxu3 %v117_v3  ;;  %v43_v1 = vld [vmem:[%s1692_s1 + $0xb8] sm:$0xff]  ;;  %v130_v2 = vld [vmem:[%s1691_s0 + $0x290] sm:$0xff] }
  0x65   :  { %560 = vmatpush.msra.mxu0 %v68_v4  ;;  %588 = vmatpush.msra.mxu1 %v85_v5  ;;  %v146_v3 = vld [vmem:[%s1691_s0 + $0x310] sm:$0xff]  ;;  %v129_v4 = vld [vmem:[%s1691_s0 + $0x288] sm:$0xff] }
  0x66   :  { %446 = vmatmul.f32.gmra.mxu0 %v181_v6  ;;  %774 = vmatmul.msk.f32.gmra.mxu2 %vm292_vm0, %v183_v7  ;;  %v145_v5 = vld [vmem:[%s1691_s0 + $0x308] sm:$0xff]  ;;  %v128_v6 = vld [vmem:[%s1691_s0 + $0x280] sm:$0xff]  ;;  %v39_v7 = vld [vmem:[%s1692_s1 + $0x98] sm:$0xff] }
  0x67   :  { %619 = vmatpush.msra.mxu2 %v99_v8  ;;  %647 = vmatpush.msra.mxu3 %v116_v9  ;;  %v25_v8 = vld [vmem:[%s1692_s1 + $0x28] sm:$0xff]  ;;  %v144_v9 = vld [vmem:[%s1691_s0 + $0x300] sm:$0xff] }
  0x68   :  { %561 = vmatpush.msra.mxu0 %v67_v10  ;;  %589 = vmatpush.msra.mxu1 %v84_v11  ;;  %v40_v10 = vld [vmem:[%s1692_s1 + $0xa0] sm:$0xff]  ;;  %v26_v11 = vld [vmem:[%s1692_s1 + $0x30] sm:$0xff] }
  0x69   :  { %475 = vmatmul.f32.gmra.mxu1 %v182_v12  ;;  %545 = vmatmul.f32.gmra.mxu3 %v41_v13  ;;  %v810_v12 = vmov 0   ;;  %v725_v13 = vld [vmem:[%s1693_s4 + $0x10] sm:$0xff] }
  0x6a   :  { %620 = vmatpush.msra.mxu2 %v98_v14  ;;  %648 = vmatpush.msra.mxu3 %v115_v15  ;;  %v723_v14 = vld [vmem:[%s1693_s4] sm:$0xff]  ;;  %v46_v15 = vld [vmem:[%s1692_s1 + $0xd0] sm:$0xff] }
  0x6b   :  { %562 = vmatpush.msra.mxu0 %v66_v16  ;;  %590 = vmatpush.msra.mxu1 %v83_v17  ;;  %v32_v16 = vld [vmem:[%s1692_s1 + $0x60] sm:$0xff]  ;;  %v47_v17 = vld [vmem:[%s1692_s1 + $0xd8] sm:$0xff] }
  0x6c   :  { %621 = vmatpush.msra.mxu2 %v97_v18  ;;  %649 = vmatpush.msra.mxu3 %v114_v19  ;;  %v33_v18 = vld [vmem:[%s1692_s1 + $0x68] sm:$0xff]  ;;  %v726_v19 = vld [vmem:[%s1693_s4 + $0x18] sm:$0xff] }
  0x6d   :  { %563 = vmatpush.msra.mxu0 %v65_v20  ;;  %591 = vmatpush.msra.mxu1 %v82_v21  ;;  %v724_v20 = vld [vmem:[%s1693_s4 + $0x8] sm:$0xff] }
  0x6e   :  { %622 = vmatpush.msra.mxu2 %v96_v22  ;;  %650 = vmatpush.msra.mxu3 %v113_v23 }
  0x6f   :  { %564 = vmatpush.msra.mxu0 %v64_v24  ;;  %592 = vmatpush.msra.mxu1 %v81_v25 }
  0x70   :  { %565 = vmatmul.f32.vlgmr.msra.gmra.mxu0 %v21_v26  ;;  %623 = vmatmul.f32.vlgmr.msra.gmra.mxu2 %v23_v27 }
  0x71   :  { %651 = vmatpush.msra.mxu3 %v112_v28  ;;  %779 = vmatpush.msrb.mxu2 %v143_v29 }
  0x72   :  { %593 = vmatpush.msra.mxu1 %v80_v30  ;;  %665 = vmatpush.msrb.mxu0 %v143_v29 }
  0x73   :  { %594 = vmatmul.f32.vlgmr.msra.gmra.mxu1 %v22_v31  ;;  %652 = vmatmul.f32.vlgmr.msra.gmra.mxu3 %v24_v32 }
  0x74   :  { %780 = vmatpush.msrb.mxu2 %v142_v33  ;;  %795 = vmatpush.msrb.mxu3 %v155_v34 }
  0x75   :  { %666 = vmatpush.msrb.mxu0 %v142_v33  ;;  %698 = vmatpush.msrb.mxu1 %v155_v34 }
  0x76   :  { %781 = vmatpush.msrb.mxu2 %v141_v35  ;;  %796 = vmatpush.msrb.mxu3 %v154_v36 }
  0x77   :  { %667 = vmatpush.msrb.mxu0 %v141_v35  ;;  %699 = vmatpush.msrb.mxu1 %v154_v36 }
  0x78   :  { %782 = vmatpush.msrb.mxu2 %v140_v37  ;;  %568 = vmatmul.f32.gmra.mxu0 %v28_v38 }
  0x79   :  { %668 = vmatpush.msrb.mxu0 %v140_v37  ;;  %626 = vmatmul.f32.gmra.mxu2 %v30_v39 }
  0x7a   :  { %783 = vmatpush.msrb.mxu2 %v139_v40  ;;  %797 = vmatpush.msrb.mxu3 %v153_v41 }
  0x7b   :  { %669 = vmatpush.msrb.mxu0 %v139_v40  ;;  %597 = vmatmul.f32.gmra.mxu1 %v29_v42 }
  0x7c   :  { %655 = vmatmul.f32.gmra.mxu3 %v31_v43  ;;  %784 = vmatpush.msrb.mxu2 %v138_v44 }
  0x7d   :  { %798 = vmatpush.msrb.mxu3 %v152_v45  ;;  %670 = vmatpush.msrb.mxu0 %v138_v44 }
  0x7e   :  { %785 = vmatpush.msrb.mxu2 %v137_v46  ;;  %700 = vmatpush.msrb.mxu1 %v153_v41 }
  0x7f   :  { %671 = vmatpush.msrb.mxu0 %v137_v46  ;;  %799 = vmatpush.msrb.mxu3 %v151_v47 }
  0x80   :  { %786 = vmatpush.msrb.mxu2 %v136_v48  ;;  %571 = vmatmul.f32.gmra.mxu0 %v35_v49 }
  0x81   :  { %672 = vmatpush.msrb.mxu0 %v136_v48  ;;  %629 = vmatmul.f32.gmra.mxu2 %v37_v50 }
  0x82   :  { %787 = vmatpush.msrb.mxu2 %v135_v51  ;;  %701 = vmatpush.msrb.mxu1 %v152_v45 }
  0x83   :  { %800 = vmatpush.msrb.mxu3 %v150_v52  ;;  %673 = vmatpush.msrb.mxu0 %v135_v51 }
  0x84   :  { %600 = vmatmul.f32.gmra.mxu1 %v36_v53  ;;  %658 = vmatmul.f32.gmra.mxu3 %v38_v54 }
  0x85   :  { %788 = vmatpush.msrb.mxu2 %v134_v55  ;;  %801 = vmatpush.msrb.mxu3 %v149_v56 }
  0x86   :  { %674 = vmatpush.msrb.mxu0 %v134_v55  ;;  %702 = vmatpush.msrb.mxu1 %v151_v47 }
  0x87   :  { %789 = vmatpush.msrb.mxu2 %v133_v57  ;;  %802 = vmatpush.msrb.mxu3 %v148_v58 }
  0x88   :  { %675 = vmatpush.msrb.mxu0 %v133_v57  ;;  %703 = vmatpush.msrb.mxu1 %v150_v52 }
  0x89   :  { %790 = vmatpush.msrb.mxu2 %v132_v59  ;;  %574 = vmatmul.f32.gmra.mxu0 %v42_v60 }
  0x8a   :  { %676 = vmatpush.msrb.mxu0 %v132_v59  ;;  %704 = vmatpush.msrb.mxu1 %v149_v56 }
  0x8b   :  { %632 = vmatmul.f32.gmra.mxu2 %v44_v61  ;;  %803 = vmatpush.msrb.mxu3 %v147_v62 }
  0x8c   :  { %791 = vmatpush.msrb.mxu2 %v131_v63  ;;  %677 = vmatpush.msrb.mxu0 %v131_v63 }
  0x8d   :  { %705 = vmatpush.msrb.mxu1 %v148_v58  ;;  %661 = vmatmul.f32.gmra.mxu3 %v45_v0 }
  0x8e   :  { %603 = vmatmul.f32.gmra.mxu1 %v43_v1  ;;  %792 = vmatpush.msrb.mxu2 %v130_v2 }
  0x8f   :  { %804 = vmatpush.msrb.mxu3 %v146_v3  ;;  %678 = vmatpush.msrb.mxu0 %v130_v2 }
  0x90   :  { %706 = vmatpush.msrb.mxu1 %v147_v62  ;;  %793 = vmatpush.msrb.mxu2 %v129_v4 }
  0x91   :  { %679 = vmatpush.msrb.mxu0 %v129_v4  ;;  %805 = vmatpush.msrb.mxu3 %v145_v5 }
  0x92   :  { %707 = vmatpush.msrb.mxu1 %v146_v3  ;;  %794 = vmatpush.msrb.mxu2 %v128_v6 }
  0x93   :  { %680 = vmatpush.msrb.mxu0 %v128_v6  ;;  %687 = vmatmul.f32.vlgmr.msrb.gmra.mxu2 %v39_v7 }
  0x94   :  { %708 = vmatpush.msrb.mxu1 %v145_v5  ;;  %681 = vmatmul.f32.vlgmr.msrb.gmra.mxu0 %v25_v8 }
  0x95   :  { %806 = vmatpush.msrb.mxu3 %v144_v9  ;;  %809 = vset.pattern.permute.xlu1 %v810_v12 }
  0x96   :  { %709 = vmatpush.msrb.mxu1 %v144_v9  ;;  %777 = vmatmul.msk.f32.vlgmr.msrb.gmra.mxu3 %vm292_vm0, %v40_v10 }
  0x97   :  { %775 = vmatmul.msk.f32.vlgmr.msrb.gmra.mxu1 %vm292_vm0, %v26_v11  ;;  %808 = vset.pattern.permute.xlu0 %v810_v12 }
  0x98   :  { %739 = vperm.xlu1 %809, %v725_v13   ;;  %729 = vperm.xlu0 %808, %v723_v14  }
  0x9b   :  { %690 = vmatmul.f32.gmra.mxu2 %v46_v15 }
  0x9c   :  { %684 = vmatmul.f32.gmra.mxu0 %v32_v16 }
  0x9e   :  { %778 = vmatmul.msk.f32.gmra.mxu3 %vm292_vm0, %v47_v17 }
  0x9f   :  { %776 = vmatmul.msk.f32.gmra.mxu1 %vm292_vm0, %v33_v18  ;;  %v322_v21 = vpop.f32.mrf.mxu0 }
  0xa0   :  { %744 = vperm.xlu1 %809, %v726_v19   ;;  %734 = vperm.xlu0 %808, %v724_v20  }
  0xa2   :  { %v351_v22 = vpop.f32.mrf.mxu1 }
  0xa3   :  { %v352_v23 = vadd.f32 %v351_v22, %v322_v21 }
  0xa5   :  { %v380_v24 = vpop.f32.mrf.mxu2 }
  0xa6   :  { %v381_v25 = vadd.f32 %v380_v24, %v352_v23 }
  0xa8   :  { %v325_v26 = vpop.f32.mrf.mxu0  ;;  %v409_v27 = vpop.f32.mrf.mxu3 }
  0xa9   :  { %v410_v28 = vadd.f32 %v409_v27, %v381_v25 }
  0xac   :  { %v354_v29 = vpop.f32.mrf.mxu1 }
  0xad   :  { %v355_v30 = vadd.f32 %v354_v29, %v325_v26 }
  0xaf   :  { %v383_v31 = vpop.f32.mrf.mxu2 }
  0xb0   :  { %v384_v32 = vadd.f32 %v383_v31, %v355_v30 }
  0xb1   :  { %v412_v33 = vpop.f32.mrf.mxu3 }
  0xb2   :  { %v328_v34 = vpop.f32.mrf.mxu0  ;;  %v413_v35 = vadd.f32 %v412_v33, %v384_v32 }
  0xb5   :  { %v357_v36 = vpop.f32.mrf.mxu1 }
  0xb6   :  { %v358_v62 = vadd.f32 %v357_v36, %v328_v34 }
  0xb8   :  { %v386_v37 = vpop.f32.mrf.mxu2 }
  0xb9   :  { %v387_v2 = vadd.f32 %v386_v37, %v358_v62 }
  0xbb   :  { %v331_v38 = vpop.f32.mrf.mxu0  ;;  %v415_v39 = vpop.f32.mrf.mxu3 }
  0xbc   :  { %v416_v5 = vadd.f32 %v415_v39, %v387_v2 }
  0xbf   :  { %v360_v40 = vpop.f32.mrf.mxu1 }
  0xc0   :  { %v361_v6 = vadd.f32 %v360_v40, %v331_v38 }
  0xc2   :  { %v389_v41 = vpop.f32.mrf.mxu2 }
  0xc3   :  { %v390_v12 = vadd.f32 %v389_v41, %v361_v6 }
  0xc4   :  { %v418_v42 = vpop.f32.mrf.mxu3 }
  0xc5   :  { %v438_v43 = vpop.f32.mrf.mxu0  ;;  %v419_v18 = vadd.f32 %v418_v42, %v390_v12 }
  0xc6   :  { %v439_v3 = vadd.f32 %v438_v43, %v410_v28 }
  0xc8   :  { %v467_v44 = vpop.f32.mrf.mxu1 }
  0xc9   :  { %v468_v8 = vadd.f32 %v467_v44, %v439_v3 }
  0xcb   :  { %v496_v45 = vpop.f32.mrf.mxu2 }
  0xcc   :  { %v497_v11 = vadd.f32 %v496_v45, %v468_v8 }
  0xce   :  { %v537_v46 = vpop.f32.mrf.mxu3 }
  0xcf   :  { %v441_v47 = vpop.f32.mrf.mxu0  ;;  %v538_v16 = vadd.f32 %v537_v46, %v497_v11 }
  0xd0   :  { %v442_v14 = vadd.f32 %v441_v47, %v413_v35 }
  0xd2   :  { %v470_v48 = vpop.f32.mrf.mxu1 }
  0xd3   :  { %v471_v20 = vadd.f32 %v470_v48, %v442_v14 }
  0xd5   :  { %v499_v49 = vpop.f32.mrf.mxu2 }
  0xd6   :  { %v500_v25 = vadd.f32 %v499_v49, %v471_v20 }
  0xd8   :  { %v540_v50 = vpop.f32.mrf.mxu3 }
  0xd9   :  { %v444_v51 = vpop.f32.mrf.mxu0  ;;  %v541_v31 = vadd.f32 %v540_v50, %v500_v25 }
  0xda   :  { %v445_v9 = vadd.f32 %v444_v51, %v416_v5 }
  0xdc   :  { %v473_v52 = vpop.f32.mrf.mxu1 }
  0xdd   :  { %v474_v15 = vadd.f32 %v473_v52, %v445_v9 }
  0xdf   :  { %v502_v53 = vpop.f32.mrf.mxu2 }
  0xe0   :  { %v503_v19 = vadd.f32 %v502_v53, %v474_v15 }
  0xe2   :  { %v543_v54 = vpop.f32.mrf.mxu3 }
  0xe3   :  { %v447_v55 = vpop.f32.mrf.mxu0  ;;  %v544_v26 = vadd.f32 %v543_v54, %v503_v19 }
  0xe4   :  { %v448_v22 = vadd.f32 %v447_v55, %v419_v18 }
  0xe6   :  { %v476_v56 = vpop.f32.mrf.mxu1 }
  0xe7   :  { %v477_v28 = vadd.f32 %v476_v56, %v448_v22 }
  0xe9   :  { %v505_v57 = vpop.f32.mrf.mxu2 }
  0xea   :  { %v506_v33 = vadd.f32 %v505_v57, %v477_v28 }
  0xec   :  { %v546_v58 = vpop.f32.mrf.mxu3 }
  0xed   :  { %v566_v59 = vpop.f32.mrf.mxu0  ;;  %v547_v39 = vadd.f32 %v546_v58, %v506_v33 }
  0xee   :  { %v567_v21 = vadd.f32 %v566_v59, %v538_v16 }
  0xf0   :  { %v595_v60 = vpop.f32.mrf.mxu1 }
  0xf1   :  { %v596_v27 = vadd.f32 %v595_v60, %v567_v21 }
  0xf3   :  { %v624_v61 = vpop.f32.mrf.mxu2 }
  0xf4   :  { %v625_v32 = vadd.f32 %v624_v61, %v596_v27 }
  0xf5   :  { %v569_v63 = vpop.f32.mrf.mxu0 }
  0xf6   :  { %v653_v0 = vpop.f32.mrf.mxu3  ;;  %v570_v34 = vadd.f32 %v569_v63, %v541_v31 }
  0xf7   :  { %v654_v37 = vadd.f32 %v653_v0, %v625_v32 }
  0xf8   :  { %v598_v1 = vpop.f32.mrf.mxu1 }
  0xf9   :  { %v599_v42 = vadd.f32 %v598_v1, %v570_v34 }
  0xfc   :  { %v627_v4 = vpop.f32.mrf.mxu2 }
  0xfd   :  { %v572_v7 = vpop.f32.mrf.mxu0  ;;  %v628_v45 = vadd.f32 %v627_v4, %v599_v42 }
  0xfe   :  { %v573_v29 = vadd.f32 %v572_v7, %v544_v26 }
  0xff   :  { %v656_v10 = vpop.f32.mrf.mxu3 }
 0x100   :  { %v657_v54 = vadd.f32 %v656_v10, %v628_v45 }
 0x101   :  { %v601_v13 = vpop.f32.mrf.mxu1 }
 0x102   :  { %v602_v36 = vadd.f32 %v601_v13, %v573_v29 }
 0x104   :  { %v630_v17 = vpop.f32.mrf.mxu2 }
 0x105   :  { %v631_v40 = vadd.f32 %v630_v17, %v602_v36 }
 0x106   :  { %v575_v23 = vpop.f32.mrf.mxu0 }
 0x107   :  { %v659_v24 = vpop.f32.mrf.mxu3  ;;  %v576_v44 = vadd.f32 %v575_v23, %v547_v39 }
 0x108   :  { %v660_v48 = vadd.f32 %v659_v24, %v631_v40 }
 0x10a   :  { %v730_v46 = vpop.permute.xlu0 %729  ;;  %v740_v55 = vpop.permute.xlu1 %739 }
 0x10b   :  { %v604_v30 = vpop.f32.mrf.mxu1 }
 0x10c   :  { %v605_v50 = vadd.f32 %v604_v30, %v576_v44 }
 0x10e   :  { %v633_v35 = vpop.f32.mrf.mxu2 }
 0x10f   :  { %v634_v56 = vadd.f32 %v633_v35, %v605_v50 }
 0x110   :  { %v662_v38 = vpop.f32.mrf.mxu3 }
 0x111   :  { %v682_v41 = vpop.f32.mrf.mxu0  ;;  %v663_v1 = vadd.f32 %v662_v38, %v634_v56 }
 0x112   :  { %v683_v43 = vadd.f32 %v682_v41, %v654_v37  ;;  %v735_v4 = vpop.permute.xlu0 %734  ;;  %v745_v12 = vpop.permute.xlu1 %744 }
 0x114   :  { %v711_v47 = vpop.f32.mrf.mxu1 }
 0x115   :  { %v712_v49 = vadd.f32 %v711_v47, %v683_v43 }
 0x116   :  { %v688_v51 = vpop.f32.mrf.mxu2 }
 0x117   :  { %v747_v52 = vadd.f32 %v730_v46, %v712_v49  ;;  %v689_v53 = vadd.f32 %v688_v51, %v660_v48 }
 0x119   :  { %vm751_vm1 = vcmp.ge.f32.partialorder %v747_v52, 0.0  ;;  %v755_v57 = vmul.f32 0.2, %v747_v52  ;;  %v685_v58 = vpop.f32.mrf.mxu0  ;;  %v717_v59 = vpop.f32.mrf.mxu3 }
 0x11a   :  { %v686_v60 = vadd.f32 %v685_v58, %v657_v54  ;;  %v718_v61 = vadd.f32 %v717_v59, %v689_v53 }
 0x11b   :  { %v759_v62 = vsel %vm751_vm1, %v747_v52, %v755_v57 }
 0x11c   :  { %763 = vst [vmem:[%s1694_s5] sm:$0xff] %v759_v62  ;;  %v749_v63 = vadd.f32 %v740_v55, %v718_v61  ;;  %v714_v0 = vpop.f32.mrf.mxu1 }
 0x11d   :  { %v715_v2 = vadd.f32 %v714_v0, %v686_v60 }
 0x11e   :  { %vm753_vm2 = vcmp.ge.f32.partialorder %v749_v63, 0.0  ;;  %v757_v3 = vmul.f32 0.2, %v749_v63  ;;  %v691_v5 = vpop.f32.mrf.mxu2 }
 0x11f   :  { %v748_v6 = vadd.f32 %v735_v4, %v715_v2  ;;  %v692_v7 = vadd.f32 %v691_v5, %v663_v1 }
 0x120   :  { %v761_v8 = vsel %vm753_vm2, %v749_v63, %v757_v3 }
 0x121   :  { %765 = vst [vmem:[%s1694_s5 + $0x10] sm:$0xff] %v761_v8  ;;  %vm752_vm3 = vcmp.ge.f32.partialorder %v748_v6, 0.0  ;;  %v756_v9 = vmul.f32 0.2, %v748_v6  ;;  %v720_v10 = vpop.f32.mrf.mxu3 }
 0x122   :  { %v721_v11 = vadd.f32 %v720_v10, %v692_v7 }
 0x123   :  { %v760_v13 = vsel %vm752_vm3, %v748_v6, %v756_v9 }
 0x124   :  { %764 = vst [vmem:[%s1694_s5 + $0x8] sm:$0xff] %v760_v13  ;;  %v750_v14 = vadd.f32 %v745_v12, %v721_v11 }
 0x126   :  { %vm754_vm4 = vcmp.ge.f32.partialorder %v750_v14, 0.0  ;;  %v758_v15 = vmul.f32 0.2, %v750_v14 }
 0x128   :  { %v762_v16 = vsel %vm754_vm4, %v750_v14, %v758_v15 }
 0x129   :  { %766 = vst [vmem:[%s1694_s5 + $0x18] sm:$0xff] %v762_v16 }

// kernel: _lambda_.19
= control target key start
LH: loop header
LB: loop body
LE: loop exit
PB: predicated region body
PF: predicated region fallthrough
CT: control target
= control target key end

     0   :  { %vm135_vm0 = vcmask 785408   ;;  %s659_s0 = inlined_call_operand.vmem [shape: f32[864,128], index: 0, kind: input, shape index: {}]   ;;  %s660_s1 = inlined_call_operand.vmem [shape: f32[6,864], index: 1, kind: input, shape index: {}]   ;;  %s661_s2 = inlined_call_operand.vmem [shape: f32[6,1], index: 2, kind: input, shape index: {}]   ;;  %s662_s3 = inlined_call_operand.vmem [shape: f32[6,128], index: 3, kind: output, shape index: {}]  }
   0x1   :  { %v36_v0 = vld [vmem:[%s659_s0 + $0x78] sm:$0xff]  ;;  %v35_v1 = vld [vmem:[%s659_s0 + $0x70] sm:$0xff]  ;;  %v34_v4 = vld [vmem:[%s659_s0 + $0x68] sm:$0xff] }
   0x2   :  { %v52_v2 = vld [vmem:[%s659_s0 + $0xf8] sm:$0xff]  ;;  %139 = vmatpush.msra.mxu0 %v36_v0  ;;  %v51_v3 = vld [vmem:[%s659_s0 + $0xf0] sm:$0xff]  ;;  %v50_v5 = vld [vmem:[%s659_s0 + $0xe8] sm:$0xff] }
   0x3   :  { %159 = vmatpush.msra.mxu1 %v52_v2  ;;  %v68_v6 = vld [vmem:[%s659_s0 + $0x178] sm:$0xff]  ;;  %v67_v7 = vld [vmem:[%s659_s0 + $0x170] sm:$0xff]  ;;  %v33_v8 = vld [vmem:[%s659_s0 + $0x60] sm:$0xff] }
   0x4   :  { %140 = vmatpush.msra.mxu0 %v35_v1  ;;  %179 = vmatpush.msra.mxu2 %v68_v6  ;;  %v49_v9 = vld [vmem:[%s659_s0 + $0xe0] sm:$0xff]  ;;  %v66_v10 = vld [vmem:[%s659_s0 + $0x168] sm:$0xff]  ;;  %v32_v11 = vld [vmem:[%s659_s0 + $0x58] sm:$0xff] }
   0x5   :  { %160 = vmatpush.msra.mxu1 %v51_v3  ;;  %v48_v12 = vld [vmem:[%s659_s0 + $0xd8] sm:$0xff]  ;;  %v65_v13 = vld [vmem:[%s659_s0 + $0x160] sm:$0xff]  ;;  %v31_v14 = vld [vmem:[%s659_s0 + $0x50] sm:$0xff] }
   0x6   :  { %141 = vmatpush.msra.mxu0 %v34_v4  ;;  %180 = vmatpush.msra.mxu2 %v67_v7  ;;  %v47_v15 = vld [vmem:[%s659_s0 + $0xd0] sm:$0xff]  ;;  %v64_v16 = vld [vmem:[%s659_s0 + $0x158] sm:$0xff]  ;;  %v30_v17 = vld [vmem:[%s659_s0 + $0x48] sm:$0xff] }
   0x7   :  { %161 = vmatpush.msra.mxu1 %v50_v5  ;;  %v46_v18 = vld [vmem:[%s659_s0 + $0xc8] sm:$0xff]  ;;  %v84_v19 = vld [vmem:[%s659_s0 + $0x1f8] sm:$0xff]  ;;  %v63_v20 = vld [vmem:[%s659_s0 + $0x150] sm:$0xff] }
   0x8   :  { %142 = vmatpush.msra.mxu0 %v33_v8  ;;  %181 = vmatpush.msra.mxu2 %v66_v10  ;;  %v29_v21 = vld [vmem:[%s659_s0 + $0x40] sm:$0xff]  ;;  %v83_v23 = vld [vmem:[%s659_s0 + $0x1f0] sm:$0xff]  ;;  %v62_v24 = vld [vmem:[%s659_s0 + $0x148] sm:$0xff] }
   0x9   :  { %162 = vmatpush.msra.mxu1 %v49_v9  ;;  %v45_v22 = vld [vmem:[%s659_s0 + $0xc0] sm:$0xff]  ;;  %199 = vmatpush.msra.mxu3 %v84_v19  ;;  %v82_v25 = vld [vmem:[%s659_s0 + $0x1e8] sm:$0xff]  ;;  %v28_v26 = vld [vmem:[%s659_s0 + $0x38] sm:$0xff] }
   0xa   :  { %143 = vmatpush.msra.mxu0 %v32_v11  ;;  %182 = vmatpush.msra.mxu2 %v65_v13  ;;  %v44_v27 = vld [vmem:[%s659_s0 + $0xb8] sm:$0xff]  ;;  %v61_v28 = vld [vmem:[%s659_s0 + $0x140] sm:$0xff]  ;;  %v27_v30 = vld [vmem:[%s659_s0 + $0x30] sm:$0xff] }
   0xb   :  { %163 = vmatpush.msra.mxu1 %v48_v12  ;;  %200 = vmatpush.msra.mxu3 %v83_v23  ;;  %v81_v29 = vld [vmem:[%s659_s0 + $0x1e0] sm:$0xff]  ;;  %v43_v31 = vld [vmem:[%s659_s0 + $0xb0] sm:$0xff]  ;;  %v60_v32 = vld [vmem:[%s659_s0 + $0x138] sm:$0xff] }
   0xc   :  { %144 = vmatpush.msra.mxu0 %v31_v14  ;;  %183 = vmatpush.msra.mxu2 %v64_v16  ;;  %v80_v33 = vld [vmem:[%s659_s0 + $0x1d8] sm:$0xff]  ;;  %v26_v34 = vld [vmem:[%s659_s0 + $0x28] sm:$0xff]  ;;  %v59_v36 = vld [vmem:[%s659_s0 + $0x130] sm:$0xff] }
   0xd   :  { %164 = vmatpush.msra.mxu1 %v47_v15  ;;  %201 = vmatpush.msra.mxu3 %v82_v25  ;;  %v42_v35 = vld [vmem:[%s659_s0 + $0xa8] sm:$0xff]  ;;  %v79_v37 = vld [vmem:[%s659_s0 + $0x1d0] sm:$0xff]  ;;  %v25_v38 = vld [vmem:[%s659_s0 + $0x20] sm:$0xff] }
   0xe   :  { %145 = vmatpush.msra.mxu0 %v30_v17  ;;  %184 = vmatpush.msra.mxu2 %v63_v20  ;;  %v41_v39 = vld [vmem:[%s659_s0 + $0xa0] sm:$0xff]  ;;  %v58_v40 = vld [vmem:[%s659_s0 + $0x128] sm:$0xff]  ;;  %v24_v42 = vld [vmem:[%s659_s0 + $0x18] sm:$0xff] }
   0xf   :  { %165 = vmatpush.msra.mxu1 %v46_v18  ;;  %202 = vmatpush.msra.mxu3 %v81_v29  ;;  %v78_v41 = vld [vmem:[%s659_s0 + $0x1c8] sm:$0xff]  ;;  %v40_v43 = vld [vmem:[%s659_s0 + $0x98] sm:$0xff]  ;;  %v57_v44 = vld [vmem:[%s659_s0 + $0x120] sm:$0xff] }
  0x10   :  { %146 = vmatpush.msra.mxu0 %v29_v21  ;;  %185 = vmatpush.msra.mxu2 %v62_v24  ;;  %v77_v45 = vld [vmem:[%s659_s0 + $0x1c0] sm:$0xff]  ;;  %v23_v46 = vld [vmem:[%s659_s0 + $0x10] sm:$0xff]  ;;  %v56_v48 = vld [vmem:[%s659_s0 + $0x118] sm:$0xff] }
  0x11   :  { %166 = vmatpush.msra.mxu1 %v45_v22  ;;  %203 = vmatpush.msra.mxu3 %v80_v33  ;;  %v39_v47 = vld [vmem:[%s659_s0 + $0x90] sm:$0xff]  ;;  %v76_v49 = vld [vmem:[%s659_s0 + $0x1b8] sm:$0xff]  ;;  %v22_v50 = vld [vmem:[%s659_s0 + $0x8] sm:$0xff] }
  0x12   :  { %147 = vmatpush.msra.mxu0 %v28_v26  ;;  %186 = vmatpush.msra.mxu2 %v61_v28  ;;  %v38_v51 = vld [vmem:[%s659_s0 + $0x88] sm:$0xff]  ;;  %v55_v52 = vld [vmem:[%s659_s0 + $0x110] sm:$0xff]  ;;  %v21_v54 = vld [vmem:[%s659_s0] sm:$0xff] }
  0x13   :  { %167 = vmatpush.msra.mxu1 %v44_v27  ;;  %204 = vmatpush.msra.mxu3 %v79_v37  ;;  %v75_v53 = vld [vmem:[%s659_s0 + $0x1b0] sm:$0xff]  ;;  %v37_v55 = vld [vmem:[%s659_s0 + $0x80] sm:$0xff]  ;;  %v100_v56 = vld [vmem:[%s659_s0 + $0x278] sm:$0xff] }
  0x14   :  { %148 = vmatpush.msra.mxu0 %v27_v30  ;;  %187 = vmatpush.msra.mxu2 %v60_v32  ;;  %v116_v57 = vld [vmem:[%s659_s0 + $0x2f8] sm:$0xff]  ;;  %v54_v58 = vld [vmem:[%s659_s0 + $0x108] sm:$0xff]  ;;  %v99_v60 = vld [vmem:[%s659_s0 + $0x270] sm:$0xff] }
  0x15   :  { %168 = vmatpush.msra.mxu1 %v43_v31  ;;  %205 = vmatpush.msra.mxu3 %v78_v41  ;;  %v74_v59 = vld [vmem:[%s659_s0 + $0x1a8] sm:$0xff]  ;;  %v115_v61 = vld [vmem:[%s659_s0 + $0x2f0] sm:$0xff]  ;;  %v53_v62 = vld [vmem:[%s659_s0 + $0x100] sm:$0xff] }
  0x16   :  { %149 = vmatpush.msra.mxu0 %v26_v34  ;;  %188 = vmatpush.msra.mxu2 %v59_v36  ;;  %v73_v63 = vld [vmem:[%s659_s0 + $0x1a0] sm:$0xff]  ;;  %v98_v0 = vld [vmem:[%s659_s0 + $0x268] sm:$0xff]  ;;  %v128_v2 = vld [vmem:[%s659_s0 + $0x358] sm:$0xff]  ;;  %v287_v36 = vmov 0  }
  0x17   :  { %169 = vmatpush.msra.mxu1 %v42_v35  ;;  %206 = vmatpush.msra.mxu3 %v77_v45  ;;  %v114_v1 = vld [vmem:[%s659_s0 + $0x2e8] sm:$0xff]  ;;  %v72_v3 = vld [vmem:[%s659_s0 + $0x198] sm:$0xff]  ;;  %v97_v4 = vld [vmem:[%s659_s0 + $0x260] sm:$0xff] }
  0x18   :  { %150 = vmatpush.msra.mxu0 %v25_v38  ;;  %189 = vmatpush.msra.mxu2 %v58_v40  ;;  %v113_v5 = vld [vmem:[%s659_s0 + $0x2e0] sm:$0xff]  ;;  %v127_v6 = vld [vmem:[%s659_s0 + $0x350] sm:$0xff]  ;;  %v96_v8 = vld [vmem:[%s659_s0 + $0x258] sm:$0xff] }
  0x19   :  { %170 = vmatpush.msra.mxu1 %v41_v39  ;;  %207 = vmatpush.msra.mxu3 %v76_v49  ;;  %v71_v7 = vld [vmem:[%s659_s0 + $0x190] sm:$0xff]  ;;  %v112_v9 = vld [vmem:[%s659_s0 + $0x2d8] sm:$0xff]  ;;  %v126_v10 = vld [vmem:[%s659_s0 + $0x348] sm:$0xff] }
  0x1a   :  { %151 = vmatpush.msra.mxu0 %v24_v42  ;;  %190 = vmatpush.msra.mxu2 %v57_v44  ;;  %v70_v11 = vld [vmem:[%s659_s0 + $0x188] sm:$0xff]  ;;  %v95_v12 = vld [vmem:[%s659_s0 + $0x250] sm:$0xff]  ;;  %v125_v14 = vld [vmem:[%s659_s0 + $0x340] sm:$0xff] }
  0x1b   :  { %171 = vmatpush.msra.mxu1 %v40_v43  ;;  %208 = vmatpush.msra.mxu3 %v75_v53  ;;  %v111_v13 = vld [vmem:[%s659_s0 + $0x2d0] sm:$0xff]  ;;  %v69_v15 = vld [vmem:[%s659_s0 + $0x180] sm:$0xff]  ;;  %v94_v16 = vld [vmem:[%s659_s0 + $0x248] sm:$0xff] }
  0x1c   :  { %152 = vmatpush.msra.mxu0 %v23_v46  ;;  %191 = vmatpush.msra.mxu2 %v56_v48  ;;  %v110_v17 = vld [vmem:[%s659_s0 + $0x2c8] sm:$0xff]  ;;  %v124_v18 = vld [vmem:[%s659_s0 + $0x338] sm:$0xff]  ;;  %v14_v19 = vld [vmem:[%s660_s1] sm:$0x3f] }
  0x1d   :  { %172 = vmatpush.msra.mxu1 %v39_v47  ;;  %209 = vmatpush.msra.mxu3 %v74_v59  ;;  %v93_v20 = vld [vmem:[%s659_s0 + $0x240] sm:$0xff]  ;;  %v123_v22 = vld [vmem:[%s659_s0 + $0x330] sm:$0xff]  ;;  %v17_v23 = vld [vmem:[%s660_s1 + $0x18] sm:$0x3f] }
  0x1e   :  { %153 = vmatpush.msra.mxu0 %v22_v50  ;;  %192 = vmatpush.msra.mxu2 %v55_v52  ;;  %v109_v21 = vld [vmem:[%s659_s0 + $0x2c0] sm:$0xff]  ;;  %v92_v24 = vld [vmem:[%s659_s0 + $0x238] sm:$0xff]  ;;  %v122_v26 = vld [vmem:[%s659_s0 + $0x328] sm:$0xff] }
  0x1f   :  { %173 = vmatpush.msra.mxu1 %v38_v51  ;;  %210 = vmatpush.msra.mxu3 %v73_v63  ;;  %v108_v25 = vld [vmem:[%s659_s0 + $0x2b8] sm:$0xff]  ;;  %v15_v27 = vld [vmem:[%s660_s1 + $0x8] sm:$0x3f]  ;;  %v91_v28 = vld [vmem:[%s659_s0 + $0x230] sm:$0xff] }
  0x20   :  { %154 = vmatpush.msra.mxu0 %v21_v54  ;;  %193 = vmatpush.msra.mxu2 %v54_v58  ;;  %v107_v29 = vld [vmem:[%s659_s0 + $0x2b0] sm:$0xff]  ;;  %v121_v30 = vld [vmem:[%s659_s0 + $0x320] sm:$0xff]  ;;  %v90_v31 = vld [vmem:[%s659_s0 + $0x228] sm:$0xff] }
  0x21   :  { %174 = vmatpush.msra.mxu1 %v37_v55  ;;  %211 = vmatpush.msra.mxu3 %v72_v3  ;;  %v16_v32 = vld [vmem:[%s660_s1 + $0x10] sm:$0x3f]  ;;  %v106_v33 = vld [vmem:[%s659_s0 + $0x2a8] sm:$0xff]  ;;  %v120_v34 = vld [vmem:[%s659_s0 + $0x318] sm:$0xff] }
  0x22   :  { %219 = vmatpush.msrb.mxu0 %v100_v56  ;;  %194 = vmatpush.msra.mxu2 %v53_v62  ;;  %v89_v35 = vld [vmem:[%s659_s0 + $0x220] sm:$0xff]  ;;  %v119_v39 = vld [vmem:[%s659_s0 + $0x310] sm:$0xff]  ;;  %v88_v40 = vld [vmem:[%s659_s0 + $0x218] sm:$0xff] }
  0x23   :  { %239 = vmatpush.msrb.mxu1 %v116_v57  ;;  %212 = vmatpush.msra.mxu3 %v71_v7  ;;  %v129_v37 = vld [vmem:[%s661_s2] sm:$0x3f]  ;;  %v104_v41 = vld [vmem:[%s659_s0 + $0x298] sm:$0xff]  ;;  %v118_v42 = vld [vmem:[%s659_s0 + $0x308] sm:$0xff] }
  0x24   :  { %220 = vmatpush.msrb.mxu0 %v99_v60  ;;  %263 = vmatpush.msrb.mxu2 %v128_v2  ;;  %v105_v38 = vld [vmem:[%s659_s0 + $0x2a0] sm:$0xff]  ;;  %v87_v43 = vld [vmem:[%s659_s0 + $0x210] sm:$0xff]  ;;  %v86_v46 = vld [vmem:[%s659_s0 + $0x208] sm:$0xff] }
  0x25   :  { %240 = vmatpush.msrb.mxu1 %v115_v61  ;;  %213 = vmatpush.msra.mxu3 %v70_v11  ;;  %v103_v44 = vld [vmem:[%s659_s0 + $0x290] sm:$0xff]  ;;  %v117_v45 = vld [vmem:[%s659_s0 + $0x300] sm:$0xff]  ;;  %v102_v48 = vld [vmem:[%s659_s0 + $0x288] sm:$0xff] }
  0x26   :  { %221 = vmatpush.msrb.mxu0 %v98_v0  ;;  %264 = vmatpush.msrb.mxu2 %v127_v6  ;;  %v20_v47 = vld [vmem:[%s660_s1 + $0x30] sm:$0x3f]  ;;  %v85_v49 = vld [vmem:[%s659_s0 + $0x200] sm:$0xff]  ;;  %v19_v52 = vld [vmem:[%s660_s1 + $0x28] sm:$0x3f] }
  0x27   :  { %241 = vmatpush.msrb.mxu1 %v114_v1  ;;  %214 = vmatpush.msra.mxu3 %v69_v15  ;;  %v18_v50 = vld [vmem:[%s660_s1 + $0x20] sm:$0x3f] }
  0x28   :  { %222 = vmatpush.msrb.mxu0 %v97_v4  ;;  %265 = vmatpush.msrb.mxu2 %v126_v10  ;;  %v101_v51 = vld [vmem:[%s659_s0 + $0x280] sm:$0xff] }
  0x29   :  { %242 = vmatpush.msrb.mxu1 %v113_v5  ;;  %155 = vmatmul.f32.vlgmr.msra.gmra.mxu0 %v14_v19 }
  0x2a   :  { %223 = vmatpush.msrb.mxu0 %v96_v8  ;;  %266 = vmatpush.msrb.mxu2 %v125_v14 }
  0x2b   :  { %243 = vmatpush.msrb.mxu1 %v112_v9  ;;  %215 = vmatmul.f32.vlgmr.msra.gmra.mxu3 %v17_v23 }
  0x2c   :  { %224 = vmatpush.msrb.mxu0 %v95_v12  ;;  %267 = vmatpush.msrb.mxu2 %v124_v18 }
  0x2d   :  { %244 = vmatpush.msrb.mxu1 %v111_v13  ;;  %286 = vset.pattern.permute.xlu0 %v287_v36 }
  0x2e   :  { %225 = vmatpush.msrb.mxu0 %v94_v16  ;;  %268 = vmatpush.msrb.mxu2 %v123_v22 }
  0x2f   :  { %245 = vmatpush.msrb.mxu1 %v110_v17  ;;  %195 = vmatmul.f32.vlgmr.msra.gmra.mxu2 %v16_v32 }
  0x30   :  { %226 = vmatpush.msrb.mxu0 %v93_v20  ;;  %269 = vmatpush.msrb.mxu2 %v122_v26 }
  0x31   :  { %246 = vmatpush.msrb.mxu1 %v109_v21  ;;  %132 = vperm.xlu0 %286, %v129_v37  }
  0x32   :  { %227 = vmatpush.msrb.mxu0 %v92_v24  ;;  %175 = vmatmul.f32.vlgmr.msra.gmra.mxu1 %v15_v27 }
  0x33   :  { %247 = vmatpush.msrb.mxu1 %v108_v25  ;;  %270 = vmatpush.msrb.mxu2 %v121_v30 }
  0x34   :  { %228 = vmatpush.msrb.mxu0 %v91_v28 }
  0x35   :  { %248 = vmatpush.msrb.mxu1 %v107_v29  ;;  %271 = vmatpush.msrb.mxu2 %v120_v34 }
  0x36   :  { %229 = vmatpush.msrb.mxu0 %v90_v31 }
  0x37   :  { %249 = vmatpush.msrb.mxu1 %v106_v33  ;;  %272 = vmatpush.msrb.mxu2 %v119_v39 }
  0x38   :  { %230 = vmatpush.msrb.mxu0 %v89_v35 }
  0x39   :  { %250 = vmatpush.msrb.mxu1 %v105_v38  ;;  %273 = vmatpush.msrb.mxu2 %v118_v42 }
  0x3a   :  { %231 = vmatpush.msrb.mxu0 %v88_v40 }
  0x3b   :  { %251 = vmatpush.msrb.mxu1 %v104_v41  ;;  %274 = vmatpush.msrb.mxu2 %v117_v45 }
  0x3c   :  { %232 = vmatpush.msrb.mxu0 %v87_v43  ;;  %284 = vmatmul.msk.f32.vlgmr.msrb.gmra.mxu2 %vm135_vm0, %v20_v47 }
  0x3d   :  { %252 = vmatpush.msrb.mxu1 %v103_v44 }
  0x3e   :  { %233 = vmatpush.msrb.mxu0 %v86_v46 }
  0x3f   :  { %253 = vmatpush.msrb.mxu1 %v102_v48 }
  0x40   :  { %234 = vmatpush.msrb.mxu0 %v85_v49 }
  0x41   :  { %235 = vmatmul.f32.vlgmr.msrb.gmra.mxu0 %v18_v50  ;;  %254 = vmatpush.msrb.mxu1 %v101_v51 }
  0x42   :  { %255 = vmatmul.f32.vlgmr.msrb.gmra.mxu1 %v19_v52 }
  0xa3   :  { %v133_v53 = vpop.permute.xlu0 %132 }
  0xa6   :  { %v156_v54 = vpop.f32.mrf.mxu0 }
  0xa7   :  { %v157_v55 = vadd.f32 %v156_v54, %v133_v53 }
  0xae   :  { %v216_v59 = vpop.f32.mrf.mxu3 }
  0xaf   :  { %v176_v56 = vpop.f32.mrf.mxu1 }
  0xb0   :  { %v177_v57 = vadd.f32 %v176_v56, %v157_v55 }
  0xb2   :  { %v196_v58 = vpop.f32.mrf.mxu2 }
  0xb3   :  { %v197_v60 = vadd.f32 %v196_v58, %v177_v57 }
  0xb5   :  { %v217_v61 = vadd.f32 %v216_v59, %v197_v60 }
  0xbe   :  { %v236_v62 = vpop.f32.mrf.mxu0 }
  0xbf   :  { %v237_v63 = vadd.f32 %v236_v62, %v217_v61  ;;  %v256_v0 = vpop.f32.mrf.mxu1  ;;  %v276_v2 = vpop.f32.mrf.mxu2 }
  0xc1   :  { %v257_v1 = vadd.f32 %v256_v0, %v237_v63 }
  0xc3   :  { %v277_v3 = vadd.f32 %v276_v2, %v257_v1 }
  0xc5   :  { %279 = vst [vmem:[%s662_s3] sm:$0x3f] %v277_v3 }

// kernel: _lambda_.22
= control target key start
LH: loop header
LB: loop body
LE: loop exit
PB: predicated region body
PF: predicated region fallthrough
CT: control target
= control target key end

     0   :  { %s2042_s18 = smov 0   ;;  %s2044_s19 = smov 0   ;;  %s3279_s0 = inlined_call_operand.vmem [shape: f32[864,512], index: 0, kind: input, shape index: {}]   ;;  %s3280_s1 = inlined_call_operand.vmem [shape: f32[16,864], index: 1, kind: input, shape index: {}]   ;;  %s3281_s2 = inlined_call_operand.vmem [shape: f32[432,512], index: 2, kind: input, shape index: {}]   ;;  %s3282_s3 = inlined_call_operand.vmem [shape: f32[16,432], index: 3, kind: input, shape index: {}]   ;;  %s3283_s4 = inlined_call_operand.vmem [shape: f32[16,1], index: 4, kind: input, shape index: {}]   ;;  %s3284_s5 = inlined_call_operand.vmem [shape: f32[16,512], index: 5, kind: output, shape index: {}]  }
   0x1   :  { %s2046_s20 = smov 0  }
   0x2 LB: > { %s1931_s21 = sadd.s32 4294967295, %s2009_s20   ;;  %s2059_s22 = sadd.s32 1, %s2009_s20   ;;  %s2009_s20 = sphi %s2046_s20, %s3289_s20   ;;  %s2005_s19 = sphi %s2044_s19, %s3288_s19   ;;  %s2001_s18 = sphi %s2042_s18, %s3287_s18  }
   0x3   : > { %s19_s23 = ssub.s32 %s2009_s20, %s2059_s22  ;;  %s22_s24 = sadd.s32 1, %s2005_s19 }
   0x4   : > { %p20_p0 = scmp.eq.s32.totalorder %s19_s23, 0  ;;  %p29_p1 = scmp.ne.s32.totalorder %s2005_s19, %s2001_s18 }
   0x5   : > { %p30_p2 = scmp.eq.s32.totalorder %s2009_s20, 0  ;;  %p148_p3 = scmp.eq.s32.totalorder %s1931_s21, 1 }
   0x6   : > { %s2070_s25 = scalar_select %p20_p0, %s2005_s19, %s22_s24  }
   0x7   : > { %p2072_p4 = por %p30_p2, %p29_p1  ;;  %p2076_p5 = por %p148_p3, %p29_p1 }
   0x8   : > { %p1934_p6 = scmp.ge.s32.totalorder %s2009_s20, 2 }
   0xa   : > { %179 = sbr.rel (%p1934_p6) target bundleno = 347 (0x15b), region = 28 }
   0xf   : > { %182 = sbr.rel (!%p2072_p4) target bundleno = 235 (0xeb), region = 32  ;;  %s184_s28 = sand.u32 (%p2072_p4), 1, %s2005_s19  }
  0x10   : > { %s1954_s29 = sshll.u32 (%p2072_p4), %s2009_s20, 4  ;;  %s1957_s30 = smul.u32 (%p2072_p4), 1728, %s184_s28 }
  0x11   : > { %s2088_s8 = scalar_lea.vmem (%p2072_p4), %s3279_s0, %s1954_s29 }
  0x12   : > { %v202_v0 = vld [vmem:[%s2088_s8] sm:$0xff] (%p2072_p4)  ;;  %v204_v1 = vld [vmem:[%s2088_s8 + $0x8] sm:$0xff] (%p2072_p4)  ;;  %s2093_s9 = scalar_lea.vmem (%p2072_p4), [#allocation2], %s1957_s30 }
  0x13   : > { %v206_v2 = vld [vmem:[%s2088_s8 + $0x20] sm:$0xff] (%p2072_p4)  ;;  %203 = vst [vmem:[%s2093_s9] sm:$0xff] (%p2072_p4), %v202_v0  ;;  %v208_v3 = vld [vmem:[%s2088_s8 + $0x28] sm:$0xff] (%p2072_p4) }
  0x14   : > { %205 = vst [vmem:[%s2093_s9 + $0x8] sm:$0xff] %v204_v1  ;;  %v210_v4 = vld [vmem:[%s2088_s8 + $0x40] sm:$0xff]  ;;  %v212_v5 = vld [vmem:[%s2088_s8 + $0x48] sm:$0xff] }
  0x15   : > { %207 = vst [vmem:[%s2093_s9 + $0x10] sm:$0xff] %v206_v2  ;;  %v214_v6 = vld [vmem:[%s2088_s8 + $0x60] sm:$0xff]  ;;  %v216_v7 = vld [vmem:[%s2088_s8 + $0x68] sm:$0xff] }
  0x16   : > { %209 = vst [vmem:[%s2093_s9 + $0x18] sm:$0xff] %v208_v3  ;;  %v218_v8 = vld [vmem:[%s2088_s8 + $0x80] sm:$0xff]  ;;  %v220_v9 = vld [vmem:[%s2088_s8 + $0x88] sm:$0xff] }
  0x17   : > { %211 = vst [vmem:[%s2093_s9 + $0x20] sm:$0xff] %v210_v4  ;;  %v222_v10 = vld [vmem:[%s2088_s8 + $0xa0] sm:$0xff]  ;;  %v224_v11 = vld [vmem:[%s2088_s8 + $0xa8] sm:$0xff] }
  0x18   : > { %213 = vst [vmem:[%s2093_s9 + $0x28] sm:$0xff] %v212_v5  ;;  %v226_v12 = vld [vmem:[%s2088_s8 + $0xc0] sm:$0xff]  ;;  %v228_v13 = vld [vmem:[%s2088_s8 + $0xc8] sm:$0xff] }
  0x19   : > { %215 = vst [vmem:[%s2093_s9 + $0x30] sm:$0xff] %v214_v6  ;;  %v230_v14 = vld [vmem:[%s2088_s8 + $0xe0] sm:$0xff]  ;;  %v232_v15 = vld [vmem:[%s2088_s8 + $0xe8] sm:$0xff] }
  0x1a   : > { %217 = vst [vmem:[%s2093_s9 + $0x38] sm:$0xff] %v216_v7  ;;  %v234_v16 = vld [vmem:[%s2088_s8 + $0x100] sm:$0xff]  ;;  %v236_v17 = vld [vmem:[%s2088_s8 + $0x108] sm:$0xff] }
  0x1b   : > { %219 = vst [vmem:[%s2093_s9 + $0x40] sm:$0xff] %v218_v8  ;;  %v238_v18 = vld [vmem:[%s2088_s8 + $0x120] sm:$0xff]  ;;  %v240_v19 = vld [vmem:[%s2088_s8 + $0x128] sm:$0xff] }
  0x1c   : > { %221 = vst [vmem:[%s2093_s9 + $0x48] sm:$0xff] %v220_v9  ;;  %v242_v20 = vld [vmem:[%s2088_s8 + $0x140] sm:$0xff]  ;;  %v244_v21 = vld [vmem:[%s2088_s8 + $0x148] sm:$0xff] }
  0x1d   : > { %223 = vst [vmem:[%s2093_s9 + $0x50] sm:$0xff] %v222_v10  ;;  %v246_v22 = vld [vmem:[%s2088_s8 + $0x160] sm:$0xff]  ;;  %v248_v23 = vld [vmem:[%s2088_s8 + $0x168] sm:$0xff] }
  0x1e   : > { %225 = vst [vmem:[%s2093_s9 + $0x58] sm:$0xff] %v224_v11  ;;  %v250_v24 = vld [vmem:[%s2088_s8 + $0x180] sm:$0xff]  ;;  %v252_v25 = vld [vmem:[%s2088_s8 + $0x188] sm:$0xff] }
  0x1f   : > { %227 = vst [vmem:[%s2093_s9 + $0x60] sm:$0xff] %v226_v12  ;;  %v254_v26 = vld [vmem:[%s2088_s8 + $0x1a0] sm:$0xff]  ;;  %v256_v27 = vld [vmem:[%s2088_s8 + $0x1a8] sm:$0xff] }
  0x20   : > { %229 = vst [vmem:[%s2093_s9 + $0x68] sm:$0xff] %v228_v13  ;;  %v258_v28 = vld [vmem:[%s2088_s8 + $0x1c0] sm:$0xff]  ;;  %v260_v29 = vld [vmem:[%s2088_s8 + $0x1c8] sm:$0xff] }
  0x21   : > { %231 = vst [vmem:[%s2093_s9 + $0x70] sm:$0xff] %v230_v14  ;;  %v262_v30 = vld [vmem:[%s2088_s8 + $0x1e0] sm:$0xff]  ;;  %v264_v31 = vld [vmem:[%s2088_s8 + $0x1e8] sm:$0xff] }
  0x22   : > { %233 = vst [vmem:[%s2093_s9 + $0x78] sm:$0xff] %v232_v15  ;;  %v266_v32 = vld [vmem:[%s2088_s8 + $0x200] sm:$0xff]  ;;  %v268_v33 = vld [vmem:[%s2088_s8 + $0x208] sm:$0xff] }
  0x23   : > { %235 = vst [vmem:[%s2093_s9 + $0x80] sm:$0xff] %v234_v16  ;;  %v270_v34 = vld [vmem:[%s2088_s8 + $0x220] sm:$0xff]  ;;  %v272_v35 = vld [vmem:[%s2088_s8 + $0x228] sm:$0xff] }
  0x24   : > { %237 = vst [vmem:[%s2093_s9 + $0x88] sm:$0xff] %v236_v17  ;;  %v274_v36 = vld [vmem:[%s2088_s8 + $0x240] sm:$0xff]  ;;  %v276_v37 = vld [vmem:[%s2088_s8 + $0x248] sm:$0xff] }
  0x25   : > { %239 = vst [vmem:[%s2093_s9 + $0x90] sm:$0xff] %v238_v18  ;;  %v278_v38 = vld [vmem:[%s2088_s8 + $0x260] sm:$0xff]  ;;  %v280_v39 = vld [vmem:[%s2088_s8 + $0x268] sm:$0xff] }
  0x26   : > { %241 = vst [vmem:[%s2093_s9 + $0x98] sm:$0xff] %v240_v19  ;;  %v282_v40 = vld [vmem:[%s2088_s8 + $0x280] sm:$0xff]  ;;  %v284_v41 = vld [vmem:[%s2088_s8 + $0x288] sm:$0xff] }
  0x27   : > { %243 = vst [vmem:[%s2093_s9 + $0xa0] sm:$0xff] %v242_v20  ;;  %v286_v42 = vld [vmem:[%s2088_s8 + $0x2a0] sm:$0xff]  ;;  %v288_v43 = vld [vmem:[%s2088_s8 + $0x2a8] sm:$0xff] }
  0x28   : > { %245 = vst [vmem:[%s2093_s9 + $0xa8] sm:$0xff] %v244_v21  ;;  %v290_v44 = vld [vmem:[%s2088_s8 + $0x2c0] sm:$0xff]  ;;  %v292_v45 = vld [vmem:[%s2088_s8 + $0x2c8] sm:$0xff] }
  0x29   : > { %247 = vst [vmem:[%s2093_s9 + $0xb0] sm:$0xff] %v246_v22  ;;  %v294_v46 = vld [vmem:[%s2088_s8 + $0x2e0] sm:$0xff]  ;;  %v296_v47 = vld [vmem:[%s2088_s8 + $0x2e8] sm:$0xff] }
  0x2a   : > { %249 = vst [vmem:[%s2093_s9 + $0xb8] sm:$0xff] %v248_v23  ;;  %v298_v48 = vld [vmem:[%s2088_s8 + $0x300] sm:$0xff]  ;;  %v300_v49 = vld [vmem:[%s2088_s8 + $0x308] sm:$0xff] }
  0x2b   : > { %251 = vst [vmem:[%s2093_s9 + $0xc0] sm:$0xff] %v250_v24  ;;  %v302_v50 = vld [vmem:[%s2088_s8 + $0x320] sm:$0xff]  ;;  %v304_v51 = vld [vmem:[%s2088_s8 + $0x328] sm:$0xff] }
  0x2c   : > { %253 = vst [vmem:[%s2093_s9 + $0xc8] sm:$0xff] %v252_v25  ;;  %v306_v52 = vld [vmem:[%s2088_s8 + $0x340] sm:$0xff]  ;;  %v308_v53 = vld [vmem:[%s2088_s8 + $0x348] sm:$0xff] }
  0x2d   : > { %255 = vst [vmem:[%s2093_s9 + $0xd0] sm:$0xff] %v254_v26  ;;  %v310_v54 = vld [vmem:[%s2088_s8 + $0x360] sm:$0xff]  ;;  %v312_v55 = vld [vmem:[%s2088_s8 + $0x368] sm:$0xff] }
  0x2e   : > { %257 = vst [vmem:[%s2093_s9 + $0xd8] sm:$0xff] %v256_v27  ;;  %v314_v56 = vld [vmem:[%s2088_s8 + $0x380] sm:$0xff]  ;;  %v316_v57 = vld [vmem:[%s2088_s8 + $0x388] sm:$0xff] }
  0x2f   : > { %259 = vst [vmem:[%s2093_s9 + $0xe0] sm:$0xff] %v258_v28  ;;  %v318_v58 = vld [vmem:[%s2088_s8 + $0x3a0] sm:$0xff]  ;;  %v320_v59 = vld [vmem:[%s2088_s8 + $0x3a8] sm:$0xff] }
  0x30   : > { %261 = vst [vmem:[%s2093_s9 + $0xe8] sm:$0xff] %v260_v29  ;;  %v322_v60 = vld [vmem:[%s2088_s8 + $0x3c0] sm:$0xff]  ;;  %v324_v61 = vld [vmem:[%s2088_s8 + $0x3c8] sm:$0xff] }
  0x31   : > { %263 = vst [vmem:[%s2093_s9 + $0xf0] sm:$0xff] %v262_v30  ;;  %v326_v62 = vld [vmem:[%s2088_s8 + $0x3e0] sm:$0xff]  ;;  %v328_v63 = vld [vmem:[%s2088_s8 + $0x3e8] sm:$0xff] }
  0x32   : > { %265 = vst [vmem:[%s2093_s9 + $0xf8] sm:$0xff] %v264_v31  ;;  %v330_v0 = vld [vmem:[%s2088_s8 + $0x400] sm:$0xff]  ;;  %v332_v1 = vld [vmem:[%s2088_s8 + $0x408] sm:$0xff] }
  0x33   : > { %267 = vst [vmem:[%s2093_s9 + $0x100] sm:$0xff] %v266_v32  ;;  %v334_v2 = vld [vmem:[%s2088_s8 + $0x420] sm:$0xff]  ;;  %v336_v3 = vld [vmem:[%s2088_s8 + $0x428] sm:$0xff] }
  0x34   : > { %269 = vst [vmem:[%s2093_s9 + $0x108] sm:$0xff] %v268_v33  ;;  %v338_v4 = vld [vmem:[%s2088_s8 + $0x440] sm:$0xff]  ;;  %v340_v5 = vld [vmem:[%s2088_s8 + $0x448] sm:$0xff] }
  0x35   : > { %271 = vst [vmem:[%s2093_s9 + $0x110] sm:$0xff] %v270_v34  ;;  %v342_v6 = vld [vmem:[%s2088_s8 + $0x460] sm:$0xff]  ;;  %v344_v7 = vld [vmem:[%s2088_s8 + $0x468] sm:$0xff] }
  0x36   : > { %273 = vst [vmem:[%s2093_s9 + $0x118] sm:$0xff] %v272_v35  ;;  %v346_v8 = vld [vmem:[%s2088_s8 + $0x480] sm:$0xff]  ;;  %v348_v9 = vld [vmem:[%s2088_s8 + $0x488] sm:$0xff] }
  0x37   : > { %275 = vst [vmem:[%s2093_s9 + $0x120] sm:$0xff] %v274_v36  ;;  %v350_v10 = vld [vmem:[%s2088_s8 + $0x4a0] sm:$0xff]  ;;  %v352_v11 = vld [vmem:[%s2088_s8 + $0x4a8] sm:$0xff] }
  0x38   : > { %277 = vst [vmem:[%s2093_s9 + $0x128] sm:$0xff] %v276_v37  ;;  %v354_v12 = vld [vmem:[%s2088_s8 + $0x4c0] sm:$0xff]  ;;  %v356_v13 = vld [vmem:[%s2088_s8 + $0x4c8] sm:$0xff] }
  0x39   : > { %279 = vst [vmem:[%s2093_s9 + $0x130] sm:$0xff] %v278_v38  ;;  %v358_v14 = vld [vmem:[%s2088_s8 + $0x4e0] sm:$0xff]  ;;  %v360_v15 = vld [vmem:[%s2088_s8 + $0x4e8] sm:$0xff] }
  0x3a   : > { %281 = vst [vmem:[%s2093_s9 + $0x138] sm:$0xff] %v280_v39  ;;  %v362_v16 = vld [vmem:[%s2088_s8 + $0x500] sm:$0xff]  ;;  %v364_v17 = vld [vmem:[%s2088_s8 + $0x508] sm:$0xff] }
  0x3b   : > { %283 = vst [vmem:[%s2093_s9 + $0x140] sm:$0xff] %v282_v40  ;;  %v366_v18 = vld [vmem:[%s2088_s8 + $0x520] sm:$0xff]  ;;  %v368_v19 = vld [vmem:[%s2088_s8 + $0x528] sm:$0xff] }
  0x3c   : > { %285 = vst [vmem:[%s2093_s9 + $0x148] sm:$0xff] %v284_v41  ;;  %v370_v20 = vld [vmem:[%s2088_s8 + $0x540] sm:$0xff]  ;;  %v372_v21 = vld [vmem:[%s2088_s8 + $0x548] sm:$0xff] }
  0x3d   : > { %287 = vst [vmem:[%s2093_s9 + $0x150] sm:$0xff] %v286_v42  ;;  %v374_v22 = vld [vmem:[%s2088_s8 + $0x560] sm:$0xff]  ;;  %v376_v23 = vld [vmem:[%s2088_s8 + $0x568] sm:$0xff] }
  0x3e   : > { %289 = vst [vmem:[%s2093_s9 + $0x158] sm:$0xff] %v288_v43  ;;  %v378_v24 = vld [vmem:[%s2088_s8 + $0x580] sm:$0xff]  ;;  %v380_v25 = vld [vmem:[%s2088_s8 + $0x588] sm:$0xff] }
  0x3f   : > { %291 = vst [vmem:[%s2093_s9 + $0x160] sm:$0xff] %v290_v44  ;;  %v382_v26 = vld [vmem:[%s2088_s8 + $0x5a0] sm:$0xff]  ;;  %v384_v27 = vld [vmem:[%s2088_s8 + $0x5a8] sm:$0xff] }
  0x40   : > { %293 = vst [vmem:[%s2093_s9 + $0x168] sm:$0xff] %v292_v45  ;;  %v386_v28 = vld [vmem:[%s2088_s8 + $0x5c0] sm:$0xff]  ;;  %v388_v29 = vld [vmem:[%s2088_s8 + $0x5c8] sm:$0xff] }
  0x41   : > { %295 = vst [vmem:[%s2093_s9 + $0x170] sm:$0xff] %v294_v46  ;;  %v390_v30 = vld [vmem:[%s2088_s8 + $0x5e0] sm:$0xff]  ;;  %v392_v31 = vld [vmem:[%s2088_s8 + $0x5e8] sm:$0xff] }
  0x42   : > { %297 = vst [vmem:[%s2093_s9 + $0x178] sm:$0xff] %v296_v47  ;;  %v394_v32 = vld [vmem:[%s2088_s8 + $0x600] sm:$0xff]  ;;  %v396_v33 = vld [vmem:[%s2088_s8 + $0x608] sm:$0xff] }
  0x43   : > { %299 = vst [vmem:[%s2093_s9 + $0x180] sm:$0xff] %v298_v48  ;;  %v398_v34 = vld [vmem:[%s2088_s8 + $0x620] sm:$0xff]  ;;  %v400_v35 = vld [vmem:[%s2088_s8 + $0x628] sm:$0xff] }
  0x44   : > { %301 = vst [vmem:[%s2093_s9 + $0x188] sm:$0xff] %v300_v49  ;;  %v402_v36 = vld [vmem:[%s2088_s8 + $0x640] sm:$0xff]  ;;  %v404_v37 = vld [vmem:[%s2088_s8 + $0x648] sm:$0xff] }
  0x45   : > { %303 = vst [vmem:[%s2093_s9 + $0x190] sm:$0xff] %v302_v50  ;;  %v406_v38 = vld [vmem:[%s2088_s8 + $0x660] sm:$0xff]  ;;  %v408_v39 = vld [vmem:[%s2088_s8 + $0x668] sm:$0xff] }
  0x46   : > { %305 = vst [vmem:[%s2093_s9 + $0x198] sm:$0xff] %v304_v51  ;;  %v410_v40 = vld [vmem:[%s2088_s8 + $0x680] sm:$0xff]  ;;  %v412_v41 = vld [vmem:[%s2088_s8 + $0x688] sm:$0xff] }
  0x47   : > { %307 = vst [vmem:[%s2093_s9 + $0x1a0] sm:$0xff] %v306_v52  ;;  %v414_v42 = vld [vmem:[%s2088_s8 + $0x6a0] sm:$0xff]  ;;  %v416_v43 = vld [vmem:[%s2088_s8 + $0x6a8] sm:$0xff] }
  0x48   : > { %309 = vst [vmem:[%s2093_s9 + $0x1a8] sm:$0xff] %v308_v53  ;;  %v418_v44 = vld [vmem:[%s2088_s8 + $0x6c0] sm:$0xff]  ;;  %v420_v45 = vld [vmem:[%s2088_s8 + $0x6c8] sm:$0xff] }
  0x49   : > { %311 = vst [vmem:[%s2093_s9 + $0x1b0] sm:$0xff] %v310_v54  ;;  %v422_v46 = vld [vmem:[%s2088_s8 + $0x6e0] sm:$0xff]  ;;  %v424_v47 = vld [vmem:[%s2088_s8 + $0x6e8] sm:$0xff] }
  0x4a   : > { %313 = vst [vmem:[%s2093_s9 + $0x1b8] sm:$0xff] %v312_v55  ;;  %v426_v48 = vld [vmem:[%s2088_s8 + $0x700] sm:$0xff]  ;;  %v428_v49 = vld [vmem:[%s2088_s8 + $0x708] sm:$0xff] }
  0x4b   : > { %315 = vst [vmem:[%s2093_s9 + $0x1c0] sm:$0xff] %v314_v56  ;;  %v430_v50 = vld [vmem:[%s2088_s8 + $0x720] sm:$0xff]  ;;  %v432_v51 = vld [vmem:[%s2088_s8 + $0x728] sm:$0xff] }
  0x4c   : > { %317 = vst [vmem:[%s2093_s9 + $0x1c8] sm:$0xff] %v316_v57  ;;  %v434_v52 = vld [vmem:[%s2088_s8 + $0x740] sm:$0xff]  ;;  %v436_v53 = vld [vmem:[%s2088_s8 + $0x748] sm:$0xff] }
  0x4d   : > { %319 = vst [vmem:[%s2093_s9 + $0x1d0] sm:$0xff] %v318_v58  ;;  %v438_v54 = vld [vmem:[%s2088_s8 + $0x760] sm:$0xff]  ;;  %v440_v55 = vld [vmem:[%s2088_s8 + $0x768] sm:$0xff] }
  0x4e   : > { %321 = vst [vmem:[%s2093_s9 + $0x1d8] sm:$0xff] %v320_v59  ;;  %v442_v56 = vld [vmem:[%s2088_s8 + $0x780] sm:$0xff]  ;;  %v444_v57 = vld [vmem:[%s2088_s8 + $0x788] sm:$0xff] }
  0x4f   : > { %323 = vst [vmem:[%s2093_s9 + $0x1e0] sm:$0xff] %v322_v60  ;;  %v446_v58 = vld [vmem:[%s2088_s8 + $0x7a0] sm:$0xff]  ;;  %v448_v59 = vld [vmem:[%s2088_s8 + $0x7a8] sm:$0xff] }
  0x50   : > { %325 = vst [vmem:[%s2093_s9 + $0x1e8] sm:$0xff] %v324_v61  ;;  %v450_v60 = vld [vmem:[%s2088_s8 + $0x7c0] sm:$0xff]  ;;  %v452_v61 = vld [vmem:[%s2088_s8 + $0x7c8] sm:$0xff] }
  0x51   : > { %327 = vst [vmem:[%s2093_s9 + $0x1f0] sm:$0xff] %v326_v62  ;;  %v454_v62 = vld [vmem:[%s2088_s8 + $0x7e0] sm:$0xff] }
  0x52   : > { %329 = vst [vmem:[%s2093_s9 + $0x1f8] sm:$0xff] %v328_v63  ;;  %v456_v63 = vld [vmem:[%s2088_s8 + $0x7e8] sm:$0xff] }
  0x53   : > { %331 = vst [vmem:[%s2093_s9 + $0x200] sm:$0xff] %v330_v0  ;;  %v458_v0 = vld [vmem:[%s2088_s8 + $0x800] sm:$0xff] }
  0x54   : > { %333 = vst [vmem:[%s2093_s9 + $0x208] sm:$0xff] %v332_v1  ;;  %v460_v1 = vld [vmem:[%s2088_s8 + $0x808] sm:$0xff] }
  0x55   : > { %335 = vst [vmem:[%s2093_s9 + $0x210] sm:$0xff] %v334_v2  ;;  %v462_v2 = vld [vmem:[%s2088_s8 + $0x820] sm:$0xff] }
  0x56   : > { %337 = vst [vmem:[%s2093_s9 + $0x218] sm:$0xff] %v336_v3  ;;  %v464_v3 = vld [vmem:[%s2088_s8 + $0x828] sm:$0xff] }
  0x57   : > { %339 = vst [vmem:[%s2093_s9 + $0x220] sm:$0xff] %v338_v4  ;;  %v466_v4 = vld [vmem:[%s2088_s8 + $0x840] sm:$0xff] }
  0x58   : > { %341 = vst [vmem:[%s2093_s9 + $0x228] sm:$0xff] %v340_v5  ;;  %v468_v5 = vld [vmem:[%s2088_s8 + $0x848] sm:$0xff] }
  0x59   : > { %343 = vst [vmem:[%s2093_s9 + $0x230] sm:$0xff] %v342_v6  ;;  %v470_v6 = vld [vmem:[%s2088_s8 + $0x860] sm:$0xff] }
  0x5a   : > { %345 = vst [vmem:[%s2093_s9 + $0x238] sm:$0xff] %v344_v7  ;;  %v472_v7 = vld [vmem:[%s2088_s8 + $0x868] sm:$0xff] }
  0x5b   : > { %347 = vst [vmem:[%s2093_s9 + $0x240] sm:$0xff] %v346_v8  ;;  %v474_v8 = vld [vmem:[%s2088_s8 + $0x880] sm:$0xff] }
  0x5c   : > { %349 = vst [vmem:[%s2093_s9 + $0x248] sm:$0xff] %v348_v9  ;;  %v476_v9 = vld [vmem:[%s2088_s8 + $0x888] sm:$0xff] }
  0x5d   : > { %351 = vst [vmem:[%s2093_s9 + $0x250] sm:$0xff] %v350_v10  ;;  %v478_v10 = vld [vmem:[%s2088_s8 + $0x8a0] sm:$0xff] }
  0x5e   : > { %353 = vst [vmem:[%s2093_s9 + $0x258] sm:$0xff] %v352_v11  ;;  %v480_v11 = vld [vmem:[%s2088_s8 + $0x8a8] sm:$0xff] }
  0x5f   : > { %355 = vst [vmem:[%s2093_s9 + $0x260] sm:$0xff] %v354_v12  ;;  %v482_v12 = vld [vmem:[%s2088_s8 + $0x8c0] sm:$0xff] }
  0x60   : > { %357 = vst [vmem:[%s2093_s9 + $0x268] sm:$0xff] %v356_v13  ;;  %v484_v13 = vld [vmem:[%s2088_s8 + $0x8c8] sm:$0xff] }
  0x61   : > { %359 = vst [vmem:[%s2093_s9 + $0x270] sm:$0xff] %v358_v14  ;;  %v486_v14 = vld [vmem:[%s2088_s8 + $0x8e0] sm:$0xff] }
  0x62   : > { %361 = vst [vmem:[%s2093_s9 + $0x278] sm:$0xff] %v360_v15  ;;  %v488_v15 = vld [vmem:[%s2088_s8 + $0x8e8] sm:$0xff] }
  0x63   : > { %363 = vst [vmem:[%s2093_s9 + $0x280] sm:$0xff] %v362_v16  ;;  %v490_v16 = vld [vmem:[%s2088_s8 + $0x900] sm:$0xff] }
  0x64   : > { %365 = vst [vmem:[%s2093_s9 + $0x288] sm:$0xff] %v364_v17  ;;  %v492_v17 = vld [vmem:[%s2088_s8 + $0x908] sm:$0xff] }
  0x65   : > { %367 = vst [vmem:[%s2093_s9 + $0x290] sm:$0xff] %v366_v18  ;;  %v494_v18 = vld [vmem:[%s2088_s8 + $0x920] sm:$0xff] }
  0x66   : > { %369 = vst [vmem:[%s2093_s9 + $0x298] sm:$0xff] %v368_v19  ;;  %v496_v19 = vld [vmem:[%s2088_s8 + $0x928] sm:$0xff] }
  0x67   : > { %371 = vst [vmem:[%s2093_s9 + $0x2a0] sm:$0xff] %v370_v20  ;;  %v498_v20 = vld [vmem:[%s2088_s8 + $0x940] sm:$0xff] }
  0x68   : > { %373 = vst [vmem:[%s2093_s9 + $0x2a8] sm:$0xff] %v372_v21  ;;  %v500_v21 = vld [vmem:[%s2088_s8 + $0x948] sm:$0xff] }
  0x69   : > { %375 = vst [vmem:[%s2093_s9 + $0x2b0] sm:$0xff] %v374_v22  ;;  %v502_v22 = vld [vmem:[%s2088_s8 + $0x960] sm:$0xff] }
  0x6a   : > { %377 = vst [vmem:[%s2093_s9 + $0x2b8] sm:$0xff] %v376_v23  ;;  %v504_v23 = vld [vmem:[%s2088_s8 + $0x968] sm:$0xff] }
  0x6b   : > { %379 = vst [vmem:[%s2093_s9 + $0x2c0] sm:$0xff] %v378_v24  ;;  %v506_v24 = vld [vmem:[%s2088_s8 + $0x980] sm:$0xff] }
  0x6c   : > { %381 = vst [vmem:[%s2093_s9 + $0x2c8] sm:$0xff] %v380_v25  ;;  %v508_v25 = vld [vmem:[%s2088_s8 + $0x988] sm:$0xff] }
  0x6d   : > { %383 = vst [vmem:[%s2093_s9 + $0x2d0] sm:$0xff] %v382_v26  ;;  %v510_v26 = vld [vmem:[%s2088_s8 + $0x9a0] sm:$0xff] }
  0x6e   : > { %385 = vst [vmem:[%s2093_s9 + $0x2d8] sm:$0xff] %v384_v27  ;;  %v512_v27 = vld [vmem:[%s2088_s8 + $0x9a8] sm:$0xff] }
  0x6f   : > { %387 = vst [vmem:[%s2093_s9 + $0x2e0] sm:$0xff] %v386_v28  ;;  %v514_v28 = vld [vmem:[%s2088_s8 + $0x9c0] sm:$0xff] }
  0x70   : > { %389 = vst [vmem:[%s2093_s9 + $0x2e8] sm:$0xff] %v388_v29  ;;  %v516_v29 = vld [vmem:[%s2088_s8 + $0x9c8] sm:$0xff] }
  0x71   : > { %391 = vst [vmem:[%s2093_s9 + $0x2f0] sm:$0xff] %v390_v30  ;;  %v518_v30 = vld [vmem:[%s2088_s8 + $0x9e0] sm:$0xff] }
  0x72   : > { %393 = vst [vmem:[%s2093_s9 + $0x2f8] sm:$0xff] %v392_v31  ;;  %v520_v31 = vld [vmem:[%s2088_s8 + $0x9e8] sm:$0xff] }
  0x73   : > { %395 = vst [vmem:[%s2093_s9 + $0x300] sm:$0xff] %v394_v32  ;;  %v522_v32 = vld [vmem:[%s2088_s8 + $0xa00] sm:$0xff] }
  0x74   : > { %397 = vst [vmem:[%s2093_s9 + $0x308] sm:$0xff] %v396_v33  ;;  %v524_v33 = vld [vmem:[%s2088_s8 + $0xa08] sm:$0xff] }
  0x75   : > { %399 = vst [vmem:[%s2093_s9 + $0x310] sm:$0xff] %v398_v34  ;;  %v526_v34 = vld [vmem:[%s2088_s8 + $0xa20] sm:$0xff] }
  0x76   : > { %401 = vst [vmem:[%s2093_s9 + $0x318] sm:$0xff] %v400_v35  ;;  %v528_v35 = vld [vmem:[%s2088_s8 + $0xa28] sm:$0xff] }
  0x77   : > { %403 = vst [vmem:[%s2093_s9 + $0x320] sm:$0xff] %v402_v36  ;;  %v530_v36 = vld [vmem:[%s2088_s8 + $0xa40] sm:$0xff] }
  0x78   : > { %405 = vst [vmem:[%s2093_s9 + $0x328] sm:$0xff] %v404_v37  ;;  %v532_v37 = vld [vmem:[%s2088_s8 + $0xa48] sm:$0xff] }
  0x79   : > { %407 = vst [vmem:[%s2093_s9 + $0x330] sm:$0xff] %v406_v38  ;;  %v534_v38 = vld [vmem:[%s2088_s8 + $0xa60] sm:$0xff] }
  0x7a   : > { %409 = vst [vmem:[%s2093_s9 + $0x338] sm:$0xff] %v408_v39  ;;  %v536_v39 = vld [vmem:[%s2088_s8 + $0xa68] sm:$0xff] }
  0x7b   : > { %411 = vst [vmem:[%s2093_s9 + $0x340] sm:$0xff] %v410_v40  ;;  %v538_v40 = vld [vmem:[%s2088_s8 + $0xa80] sm:$0xff] }
  0x7c   : > { %413 = vst [vmem:[%s2093_s9 + $0x348] sm:$0xff] %v412_v41  ;;  %v540_v41 = vld [vmem:[%s2088_s8 + $0xa88] sm:$0xff] }
  0x7d   : > { %415 = vst [vmem:[%s2093_s9 + $0x350] sm:$0xff] %v414_v42  ;;  %v542_v42 = vld [vmem:[%s2088_s8 + $0xaa0] sm:$0xff] }
  0x7e   : > { %417 = vst [vmem:[%s2093_s9 + $0x358] sm:$0xff] %v416_v43  ;;  %v544_v43 = vld [vmem:[%s2088_s8 + $0xaa8] sm:$0xff] }
  0x7f   : > { %419 = vst [vmem:[%s2093_s9 + $0x360] sm:$0xff] %v418_v44  ;;  %v546_v44 = vld [vmem:[%s2088_s8 + $0xac0] sm:$0xff] }
  0x80   : > { %421 = vst [vmem:[%s2093_s9 + $0x368] sm:$0xff] %v420_v45  ;;  %v548_v45 = vld [vmem:[%s2088_s8 + $0xac8] sm:$0xff] }
  0x81   : > { %423 = vst [vmem:[%s2093_s9 + $0x370] sm:$0xff] %v422_v46  ;;  %v550_v46 = vld [vmem:[%s2088_s8 + $0xae0] sm:$0xff] }
  0x82   : > { %425 = vst [vmem:[%s2093_s9 + $0x378] sm:$0xff] %v424_v47  ;;  %v552_v47 = vld [vmem:[%s2088_s8 + $0xae8] sm:$0xff] }
  0x83   : > { %427 = vst [vmem:[%s2093_s9 + $0x380] sm:$0xff] %v426_v48  ;;  %v554_v48 = vld [vmem:[%s2088_s8 + $0xb00] sm:$0xff] }
  0x84   : > { %429 = vst [vmem:[%s2093_s9 + $0x388] sm:$0xff] %v428_v49  ;;  %v556_v49 = vld [vmem:[%s2088_s8 + $0xb08] sm:$0xff] }
  0x85   : > { %431 = vst [vmem:[%s2093_s9 + $0x390] sm:$0xff] %v430_v50  ;;  %v558_v50 = vld [vmem:[%s2088_s8 + $0xb20] sm:$0xff] }
  0x86   : > { %433 = vst [vmem:[%s2093_s9 + $0x398] sm:$0xff] %v432_v51  ;;  %v560_v51 = vld [vmem:[%s2088_s8 + $0xb28] sm:$0xff] }
  0x87   : > { %435 = vst [vmem:[%s2093_s9 + $0x3a0] sm:$0xff] %v434_v52  ;;  %v562_v52 = vld [vmem:[%s2088_s8 + $0xb40] sm:$0xff] }
  0x88   : > { %437 = vst [vmem:[%s2093_s9 + $0x3a8] sm:$0xff] %v436_v53  ;;  %v564_v53 = vld [vmem:[%s2088_s8 + $0xb48] sm:$0xff] }
  0x89   : > { %439 = vst [vmem:[%s2093_s9 + $0x3b0] sm:$0xff] %v438_v54  ;;  %v566_v54 = vld [vmem:[%s2088_s8 + $0xb60] sm:$0xff] }
  0x8a   : > { %441 = vst [vmem:[%s2093_s9 + $0x3b8] sm:$0xff] %v440_v55  ;;  %v568_v55 = vld [vmem:[%s2088_s8 + $0xb68] sm:$0xff] }
  0x8b   : > { %443 = vst [vmem:[%s2093_s9 + $0x3c0] sm:$0xff] %v442_v56  ;;  %v570_v56 = vld [vmem:[%s2088_s8 + $0xb80] sm:$0xff] }
  0x8c   : > { %445 = vst [vmem:[%s2093_s9 + $0x3c8] sm:$0xff] %v444_v57  ;;  %v572_v57 = vld [vmem:[%s2088_s8 + $0xb88] sm:$0xff] }
  0x8d   : > { %447 = vst [vmem:[%s2093_s9 + $0x3d0] sm:$0xff] %v446_v58  ;;  %v574_v58 = vld [vmem:[%s2088_s8 + $0xba0] sm:$0xff] }
  0x8e   : > { %449 = vst [vmem:[%s2093_s9 + $0x3d8] sm:$0xff] %v448_v59  ;;  %v576_v59 = vld [vmem:[%s2088_s8 + $0xba8] sm:$0xff] }
  0x8f   : > { %451 = vst [vmem:[%s2093_s9 + $0x3e0] sm:$0xff] %v450_v60  ;;  %v578_v60 = vld [vmem:[%s2088_s8 + $0xbc0] sm:$0xff] }
  0x90   : > { %453 = vst [vmem:[%s2093_s9 + $0x3e8] sm:$0xff] %v452_v61  ;;  %v580_v61 = vld [vmem:[%s2088_s8 + $0xbc8] sm:$0xff] }
  0x91   : > { %455 = vst [vmem:[%s2093_s9 + $0x3f0] sm:$0xff] %v454_v62  ;;  %v582_v62 = vld [vmem:[%s2088_s8 + $0xbe0] sm:$0xff] }
  0x92   : > { %457 = vst [vmem:[%s2093_s9 + $0x3f8] sm:$0xff] %v456_v63  ;;  %v584_v63 = vld [vmem:[%s2088_s8 + $0xbe8] sm:$0xff] }
  0x93   : > { %459 = vst [vmem:[%s2093_s9 + $0x400] sm:$0xff] %v458_v0  ;;  %v586_v0 = vld [vmem:[%s2088_s8 + $0xc00] sm:$0xff] }
  0x94   : > { %461 = vst [vmem:[%s2093_s9 + $0x408] sm:$0xff] %v460_v1  ;;  %v588_v1 = vld [vmem:[%s2088_s8 + $0xc08] sm:$0xff] }
  0x95   : > { %463 = vst [vmem:[%s2093_s9 + $0x410] sm:$0xff] %v462_v2  ;;  %v590_v2 = vld [vmem:[%s2088_s8 + $0xc20] sm:$0xff] }
  0x96   : > { %465 = vst [vmem:[%s2093_s9 + $0x418] sm:$0xff] %v464_v3  ;;  %v592_v3 = vld [vmem:[%s2088_s8 + $0xc28] sm:$0xff] }
  0x97   : > { %467 = vst [vmem:[%s2093_s9 + $0x420] sm:$0xff] %v466_v4  ;;  %v594_v4 = vld [vmem:[%s2088_s8 + $0xc40] sm:$0xff] }
  0x98   : > { %469 = vst [vmem:[%s2093_s9 + $0x428] sm:$0xff] %v468_v5  ;;  %v596_v5 = vld [vmem:[%s2088_s8 + $0xc48] sm:$0xff] }
  0x99   : > { %471 = vst [vmem:[%s2093_s9 + $0x430] sm:$0xff] %v470_v6  ;;  %v598_v6 = vld [vmem:[%s2088_s8 + $0xc60] sm:$0xff] }
  0x9a   : > { %473 = vst [vmem:[%s2093_s9 + $0x438] sm:$0xff] %v472_v7  ;;  %v600_v7 = vld [vmem:[%s2088_s8 + $0xc68] sm:$0xff] }
  0x9b   : > { %475 = vst [vmem:[%s2093_s9 + $0x440] sm:$0xff] %v474_v8  ;;  %v602_v8 = vld [vmem:[%s2088_s8 + $0xc80] sm:$0xff] }
  0x9c   : > { %477 = vst [vmem:[%s2093_s9 + $0x448] sm:$0xff] %v476_v9  ;;  %v604_v9 = vld [vmem:[%s2088_s8 + $0xc88] sm:$0xff] }
  0x9d   : > { %479 = vst [vmem:[%s2093_s9 + $0x450] sm:$0xff] %v478_v10  ;;  %v606_v10 = vld [vmem:[%s2088_s8 + $0xca0] sm:$0xff] }
  0x9e   : > { %481 = vst [vmem:[%s2093_s9 + $0x458] sm:$0xff] %v480_v11  ;;  %v608_v11 = vld [vmem:[%s2088_s8 + $0xca8] sm:$0xff] }
  0x9f   : > { %483 = vst [vmem:[%s2093_s9 + $0x460] sm:$0xff] %v482_v12  ;;  %v610_v12 = vld [vmem:[%s2088_s8 + $0xcc0] sm:$0xff] }
  0xa0   : > { %485 = vst [vmem:[%s2093_s9 + $0x468] sm:$0xff] %v484_v13  ;;  %v612_v13 = vld [vmem:[%s2088_s8 + $0xcc8] sm:$0xff] }
  0xa1   : > { %487 = vst [vmem:[%s2093_s9 + $0x470] sm:$0xff] %v486_v14  ;;  %v614_v14 = vld [vmem:[%s2088_s8 + $0xce0] sm:$0xff] }
  0xa2   : > { %489 = vst [vmem:[%s2093_s9 + $0x478] sm:$0xff] %v488_v15  ;;  %v616_v15 = vld [vmem:[%s2088_s8 + $0xce8] sm:$0xff] }
  0xa3   : > { %491 = vst [vmem:[%s2093_s9 + $0x480] sm:$0xff] %v490_v16  ;;  %v618_v16 = vld [vmem:[%s2088_s8 + $0xd00] sm:$0xff] }
  0xa4   : > { %493 = vst [vmem:[%s2093_s9 + $0x488] sm:$0xff] %v492_v17  ;;  %v620_v17 = vld [vmem:[%s2088_s8 + $0xd08] sm:$0xff] }
  0xa5   : > { %495 = vst [vmem:[%s2093_s9 + $0x490] sm:$0xff] %v494_v18  ;;  %v622_v18 = vld [vmem:[%s2088_s8 + $0xd20] sm:$0xff] }
  0xa6   : > { %497 = vst [vmem:[%s2093_s9 + $0x498] sm:$0xff] %v496_v19  ;;  %v624_v19 = vld [vmem:[%s2088_s8 + $0xd28] sm:$0xff] }
  0xa7   : > { %499 = vst [vmem:[%s2093_s9 + $0x4a0] sm:$0xff] %v498_v20  ;;  %v626_v20 = vld [vmem:[%s2088_s8 + $0xd40] sm:$0xff] }
  0xa8   : > { %501 = vst [vmem:[%s2093_s9 + $0x4a8] sm:$0xff] %v500_v21  ;;  %v628_v21 = vld [vmem:[%s2088_s8 + $0xd48] sm:$0xff] }
  0xa9   : > { %503 = vst [vmem:[%s2093_s9 + $0x4b0] sm:$0xff] %v502_v22  ;;  %v630_v22 = vld [vmem:[%s2088_s8 + $0xd60] sm:$0xff] }
  0xaa   : > { %505 = vst [vmem:[%s2093_s9 + $0x4b8] sm:$0xff] %v504_v23  ;;  %v632_v23 = vld [vmem:[%s2088_s8 + $0xd68] sm:$0xff] }
  0xab   : > { %507 = vst [vmem:[%s2093_s9 + $0x4c0] sm:$0xff] %v506_v24 }
  0xac   : > { %509 = vst [vmem:[%s2093_s9 + $0x4c8] sm:$0xff] %v508_v25 }
  0xad   : > { %511 = vst [vmem:[%s2093_s9 + $0x4d0] sm:$0xff] %v510_v26 }
  0xae   : > { %513 = vst [vmem:[%s2093_s9 + $0x4d8] sm:$0xff] %v512_v27 }
  0xaf   : > { %515 = vst [vmem:[%s2093_s9 + $0x4e0] sm:$0xff] %v514_v28 }
  0xb0   : > { %517 = vst [vmem:[%s2093_s9 + $0x4e8] sm:$0xff] %v516_v29 }
  0xb1   : > { %519 = vst [vmem:[%s2093_s9 + $0x4f0] sm:$0xff] %v518_v30 }
  0xb2   : > { %521 = vst [vmem:[%s2093_s9 + $0x4f8] sm:$0xff] %v520_v31 }
  0xb3   : > { %523 = vst [vmem:[%s2093_s9 + $0x500] sm:$0xff] %v522_v32 }
  0xb4   : > { %525 = vst [vmem:[%s2093_s9 + $0x508] sm:$0xff] %v524_v33 }
  0xb5   : > { %527 = vst [vmem:[%s2093_s9 + $0x510] sm:$0xff] %v526_v34 }
  0xb6   : > { %529 = vst [vmem:[%s2093_s9 + $0x518] sm:$0xff] %v528_v35 }
  0xb7   : > { %531 = vst [vmem:[%s2093_s9 + $0x520] sm:$0xff] %v530_v36 }
  0xb8   : > { %533 = vst [vmem:[%s2093_s9 + $0x528] sm:$0xff] %v532_v37 }
  0xb9   : > { %535 = vst [vmem:[%s2093_s9 + $0x530] sm:$0xff] %v534_v38 }
  0xba   : > { %537 = vst [vmem:[%s2093_s9 + $0x538] sm:$0xff] %v536_v39 }
  0xbb   : > { %539 = vst [vmem:[%s2093_s9 + $0x540] sm:$0xff] %v538_v40 }
  0xbc   : > { %541 = vst [vmem:[%s2093_s9 + $0x548] sm:$0xff] %v540_v41 }
  0xbd   : > { %543 = vst [vmem:[%s2093_s9 + $0x550] sm:$0xff] %v542_v42 }
  0xbe   : > { %545 = vst [vmem:[%s2093_s9 + $0x558] sm:$0xff] %v544_v43 }
  0xbf   : > { %547 = vst [vmem:[%s2093_s9 + $0x560] sm:$0xff] %v546_v44 }
  0xc0   : > { %549 = vst [vmem:[%s2093_s9 + $0x568] sm:$0xff] %v548_v45 }
  0xc1   : > { %551 = vst [vmem:[%s2093_s9 + $0x570] sm:$0xff] %v550_v46 }
  0xc2   : > { %553 = vst [vmem:[%s2093_s9 + $0x578] sm:$0xff] %v552_v47 }
  0xc3   : > { %555 = vst [vmem:[%s2093_s9 + $0x580] sm:$0xff] %v554_v48 }
  0xc4   : > { %557 = vst [vmem:[%s2093_s9 + $0x588] sm:$0xff] %v556_v49 }
  0xc5   : > { %559 = vst [vmem:[%s2093_s9 + $0x590] sm:$0xff] %v558_v50 }
  0xc6   : > { %561 = vst [vmem:[%s2093_s9 + $0x598] sm:$0xff] %v560_v51 }
  0xc7   : > { %563 = vst [vmem:[%s2093_s9 + $0x5a0] sm:$0xff] %v562_v52 }
  0xc8   : > { %565 = vst [vmem:[%s2093_s9 + $0x5a8] sm:$0xff] %v564_v53 }
  0xc9   : > { %567 = vst [vmem:[%s2093_s9 + $0x5b0] sm:$0xff] %v566_v54 }
  0xca   : > { %569 = vst [vmem:[%s2093_s9 + $0x5b8] sm:$0xff] %v568_v55 }
  0xcb   : > { %571 = vst [vmem:[%s2093_s9 + $0x5c0] sm:$0xff] %v570_v56 }
  0xcc   : > { %573 = vst [vmem:[%s2093_s9 + $0x5c8] sm:$0xff] %v572_v57 }
  0xcd   : > { %575 = vst [vmem:[%s2093_s9 + $0x5d0] sm:$0xff] %v574_v58 }
  0xce   : > { %577 = vst [vmem:[%s2093_s9 + $0x5d8] sm:$0xff] %v576_v59 }
  0xcf   : > { %579 = vst [vmem:[%s2093_s9 + $0x5e0] sm:$0xff] %v578_v60 }
  0xd0   : > { %581 = vst [vmem:[%s2093_s9 + $0x5e8] sm:$0xff] %v580_v61 }
  0xd1   : > { %583 = vst [vmem:[%s2093_s9 + $0x5f0] sm:$0xff] %v582_v62 }
  0xd2   : > { %585 = vst [vmem:[%s2093_s9 + $0x5f8] sm:$0xff] %v584_v63 }
  0xd3   : > { %587 = vst [vmem:[%s2093_s9 + $0x600] sm:$0xff] %v586_v0 }
  0xd4   : > { %589 = vst [vmem:[%s2093_s9 + $0x608] sm:$0xff] %v588_v1 }
  0xd5   : > { %591 = vst [vmem:[%s2093_s9 + $0x610] sm:$0xff] %v590_v2 }
  0xd6   : > { %593 = vst [vmem:[%s2093_s9 + $0x618] sm:$0xff] %v592_v3 }
  0xd7   : > { %595 = vst [vmem:[%s2093_s9 + $0x620] sm:$0xff] %v594_v4 }
  0xd8   : > { %597 = vst [vmem:[%s2093_s9 + $0x628] sm:$0xff] %v596_v5 }
  0xd9   : > { %599 = vst [vmem:[%s2093_s9 + $0x630] sm:$0xff] %v598_v6 }
  0xda   : > { %601 = vst [vmem:[%s2093_s9 + $0x638] sm:$0xff] %v600_v7 }
  0xdb   : > { %603 = vst [vmem:[%s2093_s9 + $0x640] sm:$0xff] %v602_v8 }
  0xdc   : > { %605 = vst [vmem:[%s2093_s9 + $0x648] sm:$0xff] %v604_v9 }
  0xdd   : > { %607 = vst [vmem:[%s2093_s9 + $0x650] sm:$0xff] %v606_v10 }
  0xde   : > { %609 = vst [vmem:[%s2093_s9 + $0x658] sm:$0xff] %v608_v11 }
  0xdf   : > { %611 = vst [vmem:[%s2093_s9 + $0x660] sm:$0xff] %v610_v12 }
  0xe0   : > { %613 = vst [vmem:[%s2093_s9 + $0x668] sm:$0xff] %v612_v13 }
  0xe1   : > { %615 = vst [vmem:[%s2093_s9 + $0x670] sm:$0xff] %v614_v14 }
  0xe2   : > { %617 = vst [vmem:[%s2093_s9 + $0x678] sm:$0xff] %v616_v15 }
  0xe3   : > { %619 = vst [vmem:[%s2093_s9 + $0x680] sm:$0xff] %v618_v16 }
  0xe4   : > { %621 = vst [vmem:[%s2093_s9 + $0x688] sm:$0xff] %v620_v17 }
  0xe5   : > { %623 = vst [vmem:[%s2093_s9 + $0x690] sm:$0xff] %v622_v18 }
  0xe6   : > { %625 = vst [vmem:[%s2093_s9 + $0x698] sm:$0xff] %v624_v19 }
  0xe7   : > { %627 = vst [vmem:[%s2093_s9 + $0x6a0] sm:$0xff] %v626_v20 }
  0xe8   : > { %629 = vst [vmem:[%s2093_s9 + $0x6a8] sm:$0xff] %v628_v21 }
  0xe9   : > { %631 = vst [vmem:[%s2093_s9 + $0x6b0] sm:$0xff] %v630_v22 }
  0xea   : > { %633 = vst [vmem:[%s2093_s9 + $0x6b8] sm:$0xff] %v632_v23 }
  0xeb PF: > { %639 = sbr.rel (!%p2072_p4) target bundleno = 347 (0x15b), region = 55  ;;  %s641_s10 = sand.u32 (%p2072_p4), 1, %s2005_s19  }
  0xec   : > { %s1955_s11 = sshll.u32 (%p2072_p4), %s2009_s20, 4  ;;  %s1958_s12 = smul.u32 (%p2072_p4), 864, %s641_s10 }
  0xed   : > { %s2531_s15 = scalar_lea.vmem (%p2072_p4), %s3281_s2, %s1955_s11 }
  0xee   : > { %v659_v24 = vld [vmem:[%s2531_s15] sm:$0xff] (%p2072_p4)  ;;  %v661_v25 = vld [vmem:[%s2531_s15 + $0x8] sm:$0xff] (%p2072_p4)  ;;  %s2536_s16 = scalar_lea.vmem (%p2072_p4), [#allocation3], %s1958_s12 }
  0xef   : > { %v663_v26 = vld [vmem:[%s2531_s15 + $0x20] sm:$0xff] (%p2072_p4)  ;;  %660 = vst [vmem:[%s2536_s16] sm:$0xff] (%p2072_p4), %v659_v24  ;;  %v665_v27 = vld [vmem:[%s2531_s15 + $0x28] sm:$0xff] (%p2072_p4) }
  0xf0   : > { %662 = vst [vmem:[%s2536_s16 + $0x8] sm:$0xff] %v661_v25  ;;  %v667_v28 = vld [vmem:[%s2531_s15 + $0x40] sm:$0xff]  ;;  %v669_v29 = vld [vmem:[%s2531_s15 + $0x48] sm:$0xff] }
  0xf1   : > { %664 = vst [vmem:[%s2536_s16 + $0x10] sm:$0xff] %v663_v26  ;;  %v671_v30 = vld [vmem:[%s2531_s15 + $0x60] sm:$0xff]  ;;  %v673_v31 = vld [vmem:[%s2531_s15 + $0x68] sm:$0xff] }
  0xf2   : > { %666 = vst [vmem:[%s2536_s16 + $0x18] sm:$0xff] %v665_v27  ;;  %v675_v32 = vld [vmem:[%s2531_s15 + $0x80] sm:$0xff]  ;;  %v677_v33 = vld [vmem:[%s2531_s15 + $0x88] sm:$0xff] }
  0xf3   : > { %668 = vst [vmem:[%s2536_s16 + $0x20] sm:$0xff] %v667_v28  ;;  %v679_v34 = vld [vmem:[%s2531_s15 + $0xa0] sm:$0xff]  ;;  %v681_v35 = vld [vmem:[%s2531_s15 + $0xa8] sm:$0xff] }
  0xf4   : > { %670 = vst [vmem:[%s2536_s16 + $0x28] sm:$0xff] %v669_v29  ;;  %v683_v36 = vld [vmem:[%s2531_s15 + $0xc0] sm:$0xff]  ;;  %v685_v37 = vld [vmem:[%s2531_s15 + $0xc8] sm:$0xff] }
  0xf5   : > { %672 = vst [vmem:[%s2536_s16 + $0x30] sm:$0xff] %v671_v30  ;;  %v687_v38 = vld [vmem:[%s2531_s15 + $0xe0] sm:$0xff]  ;;  %v689_v39 = vld [vmem:[%s2531_s15 + $0xe8] sm:$0xff] }
  0xf6   : > { %674 = vst [vmem:[%s2536_s16 + $0x38] sm:$0xff] %v673_v31  ;;  %v691_v40 = vld [vmem:[%s2531_s15 + $0x100] sm:$0xff]  ;;  %v693_v41 = vld [vmem:[%s2531_s15 + $0x108] sm:$0xff] }
  0xf7   : > { %676 = vst [vmem:[%s2536_s16 + $0x40] sm:$0xff] %v675_v32  ;;  %v695_v42 = vld [vmem:[%s2531_s15 + $0x120] sm:$0xff]  ;;  %v697_v43 = vld [vmem:[%s2531_s15 + $0x128] sm:$0xff] }
  0xf8   : > { %678 = vst [vmem:[%s2536_s16 + $0x48] sm:$0xff] %v677_v33  ;;  %v699_v44 = vld [vmem:[%s2531_s15 + $0x140] sm:$0xff]  ;;  %v701_v45 = vld [vmem:[%s2531_s15 + $0x148] sm:$0xff] }
  0xf9   : > { %680 = vst [vmem:[%s2536_s16 + $0x50] sm:$0xff] %v679_v34  ;;  %v703_v46 = vld [vmem:[%s2531_s15 + $0x160] sm:$0xff]  ;;  %v705_v47 = vld [vmem:[%s2531_s15 + $0x168] sm:$0xff] }
  0xfa   : > { %682 = vst [vmem:[%s2536_s16 + $0x58] sm:$0xff] %v681_v35  ;;  %v707_v48 = vld [vmem:[%s2531_s15 + $0x180] sm:$0xff]  ;;  %v709_v49 = vld [vmem:[%s2531_s15 + $0x188] sm:$0xff] }
  0xfb   : > { %684 = vst [vmem:[%s2536_s16 + $0x60] sm:$0xff] %v683_v36  ;;  %v711_v50 = vld [vmem:[%s2531_s15 + $0x1a0] sm:$0xff]  ;;  %v713_v51 = vld [vmem:[%s2531_s15 + $0x1a8] sm:$0xff] }
  0xfc   : > { %686 = vst [vmem:[%s2536_s16 + $0x68] sm:$0xff] %v685_v37  ;;  %v715_v52 = vld [vmem:[%s2531_s15 + $0x1c0] sm:$0xff]  ;;  %v717_v53 = vld [vmem:[%s2531_s15 + $0x1c8] sm:$0xff] }
  0xfd   : > { %688 = vst [vmem:[%s2536_s16 + $0x70] sm:$0xff] %v687_v38  ;;  %v719_v54 = vld [vmem:[%s2531_s15 + $0x1e0] sm:$0xff]  ;;  %v721_v55 = vld [vmem:[%s2531_s15 + $0x1e8] sm:$0xff] }
  0xfe   : > { %690 = vst [vmem:[%s2536_s16 + $0x78] sm:$0xff] %v689_v39  ;;  %v723_v56 = vld [vmem:[%s2531_s15 + $0x200] sm:$0xff]  ;;  %v725_v57 = vld [vmem:[%s2531_s15 + $0x208] sm:$0xff] }
  0xff   : > { %692 = vst [vmem:[%s2536_s16 + $0x80] sm:$0xff] %v691_v40  ;;  %v727_v58 = vld [vmem:[%s2531_s15 + $0x220] sm:$0xff]  ;;  %v729_v59 = vld [vmem:[%s2531_s15 + $0x228] sm:$0xff] }
 0x100   : > { %694 = vst [vmem:[%s2536_s16 + $0x88] sm:$0xff] %v693_v41  ;;  %v731_v60 = vld [vmem:[%s2531_s15 + $0x240] sm:$0xff]  ;;  %v733_v61 = vld [vmem:[%s2531_s15 + $0x248] sm:$0xff] }
 0x101   : > { %696 = vst [vmem:[%s2536_s16 + $0x90] sm:$0xff] %v695_v42  ;;  %v735_v62 = vld [vmem:[%s2531_s15 + $0x260] sm:$0xff]  ;;  %v737_v63 = vld [vmem:[%s2531_s15 + $0x268] sm:$0xff] }
 0x102   : > { %698 = vst [vmem:[%s2536_s16 + $0x98] sm:$0xff] %v697_v43  ;;  %v739_v0 = vld [vmem:[%s2531_s15 + $0x280] sm:$0xff]  ;;  %v741_v1 = vld [vmem:[%s2531_s15 + $0x288] sm:$0xff] }
 0x103   : > { %700 = vst [vmem:[%s2536_s16 + $0xa0] sm:$0xff] %v699_v44  ;;  %v743_v2 = vld [vmem:[%s2531_s15 + $0x2a0] sm:$0xff]  ;;  %v745_v3 = vld [vmem:[%s2531_s15 + $0x2a8] sm:$0xff] }
 0x104   : > { %702 = vst [vmem:[%s2536_s16 + $0xa8] sm:$0xff] %v701_v45  ;;  %v747_v4 = vld [vmem:[%s2531_s15 + $0x2c0] sm:$0xff]  ;;  %v749_v5 = vld [vmem:[%s2531_s15 + $0x2c8] sm:$0xff] }
 0x105   : > { %704 = vst [vmem:[%s2536_s16 + $0xb0] sm:$0xff] %v703_v46  ;;  %v751_v6 = vld [vmem:[%s2531_s15 + $0x2e0] sm:$0xff]  ;;  %v753_v7 = vld [vmem:[%s2531_s15 + $0x2e8] sm:$0xff] }
 0x106   : > { %706 = vst [vmem:[%s2536_s16 + $0xb8] sm:$0xff] %v705_v47  ;;  %v755_v8 = vld [vmem:[%s2531_s15 + $0x300] sm:$0xff]  ;;  %v757_v9 = vld [vmem:[%s2531_s15 + $0x308] sm:$0xff] }
 0x107   : > { %708 = vst [vmem:[%s2536_s16 + $0xc0] sm:$0xff] %v707_v48  ;;  %v759_v10 = vld [vmem:[%s2531_s15 + $0x320] sm:$0xff]  ;;  %v761_v11 = vld [vmem:[%s2531_s15 + $0x328] sm:$0xff] }
 0x108   : > { %710 = vst [vmem:[%s2536_s16 + $0xc8] sm:$0xff] %v709_v49  ;;  %v763_v12 = vld [vmem:[%s2531_s15 + $0x340] sm:$0xff]  ;;  %v765_v13 = vld [vmem:[%s2531_s15 + $0x348] sm:$0xff] }
 0x109   : > { %712 = vst [vmem:[%s2536_s16 + $0xd0] sm:$0xff] %v711_v50  ;;  %v767_v14 = vld [vmem:[%s2531_s15 + $0x360] sm:$0xff]  ;;  %v769_v15 = vld [vmem:[%s2531_s15 + $0x368] sm:$0xff] }
 0x10a   : > { %714 = vst [vmem:[%s2536_s16 + $0xd8] sm:$0xff] %v713_v51  ;;  %v771_v16 = vld [vmem:[%s2531_s15 + $0x380] sm:$0xff]  ;;  %v773_v17 = vld [vmem:[%s2531_s15 + $0x388] sm:$0xff] }
 0x10b   : > { %716 = vst [vmem:[%s2536_s16 + $0xe0] sm:$0xff] %v715_v52  ;;  %v775_v18 = vld [vmem:[%s2531_s15 + $0x3a0] sm:$0xff]  ;;  %v777_v19 = vld [vmem:[%s2531_s15 + $0x3a8] sm:$0xff] }
 0x10c   : > { %718 = vst [vmem:[%s2536_s16 + $0xe8] sm:$0xff] %v717_v53  ;;  %v779_v20 = vld [vmem:[%s2531_s15 + $0x3c0] sm:$0xff]  ;;  %v781_v21 = vld [vmem:[%s2531_s15 + $0x3c8] sm:$0xff] }
 0x10d   : > { %720 = vst [vmem:[%s2536_s16 + $0xf0] sm:$0xff] %v719_v54  ;;  %v783_v22 = vld [vmem:[%s2531_s15 + $0x3e0] sm:$0xff]  ;;  %v785_v23 = vld [vmem:[%s2531_s15 + $0x3e8] sm:$0xff] }
 0x10e   : > { %722 = vst [vmem:[%s2536_s16 + $0xf8] sm:$0xff] %v721_v55  ;;  %v787_v24 = vld [vmem:[%s2531_s15 + $0x400] sm:$0xff]  ;;  %v789_v25 = vld [vmem:[%s2531_s15 + $0x408] sm:$0xff] }
 0x10f   : > { %724 = vst [vmem:[%s2536_s16 + $0x100] sm:$0xff] %v723_v56  ;;  %v791_v26 = vld [vmem:[%s2531_s15 + $0x420] sm:$0xff]  ;;  %v793_v27 = vld [vmem:[%s2531_s15 + $0x428] sm:$0xff] }
 0x110   : > { %726 = vst [vmem:[%s2536_s16 + $0x108] sm:$0xff] %v725_v57  ;;  %v795_v28 = vld [vmem:[%s2531_s15 + $0x440] sm:$0xff]  ;;  %v797_v29 = vld [vmem:[%s2531_s15 + $0x448] sm:$0xff] }
 0x111   : > { %728 = vst [vmem:[%s2536_s16 + $0x110] sm:$0xff] %v727_v58  ;;  %v799_v30 = vld [vmem:[%s2531_s15 + $0x460] sm:$0xff]  ;;  %v801_v31 = vld [vmem:[%s2531_s15 + $0x468] sm:$0xff] }
 0x112   : > { %730 = vst [vmem:[%s2536_s16 + $0x118] sm:$0xff] %v729_v59  ;;  %v803_v32 = vld [vmem:[%s2531_s15 + $0x480] sm:$0xff]  ;;  %v805_v33 = vld [vmem:[%s2531_s15 + $0x488] sm:$0xff] }
 0x113   : > { %732 = vst [vmem:[%s2536_s16 + $0x120] sm:$0xff] %v731_v60  ;;  %v807_v34 = vld [vmem:[%s2531_s15 + $0x4a0] sm:$0xff]  ;;  %v809_v35 = vld [vmem:[%s2531_s15 + $0x4a8] sm:$0xff] }
 0x114   : > { %734 = vst [vmem:[%s2536_s16 + $0x128] sm:$0xff] %v733_v61  ;;  %v811_v36 = vld [vmem:[%s2531_s15 + $0x4c0] sm:$0xff]  ;;  %v813_v37 = vld [vmem:[%s2531_s15 + $0x4c8] sm:$0xff] }
 0x115   : > { %736 = vst [vmem:[%s2536_s16 + $0x130] sm:$0xff] %v735_v62  ;;  %v815_v38 = vld [vmem:[%s2531_s15 + $0x4e0] sm:$0xff]  ;;  %v817_v39 = vld [vmem:[%s2531_s15 + $0x4e8] sm:$0xff] }
 0x116   : > { %738 = vst [vmem:[%s2536_s16 + $0x138] sm:$0xff] %v737_v63  ;;  %v819_v40 = vld [vmem:[%s2531_s15 + $0x500] sm:$0xff]  ;;  %v821_v41 = vld [vmem:[%s2531_s15 + $0x508] sm:$0xff] }
 0x117   : > { %740 = vst [vmem:[%s2536_s16 + $0x140] sm:$0xff] %v739_v0  ;;  %v823_v42 = vld [vmem:[%s2531_s15 + $0x520] sm:$0xff]  ;;  %v825_v43 = vld [vmem:[%s2531_s15 + $0x528] sm:$0xff] }
 0x118   : > { %742 = vst [vmem:[%s2536_s16 + $0x148] sm:$0xff] %v741_v1  ;;  %v827_v44 = vld [vmem:[%s2531_s15 + $0x540] sm:$0xff]  ;;  %v829_v45 = vld [vmem:[%s2531_s15 + $0x548] sm:$0xff] }
 0x119   : > { %744 = vst [vmem:[%s2536_s16 + $0x150] sm:$0xff] %v743_v2  ;;  %v831_v46 = vld [vmem:[%s2531_s15 + $0x560] sm:$0xff]  ;;  %v833_v47 = vld [vmem:[%s2531_s15 + $0x568] sm:$0xff] }
 0x11a   : > { %746 = vst [vmem:[%s2536_s16 + $0x158] sm:$0xff] %v745_v3  ;;  %v835_v48 = vld [vmem:[%s2531_s15 + $0x580] sm:$0xff]  ;;  %v837_v49 = vld [vmem:[%s2531_s15 + $0x588] sm:$0xff] }
 0x11b   : > { %748 = vst [vmem:[%s2536_s16 + $0x160] sm:$0xff] %v747_v4  ;;  %v839_v50 = vld [vmem:[%s2531_s15 + $0x5a0] sm:$0xff]  ;;  %v841_v51 = vld [vmem:[%s2531_s15 + $0x5a8] sm:$0xff] }
 0x11c   : > { %750 = vst [vmem:[%s2536_s16 + $0x168] sm:$0xff] %v749_v5  ;;  %v843_v52 = vld [vmem:[%s2531_s15 + $0x5c0] sm:$0xff]  ;;  %v845_v53 = vld [vmem:[%s2531_s15 + $0x5c8] sm:$0xff] }
 0x11d   : > { %752 = vst [vmem:[%s2536_s16 + $0x170] sm:$0xff] %v751_v6  ;;  %v847_v54 = vld [vmem:[%s2531_s15 + $0x5e0] sm:$0xff]  ;;  %v849_v55 = vld [vmem:[%s2531_s15 + $0x5e8] sm:$0xff] }
 0x11e   : > { %754 = vst [vmem:[%s2536_s16 + $0x178] sm:$0xff] %v753_v7  ;;  %v851_v56 = vld [vmem:[%s2531_s15 + $0x600] sm:$0xff]  ;;  %v853_v57 = vld [vmem:[%s2531_s15 + $0x608] sm:$0xff] }
 0x11f   : > { %756 = vst [vmem:[%s2536_s16 + $0x180] sm:$0xff] %v755_v8  ;;  %v855_v58 = vld [vmem:[%s2531_s15 + $0x620] sm:$0xff]  ;;  %v857_v59 = vld [vmem:[%s2531_s15 + $0x628] sm:$0xff] }
 0x120   : > { %758 = vst [vmem:[%s2536_s16 + $0x188] sm:$0xff] %v757_v9  ;;  %v859_v60 = vld [vmem:[%s2531_s15 + $0x640] sm:$0xff]  ;;  %v861_v61 = vld [vmem:[%s2531_s15 + $0x648] sm:$0xff] }
 0x121   : > { %760 = vst [vmem:[%s2536_s16 + $0x190] sm:$0xff] %v759_v10  ;;  %v863_v62 = vld [vmem:[%s2531_s15 + $0x660] sm:$0xff]  ;;  %v865_v63 = vld [vmem:[%s2531_s15 + $0x668] sm:$0xff] }
 0x122   : > { %762 = vst [vmem:[%s2536_s16 + $0x198] sm:$0xff] %v761_v11  ;;  %v867_v0 = vld [vmem:[%s2531_s15 + $0x680] sm:$0xff]  ;;  %v869_v1 = vld [vmem:[%s2531_s15 + $0x688] sm:$0xff] }
 0x123   : > { %764 = vst [vmem:[%s2536_s16 + $0x1a0] sm:$0xff] %v763_v12  ;;  %v871_v2 = vld [vmem:[%s2531_s15 + $0x6a0] sm:$0xff]  ;;  %v873_v3 = vld [vmem:[%s2531_s15 + $0x6a8] sm:$0xff] }
 0x124   : > { %766 = vst [vmem:[%s2536_s16 + $0x1a8] sm:$0xff] %v765_v13 }
 0x125   : > { %768 = vst [vmem:[%s2536_s16 + $0x1b0] sm:$0xff] %v767_v14 }
 0x126   : > { %770 = vst [vmem:[%s2536_s16 + $0x1b8] sm:$0xff] %v769_v15 }
 0x127   : > { %772 = vst [vmem:[%s2536_s16 + $0x1c0] sm:$0xff] %v771_v16 }
 0x128   : > { %774 = vst [vmem:[%s2536_s16 + $0x1c8] sm:$0xff] %v773_v17 }
 0x129   : > { %776 = vst [vmem:[%s2536_s16 + $0x1d0] sm:$0xff] %v775_v18 }
 0x12a   : > { %778 = vst [vmem:[%s2536_s16 + $0x1d8] sm:$0xff] %v777_v19 }
 0x12b   : > { %780 = vst [vmem:[%s2536_s16 + $0x1e0] sm:$0xff] %v779_v20 }
 0x12c   : > { %782 = vst [vmem:[%s2536_s16 + $0x1e8] sm:$0xff] %v781_v21 }
 0x12d   : > { %784 = vst [vmem:[%s2536_s16 + $0x1f0] sm:$0xff] %v783_v22 }
 0x12e   : > { %786 = vst [vmem:[%s2536_s16 + $0x1f8] sm:$0xff] %v785_v23 }
 0x12f   : > { %788 = vst [vmem:[%s2536_s16 + $0x200] sm:$0xff] %v787_v24 }
 0x130   : > { %790 = vst [vmem:[%s2536_s16 + $0x208] sm:$0xff] %v789_v25 }
 0x131   : > { %792 = vst [vmem:[%s2536_s16 + $0x210] sm:$0xff] %v791_v26 }
 0x132   : > { %794 = vst [vmem:[%s2536_s16 + $0x218] sm:$0xff] %v793_v27 }
 0x133   : > { %796 = vst [vmem:[%s2536_s16 + $0x220] sm:$0xff] %v795_v28 }
 0x134   : > { %798 = vst [vmem:[%s2536_s16 + $0x228] sm:$0xff] %v797_v29 }
 0x135   : > { %800 = vst [vmem:[%s2536_s16 + $0x230] sm:$0xff] %v799_v30 }
 0x136   : > { %802 = vst [vmem:[%s2536_s16 + $0x238] sm:$0xff] %v801_v31 }
 0x137   : > { %804 = vst [vmem:[%s2536_s16 + $0x240] sm:$0xff] %v803_v32 }
 0x138   : > { %806 = vst [vmem:[%s2536_s16 + $0x248] sm:$0xff] %v805_v33 }
 0x139   : > { %808 = vst [vmem:[%s2536_s16 + $0x250] sm:$0xff] %v807_v34 }
 0x13a   : > { %810 = vst [vmem:[%s2536_s16 + $0x258] sm:$0xff] %v809_v35 }
 0x13b   : > { %812 = vst [vmem:[%s2536_s16 + $0x260] sm:$0xff] %v811_v36 }
 0x13c   : > { %814 = vst [vmem:[%s2536_s16 + $0x268] sm:$0xff] %v813_v37 }
 0x13d   : > { %816 = vst [vmem:[%s2536_s16 + $0x270] sm:$0xff] %v815_v38 }
 0x13e   : > { %818 = vst [vmem:[%s2536_s16 + $0x278] sm:$0xff] %v817_v39 }
 0x13f   : > { %820 = vst [vmem:[%s2536_s16 + $0x280] sm:$0xff] %v819_v40 }
 0x140   : > { %822 = vst [vmem:[%s2536_s16 + $0x288] sm:$0xff] %v821_v41 }
 0x141   : > { %824 = vst [vmem:[%s2536_s16 + $0x290] sm:$0xff] %v823_v42 }
 0x142   : > { %826 = vst [vmem:[%s2536_s16 + $0x298] sm:$0xff] %v825_v43 }
 0x143   : > { %828 = vst [vmem:[%s2536_s16 + $0x2a0] sm:$0xff] %v827_v44 }
 0x144   : > { %830 = vst [vmem:[%s2536_s16 + $0x2a8] sm:$0xff] %v829_v45 }
 0x145   : > { %832 = vst [vmem:[%s2536_s16 + $0x2b0] sm:$0xff] %v831_v46 }
 0x146   : > { %834 = vst [vmem:[%s2536_s16 + $0x2b8] sm:$0xff] %v833_v47 }
 0x147   : > { %836 = vst [vmem:[%s2536_s16 + $0x2c0] sm:$0xff] %v835_v48 }
 0x148   : > { %838 = vst [vmem:[%s2536_s16 + $0x2c8] sm:$0xff] %v837_v49 }
 0x149   : > { %840 = vst [vmem:[%s2536_s16 + $0x2d0] sm:$0xff] %v839_v50 }
 0x14a   : > { %842 = vst [vmem:[%s2536_s16 + $0x2d8] sm:$0xff] %v841_v51 }
 0x14b   : > { %844 = vst [vmem:[%s2536_s16 + $0x2e0] sm:$0xff] %v843_v52 }
 0x14c   : > { %846 = vst [vmem:[%s2536_s16 + $0x2e8] sm:$0xff] %v845_v53 }
 0x14d   : > { %848 = vst [vmem:[%s2536_s16 + $0x2f0] sm:$0xff] %v847_v54 }
 0x14e   : > { %850 = vst [vmem:[%s2536_s16 + $0x2f8] sm:$0xff] %v849_v55 }
 0x14f   : > { %852 = vst [vmem:[%s2536_s16 + $0x300] sm:$0xff] %v851_v56 }
 0x150   : > { %854 = vst [vmem:[%s2536_s16 + $0x308] sm:$0xff] %v853_v57 }
 0x151   : > { %856 = vst [vmem:[%s2536_s16 + $0x310] sm:$0xff] %v855_v58 }
 0x152   : > { %858 = vst [vmem:[%s2536_s16 + $0x318] sm:$0xff] %v857_v59 }
 0x153   : > { %860 = vst [vmem:[%s2536_s16 + $0x320] sm:$0xff] %v859_v60 }
 0x154   : > { %862 = vst [vmem:[%s2536_s16 + $0x328] sm:$0xff] %v861_v61 }
 0x155   : > { %864 = vst [vmem:[%s2536_s16 + $0x330] sm:$0xff] %v863_v62 }
 0x156   : > { %866 = vst [vmem:[%s2536_s16 + $0x338] sm:$0xff] %v865_v63 }
 0x157   : > { %868 = vst [vmem:[%s2536_s16 + $0x340] sm:$0xff] %v867_v0 }
 0x158   : > { %870 = vst [vmem:[%s2536_s16 + $0x348] sm:$0xff] %v869_v1 }
 0x159   : > { %872 = vst [vmem:[%s2536_s16 + $0x350] sm:$0xff] %v871_v2 }
 0x15a   : > { %874 = vst [vmem:[%s2536_s16 + $0x358] sm:$0xff] %v873_v3 }
 0x15b PF: > { %p1939_p7 = scmp.ge.s32.totalorder %s2009_s20, 1  ;;  %p879_p8 = scmp.lt.s32.totalorder %s2009_s20, 3 }
 0x15d   : > { %p880_p9 = pnand %p1939_p7, %p879_p8 }
 0x15e   : > { %s2754_s17 = sand.u32 (!%p880_p9), 1, %s2001_s18  }
 0x15f   : > { %883 = sbr.rel (%p880_p9) target bundleno = 695 (0x2b7), region = 78 }
 0x160   : > { %s1960_s23 = smul.u32 (!%p880_p9), 864, %s2754_s17 }
 0x161   : > { %s1959_s18 = smul.u32 (!%p880_p9), 1728, %s2754_s17 }
 0x162   : > { %s2757_s24 = scalar_lea.vmem (!%p880_p9), [#allocation3], %s1960_s23 }
 0x163   : > { %s2834_s29 = scalar_lea.vmem (!%p880_p9), [#allocation2], %s1959_s18 }
 0x164   : > { %v1194_v4 = vld [vmem:[%s2757_s24 + $0xf0] sm:$0xff]  ;;  %v1195_v7 = vld [vmem:[%s2757_s24 + $0xf8] sm:$0xff]  ;;  %v1192_v8 = vld [vmem:[%s2757_s24 + $0xe0] sm:$0xff]  ;;  %vm1272_vm0 = vcmask 392192   ;;  %vm1463_vm1 = vcmask 785408  }
 0x165   : > { %v1226_v5 = vld [vmem:[%s2757_s24 + $0x1f0] sm:$0xff]  ;;  %1279 = vmatpush.msra.mxu0 %v1194_v4  ;;  %v1224_v9 = vld [vmem:[%s2757_s24 + $0x1e0] sm:$0xff]  ;;  %1371 = vmatpush.msra.mxu3 %v1195_v7  ;;  %v1193_v11 = vld [vmem:[%s2757_s24 + $0xe8] sm:$0xff] }
 0x166   : > { %v1258_v6 = vld [vmem:[%s2757_s24 + $0x2f0] sm:$0xff]  ;;  %1302 = vmatpush.msra.mxu1 %v1226_v5  ;;  %v1256_v10 = vld [vmem:[%s2757_s24 + $0x2e0] sm:$0xff]  ;;  %v1191_v15 = vld [vmem:[%s2757_s24 + $0xd8] sm:$0xff] }
 0x167   : > { %1325 = vmatpush.msra.mxu2 %v1258_v6  ;;  %v1190_v12 = vld [vmem:[%s2757_s24 + $0xd0] sm:$0xff]  ;;  %1280 = vmatpush.msra.mxu0 %v1192_v8  ;;  %v1188_v16 = vld [vmem:[%s2757_s24 + $0xc0] sm:$0xff]  ;;  %v1189_v19 = vld [vmem:[%s2757_s24 + $0xc8] sm:$0xff] }
 0x168   : > { %1303 = vmatpush.msra.mxu1 %v1224_v9  ;;  %v1222_v13 = vld [vmem:[%s2757_s24 + $0x1d0] sm:$0xff]  ;;  %1372 = vmatpush.msra.mxu3 %v1193_v11  ;;  %v1220_v17 = vld [vmem:[%s2757_s24 + $0x1c0] sm:$0xff]  ;;  %v1187_v23 = vld [vmem:[%s2757_s24 + $0xb8] sm:$0xff] }
 0x169   : > { %v1254_v14 = vld [vmem:[%s2757_s24 + $0x2d0] sm:$0xff]  ;;  %1326 = vmatpush.msra.mxu2 %v1256_v10  ;;  %1281 = vmatpush.msra.mxu0 %v1190_v12  ;;  %v1252_v18 = vld [vmem:[%s2757_s24 + $0x2c0] sm:$0xff]  ;;  %v1185_v27 = vld [vmem:[%s2757_s24 + $0xa8] sm:$0xff] }
 0x16a   : > { %1304 = vmatpush.msra.mxu1 %v1222_v13  ;;  %1373 = vmatpush.msra.mxu3 %v1191_v15  ;;  %v1186_v20 = vld [vmem:[%s2757_s24 + $0xb0] sm:$0xff]  ;;  %v1184_v24 = vld [vmem:[%s2757_s24 + $0xa0] sm:$0xff]  ;;  %v1183_v31 = vld [vmem:[%s2757_s24 + $0x98] sm:$0xff] }
 0x16b   : > { %1327 = vmatpush.msra.mxu2 %v1254_v14  ;;  %v1218_v21 = vld [vmem:[%s2757_s24 + $0x1b0] sm:$0xff]  ;;  %1282 = vmatpush.msra.mxu0 %v1188_v16  ;;  %v1216_v25 = vld [vmem:[%s2757_s24 + $0x1a0] sm:$0xff]  ;;  %v1181_v35 = vld [vmem:[%s2757_s24 + $0x88] sm:$0xff] }
 0x16c   : > { %1305 = vmatpush.msra.mxu1 %v1220_v17  ;;  %v1250_v22 = vld [vmem:[%s2757_s24 + $0x2b0] sm:$0xff]  ;;  %1374 = vmatpush.msra.mxu3 %v1189_v19  ;;  %v1248_v26 = vld [vmem:[%s2757_s24 + $0x2a0] sm:$0xff]  ;;  %v1179_v39 = vld [vmem:[%s2757_s24 + $0x78] sm:$0xff] }
 0x16d   : > { %1328 = vmatpush.msra.mxu2 %v1252_v18  ;;  %1283 = vmatpush.msra.mxu0 %v1186_v20  ;;  %v1182_v28 = vld [vmem:[%s2757_s24 + $0x90] sm:$0xff]  ;;  %v1180_v32 = vld [vmem:[%s2757_s24 + $0x80] sm:$0xff]  ;;  %v1177_v43 = vld [vmem:[%s2757_s24 + $0x68] sm:$0xff] }
 0x16e   : > { %1306 = vmatpush.msra.mxu1 %v1218_v21  ;;  %1375 = vmatpush.msra.mxu3 %v1187_v23  ;;  %v1214_v29 = vld [vmem:[%s2757_s24 + $0x190] sm:$0xff]  ;;  %v1212_v33 = vld [vmem:[%s2757_s24 + $0x180] sm:$0xff]  ;;  %v1175_v47 = vld [vmem:[%s2757_s24 + $0x58] sm:$0xff] }
 0x16f   : > { %1329 = vmatpush.msra.mxu2 %v1250_v22  ;;  %1284 = vmatpush.msra.mxu0 %v1184_v24  ;;  %v1246_v30 = vld [vmem:[%s2757_s24 + $0x290] sm:$0xff]  ;;  %v1244_v34 = vld [vmem:[%s2757_s24 + $0x280] sm:$0xff]  ;;  %v1173_v51 = vld [vmem:[%s2757_s24 + $0x48] sm:$0xff] }
 0x170   : > { %1307 = vmatpush.msra.mxu1 %v1216_v25  ;;  %1376 = vmatpush.msra.mxu3 %v1185_v27  ;;  %v1178_v36 = vld [vmem:[%s2757_s24 + $0x70] sm:$0xff]  ;;  %v1176_v40 = vld [vmem:[%s2757_s24 + $0x60] sm:$0xff]  ;;  %v1171_v55 = vld [vmem:[%s2757_s24 + $0x38] sm:$0xff] }
 0x171   : > { %1330 = vmatpush.msra.mxu2 %v1248_v26  ;;  %1285 = vmatpush.msra.mxu0 %v1182_v28  ;;  %v1210_v37 = vld [vmem:[%s2757_s24 + $0x170] sm:$0xff]  ;;  %v1208_v41 = vld [vmem:[%s2757_s24 + $0x160] sm:$0xff]  ;;  %v1169_v59 = vld [vmem:[%s2757_s24 + $0x28] sm:$0xff] }
 0x172   : > { %1308 = vmatpush.msra.mxu1 %v1214_v29  ;;  %1377 = vmatpush.msra.mxu3 %v1183_v31  ;;  %v1242_v38 = vld [vmem:[%s2757_s24 + $0x270] sm:$0xff]  ;;  %v1240_v42 = vld [vmem:[%s2757_s24 + $0x260] sm:$0xff]  ;;  %v1167_v63 = vld [vmem:[%s2757_s24 + $0x18] sm:$0xff] }
 0x173   : > { %1331 = vmatpush.msra.mxu2 %v1246_v30  ;;  %1286 = vmatpush.msra.mxu0 %v1180_v32  ;;  %v1174_v44 = vld [vmem:[%s2757_s24 + $0x50] sm:$0xff]  ;;  %v1172_v48 = vld [vmem:[%s2757_s24 + $0x40] sm:$0xff]  ;;  %v1165_v3 = vld [vmem:[%s2757_s24 + $0x8] sm:$0xff] }
 0x174   : > { %1309 = vmatpush.msra.mxu1 %v1212_v33  ;;  %1378 = vmatpush.msra.mxu3 %v1181_v35  ;;  %v1206_v45 = vld [vmem:[%s2757_s24 + $0x150] sm:$0xff]  ;;  %v1204_v49 = vld [vmem:[%s2757_s24 + $0x140] sm:$0xff]  ;;  %v1259_v5 = vld [vmem:[%s2757_s24 + $0x2f8] sm:$0xff] }
 0x175   : > { %1332 = vmatpush.msra.mxu2 %v1244_v34  ;;  %1287 = vmatpush.msra.mxu0 %v1178_v36  ;;  %v1238_v46 = vld [vmem:[%s2757_s24 + $0x250] sm:$0xff]  ;;  %v1236_v50 = vld [vmem:[%s2757_s24 + $0x240] sm:$0xff]  ;;  %v1271_v7 = vld [vmem:[%s2757_s24 + $0x358] sm:$0xff] }
 0x176   : > { %1310 = vmatpush.msra.mxu1 %v1210_v37  ;;  %1379 = vmatpush.msra.mxu3 %v1179_v39  ;;  %v1170_v52 = vld [vmem:[%s2757_s24 + $0x30] sm:$0xff]  ;;  %v1168_v56 = vld [vmem:[%s2757_s24 + $0x20] sm:$0xff]  ;;  %v1257_v9 = vld [vmem:[%s2757_s24 + $0x2e8] sm:$0xff] }
 0x177   : > { %1333 = vmatpush.msra.mxu2 %v1242_v38  ;;  %1288 = vmatpush.msra.mxu0 %v1176_v40  ;;  %v1202_v53 = vld [vmem:[%s2757_s24 + $0x130] sm:$0xff]  ;;  %v1200_v57 = vld [vmem:[%s2757_s24 + $0x120] sm:$0xff]  ;;  %v1269_v11 = vld [vmem:[%s2757_s24 + $0x348] sm:$0xff] }
 0x178   : > { %1311 = vmatpush.msra.mxu1 %v1208_v41  ;;  %1380 = vmatpush.msra.mxu3 %v1177_v43  ;;  %v1234_v54 = vld [vmem:[%s2757_s24 + $0x230] sm:$0xff]  ;;  %v1232_v58 = vld [vmem:[%s2757_s24 + $0x220] sm:$0xff]  ;;  %v1255_v13 = vld [vmem:[%s2757_s24 + $0x2d8] sm:$0xff] }
 0x179   : > { %1334 = vmatpush.msra.mxu2 %v1240_v42  ;;  %1289 = vmatpush.msra.mxu0 %v1174_v44  ;;  %v1166_v60 = vld [vmem:[%s2757_s24 + $0x10] sm:$0xff]  ;;  %v1164_v0 = vld [vmem:[%s2757_s24] sm:$0xff]  ;;  %v1267_v15 = vld [vmem:[%s2757_s24 + $0x338] sm:$0xff] }
 0x17a   : > { %1312 = vmatpush.msra.mxu1 %v1206_v45  ;;  %1381 = vmatpush.msra.mxu3 %v1175_v47  ;;  %v1198_v61 = vld [vmem:[%s2757_s24 + $0x110] sm:$0xff]  ;;  %v1196_v1 = vld [vmem:[%s2757_s24 + $0x100] sm:$0xff]  ;;  %v1253_v17 = vld [vmem:[%s2757_s24 + $0x2c8] sm:$0xff] }
 0x17b   : > { %1335 = vmatpush.msra.mxu2 %v1238_v46  ;;  %1290 = vmatpush.msra.mxu0 %v1172_v48  ;;  %v1230_v62 = vld [vmem:[%s2757_s24 + $0x210] sm:$0xff]  ;;  %v1228_v2 = vld [vmem:[%s2757_s24 + $0x200] sm:$0xff]  ;;  %v1265_v19 = vld [vmem:[%s2757_s24 + $0x328] sm:$0xff] }
 0x17c   : > { %1313 = vmatpush.msra.mxu1 %v1204_v49  ;;  %1382 = vmatpush.msra.mxu3 %v1173_v51  ;;  %v2827_v4 = vld [vmem:[%s3282_s3] sm:$0xff]  ;;  %v1270_v6 = vld [vmem:[%s2757_s24 + $0x350] sm:$0xff]  ;;  %v1251_v23 = vld [vmem:[%s2757_s24 + $0x2b8] sm:$0xff] }
 0x17d   : > { %1336 = vmatpush.msra.mxu2 %v1236_v50  ;;  %1291 = vmatpush.msra.mxu0 %v1170_v52  ;;  %v970_v8 = vld [vmem:[%s2834_s29 + $0xf0] sm:$0xff]  ;;  %v1268_v10 = vld [vmem:[%s2757_s24 + $0x340] sm:$0xff]  ;;  %v1263_v25 = vld [vmem:[%s2757_s24 + $0x318] sm:$0xff] }
 0x17e   : > { %1314 = vmatpush.msra.mxu1 %v1202_v53  ;;  %1383 = vmatpush.msra.mxu3 %v1171_v55  ;;  %v968_v12 = vld [vmem:[%s2834_s29 + $0xe0] sm:$0xff]  ;;  %v1266_v14 = vld [vmem:[%s2757_s24 + $0x330] sm:$0xff]  ;;  %v1249_v27 = vld [vmem:[%s2757_s24 + $0x2a8] sm:$0xff] }
 0x17f   : > { %1337 = vmatpush.msra.mxu2 %v1234_v54  ;;  %1292 = vmatpush.msra.mxu0 %v1168_v56  ;;  %v966_v16 = vld [vmem:[%s2834_s29 + $0xd0] sm:$0xff]  ;;  %v1264_v18 = vld [vmem:[%s2757_s24 + $0x320] sm:$0xff]  ;;  %v1261_v29 = vld [vmem:[%s2757_s24 + $0x308] sm:$0xff] }
 0x180   : > { %1315 = vmatpush.msra.mxu1 %v1200_v57  ;;  %1384 = vmatpush.msra.mxu3 %v1169_v59  ;;  %v964_v20 = vld [vmem:[%s2834_s29 + $0xc0] sm:$0xff]  ;;  %v2853_v21 = vld [vmem:[%s3282_s3 + $0x10] sm:$0xff]  ;;  %v2873_v31 = vld [vmem:[%s3282_s3 + $0x8] sm:$0xff] }
 0x181   : > { %1338 = vmatpush.msra.mxu2 %v1232_v58  ;;  %1293 = vmatpush.msra.mxu0 %v1166_v60  ;;  %v2858_v22 = vld [vmem:[%s3282_s3 + $0x20] sm:$0xff]  ;;  %v1262_v24 = vld [vmem:[%s2757_s24 + $0x310] sm:$0xff]  ;;  %v1227_v32 = vld [vmem:[%s2757_s24 + $0x1f8] sm:$0xff] }
 0x182   : > { %1316 = vmatpush.msra.mxu1 %v1198_v61  ;;  %1385 = vmatpush.msra.mxu3 %v1167_v63  ;;  %v962_v26 = vld [vmem:[%s2834_s29 + $0xb0] sm:$0xff]  ;;  %v1260_v28 = vld [vmem:[%s2757_s24 + $0x300] sm:$0xff]  ;;  %v1247_v34 = vld [vmem:[%s2757_s24 + $0x298] sm:$0xff] }
 0x183   : > { %1339 = vmatpush.msra.mxu2 %v1230_v62  ;;  %1294 = vmatpush.msra.mxu0 %v1164_v0  ;;  %v960_v30 = vld [vmem:[%s2834_s29 + $0xa0] sm:$0xff]  ;;  %v1002_v33 = vld [vmem:[%s2834_s29 + $0x1f0] sm:$0xff]  ;;  %v1225_v36 = vld [vmem:[%s2757_s24 + $0x1e8] sm:$0xff] }
 0x184   : > { %1317 = vmatpush.msra.mxu1 %v1196_v1  ;;  %1386 = vmatpush.msra.mxu3 %v1165_v3  ;;  %v958_v35 = vld [vmem:[%s2834_s29 + $0x90] sm:$0xff]  ;;  %v1000_v37 = vld [vmem:[%s2834_s29 + $0x1e0] sm:$0xff]  ;;  %v1245_v38 = vld [vmem:[%s2757_s24 + $0x288] sm:$0xff] }
 0x185   : > { %1340 = vmatpush.msra.mxu2 %v1228_v2  ;;  %1295 = vmatmul.f32.vlgmr.msra.gmra.mxu0 %v2827_v4  ;;  %v956_v39 = vld [vmem:[%s2834_s29 + $0x80] sm:$0xff]  ;;  %v1223_v40 = vld [vmem:[%s2757_s24 + $0x1d8] sm:$0xff]  ;;  %v998_v41 = vld [vmem:[%s2834_s29 + $0x1d0] sm:$0xff] }
 0x186   : > { %1417 = vmatpush.msrb.mxu1 %v1259_v5  ;;  %1358 = vmatpush.msrb.mxu0 %v1270_v6  ;;  %v1159_v42 = vld [vmem:[%s3282_s3 + $0x18] sm:$0xff]  ;;  %v954_v44 = vld [vmem:[%s2834_s29 + $0x70] sm:$0xff]  ;;  %v1221_v45 = vld [vmem:[%s2757_s24 + $0x1c8] sm:$0xff] }
 0x187   : > { %1450 = vmatpush.msrb.mxu2 %v1271_v7  ;;  %1470 = vmatpush.msrb.mxu3 %v970_v8  ;;  %v1243_v43 = vld [vmem:[%s2757_s24 + $0x278] sm:$0xff]  ;;  %v996_v46 = vld [vmem:[%s2834_s29 + $0x1c0] sm:$0xff]  ;;  %v2898_v47 = vld [vmem:[%s3282_s3 + $0x30] sm:$0xff] }
 0x188   : > { %1418 = vmatpush.msrb.mxu1 %v1257_v9  ;;  %1359 = vmatpush.msrb.mxu0 %v1268_v10  ;;  %v1241_v48 = vld [vmem:[%s2757_s24 + $0x268] sm:$0xff]  ;;  %v952_v49 = vld [vmem:[%s2834_s29 + $0x60] sm:$0xff]  ;;  %v1219_v50 = vld [vmem:[%s2757_s24 + $0x1b8] sm:$0xff] }
 0x189   : > { %1451 = vmatpush.msrb.mxu2 %v1269_v11  ;;  %1471 = vmatpush.msrb.mxu3 %v968_v12  ;;  %v994_v51 = vld [vmem:[%s2834_s29 + $0x1b0] sm:$0xff]  ;;  %v1239_v52 = vld [vmem:[%s2757_s24 + $0x258] sm:$0xff]  ;;  %v1217_v54 = vld [vmem:[%s2757_s24 + $0x1a8] sm:$0xff] }
 0x18a   : > { %1419 = vmatpush.msrb.mxu1 %v1255_v13  ;;  %1360 = vmatpush.msrb.mxu0 %v1266_v14  ;;  %v950_v53 = vld [vmem:[%s2834_s29 + $0x50] sm:$0xff]  ;;  %v992_v55 = vld [vmem:[%s2834_s29 + $0x1a0] sm:$0xff]  ;;  %v1237_v56 = vld [vmem:[%s2757_s24 + $0x248] sm:$0xff] }
 0x18b   : > { %1452 = vmatpush.msrb.mxu2 %v1267_v15  ;;  %1472 = vmatpush.msrb.mxu3 %v966_v16  ;;  %v948_v57 = vld [vmem:[%s2834_s29 + $0x40] sm:$0xff]  ;;  %v1215_v58 = vld [vmem:[%s2757_s24 + $0x198] sm:$0xff]  ;;  %v990_v59 = vld [vmem:[%s2834_s29 + $0x190] sm:$0xff] }
 0x18c   : > { %1420 = vmatpush.msrb.mxu1 %v1253_v17  ;;  %1361 = vmatpush.msrb.mxu0 %v1264_v18  ;;  %v1235_v60 = vld [vmem:[%s2757_s24 + $0x238] sm:$0xff]  ;;  %v946_v61 = vld [vmem:[%s2834_s29 + $0x30] sm:$0xff]  ;;  %v1213_v62 = vld [vmem:[%s2757_s24 + $0x188] sm:$0xff] }
 0x18d   : > { %1453 = vmatpush.msrb.mxu2 %v1265_v19  ;;  %1473 = vmatpush.msrb.mxu3 %v964_v20  ;;  %v988_v63 = vld [vmem:[%s2834_s29 + $0x180] sm:$0xff]  ;;  %v1233_v0 = vld [vmem:[%s2757_s24 + $0x228] sm:$0xff]  ;;  %v1211_v2 = vld [vmem:[%s2757_s24 + $0x178] sm:$0xff] }
 0x18e   : > { %1341 = vmatmul.f32.vlgmr.msra.gmra.mxu2 %v2853_v21  ;;  %1298 = vmatmul.f32.gmra.mxu0 %v2858_v22  ;;  %v944_v1 = vld [vmem:[%s2834_s29 + $0x20] sm:$0xff]  ;;  %v986_v3 = vld [vmem:[%s2834_s29 + $0x170] sm:$0xff]  ;;  %v1209_v6 = vld [vmem:[%s2757_s24 + $0x168] sm:$0xff] }
 0x18f   : > { %1421 = vmatpush.msrb.mxu1 %v1251_v23  ;;  %1362 = vmatpush.msrb.mxu0 %v1262_v24  ;;  %v942_v5 = vld [vmem:[%s2834_s29 + $0x10] sm:$0xff]  ;;  %v984_v7 = vld [vmem:[%s2834_s29 + $0x160] sm:$0xff]  ;;  %v1229_v8 = vld [vmem:[%s2757_s24 + $0x208] sm:$0xff] }
 0x190   : > { %1454 = vmatpush.msrb.mxu2 %v1263_v25  ;;  %1474 = vmatpush.msrb.mxu3 %v962_v26  ;;  %v940_v9 = vld [vmem:[%s2834_s29] sm:$0xff]  ;;  %v1207_v10 = vld [vmem:[%s2757_s24 + $0x158] sm:$0xff]  ;;  %v982_v12 = vld [vmem:[%s2834_s29 + $0x150] sm:$0xff] }
 0x191   : > { %1422 = vmatpush.msrb.mxu1 %v1249_v27  ;;  %1363 = vmatpush.msrb.mxu0 %v1260_v28  ;;  %v2933_v11 = vld [vmem:[%s3280_s1] sm:$0xff]  ;;  %v1066_v13 = vld [vmem:[%s2834_s29 + $0x3f0] sm:$0xff]  ;;  %v1205_v15 = vld [vmem:[%s2757_s24 + $0x148] sm:$0xff] }
 0x192   : > { %1455 = vmatpush.msrb.mxu2 %v1261_v29  ;;  %1475 = vmatpush.msrb.mxu3 %v960_v30  ;;  %v1098_v14 = vld [vmem:[%s2834_s29 + $0x4f0] sm:$0xff]  ;;  %v980_v16 = vld [vmem:[%s2834_s29 + $0x140] sm:$0xff]  ;;  %v2946_v19 = vld [vmem:[%s3282_s3 + $0x28] sm:$0xff] }
 0x193   : > { %1318 = vmatmul.f32.vlgmr.msra.gmra.mxu1 %v2873_v31  ;;  %1394 = vmatpush.msra.mxu0 %v1227_v32  ;;  %v1064_v17 = vld [vmem:[%s2834_s29 + $0x3e0] sm:$0xff]  ;;  %v1163_v20 = vld [vmem:[%s3282_s3 + $0x38] sm:$0xff]  ;;  %v978_v23 = vld [vmem:[%s2834_s29 + $0x130] sm:$0xff] }
 0x194   : > { %1493 = vmatpush.msra.mxu2 %v1002_v33  ;;  %1423 = vmatpush.msrb.mxu1 %v1247_v34  ;;  %v1096_v18 = vld [vmem:[%s2834_s29 + $0x4e0] sm:$0xff]  ;;  %v1062_v24 = vld [vmem:[%s2834_s29 + $0x3d0] sm:$0xff]  ;;  %v1201_v26 = vld [vmem:[%s2757_s24 + $0x128] sm:$0xff] }
 0x195   : > { %1476 = vmatpush.msrb.mxu3 %v958_v35  ;;  %1395 = vmatpush.msra.mxu0 %v1225_v36  ;;  %v1094_v25 = vld [vmem:[%s2834_s29 + $0x4d0] sm:$0xff]  ;;  %v976_v27 = vld [vmem:[%s2834_s29 + $0x120] sm:$0xff]  ;;  %v1199_v30 = vld [vmem:[%s2757_s24 + $0x118] sm:$0xff] }
 0x196   : > { %1494 = vmatpush.msra.mxu2 %v1000_v37  ;;  %1424 = vmatpush.msrb.mxu1 %v1245_v38  ;;  %v1060_v28 = vld [vmem:[%s2834_s29 + $0x3c0] sm:$0xff]  ;;  %v2966_v32 = vld [vmem:[%s3280_s1 + $0x38] sm:$0xff]  ;;  %v974_v33 = vld [vmem:[%s2834_s29 + $0x110] sm:$0xff] }
 0x197   : > { %1477 = vmatpush.msrb.mxu3 %v956_v39  ;;  %1396 = vmatpush.msra.mxu0 %v1223_v40  ;;  %v1092_v29 = vld [vmem:[%s2834_s29 + $0x4c0] sm:$0xff]  ;;  %v1058_v34 = vld [vmem:[%s2834_s29 + $0x3b0] sm:$0xff]  ;;  %v1197_v36 = vld [vmem:[%s2757_s24 + $0x108] sm:$0xff] }
 0x198   : > { %1387 = vmatmul.f32.vlgmr.msra.gmra.mxu3 %v2827_v4  ;;  %1495 = vmatpush.msra.mxu2 %v998_v41  ;;  %v1231_v4 = vld [vmem:[%s2757_s24 + $0x218] sm:$0xff]  ;;  %v1090_v35 = vld [vmem:[%s2834_s29 + $0x4b0] sm:$0xff]  ;;  %v972_v37 = vld [vmem:[%s2834_s29 + $0x100] sm:$0xff] }
 0x199   : > { %1941 = vmatmul.msk.f32.vlgmr.msrb.gmra.mxu0 %vm1272_vm0, %v1159_v42  ;;  %1425 = vmatpush.msrb.mxu1 %v1243_v43  ;;  %v1056_v38 = vld [vmem:[%s2834_s29 + $0x3a0] sm:$0xff]  ;;  %v2979_v40 = vld [vmem:[%s3280_s1 + $0x8] sm:$0xff]  ;;  %v1034_v41 = vld [vmem:[%s2834_s29 + $0x2f0] sm:$0xff] }
 0x19a   : > { %1478 = vmatpush.msrb.mxu3 %v954_v44  ;;  %1397 = vmatpush.msra.mxu0 %v1221_v45  ;;  %v1088_v39 = vld [vmem:[%s2834_s29 + $0x4a0] sm:$0xff]  ;;  %v1054_v43 = vld [vmem:[%s2834_s29 + $0x390] sm:$0xff] }
 0x19b   : > { %1496 = vmatpush.msra.mxu2 %v996_v46  ;;  %1426 = vmatpush.msrb.mxu1 %v1241_v48  ;;  %v1086_v44 = vld [vmem:[%s2834_s29 + $0x490] sm:$0xff]  ;;  %v1032_v45 = vld [vmem:[%s2834_s29 + $0x2e0] sm:$0xff] }
 0x19c   : > { %1344 = vmatmul.f32.gmra.mxu2 %v2898_v47  ;;  %1479 = vmatpush.msrb.mxu3 %v952_v49  ;;  %v1128_v46 = vld [vmem:[%s2834_s29 + $0x5e0] sm:$0xff] }
 0x19d   : > { %1398 = vmatpush.msra.mxu0 %v1219_v50  ;;  %1497 = vmatpush.msra.mxu2 %v994_v51  ;;  %v1052_v48 = vld [vmem:[%s2834_s29 + $0x380] sm:$0xff]  ;;  %v1030_v50 = vld [vmem:[%s2834_s29 + $0x2d0] sm:$0xff] }
 0x19e   : > { %1427 = vmatpush.msrb.mxu1 %v1239_v52  ;;  %1480 = vmatpush.msrb.mxu3 %v950_v53  ;;  %v1084_v49 = vld [vmem:[%s2834_s29 + $0x480] sm:$0xff]  ;;  %v1050_v51 = vld [vmem:[%s2834_s29 + $0x370] sm:$0xff] }
 0x19f   : > { %1399 = vmatpush.msra.mxu0 %v1217_v54  ;;  %1498 = vmatpush.msra.mxu2 %v992_v55  ;;  %v1082_v52 = vld [vmem:[%s2834_s29 + $0x470] sm:$0xff]  ;;  %v1028_v53 = vld [vmem:[%s2834_s29 + $0x2c0] sm:$0xff] }
 0x1a0   : > { %1428 = vmatpush.msrb.mxu1 %v1237_v56  ;;  %1481 = vmatpush.msrb.mxu3 %v948_v57  ;;  %v1124_v54 = vld [vmem:[%s2834_s29 + $0x5c0] sm:$0xff]  ;;  %v1026_v57 = vld [vmem:[%s2834_s29 + $0x2b0] sm:$0xff] }
 0x1a1   : > { %1400 = vmatpush.msra.mxu0 %v1215_v58  ;;  %1390 = vmatmul.f32.gmra.mxu3 %v2858_v22  ;;  %v1203_v22 = vld [vmem:[%s2757_s24 + $0x138] sm:$0xff]  ;;  %v1048_v55 = vld [vmem:[%s2834_s29 + $0x360] sm:$0xff]  ;;  %v1122_v58 = vld [vmem:[%s2834_s29 + $0x5b0] sm:$0xff] }
 0x1a2   : > { %1499 = vmatpush.msra.mxu2 %v990_v59  ;;  %1429 = vmatpush.msrb.mxu1 %v1235_v60  ;;  %v3003_v56 = vld [vmem:[%s3280_s1 + $0x40] sm:$0xff]  ;;  %v1046_v59 = vld [vmem:[%s2834_s29 + $0x350] sm:$0xff] }
 0x1a3   : > { %1482 = vmatpush.msrb.mxu3 %v946_v61  ;;  %1401 = vmatpush.msra.mxu0 %v1213_v62  ;;  %v1078_v60 = vld [vmem:[%s2834_s29 + $0x450] sm:$0xff]  ;;  %v1024_v61 = vld [vmem:[%s2834_s29 + $0x2a0] sm:$0xff] }
 0x1a4   : > { %1500 = vmatpush.msra.mxu2 %v988_v63  ;;  %1430 = vmatpush.msrb.mxu1 %v1233_v0  ;;  %v1120_v62 = vld [vmem:[%s2834_s29 + $0x5a0] sm:$0xff] }
 0x1a5   : > { %1943 = vmatmul.msk.f32.vlgmr.msrb.gmra.mxu2 %vm1272_vm0, %v1159_v42  ;;  %1483 = vmatpush.msrb.mxu3 %v944_v1  ;;  %v1130_v42 = vld [vmem:[%s2834_s29 + $0x5f0] sm:$0xff]  ;;  %v1044_v63 = vld [vmem:[%s2834_s29 + $0x340] sm:$0xff] }
 0x1a6   : > { %1402 = vmatpush.msra.mxu0 %v1211_v2  ;;  %1501 = vmatpush.msra.mxu2 %v986_v3  ;;  %v1076_v0 = vld [vmem:[%s2834_s29 + $0x440] sm:$0xff]  ;;  %v1022_v1 = vld [vmem:[%s2834_s29 + $0x290] sm:$0xff] }
 0x1a7   : > { %1431 = vmatpush.msrb.mxu1 %v1231_v4  ;;  %1484 = vmatpush.msrb.mxu3 %v942_v5  ;;  %v1118_v2 = vld [vmem:[%s2834_s29 + $0x590] sm:$0xff]  ;;  %v1020_v5 = vld [vmem:[%s2834_s29 + $0x280] sm:$0xff] }
 0x1a8   : > { %1403 = vmatpush.msra.mxu0 %v1209_v6  ;;  %1502 = vmatpush.msra.mxu2 %v984_v7  ;;  %v1042_v3 = vld [vmem:[%s2834_s29 + $0x330] sm:$0xff]  ;;  %v1116_v6 = vld [vmem:[%s2834_s29 + $0x580] sm:$0xff] }
 0x1a9   : > { %1432 = vmatpush.msrb.mxu1 %v1229_v8  ;;  %1485 = vmatpush.msrb.mxu3 %v940_v9  ;;  %v1074_v4 = vld [vmem:[%s2834_s29 + $0x430] sm:$0xff]  ;;  %v1040_v7 = vld [vmem:[%s2834_s29 + $0x320] sm:$0xff] }
 0x1aa   : > { %1404 = vmatpush.msra.mxu0 %v1207_v10  ;;  %1486 = vmatmul.f32.vlgmr.msrb.gmra.mxu3 %v2933_v11  ;;  %v1072_v8 = vld [vmem:[%s2834_s29 + $0x420] sm:$0xff]  ;;  %v1018_v9 = vld [vmem:[%s2834_s29 + $0x270] sm:$0xff] }
 0x1ab   : > { %1503 = vmatpush.msra.mxu2 %v982_v12  ;;  %1539 = vmatpush.msra.mxu1 %v1066_v13  ;;  %v1114_v10 = vld [vmem:[%s2834_s29 + $0x570] sm:$0xff] }
 0x1ac   : > { %1562 = vmatpush.msra.mxu3 %v1098_v14  ;;  %1405 = vmatpush.msra.mxu0 %v1205_v15  ;;  %v1038_v12 = vld [vmem:[%s2834_s29 + $0x310] sm:$0xff]  ;;  %v1016_v14 = vld [vmem:[%s2834_s29 + $0x260] sm:$0xff] }
 0x1ad   : > { %1504 = vmatpush.msra.mxu2 %v980_v16  ;;  %1540 = vmatpush.msra.mxu1 %v1064_v17  ;;  %v1070_v13 = vld [vmem:[%s2834_s29 + $0x410] sm:$0xff]  ;;  %v1112_v15 = vld [vmem:[%s2834_s29 + $0x560] sm:$0xff] }
 0x1ae   : > { %1563 = vmatpush.msra.mxu3 %v1096_v18  ;;  %1321 = vmatmul.f32.gmra.mxu1 %v2946_v19  ;;  %v1036_v16 = vld [vmem:[%s2834_s29 + $0x300] sm:$0xff]  ;;  %v1014_v18 = vld [vmem:[%s2834_s29 + $0x250] sm:$0xff] }
 0x1af   : > { %1942 = vmatmul.msk.f32.gmra.mxu0 %vm1272_vm0, %v1163_v20  ;;  %1944 = vmatmul.msk.f32.gmra.mxu2 %vm1272_vm0, %v1163_v20  ;;  %v1068_v17 = vld [vmem:[%s2834_s29 + $0x400] sm:$0xff]  ;;  %v1110_v20 = vld [vmem:[%s2834_s29 + $0x550] sm:$0xff] }
 0x1b0   : > { %1406 = vmatpush.msra.mxu0 %v1203_v22  ;;  %1505 = vmatpush.msra.mxu2 %v978_v23  ;;  %v971_v22 = vld [vmem:[%s2834_s29 + $0xf8] sm:$0xff] }
 0x1b1   : > { %1541 = vmatpush.msra.mxu1 %v1062_v24  ;;  %1564 = vmatpush.msra.mxu3 %v1094_v25  ;;  %v1003_v23 = vld [vmem:[%s2834_s29 + $0x1f8] sm:$0xff]  ;;  %v1012_v24 = vld [vmem:[%s2834_s29 + $0x240] sm:$0xff] }
 0x1b2   : > { %1407 = vmatpush.msra.mxu0 %v1201_v26  ;;  %1506 = vmatpush.msra.mxu2 %v976_v27  ;;  %v1108_v25 = vld [vmem:[%s2834_s29 + $0x540] sm:$0xff]  ;;  %v969_v26 = vld [vmem:[%s2834_s29 + $0xe8] sm:$0xff] }
 0x1b3   : > { %1542 = vmatpush.msra.mxu1 %v1060_v28  ;;  %1565 = vmatpush.msra.mxu3 %v1092_v29  ;;  %v1001_v27 = vld [vmem:[%s2834_s29 + $0x1e8] sm:$0xff]  ;;  %v1106_v28 = vld [vmem:[%s2834_s29 + $0x530] sm:$0xff]  ;;  %v967_v29 = vld [vmem:[%s2834_s29 + $0xd8] sm:$0xff] }
 0x1b4   : > { %1408 = vmatpush.msra.mxu0 %v1199_v30  ;;  %1489 = vmatmul.f32.gmra.mxu3 %v2966_v32  ;;  %v999_v30 = vld [vmem:[%s2834_s29 + $0x1d8] sm:$0xff] }
 0x1b5   : > { %1507 = vmatpush.msra.mxu2 %v974_v33  ;;  %1543 = vmatpush.msra.mxu1 %v1058_v34  ;;  %v1008_v33 = vld [vmem:[%s2834_s29 + $0x220] sm:$0xff] }
 0x1b6   : > { %1566 = vmatpush.msra.mxu3 %v1090_v35  ;;  %1409 = vmatpush.msra.mxu0 %v1197_v36  ;;  %v1104_v34 = vld [vmem:[%s2834_s29 + $0x520] sm:$0xff]  ;;  %v965_v35 = vld [vmem:[%s2834_s29 + $0xc8] sm:$0xff]  ;;  %v1006_v36 = vld [vmem:[%s2834_s29 + $0x210] sm:$0xff] }
 0x1b7   : > { %1508 = vmatpush.msra.mxu2 %v972_v37  ;;  %1544 = vmatpush.msra.mxu1 %v1056_v38  ;;  %v1102_v37 = vld [vmem:[%s2834_s29 + $0x510] sm:$0xff]  ;;  %v963_v38 = vld [vmem:[%s2834_s29 + $0xb8] sm:$0xff] }
 0x1b8   : > { %1567 = vmatpush.msra.mxu3 %v1088_v39  ;;  %1410 = vmatmul.f32.vlgmr.msra.gmra.mxu0 %v2873_v31  ;;  %v1126_v31 = vld [vmem:[%s2834_s29 + $0x5d0] sm:$0xff]  ;;  %v995_v39 = vld [vmem:[%s2834_s29 + $0x1b8] sm:$0xff] }
 0x1b9   : > { %1509 = vmatmul.f32.vlgmr.msra.gmra.mxu2 %v2979_v40  ;;  %1516 = vmatpush.msrb.mxu0 %v1034_v41  ;;  %v3055_v41 = vld [vmem:[%s3280_s1 + $0x20] sm:$0xff] }
 0x1ba   : > { %1585 = vmatpush.msrb.mxu2 %v1130_v42  ;;  %1545 = vmatpush.msra.mxu1 %v1054_v43  ;;  %v1004_v42 = vld [vmem:[%s2834_s29 + $0x200] sm:$0xff] }
 0x1bb   : > { %1568 = vmatpush.msra.mxu3 %v1086_v44  ;;  %1433 = vmatmul.f32.vlgmr.msrb.gmra.mxu1 %v2853_v21  ;;  %v1080_v21 = vld [vmem:[%s2834_s29 + $0x460] sm:$0xff]  ;;  %v961_v44 = vld [vmem:[%s2834_s29 + $0xa8] sm:$0xff] }
 0x1bc   : > { %1517 = vmatpush.msrb.mxu0 %v1032_v45  ;;  %1586 = vmatpush.msrb.mxu2 %v1128_v46  ;;  %v1100_v43 = vld [vmem:[%s2834_s29 + $0x500] sm:$0xff]  ;;  %v993_v45 = vld [vmem:[%s2834_s29 + $0x1a8] sm:$0xff]  ;;  %v3064_v46 = vld [vmem:[%s3280_s1 + $0x10] sm:$0xff] }
 0x1bd   : > { %1546 = vmatpush.msra.mxu1 %v1052_v48  ;;  %1569 = vmatpush.msra.mxu3 %v1084_v49  ;;  %v3070_v48 = vld [vmem:[%s3280_s1 + $0x28] sm:$0xff]  ;;  %v1154_v49 = vld [vmem:[%s2834_s29 + $0x6b0] sm:$0xff] }
 0x1be   : > { %1518 = vmatpush.msrb.mxu0 %v1030_v50  ;;  %1587 = vmatpush.msrb.mxu2 %v1126_v31  ;;  %v1035_v50 = vld [vmem:[%s2834_s29 + $0x2f8] sm:$0xff] }
 0x1bf   : > { %1547 = vmatpush.msra.mxu1 %v1050_v51  ;;  %1570 = vmatpush.msra.mxu3 %v1082_v52  ;;  %v959_v31 = vld [vmem:[%s2834_s29 + $0x98] sm:$0xff] }
 0x1c0   : > { %1519 = vmatpush.msrb.mxu0 %v1028_v53  ;;  %1588 = vmatpush.msrb.mxu2 %v1124_v54  ;;  %v991_v51 = vld [vmem:[%s2834_s29 + $0x198] sm:$0xff]  ;;  %v1152_v53 = vld [vmem:[%s2834_s29 + $0x6a0] sm:$0xff]  ;;  %v1033_v54 = vld [vmem:[%s2834_s29 + $0x2e8] sm:$0xff] }
 0x1c1   : > { %1548 = vmatpush.msra.mxu1 %v1048_v55  ;;  %1571 = vmatpush.msra.mxu3 %v1080_v21  ;;  %v3080_v52 = vld [vmem:[%s3280_s1 + $0x18] sm:$0xff]  ;;  %v957_v55 = vld [vmem:[%s2834_s29 + $0x88] sm:$0xff] }
 0x1c2   : > { %1512 = vmatmul.f32.gmra.mxu2 %v3003_v56  ;;  %1520 = vmatpush.msrb.mxu0 %v1026_v57  ;;  %v989_v21 = vld [vmem:[%s2834_s29 + $0x188] sm:$0xff]  ;;  %v1150_v57 = vld [vmem:[%s2834_s29 + $0x690] sm:$0xff] }
 0x1c3   : > { %1589 = vmatpush.msrb.mxu2 %v1122_v58  ;;  %1549 = vmatpush.msra.mxu1 %v1046_v59  ;;  %v1031_v58 = vld [vmem:[%s2834_s29 + $0x2d8] sm:$0xff] }
 0x1c4   : > { %1572 = vmatpush.msra.mxu3 %v1078_v60  ;;  %1521 = vmatpush.msrb.mxu0 %v1024_v61  ;;  %v955_v59 = vld [vmem:[%s2834_s29 + $0x78] sm:$0xff] }
 0x1c5   : > { %1590 = vmatpush.msrb.mxu2 %v1120_v62  ;;  %1550 = vmatpush.msra.mxu1 %v1044_v63  ;;  %v987_v60 = vld [vmem:[%s2834_s29 + $0x178] sm:$0xff]  ;;  %v1148_v62 = vld [vmem:[%s2834_s29 + $0x680] sm:$0xff]  ;;  %v1029_v63 = vld [vmem:[%s2834_s29 + $0x2c8] sm:$0xff] }
 0x1c6   : > { %1573 = vmatpush.msra.mxu3 %v1076_v0  ;;  %1522 = vmatpush.msrb.mxu0 %v1022_v1  ;;  %v3095_v61 = vld [vmem:[%s3280_s1 + $0x58] sm:$0xff]  ;;  %v953_v0 = vld [vmem:[%s2834_s29 + $0x68] sm:$0xff] }
 0x1c7   : > { %1591 = vmatpush.msrb.mxu2 %v1118_v2  ;;  %1551 = vmatpush.msra.mxu1 %v1042_v3  ;;  %v985_v1 = vld [vmem:[%s2834_s29 + $0x168] sm:$0xff]  ;;  %v3110_v3 = vld [vmem:[%s3280_s1 + $0x60] sm:$0xff] }
 0x1c8   : > { %1574 = vmatpush.msra.mxu3 %v1074_v4  ;;  %1523 = vmatpush.msrb.mxu0 %v1020_v5  ;;  %v3104_v2 = vld [vmem:[%s3280_s1 + $0x48] sm:$0xff]  ;;  %v1146_v4 = vld [vmem:[%s2834_s29 + $0x670] sm:$0xff]  ;;  %v1027_v5 = vld [vmem:[%s2834_s29 + $0x2b8] sm:$0xff] }
 0x1c9   : > { %1592 = vmatpush.msrb.mxu2 %v1116_v6  ;;  %1552 = vmatpush.msra.mxu1 %v1040_v7  ;;  %v951_v6 = vld [vmem:[%s2834_s29 + $0x58] sm:$0xff] }
 0x1ca   : > { %1575 = vmatpush.msra.mxu3 %v1072_v8  ;;  %1524 = vmatpush.msrb.mxu0 %v1018_v9  ;;  %v983_v7 = vld [vmem:[%s2834_s29 + $0x158] sm:$0xff]  ;;  %v3120_v8 = vld [vmem:[%s3280_s1 + $0x50] sm:$0xff]  ;;  %v1144_v9 = vld [vmem:[%s2834_s29 + $0x660] sm:$0xff] }
 0x1cb   : > { %1593 = vmatpush.msrb.mxu2 %v1114_v10  ;;  %1553 = vmatpush.msra.mxu1 %v1038_v12  ;;  %v1025_v10 = vld [vmem:[%s2834_s29 + $0x2a8] sm:$0xff] }
 0x1cc   : > { %1576 = vmatpush.msra.mxu3 %v1070_v13  ;;  %1525 = vmatpush.msrb.mxu0 %v1016_v14  ;;  %v949_v12 = vld [vmem:[%s2834_s29 + $0x48] sm:$0xff]  ;;  %v1142_v14 = vld [vmem:[%s2834_s29 + $0x650] sm:$0xff] }
 0x1cd   : > { %1594 = vmatpush.msrb.mxu2 %v1112_v15  ;;  %1413 = vmatmul.f32.gmra.mxu0 %v2946_v19  ;;  %v1010_v19 = vld [vmem:[%s2834_s29 + $0x230] sm:$0xff]  ;;  %v981_v13 = vld [vmem:[%s2834_s29 + $0x148] sm:$0xff]  ;;  %v1023_v15 = vld [vmem:[%s2834_s29 + $0x298] sm:$0xff] }
 0x1ce   : > { %1554 = vmatpush.msra.mxu1 %v1036_v16  ;;  %1577 = vmatpush.msra.mxu3 %v1068_v17  ;;  %v947_v16 = vld [vmem:[%s2834_s29 + $0x38] sm:$0xff] }
 0x1cf   : > { %1526 = vmatpush.msrb.mxu0 %v1014_v18  ;;  %1595 = vmatpush.msrb.mxu2 %v1110_v20  ;;  %v979_v17 = vld [vmem:[%s2834_s29 + $0x138] sm:$0xff]  ;;  %v1140_v18 = vld [vmem:[%s2834_s29 + $0x640] sm:$0xff]  ;;  %v1021_v20 = vld [vmem:[%s2834_s29 + $0x288] sm:$0xff] }
 0x1d0   : > { %1631 = vmatpush.msrb.mxu1 %v971_v22  ;;  %1654 = vmatpush.msrb.mxu3 %v1003_v23  ;;  %v945_v22 = vld [vmem:[%s2834_s29 + $0x28] sm:$0xff] }
 0x1d1   : > { %1436 = vmatmul.f32.gmra.mxu1 %v2898_v47  ;;  %1527 = vmatpush.msrb.mxu0 %v1012_v24  ;;  %v997_v47 = vld [vmem:[%s2834_s29 + $0x1c8] sm:$0xff]  ;;  %v1138_v24 = vld [vmem:[%s2834_s29 + $0x630] sm:$0xff] }
 0x1d2   : > { %1596 = vmatpush.msrb.mxu2 %v1108_v25  ;;  %1632 = vmatpush.msrb.mxu1 %v969_v26  ;;  %v977_v23 = vld [vmem:[%s2834_s29 + $0x128] sm:$0xff]  ;;  %v1019_v25 = vld [vmem:[%s2834_s29 + $0x278] sm:$0xff] }
 0x1d3   : > { %1655 = vmatpush.msrb.mxu3 %v1001_v27  ;;  %1528 = vmatpush.msrb.mxu0 %v1010_v19  ;;  %v943_v26 = vld [vmem:[%s2834_s29 + $0x18] sm:$0xff]  ;;  %v1136_v19 = vld [vmem:[%s2834_s29 + $0x620] sm:$0xff] }
 0x1d4   : > { %1597 = vmatpush.msrb.mxu2 %v1106_v28  ;;  %1633 = vmatpush.msrb.mxu1 %v967_v29  ;;  %v975_v27 = vld [vmem:[%s2834_s29 + $0x118] sm:$0xff]  ;;  %v1017_v28 = vld [vmem:[%s2834_s29 + $0x268] sm:$0xff] }
 0x1d5   : > { %1656 = vmatpush.msrb.mxu3 %v999_v30  ;;  %1529 = vmatpush.msrb.mxu0 %v1008_v33  ;;  %v941_v29 = vld [vmem:[%s2834_s29 + $0x8] sm:$0xff]  ;;  %v1134_v33 = vld [vmem:[%s2834_s29 + $0x610] sm:$0xff] }
 0x1d6   : > { %1598 = vmatpush.msrb.mxu2 %v1104_v34  ;;  %1634 = vmatpush.msrb.mxu1 %v965_v35  ;;  %v973_v30 = vld [vmem:[%s2834_s29 + $0x108] sm:$0xff]  ;;  %v1015_v34 = vld [vmem:[%s2834_s29 + $0x258] sm:$0xff] }
 0x1d7   : > { %1657 = vmatpush.msrb.mxu3 %v997_v47  ;;  %1530 = vmatpush.msrb.mxu0 %v1006_v36  ;;  %v1131_v35 = vld [vmem:[%s2834_s29 + $0x5f8] sm:$0xff]  ;;  %v1132_v47 = vld [vmem:[%s2834_s29 + $0x600] sm:$0xff]  ;;  %v1013_v36 = vld [vmem:[%s2834_s29 + $0x248] sm:$0xff] }
 0x1d8   : > { %1599 = vmatpush.msrb.mxu2 %v1102_v37  ;;  %1635 = vmatpush.msrb.mxu1 %v963_v38  ;;  %v3153_v37 = vld [vmem:[%s3280_s1 + $0x30] sm:$0xff]  ;;  %v1067_v38 = vld [vmem:[%s2834_s29 + $0x3f8] sm:$0xff] }
 0x1d9   : > { %1658 = vmatpush.msrb.mxu3 %v995_v39  ;;  %1531 = vmatpush.msrb.mxu0 %v1004_v42  ;;  %v1129_v39 = vld [vmem:[%s2834_s29 + $0x5e8] sm:$0xff]  ;;  %v1011_v42 = vld [vmem:[%s2834_s29 + $0x238] sm:$0xff] }
 0x1da   : > { %1578 = vmatmul.f32.vlgmr.msra.gmra.mxu3 %v3055_v41  ;;  %1600 = vmatpush.msrb.mxu2 %v1100_v43  ;;  %v1065_v43 = vld [vmem:[%s2834_s29 + $0x3e8] sm:$0xff] }
 0x1db   : > { %1636 = vmatpush.msrb.mxu1 %v961_v44  ;;  %1659 = vmatpush.msrb.mxu3 %v993_v45  ;;  %v1127_v44 = vld [vmem:[%s2834_s29 + $0x5d8] sm:$0xff]  ;;  %v1097_v45 = vld [vmem:[%s2834_s29 + $0x4e8] sm:$0xff] }
 0x1dc   : > { %1532 = vmatmul.f32.vlgmr.msrb.gmra.mxu0 %v3064_v46  ;;  %1601 = vmatmul.f32.vlgmr.msrb.gmra.mxu2 %v3070_v48 }
 0x1dd   : > { %1612 = vmatpush.msra.mxu0 %v1154_v49  ;;  %1677 = vmatpush.msra.mxu2 %v1035_v50  ;;  %v1063_v49 = vld [vmem:[%s2834_s29 + $0x3d8] sm:$0xff]  ;;  %v1125_v50 = vld [vmem:[%s2834_s29 + $0x5c8] sm:$0xff] }
 0x1de   : > { %1637 = vmatpush.msrb.mxu1 %v959_v31  ;;  %1660 = vmatpush.msrb.mxu3 %v991_v51  ;;  %v1007_v31 = vld [vmem:[%s2834_s29 + $0x218] sm:$0xff]  ;;  %v1061_v51 = vld [vmem:[%s2834_s29 + $0x3c8] sm:$0xff] }
 0x1df   : > { %1555 = vmatmul.f32.vlgmr.msra.gmra.mxu1 %v3080_v52  ;;  %1613 = vmatpush.msra.mxu0 %v1152_v53  ;;  %v1095_v53 = vld [vmem:[%s2834_s29 + $0x4d8] sm:$0xff] }
 0x1e0   : > { %1678 = vmatpush.msra.mxu2 %v1033_v54  ;;  %1638 = vmatpush.msrb.mxu1 %v957_v55  ;;  %v1123_v54 = vld [vmem:[%s2834_s29 + $0x5b8] sm:$0xff]  ;;  %v1005_v55 = vld [vmem:[%s2834_s29 + $0x208] sm:$0xff] }
 0x1e1   : > { %1661 = vmatpush.msrb.mxu3 %v989_v21  ;;  %1614 = vmatpush.msra.mxu0 %v1150_v57  ;;  %v3178_v21 = vld [vmem:[%s3280_s1 + $0x68] sm:$0xff]  ;;  %v1059_v57 = vld [vmem:[%s2834_s29 + $0x3b8] sm:$0xff] }
 0x1e2   : > { %1679 = vmatpush.msra.mxu2 %v1031_v58  ;;  %1639 = vmatpush.msrb.mxu1 %v955_v59  ;;  %v1093_v58 = vld [vmem:[%s2834_s29 + $0x4c8] sm:$0xff] }
 0x1e3   : > { %1662 = vmatpush.msrb.mxu3 %v987_v60  ;;  %1615 = vmatpush.msra.mxu0 %v1148_v62  ;;  %v1057_v59 = vld [vmem:[%s2834_s29 + $0x3a8] sm:$0xff]  ;;  %v1091_v60 = vld [vmem:[%s2834_s29 + $0x4b8] sm:$0xff] }
 0x1e4   : > { %1581 = vmatmul.f32.gmra.mxu3 %v3095_v61  ;;  %1680 = vmatpush.msra.mxu2 %v1029_v63  ;;  %v1119_v62 = vld [vmem:[%s2834_s29 + $0x598] sm:$0xff]  ;;  %v1153_v63 = vld [vmem:[%s2834_s29 + $0x6a8] sm:$0xff] }
 0x1e5   : > { %1640 = vmatpush.msrb.mxu1 %v953_v0  ;;  %1663 = vmatpush.msrb.mxu3 %v985_v1  ;;  %v1055_v0 = vld [vmem:[%s2834_s29 + $0x398] sm:$0xff]  ;;  %v1089_v1 = vld [vmem:[%s2834_s29 + $0x4a8] sm:$0xff] }
 0x1e6   : > { %1535 = vmatmul.f32.gmra.mxu0 %v3104_v2  ;;  %1604 = vmatmul.f32.gmra.mxu2 %v3110_v3 }
 0x1e7   : > { %1616 = vmatpush.msra.mxu0 %v1146_v4  ;;  %1681 = vmatpush.msra.mxu2 %v1027_v5  ;;  %v1117_v4 = vld [vmem:[%s2834_s29 + $0x588] sm:$0xff]  ;;  %v1151_v5 = vld [vmem:[%s2834_s29 + $0x698] sm:$0xff] }
 0x1e8   : > { %1641 = vmatpush.msrb.mxu1 %v951_v6  ;;  %1664 = vmatpush.msrb.mxu3 %v983_v7  ;;  %v1792_v6 = vld [vmem:[%s3283_s4] sm:$0xff]  ;;  %v1053_v7 = vld [vmem:[%s2834_s29 + $0x388] sm:$0xff] }
 0x1e9   : > { %1558 = vmatmul.f32.gmra.mxu1 %v3120_v8  ;;  %1617 = vmatpush.msra.mxu0 %v1144_v9  ;;  %v1087_v9 = vld [vmem:[%s2834_s29 + $0x498] sm:$0xff] }
 0x1ea   : > { %1682 = vmatpush.msra.mxu2 %v1025_v10  ;;  %1642 = vmatpush.msrb.mxu1 %v949_v12  ;;  %v1115_v10 = vld [vmem:[%s2834_s29 + $0x578] sm:$0xff]  ;;  %v1149_v12 = vld [vmem:[%s2834_s29 + $0x688] sm:$0xff] }
 0x1eb   : > { %1665 = vmatpush.msrb.mxu3 %v981_v13  ;;  %1618 = vmatpush.msra.mxu0 %v1142_v14  ;;  %v1051_v13 = vld [vmem:[%s2834_s29 + $0x378] sm:$0xff]  ;;  %v1085_v14 = vld [vmem:[%s2834_s29 + $0x488] sm:$0xff] }
 0x1ec   : > { %1683 = vmatpush.msra.mxu2 %v1023_v15  ;;  %1643 = vmatpush.msrb.mxu1 %v947_v16  ;;  %v1113_v15 = vld [vmem:[%s2834_s29 + $0x568] sm:$0xff]  ;;  %v1147_v16 = vld [vmem:[%s2834_s29 + $0x678] sm:$0xff] }
 0x1ed   : > { %1666 = vmatpush.msrb.mxu3 %v979_v17  ;;  %1619 = vmatpush.msra.mxu0 %v1140_v18  ;;  %v1049_v17 = vld [vmem:[%s2834_s29 + $0x368] sm:$0xff]  ;;  %v1083_v18 = vld [vmem:[%s2834_s29 + $0x478] sm:$0xff] }
 0x1ee   : > { %1684 = vmatpush.msra.mxu2 %v1021_v20  ;;  %1644 = vmatpush.msrb.mxu1 %v945_v22  ;;  %v1111_v20 = vld [vmem:[%s2834_s29 + $0x558] sm:$0xff]  ;;  %v1145_v22 = vld [vmem:[%s2834_s29 + $0x668] sm:$0xff] }
 0x1ef   : > { %1667 = vmatpush.msrb.mxu3 %v977_v23  ;;  %1620 = vmatpush.msra.mxu0 %v1138_v24  ;;  %v1047_v23 = vld [vmem:[%s2834_s29 + $0x358] sm:$0xff]  ;;  %v1081_v24 = vld [vmem:[%s2834_s29 + $0x468] sm:$0xff] }
 0x1f0   : > { %1685 = vmatpush.msra.mxu2 %v1019_v25  ;;  %1645 = vmatpush.msrb.mxu1 %v943_v26  ;;  %v1109_v25 = vld [vmem:[%s2834_s29 + $0x548] sm:$0xff]  ;;  %v1143_v26 = vld [vmem:[%s2834_s29 + $0x658] sm:$0xff] }
 0x1f1   : > { %1668 = vmatpush.msrb.mxu3 %v975_v27  ;;  %1621 = vmatpush.msra.mxu0 %v1136_v19  ;;  %v1045_v27 = vld [vmem:[%s2834_s29 + $0x348] sm:$0xff]  ;;  %v1079_v19 = vld [vmem:[%s2834_s29 + $0x458] sm:$0xff] }
 0x1f2   : > { %1686 = vmatpush.msra.mxu2 %v1017_v28  ;;  %1646 = vmatpush.msrb.mxu1 %v941_v29  ;;  %v1107_v28 = vld [vmem:[%s2834_s29 + $0x538] sm:$0xff]  ;;  %v1141_v29 = vld [vmem:[%s2834_s29 + $0x648] sm:$0xff] }
 0x1f3   : > { %1669 = vmatpush.msrb.mxu3 %v973_v30  ;;  %1622 = vmatpush.msra.mxu0 %v1134_v33  ;;  %v1043_v30 = vld [vmem:[%s2834_s29 + $0x338] sm:$0xff]  ;;  %v1077_v33 = vld [vmem:[%s2834_s29 + $0x448] sm:$0xff] }
 0x1f4   : > { %1647 = vmatmul.f32.vlgmr.msrb.gmra.mxu1 %v2933_v11  ;;  %1670 = vmatmul.f32.vlgmr.msrb.gmra.mxu3 %v2979_v40  ;;  %v1099_v11 = vld [vmem:[%s2834_s29 + $0x4f8] sm:$0xff]  ;;  %v1009_v40 = vld [vmem:[%s2834_s29 + $0x228] sm:$0xff] }
 0x1f5   : > { %1687 = vmatpush.msra.mxu2 %v1015_v34  ;;  %1746 = vmatpush.msra.mxu3 %v1131_v35  ;;  %v1105_v34 = vld [vmem:[%s2834_s29 + $0x528] sm:$0xff]  ;;  %v1139_v35 = vld [vmem:[%s2834_s29 + $0x638] sm:$0xff] }
 0x1f6   : > { %1623 = vmatpush.msra.mxu0 %v1132_v47  ;;  %1723 = vmatpush.msra.mxu1 %v1099_v11  ;;  %v1041_v47 = vld [vmem:[%s2834_s29 + $0x328] sm:$0xff] }
 0x1f7   : > { %1688 = vmatpush.msra.mxu2 %v1013_v36  ;;  %1945 = vmatmul.msk.f32.vlgmr.msra.gmra.mxu0 %vm1463_vm1, %v3153_v37  ;;  %v1075_v36 = vld [vmem:[%s2834_s29 + $0x438] sm:$0xff]  ;;  %v1073_v11 = vld [vmem:[%s2834_s29 + $0x428] sm:$0xff] }
 0x1f8   : > { %1700 = vmatpush.msrb.mxu0 %v1067_v38  ;;  %1747 = vmatpush.msra.mxu3 %v1129_v39  ;;  %v1103_v38 = vld [vmem:[%s2834_s29 + $0x518] sm:$0xff]  ;;  %v1137_v39 = vld [vmem:[%s2834_s29 + $0x628] sm:$0xff] }
 0x1f9   : > { %1689 = vmatpush.msra.mxu2 %v1011_v42  ;;  %1724 = vmatpush.msra.mxu1 %v1097_v45  ;;  %v1039_v42 = vld [vmem:[%s2834_s29 + $0x318] sm:$0xff] }
 0x1fa   : > { %1701 = vmatpush.msrb.mxu0 %v1065_v43  ;;  %1748 = vmatpush.msra.mxu3 %v1127_v44  ;;  %v1101_v43 = vld [vmem:[%s2834_s29 + $0x508] sm:$0xff]  ;;  %v1135_v44 = vld [vmem:[%s2834_s29 + $0x618] sm:$0xff] }
 0x1fb   : > { %1690 = vmatpush.msra.mxu2 %v1009_v40  ;;  %1725 = vmatpush.msra.mxu1 %v1095_v53  ;;  %v1037_v40 = vld [vmem:[%s2834_s29 + $0x308] sm:$0xff]  ;;  %v1071_v45 = vld [vmem:[%s2834_s29 + $0x418] sm:$0xff] }
 0x1fc   : > { %1702 = vmatpush.msrb.mxu0 %v1063_v49  ;;  %1749 = vmatpush.msra.mxu3 %v1125_v50  ;;  %v1133_v49 = vld [vmem:[%s2834_s29 + $0x608] sm:$0xff] }
 0x1fd   : > { %1650 = vmatmul.f32.gmra.mxu1 %v2966_v32  ;;  %1673 = vmatmul.f32.gmra.mxu3 %v3003_v56  ;;  %v1121_v32 = vld [vmem:[%s2834_s29 + $0x5a8] sm:$0xff]  ;;  %v1155_v56 = vld [vmem:[%s2834_s29 + $0x6b8] sm:$0xff] }
 0x1fe   : > { %1691 = vmatpush.msra.mxu2 %v1007_v31  ;;  %1703 = vmatpush.msrb.mxu0 %v1061_v51  ;;  %v1069_v50 = vld [vmem:[%s2834_s29 + $0x408] sm:$0xff]  ;;  %s1940_s29 = sshll.u32 %s2754_s17, 5  ;;  %s1956_s17 = sshll.u32 (%p2076_p5), %s1931_s21, 4 }
 0x1ff   : > { %1750 = vmatpush.msra.mxu3 %v1123_v54  ;;  %1946 = vmatmul.msk.f32.gmra.mxu0 %vm1463_vm1, %v3178_v21  ;;  %s3251_s23 = scalar_lea.vmem [#allocation4], %s1940_s29  ;;  %s1833_s28 = scalar_lea.vmem (%p2076_p5), %s3284_s5, %s1956_s17 }
 0x200   : > { %1692 = vmatpush.msra.mxu2 %v1005_v55  ;;  %1704 = vmatpush.msrb.mxu0 %v1059_v57 }
 0x201   : > { %1693 = vmatmul.f32.vlgmr.msra.gmra.mxu2 %v3064_v46  ;;  %1726 = vmatpush.msra.mxu1 %v1093_v58  ;;  %v2011_v46 = vmov 0  }
 0x202   : > { %1751 = vmatpush.msra.mxu3 %v1121_v32  ;;  %1773 = vmatpush.msrb.mxu2 %v1155_v56 }
 0x203   : > { %1705 = vmatpush.msrb.mxu0 %v1057_v59  ;;  %1727 = vmatpush.msra.mxu1 %v1091_v60 }
 0x204   : > { %1752 = vmatpush.msra.mxu3 %v1119_v62  ;;  %1774 = vmatpush.msrb.mxu2 %v1153_v63 }
 0x205   : > { %1986 = vset.pattern.permute.xlu0 %v2011_v46  ;;  %1706 = vmatpush.msrb.mxu0 %v1055_v0 }
 0x206   : > { %1728 = vmatpush.msra.mxu1 %v1089_v1  ;;  %1753 = vmatpush.msra.mxu3 %v1117_v4 }
 0x207   : > { %1775 = vmatpush.msrb.mxu2 %v1151_v5  ;;  %1796 = vperm.xlu0 %1986, %v1792_v6  }
 0x208   : > { %1707 = vmatpush.msrb.mxu0 %v1053_v7  ;;  %1729 = vmatpush.msra.mxu1 %v1087_v9 }
 0x209   : > { %1754 = vmatpush.msra.mxu3 %v1115_v10  ;;  %1776 = vmatpush.msrb.mxu2 %v1149_v12 }
 0x20a   : > { %1708 = vmatpush.msrb.mxu0 %v1051_v13  ;;  %1696 = vmatmul.f32.gmra.mxu2 %v3104_v2  ;;  %v1793_v2 = vld [vmem:[%s3283_s4 + $0x8] sm:$0xff] }
 0x20b   : > { %1730 = vmatpush.msra.mxu1 %v1085_v14  ;;  %1755 = vmatpush.msra.mxu3 %v1113_v15 }
 0x20c   : > { %1777 = vmatpush.msrb.mxu2 %v1147_v16  ;;  %1709 = vmatpush.msrb.mxu0 %v1049_v17 }
 0x20d   : > { %1731 = vmatpush.msra.mxu1 %v1083_v18  ;;  %1756 = vmatpush.msra.mxu3 %v1111_v20 }
 0x20e   : > { %1778 = vmatpush.msrb.mxu2 %v1145_v22  ;;  %1710 = vmatpush.msrb.mxu0 %v1047_v23 }
 0x20f   : > { %1732 = vmatpush.msra.mxu1 %v1081_v24  ;;  %1757 = vmatpush.msra.mxu3 %v1109_v25 }
 0x210   : > { %1779 = vmatpush.msrb.mxu2 %v1143_v26  ;;  %1801 = vperm.xlu0 %1986, %v1793_v2  }
 0x211   : > { %1711 = vmatpush.msrb.mxu0 %v1045_v27  ;;  %1733 = vmatpush.msra.mxu1 %v1079_v19  ;;  %v1342_v51 = vpop.f32.mrf.mxu2 }
 0x212   : > { %1758 = vmatpush.msra.mxu3 %v1107_v28  ;;  %1780 = vmatpush.msrb.mxu2 %v1141_v29 }
 0x213   : > { %1712 = vmatpush.msrb.mxu0 %v1043_v30  ;;  %1734 = vmatpush.msra.mxu1 %v1077_v33 }
 0x214   : > { %1759 = vmatpush.msra.mxu3 %v1105_v34  ;;  %1781 = vmatpush.msrb.mxu2 %v1139_v35 }
 0x215   : > { %1713 = vmatpush.msrb.mxu0 %v1041_v47  ;;  %1735 = vmatpush.msra.mxu1 %v1075_v36 }
 0x216   : > { %1760 = vmatpush.msra.mxu3 %v1103_v38  ;;  %1782 = vmatpush.msrb.mxu2 %v1137_v39 }
 0x217   : > { %1714 = vmatpush.msrb.mxu0 %v1039_v42  ;;  %1736 = vmatpush.msra.mxu1 %v1073_v11 }
 0x218   : > { %1761 = vmatpush.msra.mxu3 %v1101_v43  ;;  %1783 = vmatpush.msrb.mxu2 %v1135_v44 }
 0x219   : > { %1762 = vmatmul.f32.vlgmr.msra.gmra.mxu3 %v3070_v48  ;;  %1715 = vmatpush.msrb.mxu0 %v1037_v40  ;;  %v1296_v48 = vpop.f32.mrf.mxu0 }
 0x21a   : > { %1737 = vmatpush.msra.mxu1 %v1071_v45  ;;  %1784 = vmatpush.msrb.mxu2 %v1133_v49 }
 0x21b   : > { %1716 = vmatmul.f32.vlgmr.msrb.gmra.mxu0 %v3080_v52  ;;  %1947 = vmatmul.msk.f32.vlgmr.msrb.gmra.mxu2 %vm1463_vm1, %v3153_v37  ;;  %v1388_v54 = vpop.f32.mrf.mxu3  ;;  %v1319_v37 = vpop.f32.mrf.mxu1 }
 0x21c   : > { %1738 = vmatpush.msra.mxu1 %v1069_v50  ;;  %v1320_v59 = vadd.f32 %v1319_v37, %v1296_v48 }
 0x21d   : > { %1739 = vmatmul.f32.vlgmr.msra.gmra.mxu1 %v3055_v41 }
 0x21e   : > { %v1343_v60 = vadd.f32 %v1342_v51, %v1320_v59 }
 0x21f   : > { %v1345_v52 = vpop.f32.mrf.mxu2 }
 0x221   : > { %1765 = vmatmul.f32.gmra.mxu3 %v3110_v3  ;;  %v1299_v31 = vpop.f32.mrf.mxu0 }
 0x223   : > { %1719 = vmatmul.f32.gmra.mxu0 %v3120_v8  ;;  %1948 = vmatmul.msk.f32.gmra.mxu2 %vm1463_vm1, %v3178_v21 }
 0x224   : > { %v1391_v58 = vpop.f32.mrf.mxu3 }
 0x225   : > { %1742 = vmatmul.f32.gmra.mxu1 %v3095_v61 }
 0x228   : > { %v1457_v57 = vpop.f32.mrf.mxu2 }
 0x229   : > { %v1365_v53 = vpop.f32.mrf.mxu0 }
 0x22a   : > { %v1366_v0 = vadd.f32 %v1365_v53, %v1343_v60 }
 0x22b   : > { %v1322_v41 = vpop.f32.mrf.mxu1 }
 0x22c   : > { %v1323_v1 = vadd.f32 %v1322_v41, %v1299_v31 }
 0x22d   : > { %v1487_v21 = vpop.f32.mrf.mxu3 }
 0x22e   : > { %v1488_v4 = vadd.f32 %v1487_v21, %v1366_v0  ;;  %v1346_v6 = vadd.f32 %v1345_v52, %v1323_v1 }
 0x231   : > { %v1368_v55 = vpop.f32.mrf.mxu0 }
 0x232   : > { %v3248_v3 = vpop.f32.mrf.mxu2  ;;  %v1369_v12 = vadd.f32 %v1368_v55, %v1346_v6 }
 0x237   : > { %v1490_v5 = vpop.f32.mrf.mxu3 }
 0x238   : > { %v1434_v8 = vpop.f32.mrf.mxu1  ;;  %v1491_v16 = vadd.f32 %v1490_v5, %v1369_v12 }
 0x239   : > { %v1411_v32 = vpop.f32.mrf.mxu0 }
 0x23a   : > { %v1412_v44 = vadd.f32 %v1411_v32, %v1388_v54 }
 0x23c   : > { %v1510_v61 = vpop.f32.mrf.mxu2  ;;  %v1435_v45 = vadd.f32 %v1434_v8, %v1412_v44 }
 0x23d   : > { %v1511_v46 = vadd.f32 %v1510_v61, %v1488_v4 }
 0x23e   : > { %v1458_v48 = vadd.f32 %v1457_v57, %v1435_v45 }
 0x245   : > { %v1513_v7 = vpop.f32.mrf.mxu2 }
 0x246   : > { %v1514_v17 = vadd.f32 %v1513_v7, %v1491_v16 }
 0x24a   : > { %v1414_v56 = vpop.f32.mrf.mxu0 }
 0x24b   : > { %v1415_v50 = vadd.f32 %v1414_v56, %v1391_v58 }
 0x24e   : > { %v1437_v62 = vpop.f32.mrf.mxu1 }
 0x24f   : > { %v1438_v52 = vadd.f32 %v1437_v62, %v1415_v50 }
 0x251   : > { %v1461_v21 = vadd.f32 %v3248_v3, %v1438_v52 }
 0x259   : > { %v1533_v63 = vpop.f32.mrf.mxu0 }
 0x25a   : > { %v1534_v9 = vadd.f32 %v1533_v63, %v1511_v46 }
 0x25c   : > { %v1556_v10 = vpop.f32.mrf.mxu1 }
 0x25d   : > { %v1557_v14 = vadd.f32 %v1556_v10, %v1534_v9  ;;  %v1579_v15 = vpop.f32.mrf.mxu3 }
 0x25f   : > { %v1580_v18 = vadd.f32 %v1579_v15, %v1557_v14  ;;  %v1602_v20 = vpop.f32.mrf.mxu2 }
 0x261   : > { %v1603_v25 = vadd.f32 %v1602_v20, %v1580_v18 }
 0x263   : > { %v1536_v13 = vpop.f32.mrf.mxu0 }
 0x264   : > { %v1537_v22 = vadd.f32 %v1536_v13, %v1514_v17 }
 0x266   : > { %v1559_v23 = vpop.f32.mrf.mxu1 }
 0x267   : > { %v1560_v26 = vadd.f32 %v1559_v23, %v1537_v22  ;;  %v1582_v2 = vpop.f32.mrf.mxu3 }
 0x269   : > { %v1583_v19 = vadd.f32 %v1582_v2, %v1560_v26  ;;  %v1605_v29 = vpop.f32.mrf.mxu2 }
 0x26b   : > { %v1606_v35 = vadd.f32 %v1605_v29, %v1583_v19 }
 0x271   : > { %v1648_v11 = vpop.f32.mrf.mxu1 }
 0x272   : > { %v1649_v51 = vadd.f32 %v1648_v11, %v1458_v48 }
 0x274   : > { %v1625_v24 = vpop.f32.mrf.mxu0 }
 0x275   : > { %v1626_v27 = vadd.f32 %v1625_v24, %v1603_v25 }
 0x277   : > { %v1671_v40 = vpop.f32.mrf.mxu3 }
 0x278   : > { %v1672_v55 = vadd.f32 %v1671_v40, %v1649_v51 }
 0x279   : > { %v1797_v28 = vpop.permute.xlu0 %1796 }
 0x27a   : > { %v1804_v30 = vadd.f32 %v1797_v28, %v1626_v27  ;;  %v1651_v31 = vpop.f32.mrf.mxu1 }
 0x27b   : > { %v1652_v63 = vadd.f32 %v1651_v31, %v1461_v21 }
 0x27c   : > { %vm1808_vm2 = vcmp.ge.f32.partialorder %v1804_v30, 0.0  ;;  %v1812_v33 = vmul.f32 0.2, %v1804_v30  ;;  %v1628_v34 = vpop.f32.mrf.mxu0 }
 0x27d   : > { %v1629_v36 = vadd.f32 %v1628_v34, %v1606_v35 }
 0x27e   : > { %v1816_v47 = vsel %vm1808_vm2, %v1804_v30, %v1812_v33 }
 0x27f   : > { %1820 = vst [vmem:[%s3251_s23] sm:$0xff] %v1816_v47 }
 0x280   : > { %v1674_v53 = vpop.f32.mrf.mxu3 }
 0x281   : > { %v1675_v8 = vadd.f32 %v1674_v53, %v1652_v63 }
 0x282   : > { %v1802_v38 = vpop.permute.xlu0 %1801 }
 0x283   : > { %v1806_v39 = vadd.f32 %v1802_v38, %v1629_v36 }
 0x284   : > { %v1694_v49 = vpop.f32.mrf.mxu2 }
 0x285   : > { %vm1810_vm3 = vcmp.ge.f32.partialorder %v1806_v39, 0.0  ;;  %v1814_v42 = vmul.f32 0.2, %v1806_v39  ;;  %v1695_v37 = vadd.f32 %v1694_v49, %v1672_v55 }
 0x286   : > { %v1846_v16 = vld [vmem:[%s3251_s23] sm:$0xff] (%p2076_p5) }
 0x287   : > { %v1818_v43 = vsel %vm1810_vm3, %v1806_v39, %v1814_v42  ;;  %1847 = vst [vmem:[%s1833_s28] sm:$0xff] (%p2076_p5), %v1846_v16 }
 0x288   : > { %1822 = vst [vmem:[%s3251_s23 + $0x10] sm:$0xff] %v1818_v43 }
 0x28d   : > { %v1697_v41 = vpop.f32.mrf.mxu2 }
 0x28e   : > { %v1698_v58 = vadd.f32 %v1697_v41, %v1675_v8 }
 0x28f   : > { %v1850_v18 = vld [vmem:[%s3251_s23 + $0x10] sm:$0xff] (%p2076_p5) }
 0x290   : > { %1851 = vst [vmem:[%s1833_s28 + $0x20] sm:$0xff] (%p2076_p5), %v1850_v18 }
 0x298   : > { %v1717_v59 = vpop.f32.mrf.mxu0 }
 0x299   : > { %v1718_v60 = vadd.f32 %v1717_v59, %v1695_v37 }
 0x29a   : > { %v1740_v61 = vpop.f32.mrf.mxu1 }
 0x29b   : > { %v1741_v54 = vadd.f32 %v1740_v61, %v1718_v60 }
 0x29c   : > { %v1763_v32 = vpop.f32.mrf.mxu3 }
 0x29d   : > { %v1764_v0 = vadd.f32 %v1763_v32, %v1741_v54 }
 0x29e   : > { %v1786_v57 = vpop.f32.mrf.mxu2 }
 0x29f   : > { %v1787_v56 = vadd.f32 %v1786_v57, %v1764_v0 }
 0x2a0   : > { %v1720_v1 = vpop.f32.mrf.mxu0 }
 0x2a1   : > { %v1721_v4 = vadd.f32 %v1720_v1, %v1698_v58  ;;  %v1805_v62 = vadd.f32 %v1797_v28, %v1787_v56 }
 0x2a2   : > { %v1743_v5 = vpop.f32.mrf.mxu1 }
 0x2a3   : > { %v1744_v46 = vadd.f32 %v1743_v5, %v1721_v4  ;;  %vm1809_vm4 = vcmp.ge.f32.partialorder %v1805_v62, 0.0  ;;  %v1813_v6 = vmul.f32 0.2, %v1805_v62 }
 0x2a4   : > { %v1766_v3 = vpop.f32.mrf.mxu3 }
 0x2a5   : > { %v1767_v7 = vadd.f32 %v1766_v3, %v1744_v46  ;;  %v1817_v9 = vsel %vm1809_vm4, %v1805_v62, %v1813_v6 }
 0x2a6   : > { %1821 = vst [vmem:[%s3251_s23 + $0x8] sm:$0xff] %v1817_v9  ;;  %v1789_v10 = vpop.f32.mrf.mxu2 }
 0x2a7   : > { %v1790_v12 = vadd.f32 %v1789_v10, %v1767_v7 }
 0x2a9   : > { %v1807_v13 = vadd.f32 %v1802_v38, %v1790_v12 }
 0x2aa   : > { %1830 = sbr.rel (!%p2076_p5) target bundleno = 695 (0x2b7), region = 90 }
 0x2ab   : > { %vm1811_vm5 = vcmp.ge.f32.partialorder %v1807_v13, 0.0  ;;  %v1815_v14 = vmul.f32 0.2, %v1807_v13 }
 0x2ad   : > { %v1819_v15 = vsel %vm1811_vm5, %v1807_v13, %v1815_v14  ;;  %v1848_v17 = vld [vmem:[%s3251_s23 + $0x8] sm:$0xff] (%p2076_p5) }
 0x2ae   : > { %1823 = vst [vmem:[%s3251_s23 + $0x18] sm:$0xff] %v1819_v15 }
 0x2af   : > { %1849 = vst [vmem:[%s1833_s28 + $0x8] sm:$0xff] %v1848_v17 }
 0x2b5   : > { %v1852_v20 = vld [vmem:[%s3251_s23 + $0x18] sm:$0xff] }
 0x2b6   : > { %1853 = vst [vmem:[%s1833_s28 + $0x28] sm:$0xff] %v1852_v20 }
 0x2b7 PF: > { %p12_p10 = scmp.ge.s32.totalorder %s2059_s22, 4   ;;  %s3287_s18 = smov %s2005_s19 }
 0x2b8   : > { %s3288_s19 = smov %s2070_s25  ;;  %s3289_s20 = smov %s2059_s22 }
 0x2b9   :  { %14 = sbr.rel (!%p12_p10) target bundleno = 2 (0x2), region = 152 }

// kernel: _lambda_.23
= control target key start
LH: loop header
LB: loop body
LE: loop exit
PB: predicated region body
PF: predicated region fallthrough
CT: control target
= control target key end

     0   :  { %s840_s12 = smov 0   ;;  %s842_s13 = smov 0   ;;  %s1251_s0 = inlined_call_operand.vmem [shape: f32[432,512], index: 0, kind: input, shape index: {}]   ;;  %s1252_s1 = inlined_call_operand.vmem [shape: f32[6,432], index: 1, kind: input, shape index: {}]   ;;  %s1253_s2 = inlined_call_operand.vmem [shape: f32[6,1], index: 2, kind: input, shape index: {}]   ;;  %s1254_s3 = inlined_call_operand.vmem [shape: f32[6,512], index: 3, kind: output, shape index: {}]  }
   0x1   :  { %s844_s14 = smov 0  }
   0x2 LB: > { %s753_s15 = sadd.s32 4294967295, %s817_s14   ;;  %s857_s16 = sadd.s32 1, %s817_s14   ;;  %s817_s14 = sphi %s844_s14, %s1257_s14   ;;  %s813_s13 = sphi %s842_s13, %s1256_s13   ;;  %s809_s12 = sphi %s840_s12, %s1255_s12  }
   0x3   : > { %s17_s17 = ssub.s32 %s817_s14, %s857_s16  ;;  %s20_s18 = sadd.s32 1, %s813_s13 }
   0x4   : > { %p18_p0 = scmp.eq.s32.totalorder %s17_s17, 0  ;;  %p27_p1 = scmp.ne.s32.totalorder %s813_s13, %s809_s12 }
   0x5   : > { %p28_p2 = scmp.eq.s32.totalorder %s817_s14, 0  ;;  %p756_p4 = scmp.ge.s32.totalorder %s817_s14, 2 }
   0x6   : > { %s866_s19 = scalar_select %p18_p0, %s813_s13, %s20_s18  }
   0x7   : > { %p29_p3 = por %p28_p2, %p27_p1  ;;  %127 = sbr.rel (%p756_p4) target bundleno = 124 (0x7c), region = 24 }
   0xc   : > { %130 = sbr.rel (!%p29_p3) target bundleno = 124 (0x7c), region = 28  ;;  %s132_s20 = sand.u32 (%p29_p3), 1, %s813_s13  }
   0xd   : > { %s766_s21 = sshll.u32 (%p29_p3), %s817_s14, 4  ;;  %s767_s22 = smul.u32 (%p29_p3), 864, %s132_s20 }
   0xe   : > { %s874_s25 = scalar_lea.vmem (%p29_p3), %s1251_s0, %s766_s21 }
   0xf   : > { %v150_v0 = vld [vmem:[%s874_s25] sm:$0xff] (%p29_p3)  ;;  %v152_v1 = vld [vmem:[%s874_s25 + $0x8] sm:$0xff] (%p29_p3)  ;;  %s879_s26 = scalar_lea.vmem (%p29_p3), [#allocation2], %s767_s22 }
  0x10   : > { %v154_v2 = vld [vmem:[%s874_s25 + $0x20] sm:$0xff] (%p29_p3)  ;;  %151 = vst [vmem:[%s879_s26] sm:$0xff] (%p29_p3), %v150_v0  ;;  %v156_v3 = vld [vmem:[%s874_s25 + $0x28] sm:$0xff] (%p29_p3) }
  0x11   : > { %153 = vst [vmem:[%s879_s26 + $0x8] sm:$0xff] %v152_v1  ;;  %v158_v4 = vld [vmem:[%s874_s25 + $0x40] sm:$0xff]  ;;  %v160_v5 = vld [vmem:[%s874_s25 + $0x48] sm:$0xff] }
  0x12   : > { %155 = vst [vmem:[%s879_s26 + $0x10] sm:$0xff] %v154_v2  ;;  %v162_v6 = vld [vmem:[%s874_s25 + $0x60] sm:$0xff]  ;;  %v164_v7 = vld [vmem:[%s874_s25 + $0x68] sm:$0xff] }
  0x13   : > { %157 = vst [vmem:[%s879_s26 + $0x18] sm:$0xff] %v156_v3  ;;  %v166_v8 = vld [vmem:[%s874_s25 + $0x80] sm:$0xff]  ;;  %v168_v9 = vld [vmem:[%s874_s25 + $0x88] sm:$0xff] }
  0x14   : > { %159 = vst [vmem:[%s879_s26 + $0x20] sm:$0xff] %v158_v4  ;;  %v170_v10 = vld [vmem:[%s874_s25 + $0xa0] sm:$0xff]  ;;  %v172_v11 = vld [vmem:[%s874_s25 + $0xa8] sm:$0xff] }
  0x15   : > { %161 = vst [vmem:[%s879_s26 + $0x28] sm:$0xff] %v160_v5  ;;  %v174_v12 = vld [vmem:[%s874_s25 + $0xc0] sm:$0xff]  ;;  %v176_v13 = vld [vmem:[%s874_s25 + $0xc8] sm:$0xff] }
  0x16   : > { %163 = vst [vmem:[%s879_s26 + $0x30] sm:$0xff] %v162_v6  ;;  %v178_v14 = vld [vmem:[%s874_s25 + $0xe0] sm:$0xff]  ;;  %v180_v15 = vld [vmem:[%s874_s25 + $0xe8] sm:$0xff] }
  0x17   : > { %165 = vst [vmem:[%s879_s26 + $0x38] sm:$0xff] %v164_v7  ;;  %v182_v16 = vld [vmem:[%s874_s25 + $0x100] sm:$0xff]  ;;  %v184_v17 = vld [vmem:[%s874_s25 + $0x108] sm:$0xff] }
  0x18   : > { %167 = vst [vmem:[%s879_s26 + $0x40] sm:$0xff] %v166_v8  ;;  %v186_v18 = vld [vmem:[%s874_s25 + $0x120] sm:$0xff]  ;;  %v188_v19 = vld [vmem:[%s874_s25 + $0x128] sm:$0xff] }
  0x19   : > { %169 = vst [vmem:[%s879_s26 + $0x48] sm:$0xff] %v168_v9  ;;  %v190_v20 = vld [vmem:[%s874_s25 + $0x140] sm:$0xff]  ;;  %v192_v21 = vld [vmem:[%s874_s25 + $0x148] sm:$0xff] }
  0x1a   : > { %171 = vst [vmem:[%s879_s26 + $0x50] sm:$0xff] %v170_v10  ;;  %v194_v22 = vld [vmem:[%s874_s25 + $0x160] sm:$0xff]  ;;  %v196_v23 = vld [vmem:[%s874_s25 + $0x168] sm:$0xff] }
  0x1b   : > { %173 = vst [vmem:[%s879_s26 + $0x58] sm:$0xff] %v172_v11  ;;  %v198_v24 = vld [vmem:[%s874_s25 + $0x180] sm:$0xff]  ;;  %v200_v25 = vld [vmem:[%s874_s25 + $0x188] sm:$0xff] }
  0x1c   : > { %175 = vst [vmem:[%s879_s26 + $0x60] sm:$0xff] %v174_v12  ;;  %v202_v26 = vld [vmem:[%s874_s25 + $0x1a0] sm:$0xff]  ;;  %v204_v27 = vld [vmem:[%s874_s25 + $0x1a8] sm:$0xff] }
  0x1d   : > { %177 = vst [vmem:[%s879_s26 + $0x68] sm:$0xff] %v176_v13  ;;  %v206_v28 = vld [vmem:[%s874_s25 + $0x1c0] sm:$0xff]  ;;  %v208_v29 = vld [vmem:[%s874_s25 + $0x1c8] sm:$0xff] }
  0x1e   : > { %179 = vst [vmem:[%s879_s26 + $0x70] sm:$0xff] %v178_v14  ;;  %v210_v30 = vld [vmem:[%s874_s25 + $0x1e0] sm:$0xff]  ;;  %v212_v31 = vld [vmem:[%s874_s25 + $0x1e8] sm:$0xff] }
  0x1f   : > { %181 = vst [vmem:[%s879_s26 + $0x78] sm:$0xff] %v180_v15  ;;  %v214_v32 = vld [vmem:[%s874_s25 + $0x200] sm:$0xff]  ;;  %v216_v33 = vld [vmem:[%s874_s25 + $0x208] sm:$0xff] }
  0x20   : > { %183 = vst [vmem:[%s879_s26 + $0x80] sm:$0xff] %v182_v16  ;;  %v218_v34 = vld [vmem:[%s874_s25 + $0x220] sm:$0xff]  ;;  %v220_v35 = vld [vmem:[%s874_s25 + $0x228] sm:$0xff] }
  0x21   : > { %185 = vst [vmem:[%s879_s26 + $0x88] sm:$0xff] %v184_v17  ;;  %v222_v36 = vld [vmem:[%s874_s25 + $0x240] sm:$0xff]  ;;  %v224_v37 = vld [vmem:[%s874_s25 + $0x248] sm:$0xff] }
  0x22   : > { %187 = vst [vmem:[%s879_s26 + $0x90] sm:$0xff] %v186_v18  ;;  %v226_v38 = vld [vmem:[%s874_s25 + $0x260] sm:$0xff]  ;;  %v228_v39 = vld [vmem:[%s874_s25 + $0x268] sm:$0xff] }
  0x23   : > { %189 = vst [vmem:[%s879_s26 + $0x98] sm:$0xff] %v188_v19  ;;  %v230_v40 = vld [vmem:[%s874_s25 + $0x280] sm:$0xff]  ;;  %v232_v41 = vld [vmem:[%s874_s25 + $0x288] sm:$0xff] }
  0x24   : > { %191 = vst [vmem:[%s879_s26 + $0xa0] sm:$0xff] %v190_v20  ;;  %v234_v42 = vld [vmem:[%s874_s25 + $0x2a0] sm:$0xff]  ;;  %v236_v43 = vld [vmem:[%s874_s25 + $0x2a8] sm:$0xff] }
  0x25   : > { %193 = vst [vmem:[%s879_s26 + $0xa8] sm:$0xff] %v192_v21  ;;  %v238_v44 = vld [vmem:[%s874_s25 + $0x2c0] sm:$0xff]  ;;  %v240_v45 = vld [vmem:[%s874_s25 + $0x2c8] sm:$0xff] }
  0x26   : > { %195 = vst [vmem:[%s879_s26 + $0xb0] sm:$0xff] %v194_v22  ;;  %v242_v46 = vld [vmem:[%s874_s25 + $0x2e0] sm:$0xff]  ;;  %v244_v47 = vld [vmem:[%s874_s25 + $0x2e8] sm:$0xff] }
  0x27   : > { %197 = vst [vmem:[%s879_s26 + $0xb8] sm:$0xff] %v196_v23  ;;  %v246_v48 = vld [vmem:[%s874_s25 + $0x300] sm:$0xff]  ;;  %v248_v49 = vld [vmem:[%s874_s25 + $0x308] sm:$0xff] }
  0x28   : > { %199 = vst [vmem:[%s879_s26 + $0xc0] sm:$0xff] %v198_v24  ;;  %v250_v50 = vld [vmem:[%s874_s25 + $0x320] sm:$0xff]  ;;  %v252_v51 = vld [vmem:[%s874_s25 + $0x328] sm:$0xff] }
  0x29   : > { %201 = vst [vmem:[%s879_s26 + $0xc8] sm:$0xff] %v200_v25  ;;  %v254_v52 = vld [vmem:[%s874_s25 + $0x340] sm:$0xff]  ;;  %v256_v53 = vld [vmem:[%s874_s25 + $0x348] sm:$0xff] }
  0x2a   : > { %203 = vst [vmem:[%s879_s26 + $0xd0] sm:$0xff] %v202_v26  ;;  %v258_v54 = vld [vmem:[%s874_s25 + $0x360] sm:$0xff]  ;;  %v260_v55 = vld [vmem:[%s874_s25 + $0x368] sm:$0xff] }
  0x2b   : > { %205 = vst [vmem:[%s879_s26 + $0xd8] sm:$0xff] %v204_v27  ;;  %v262_v56 = vld [vmem:[%s874_s25 + $0x380] sm:$0xff]  ;;  %v264_v57 = vld [vmem:[%s874_s25 + $0x388] sm:$0xff] }
  0x2c   : > { %207 = vst [vmem:[%s879_s26 + $0xe0] sm:$0xff] %v206_v28  ;;  %v266_v58 = vld [vmem:[%s874_s25 + $0x3a0] sm:$0xff]  ;;  %v268_v59 = vld [vmem:[%s874_s25 + $0x3a8] sm:$0xff] }
  0x2d   : > { %209 = vst [vmem:[%s879_s26 + $0xe8] sm:$0xff] %v208_v29  ;;  %v270_v60 = vld [vmem:[%s874_s25 + $0x3c0] sm:$0xff]  ;;  %v272_v61 = vld [vmem:[%s874_s25 + $0x3c8] sm:$0xff] }
  0x2e   : > { %211 = vst [vmem:[%s879_s26 + $0xf0] sm:$0xff] %v210_v30  ;;  %v274_v62 = vld [vmem:[%s874_s25 + $0x3e0] sm:$0xff]  ;;  %v276_v63 = vld [vmem:[%s874_s25 + $0x3e8] sm:$0xff] }
  0x2f   : > { %213 = vst [vmem:[%s879_s26 + $0xf8] sm:$0xff] %v212_v31  ;;  %v278_v0 = vld [vmem:[%s874_s25 + $0x400] sm:$0xff]  ;;  %v280_v1 = vld [vmem:[%s874_s25 + $0x408] sm:$0xff] }
  0x30   : > { %215 = vst [vmem:[%s879_s26 + $0x100] sm:$0xff] %v214_v32  ;;  %v282_v2 = vld [vmem:[%s874_s25 + $0x420] sm:$0xff]  ;;  %v284_v3 = vld [vmem:[%s874_s25 + $0x428] sm:$0xff] }
  0x31   : > { %217 = vst [vmem:[%s879_s26 + $0x108] sm:$0xff] %v216_v33  ;;  %v286_v4 = vld [vmem:[%s874_s25 + $0x440] sm:$0xff]  ;;  %v288_v5 = vld [vmem:[%s874_s25 + $0x448] sm:$0xff] }
  0x32   : > { %219 = vst [vmem:[%s879_s26 + $0x110] sm:$0xff] %v218_v34  ;;  %v290_v6 = vld [vmem:[%s874_s25 + $0x460] sm:$0xff]  ;;  %v292_v7 = vld [vmem:[%s874_s25 + $0x468] sm:$0xff] }
  0x33   : > { %221 = vst [vmem:[%s879_s26 + $0x118] sm:$0xff] %v220_v35  ;;  %v294_v8 = vld [vmem:[%s874_s25 + $0x480] sm:$0xff]  ;;  %v296_v9 = vld [vmem:[%s874_s25 + $0x488] sm:$0xff] }
  0x34   : > { %223 = vst [vmem:[%s879_s26 + $0x120] sm:$0xff] %v222_v36  ;;  %v298_v10 = vld [vmem:[%s874_s25 + $0x4a0] sm:$0xff]  ;;  %v300_v11 = vld [vmem:[%s874_s25 + $0x4a8] sm:$0xff] }
  0x35   : > { %225 = vst [vmem:[%s879_s26 + $0x128] sm:$0xff] %v224_v37  ;;  %v302_v12 = vld [vmem:[%s874_s25 + $0x4c0] sm:$0xff]  ;;  %v304_v13 = vld [vmem:[%s874_s25 + $0x4c8] sm:$0xff] }
  0x36   : > { %227 = vst [vmem:[%s879_s26 + $0x130] sm:$0xff] %v226_v38  ;;  %v306_v14 = vld [vmem:[%s874_s25 + $0x4e0] sm:$0xff]  ;;  %v308_v15 = vld [vmem:[%s874_s25 + $0x4e8] sm:$0xff] }
  0x37   : > { %229 = vst [vmem:[%s879_s26 + $0x138] sm:$0xff] %v228_v39  ;;  %v310_v16 = vld [vmem:[%s874_s25 + $0x500] sm:$0xff]  ;;  %v312_v17 = vld [vmem:[%s874_s25 + $0x508] sm:$0xff] }
  0x38   : > { %231 = vst [vmem:[%s879_s26 + $0x140] sm:$0xff] %v230_v40  ;;  %v314_v18 = vld [vmem:[%s874_s25 + $0x520] sm:$0xff]  ;;  %v316_v19 = vld [vmem:[%s874_s25 + $0x528] sm:$0xff] }
  0x39   : > { %233 = vst [vmem:[%s879_s26 + $0x148] sm:$0xff] %v232_v41  ;;  %v318_v20 = vld [vmem:[%s874_s25 + $0x540] sm:$0xff]  ;;  %v320_v21 = vld [vmem:[%s874_s25 + $0x548] sm:$0xff] }
  0x3a   : > { %235 = vst [vmem:[%s879_s26 + $0x150] sm:$0xff] %v234_v42  ;;  %v322_v22 = vld [vmem:[%s874_s25 + $0x560] sm:$0xff]  ;;  %v324_v23 = vld [vmem:[%s874_s25 + $0x568] sm:$0xff] }
  0x3b   : > { %237 = vst [vmem:[%s879_s26 + $0x158] sm:$0xff] %v236_v43  ;;  %v326_v24 = vld [vmem:[%s874_s25 + $0x580] sm:$0xff]  ;;  %v328_v25 = vld [vmem:[%s874_s25 + $0x588] sm:$0xff] }
  0x3c   : > { %239 = vst [vmem:[%s879_s26 + $0x160] sm:$0xff] %v238_v44  ;;  %v330_v26 = vld [vmem:[%s874_s25 + $0x5a0] sm:$0xff]  ;;  %v332_v27 = vld [vmem:[%s874_s25 + $0x5a8] sm:$0xff] }
  0x3d   : > { %241 = vst [vmem:[%s879_s26 + $0x168] sm:$0xff] %v240_v45  ;;  %v334_v28 = vld [vmem:[%s874_s25 + $0x5c0] sm:$0xff]  ;;  %v336_v29 = vld [vmem:[%s874_s25 + $0x5c8] sm:$0xff] }
  0x3e   : > { %243 = vst [vmem:[%s879_s26 + $0x170] sm:$0xff] %v242_v46  ;;  %v338_v30 = vld [vmem:[%s874_s25 + $0x5e0] sm:$0xff]  ;;  %v340_v31 = vld [vmem:[%s874_s25 + $0x5e8] sm:$0xff] }
  0x3f   : > { %245 = vst [vmem:[%s879_s26 + $0x178] sm:$0xff] %v244_v47  ;;  %v342_v32 = vld [vmem:[%s874_s25 + $0x600] sm:$0xff]  ;;  %v344_v33 = vld [vmem:[%s874_s25 + $0x608] sm:$0xff] }
  0x40   : > { %247 = vst [vmem:[%s879_s26 + $0x180] sm:$0xff] %v246_v48  ;;  %v346_v34 = vld [vmem:[%s874_s25 + $0x620] sm:$0xff]  ;;  %v348_v35 = vld [vmem:[%s874_s25 + $0x628] sm:$0xff] }
  0x41   : > { %249 = vst [vmem:[%s879_s26 + $0x188] sm:$0xff] %v248_v49  ;;  %v350_v36 = vld [vmem:[%s874_s25 + $0x640] sm:$0xff]  ;;  %v352_v37 = vld [vmem:[%s874_s25 + $0x648] sm:$0xff] }
  0x42   : > { %251 = vst [vmem:[%s879_s26 + $0x190] sm:$0xff] %v250_v50  ;;  %v354_v38 = vld [vmem:[%s874_s25 + $0x660] sm:$0xff]  ;;  %v356_v39 = vld [vmem:[%s874_s25 + $0x668] sm:$0xff] }
  0x43   : > { %253 = vst [vmem:[%s879_s26 + $0x198] sm:$0xff] %v252_v51  ;;  %v358_v40 = vld [vmem:[%s874_s25 + $0x680] sm:$0xff]  ;;  %v360_v41 = vld [vmem:[%s874_s25 + $0x688] sm:$0xff] }
  0x44   : > { %255 = vst [vmem:[%s879_s26 + $0x1a0] sm:$0xff] %v254_v52  ;;  %v362_v42 = vld [vmem:[%s874_s25 + $0x6a0] sm:$0xff]  ;;  %v364_v43 = vld [vmem:[%s874_s25 + $0x6a8] sm:$0xff] }
  0x45   : > { %257 = vst [vmem:[%s879_s26 + $0x1a8] sm:$0xff] %v256_v53 }
  0x46   : > { %259 = vst [vmem:[%s879_s26 + $0x1b0] sm:$0xff] %v258_v54 }
  0x47   : > { %261 = vst [vmem:[%s879_s26 + $0x1b8] sm:$0xff] %v260_v55 }
  0x48   : > { %263 = vst [vmem:[%s879_s26 + $0x1c0] sm:$0xff] %v262_v56 }
  0x49   : > { %265 = vst [vmem:[%s879_s26 + $0x1c8] sm:$0xff] %v264_v57 }
  0x4a   : > { %267 = vst [vmem:[%s879_s26 + $0x1d0] sm:$0xff] %v266_v58 }
  0x4b   : > { %269 = vst [vmem:[%s879_s26 + $0x1d8] sm:$0xff] %v268_v59 }
  0x4c   : > { %271 = vst [vmem:[%s879_s26 + $0x1e0] sm:$0xff] %v270_v60 }
  0x4d   : > { %273 = vst [vmem:[%s879_s26 + $0x1e8] sm:$0xff] %v272_v61 }
  0x4e   : > { %275 = vst [vmem:[%s879_s26 + $0x1f0] sm:$0xff] %v274_v62 }
  0x4f   : > { %277 = vst [vmem:[%s879_s26 + $0x1f8] sm:$0xff] %v276_v63 }
  0x50   : > { %279 = vst [vmem:[%s879_s26 + $0x200] sm:$0xff] %v278_v0 }
  0x51   : > { %281 = vst [vmem:[%s879_s26 + $0x208] sm:$0xff] %v280_v1 }
  0x52   : > { %283 = vst [vmem:[%s879_s26 + $0x210] sm:$0xff] %v282_v2 }
  0x53   : > { %285 = vst [vmem:[%s879_s26 + $0x218] sm:$0xff] %v284_v3 }
  0x54   : > { %287 = vst [vmem:[%s879_s26 + $0x220] sm:$0xff] %v286_v4 }
  0x55   : > { %289 = vst [vmem:[%s879_s26 + $0x228] sm:$0xff] %v288_v5 }
  0x56   : > { %291 = vst [vmem:[%s879_s26 + $0x230] sm:$0xff] %v290_v6 }
  0x57   : > { %293 = vst [vmem:[%s879_s26 + $0x238] sm:$0xff] %v292_v7 }
  0x58   : > { %295 = vst [vmem:[%s879_s26 + $0x240] sm:$0xff] %v294_v8 }
  0x59   : > { %297 = vst [vmem:[%s879_s26 + $0x248] sm:$0xff] %v296_v9 }
  0x5a   : > { %299 = vst [vmem:[%s879_s26 + $0x250] sm:$0xff] %v298_v10 }
  0x5b   : > { %301 = vst [vmem:[%s879_s26 + $0x258] sm:$0xff] %v300_v11 }
  0x5c   : > { %303 = vst [vmem:[%s879_s26 + $0x260] sm:$0xff] %v302_v12 }
  0x5d   : > { %305 = vst [vmem:[%s879_s26 + $0x268] sm:$0xff] %v304_v13 }
  0x5e   : > { %307 = vst [vmem:[%s879_s26 + $0x270] sm:$0xff] %v306_v14 }
  0x5f   : > { %309 = vst [vmem:[%s879_s26 + $0x278] sm:$0xff] %v308_v15 }
  0x60   : > { %311 = vst [vmem:[%s879_s26 + $0x280] sm:$0xff] %v310_v16 }
  0x61   : > { %313 = vst [vmem:[%s879_s26 + $0x288] sm:$0xff] %v312_v17 }
  0x62   : > { %315 = vst [vmem:[%s879_s26 + $0x290] sm:$0xff] %v314_v18 }
  0x63   : > { %317 = vst [vmem:[%s879_s26 + $0x298] sm:$0xff] %v316_v19 }
  0x64   : > { %319 = vst [vmem:[%s879_s26 + $0x2a0] sm:$0xff] %v318_v20 }
  0x65   : > { %321 = vst [vmem:[%s879_s26 + $0x2a8] sm:$0xff] %v320_v21 }
  0x66   : > { %323 = vst [vmem:[%s879_s26 + $0x2b0] sm:$0xff] %v322_v22 }
  0x67   : > { %325 = vst [vmem:[%s879_s26 + $0x2b8] sm:$0xff] %v324_v23 }
  0x68   : > { %327 = vst [vmem:[%s879_s26 + $0x2c0] sm:$0xff] %v326_v24 }
  0x69   : > { %329 = vst [vmem:[%s879_s26 + $0x2c8] sm:$0xff] %v328_v25 }
  0x6a   : > { %331 = vst [vmem:[%s879_s26 + $0x2d0] sm:$0xff] %v330_v26 }
  0x6b   : > { %333 = vst [vmem:[%s879_s26 + $0x2d8] sm:$0xff] %v332_v27 }
  0x6c   : > { %335 = vst [vmem:[%s879_s26 + $0x2e0] sm:$0xff] %v334_v28 }
  0x6d   : > { %337 = vst [vmem:[%s879_s26 + $0x2e8] sm:$0xff] %v336_v29 }
  0x6e   : > { %339 = vst [vmem:[%s879_s26 + $0x2f0] sm:$0xff] %v338_v30 }
  0x6f   : > { %341 = vst [vmem:[%s879_s26 + $0x2f8] sm:$0xff] %v340_v31 }
  0x70   : > { %343 = vst [vmem:[%s879_s26 + $0x300] sm:$0xff] %v342_v32 }
  0x71   : > { %345 = vst [vmem:[%s879_s26 + $0x308] sm:$0xff] %v344_v33 }
  0x72   : > { %347 = vst [vmem:[%s879_s26 + $0x310] sm:$0xff] %v346_v34 }
  0x73   : > { %349 = vst [vmem:[%s879_s26 + $0x318] sm:$0xff] %v348_v35 }
  0x74   : > { %351 = vst [vmem:[%s879_s26 + $0x320] sm:$0xff] %v350_v36 }
  0x75   : > { %353 = vst [vmem:[%s879_s26 + $0x328] sm:$0xff] %v352_v37 }
  0x76   : > { %355 = vst [vmem:[%s879_s26 + $0x330] sm:$0xff] %v354_v38 }
  0x77   : > { %357 = vst [vmem:[%s879_s26 + $0x338] sm:$0xff] %v356_v39 }
  0x78   : > { %359 = vst [vmem:[%s879_s26 + $0x340] sm:$0xff] %v358_v40 }
  0x79   : > { %361 = vst [vmem:[%s879_s26 + $0x348] sm:$0xff] %v360_v41 }
  0x7a   : > { %363 = vst [vmem:[%s879_s26 + $0x350] sm:$0xff] %v362_v42 }
  0x7b   : > { %365 = vst [vmem:[%s879_s26 + $0x358] sm:$0xff] %v364_v43 }
  0x7c PF: > { %p759_p5 = scmp.ge.s32.totalorder %s817_s14, 1  ;;  %p370_p6 = scmp.lt.s32.totalorder %s817_s14, 3 }
  0x7e   : > { %p371_p7 = pnand %p759_p5, %p370_p6 }
  0x7f   : > { %s377_s27 = sand.u32 (!%p371_p7), 1, %s809_s12   ;;  %s760_s17 = sshll.u32 (!%p371_p7), %s753_s15, 1 }
  0x80   : > { %374 = sbr.rel (%p371_p7) target bundleno = 330 (0x14a), region = 51  ;;  %p402_p8 = scmp.lt.s32.totalorder (!%p371_p7), %s760_s17, 3 }
  0x81   : > { %s768_s28 = smul.u32 (!%p371_p7), 864, %s377_s27 }
  0x83   : > { %s1097_s29 = scalar_lea.vmem (!%p371_p7), [#allocation2], %s768_s28 }
  0x85   : > { %v441_v44 = vld [vmem:[%s1097_s29 + $0xf0] sm:$0xff]  ;;  %v439_v45 = vld [vmem:[%s1097_s29 + $0xe0] sm:$0xff]  ;;  %v442_v7 = vld [vmem:[%s1097_s29 + $0xf8] sm:$0xff]  ;;  %vm525_vm0 = vcmask 392192   ;;  %s1259_s17 = smov (!%p402_p8, %s760_s17), 3 }
  0x86   : > { %v473_v46 = vld [vmem:[%s1097_s29 + $0x1f0] sm:$0xff]  ;;  %529 = vmatpush.msra.mxu0 %v441_v44  ;;  %v471_v47 = vld [vmem:[%s1097_s29 + $0x1e0] sm:$0xff]  ;;  %v440_v11 = vld [vmem:[%s1097_s29 + $0xe8] sm:$0xff]  ;;  %s761_s18 = sshll.u32 %s1259_s17, 3 }
  0x87   : > { %549 = vmatpush.msra.mxu1 %v473_v46  ;;  %v437_v48 = vld [vmem:[%s1097_s29 + $0xd0] sm:$0xff]  ;;  %v435_v51 = vld [vmem:[%s1097_s29 + $0xc0] sm:$0xff]  ;;  %v438_v15 = vld [vmem:[%s1097_s29 + $0xd8] sm:$0xff]  ;;  %s405_s22 = scalar_lea.vmem %s1254_s3, %s761_s18 }
  0x88   : > { %v469_v49 = vld [vmem:[%s1097_s29 + $0x1d0] sm:$0xff]  ;;  %530 = vmatpush.msra.mxu0 %v439_v45  ;;  %v467_v52 = vld [vmem:[%s1097_s29 + $0x1c0] sm:$0xff]  ;;  %v436_v19 = vld [vmem:[%s1097_s29 + $0xc8] sm:$0xff] }
  0x89   : > { %550 = vmatpush.msra.mxu1 %v471_v47  ;;  %v517_v50 = vld [vmem:[%s1097_s29 + $0x350] sm:$0xff]  ;;  %v515_v55 = vld [vmem:[%s1097_s29 + $0x340] sm:$0xff]  ;;  %v434_v23 = vld [vmem:[%s1097_s29 + $0xb8] sm:$0xff] }
  0x8a   : > { %599 = vmatpush.msra.mxu3 %v517_v50  ;;  %v505_v53 = vld [vmem:[%s1097_s29 + $0x2f0] sm:$0xff]  ;;  %531 = vmatpush.msra.mxu0 %v437_v48  ;;  %v503_v57 = vld [vmem:[%s1097_s29 + $0x2e0] sm:$0xff]  ;;  %v432_v27 = vld [vmem:[%s1097_s29 + $0xa8] sm:$0xff] }
  0x8b   : > { %551 = vmatpush.msra.mxu1 %v469_v49  ;;  %v433_v54 = vld [vmem:[%s1097_s29 + $0xb0] sm:$0xff]  ;;  %569 = vmatpush.msra.mxu2 %v505_v53  ;;  %v511_v60 = vld [vmem:[%s1097_s29 + $0x320] sm:$0xff]  ;;  %v430_v31 = vld [vmem:[%s1097_s29 + $0x98] sm:$0xff] }
  0x8c   : > { %v465_v56 = vld [vmem:[%s1097_s29 + $0x1b0] sm:$0xff]  ;;  %600 = vmatpush.msra.mxu3 %v515_v55  ;;  %532 = vmatpush.msra.mxu0 %v435_v51  ;;  %v431_v61 = vld [vmem:[%s1097_s29 + $0xa0] sm:$0xff]  ;;  %v428_v35 = vld [vmem:[%s1097_s29 + $0x88] sm:$0xff] }
  0x8d   : > { %v513_v58 = vld [vmem:[%s1097_s29 + $0x330] sm:$0xff]  ;;  %552 = vmatpush.msra.mxu1 %v467_v52  ;;  %v463_v62 = vld [vmem:[%s1097_s29 + $0x1a0] sm:$0xff]  ;;  %570 = vmatpush.msra.mxu2 %v503_v57  ;;  %v474_v39 = vld [vmem:[%s1097_s29 + $0x1f8] sm:$0xff] }
  0x8e   : > { %v501_v59 = vld [vmem:[%s1097_s29 + $0x2d0] sm:$0xff]  ;;  %601 = vmatpush.msra.mxu3 %v513_v58  ;;  %533 = vmatpush.msra.mxu0 %v433_v54  ;;  %v499_v63 = vld [vmem:[%s1097_s29 + $0x2c0] sm:$0xff]  ;;  %v506_v40 = vld [vmem:[%s1097_s29 + $0x2f8] sm:$0xff] }
  0x8f   : > { %553 = vmatpush.msra.mxu1 %v465_v56  ;;  %v509_v0 = vld [vmem:[%s1097_s29 + $0x310] sm:$0xff]  ;;  %571 = vmatpush.msra.mxu2 %v501_v59  ;;  %v507_v4 = vld [vmem:[%s1097_s29 + $0x300] sm:$0xff]  ;;  %v426_v41 = vld [vmem:[%s1097_s29 + $0x78] sm:$0xff] }
  0x90   : > { %v429_v1 = vld [vmem:[%s1097_s29 + $0x90] sm:$0xff]  ;;  %602 = vmatpush.msra.mxu3 %v511_v60  ;;  %534 = vmatpush.msra.mxu0 %v431_v61  ;;  %v427_v5 = vld [vmem:[%s1097_s29 + $0x80] sm:$0xff]  ;;  %v472_v43 = vld [vmem:[%s1097_s29 + $0x1e8] sm:$0xff] }
  0x91   : > { %v461_v2 = vld [vmem:[%s1097_s29 + $0x190] sm:$0xff]  ;;  %554 = vmatpush.msra.mxu1 %v463_v62  ;;  %v459_v6 = vld [vmem:[%s1097_s29 + $0x180] sm:$0xff]  ;;  %572 = vmatpush.msra.mxu2 %v499_v63  ;;  %v504_v44 = vld [vmem:[%s1097_s29 + $0x2e8] sm:$0xff] }
  0x92   : > { %v497_v3 = vld [vmem:[%s1097_s29 + $0x2b0] sm:$0xff]  ;;  %603 = vmatpush.msra.mxu3 %v509_v0  ;;  %535 = vmatpush.msra.mxu0 %v429_v1  ;;  %v495_v8 = vld [vmem:[%s1097_s29 + $0x2a0] sm:$0xff]  ;;  %v424_v45 = vld [vmem:[%s1097_s29 + $0x68] sm:$0xff] }
  0x93   : > { %555 = vmatpush.msra.mxu1 %v461_v2  ;;  %v425_v9 = vld [vmem:[%s1097_s29 + $0x70] sm:$0xff]  ;;  %573 = vmatpush.msra.mxu2 %v497_v3  ;;  %v423_v13 = vld [vmem:[%s1097_s29 + $0x60] sm:$0xff]  ;;  %v470_v47 = vld [vmem:[%s1097_s29 + $0x1d8] sm:$0xff] }
  0x94   : > { %v457_v10 = vld [vmem:[%s1097_s29 + $0x170] sm:$0xff]  ;;  %604 = vmatpush.msra.mxu3 %v507_v4  ;;  %536 = vmatpush.msra.mxu0 %v427_v5  ;;  %v455_v14 = vld [vmem:[%s1097_s29 + $0x160] sm:$0xff]  ;;  %v502_v48 = vld [vmem:[%s1097_s29 + $0x2d8] sm:$0xff] }
  0x95   : > { %556 = vmatpush.msra.mxu1 %v459_v6  ;;  %v493_v12 = vld [vmem:[%s1097_s29 + $0x290] sm:$0xff]  ;;  %574 = vmatpush.msra.mxu2 %v495_v8  ;;  %v491_v16 = vld [vmem:[%s1097_s29 + $0x280] sm:$0xff]  ;;  %v422_v49 = vld [vmem:[%s1097_s29 + $0x58] sm:$0xff] }
  0x96   : > { %609 = vmatpush.msrb.mxu3 %v442_v7  ;;  %537 = vmatpush.msra.mxu0 %v425_v9  ;;  %v421_v17 = vld [vmem:[%s1097_s29 + $0x50] sm:$0xff]  ;;  %v419_v21 = vld [vmem:[%s1097_s29 + $0x40] sm:$0xff]  ;;  %v468_v51 = vld [vmem:[%s1097_s29 + $0x1c8] sm:$0xff] }
  0x97   : > { %557 = vmatpush.msra.mxu1 %v457_v10  ;;  %v453_v18 = vld [vmem:[%s1097_s29 + $0x150] sm:$0xff]  ;;  %575 = vmatpush.msra.mxu2 %v493_v12  ;;  %v451_v22 = vld [vmem:[%s1097_s29 + $0x140] sm:$0xff]  ;;  %v500_v52 = vld [vmem:[%s1097_s29 + $0x2c8] sm:$0xff] }
  0x98   : > { %610 = vmatpush.msrb.mxu3 %v440_v11  ;;  %538 = vmatpush.msra.mxu0 %v423_v13  ;;  %v489_v20 = vld [vmem:[%s1097_s29 + $0x270] sm:$0xff]  ;;  %v487_v24 = vld [vmem:[%s1097_s29 + $0x260] sm:$0xff]  ;;  %v420_v54 = vld [vmem:[%s1097_s29 + $0x48] sm:$0xff] }
  0x99   : > { %558 = vmatpush.msra.mxu1 %v455_v14  ;;  %576 = vmatpush.msra.mxu2 %v491_v16  ;;  %v417_v25 = vld [vmem:[%s1097_s29 + $0x30] sm:$0xff]  ;;  %v415_v29 = vld [vmem:[%s1097_s29 + $0x20] sm:$0xff]  ;;  %v466_v55 = vld [vmem:[%s1097_s29 + $0x1b8] sm:$0xff] }
  0x9a   : > { %611 = vmatpush.msrb.mxu3 %v438_v15  ;;  %539 = vmatpush.msra.mxu0 %v421_v17  ;;  %v449_v26 = vld [vmem:[%s1097_s29 + $0x130] sm:$0xff]  ;;  %v447_v30 = vld [vmem:[%s1097_s29 + $0x120] sm:$0xff]  ;;  %v498_v56 = vld [vmem:[%s1097_s29 + $0x2b8] sm:$0xff] }
  0x9b   : > { %559 = vmatpush.msra.mxu1 %v453_v18  ;;  %577 = vmatpush.msra.mxu2 %v489_v20  ;;  %v485_v28 = vld [vmem:[%s1097_s29 + $0x250] sm:$0xff]  ;;  %v483_v32 = vld [vmem:[%s1097_s29 + $0x240] sm:$0xff]  ;;  %v1183_v57 = vld [vmem:[%s1252_s1 + $0x18] sm:$0x3f] }
  0x9c   : > { %612 = vmatpush.msrb.mxu3 %v436_v19  ;;  %540 = vmatpush.msra.mxu0 %v419_v21  ;;  %v413_v33 = vld [vmem:[%s1097_s29 + $0x10] sm:$0xff]  ;;  %v411_v37 = vld [vmem:[%s1097_s29] sm:$0xff]  ;;  %v464_v59 = vld [vmem:[%s1097_s29 + $0x1a8] sm:$0xff] }
  0x9d   : > { %560 = vmatpush.msra.mxu1 %v451_v22  ;;  %578 = vmatpush.msra.mxu2 %v487_v24  ;;  %v445_v34 = vld [vmem:[%s1097_s29 + $0x110] sm:$0xff]  ;;  %v443_v38 = vld [vmem:[%s1097_s29 + $0x100] sm:$0xff]  ;;  %v496_v60 = vld [vmem:[%s1097_s29 + $0x2a8] sm:$0xff]  ;;  %v819_v22 = vmov 0  }
  0x9e   : > { %613 = vmatpush.msrb.mxu3 %v434_v23  ;;  %541 = vmatpush.msra.mxu0 %v417_v25  ;;  %v481_v36 = vld [vmem:[%s1097_s29 + $0x230] sm:$0xff]  ;;  %v479_v42 = vld [vmem:[%s1097_s29 + $0x220] sm:$0xff]  ;;  %v418_v61 = vld [vmem:[%s1097_s29 + $0x38] sm:$0xff] }
  0x9f   : > { %561 = vmatpush.msra.mxu1 %v449_v26  ;;  %579 = vmatpush.msra.mxu2 %v485_v28  ;;  %v477_v46 = vld [vmem:[%s1097_s29 + $0x210] sm:$0xff]  ;;  %v475_v50 = vld [vmem:[%s1097_s29 + $0x200] sm:$0xff]  ;;  %v1195_v62 = vld [vmem:[%s1252_s1 + $0x8] sm:$0x3f] }
  0xa0   : > { %614 = vmatpush.msrb.mxu3 %v432_v27  ;;  %542 = vmatpush.msra.mxu0 %v415_v29  ;;  %v1175_v53 = vld [vmem:[%s1252_s1 + $0x10] sm:$0x3f]  ;;  %v407_v58 = vld [vmem:[%s1252_s1] sm:$0x3f]  ;;  %v462_v63 = vld [vmem:[%s1097_s29 + $0x198] sm:$0xff] }
  0xa1   : > { %562 = vmatpush.msra.mxu1 %v447_v30  ;;  %580 = vmatpush.msra.mxu2 %v483_v32  ;;  %v494_v0 = vld [vmem:[%s1097_s29 + $0x298] sm:$0xff]  ;;  %v416_v1 = vld [vmem:[%s1097_s29 + $0x28] sm:$0xff]  ;;  %v519_v19 = vld [vmem:[%s1253_s2] sm:$0x3f] }
  0xa2   : > { %615 = vmatpush.msrb.mxu3 %v430_v31  ;;  %543 = vmatpush.msra.mxu0 %v413_v33  ;;  %v518_v2 = vld [vmem:[%s1097_s29 + $0x358] sm:$0xff]  ;;  %v460_v3 = vld [vmem:[%s1097_s29 + $0x188] sm:$0xff] }
  0xa3   : > { %563 = vmatpush.msra.mxu1 %v445_v34  ;;  %581 = vmatpush.msra.mxu2 %v481_v36  ;;  %v492_v4 = vld [vmem:[%s1097_s29 + $0x288] sm:$0xff]  ;;  %v414_v5 = vld [vmem:[%s1097_s29 + $0x18] sm:$0xff] }
  0xa4   : > { %616 = vmatpush.msrb.mxu3 %v428_v35  ;;  %544 = vmatpush.msra.mxu0 %v411_v37  ;;  %v516_v6 = vld [vmem:[%s1097_s29 + $0x348] sm:$0xff]  ;;  %v458_v7 = vld [vmem:[%s1097_s29 + $0x178] sm:$0xff] }
  0xa5   : > { %564 = vmatpush.msra.mxu1 %v443_v38  ;;  %582 = vmatpush.msra.mxu2 %v479_v42  ;;  %v490_v8 = vld [vmem:[%s1097_s29 + $0x278] sm:$0xff]  ;;  %v412_v9 = vld [vmem:[%s1097_s29 + $0x8] sm:$0xff] }
  0xa6   : > { %629 = vmatpush.msrb.mxu0 %v474_v39  ;;  %617 = vmatpush.msrb.mxu3 %v426_v41  ;;  %v514_v10 = vld [vmem:[%s1097_s29 + $0x338] sm:$0xff]  ;;  %v456_v11 = vld [vmem:[%s1097_s29 + $0x168] sm:$0xff] }
  0xa7   : > { %649 = vmatpush.msrb.mxu1 %v506_v40  ;;  %583 = vmatpush.msra.mxu2 %v477_v46  ;;  %v488_v12 = vld [vmem:[%s1097_s29 + $0x268] sm:$0xff]  ;;  %v454_v14 = vld [vmem:[%s1097_s29 + $0x158] sm:$0xff] }
  0xa8   : > { %630 = vmatpush.msrb.mxu0 %v472_v43  ;;  %618 = vmatpush.msrb.mxu3 %v424_v45  ;;  %v512_v13 = vld [vmem:[%s1097_s29 + $0x328] sm:$0xff]  ;;  %v486_v15 = vld [vmem:[%s1097_s29 + $0x258] sm:$0xff] }
  0xa9   : > { %650 = vmatpush.msrb.mxu1 %v504_v44  ;;  %584 = vmatpush.msra.mxu2 %v475_v50  ;;  %v510_v16 = vld [vmem:[%s1097_s29 + $0x318] sm:$0xff]  ;;  %v452_v17 = vld [vmem:[%s1097_s29 + $0x148] sm:$0xff] }
  0xaa   : > { %631 = vmatpush.msrb.mxu0 %v470_v47  ;;  %619 = vmatpush.msrb.mxu3 %v422_v49  ;;  %v484_v18 = vld [vmem:[%s1097_s29 + $0x248] sm:$0xff]  ;;  %v450_v21 = vld [vmem:[%s1097_s29 + $0x138] sm:$0xff] }
  0xab   : > { %651 = vmatpush.msrb.mxu1 %v502_v48  ;;  %585 = vmatmul.f32.vlgmr.msra.gmra.mxu2 %v1175_v53  ;;  %v508_v20 = vld [vmem:[%s1097_s29 + $0x308] sm:$0xff]  ;;  %v482_v23 = vld [vmem:[%s1097_s29 + $0x238] sm:$0xff] }
  0xac   : > { %632 = vmatpush.msrb.mxu0 %v468_v51  ;;  %620 = vmatpush.msrb.mxu3 %v420_v54  ;;  %v448_v24 = vld [vmem:[%s1097_s29 + $0x128] sm:$0xff]  ;;  %v446_v26 = vld [vmem:[%s1097_s29 + $0x118] sm:$0xff] }
  0xad   : > { %652 = vmatpush.msrb.mxu1 %v500_v52  ;;  %762 = vmatmul.msk.f32.vlgmr.msra.gmra.mxu3 %vm525_vm0, %v1183_v57  ;;  %v480_v25 = vld [vmem:[%s1097_s29 + $0x228] sm:$0xff]  ;;  %v478_v27 = vld [vmem:[%s1097_s29 + $0x218] sm:$0xff] }
  0xae   : > { %633 = vmatpush.msrb.mxu0 %v466_v55  ;;  %621 = vmatpush.msrb.mxu3 %v418_v61  ;;  %v444_v28 = vld [vmem:[%s1097_s29 + $0x108] sm:$0xff] }
  0xaf   : > { %653 = vmatpush.msrb.mxu1 %v498_v56  ;;  %545 = vmatmul.f32.vlgmr.msra.gmra.mxu0 %v407_v58  ;;  %v476_v29 = vld [vmem:[%s1097_s29 + $0x208] sm:$0xff] }
  0xb0   : > { %634 = vmatpush.msrb.mxu0 %v464_v59  ;;  %565 = vmatmul.f32.vlgmr.msra.gmra.mxu1 %v1195_v62 }
  0xb1   : > { %654 = vmatpush.msrb.mxu1 %v496_v60  ;;  %622 = vmatpush.msrb.mxu3 %v416_v1 }
  0xb2   : > { %635 = vmatpush.msrb.mxu0 %v462_v63  ;;  %679 = vmatpush.msrb.mxu2 %v518_v2 }
  0xb3   : > { %655 = vmatpush.msrb.mxu1 %v494_v0  ;;  %623 = vmatpush.msrb.mxu3 %v414_v5 }
  0xb4   : > { %636 = vmatpush.msrb.mxu0 %v460_v3  ;;  %680 = vmatpush.msrb.mxu2 %v516_v6 }
  0xb5   : > { %656 = vmatpush.msrb.mxu1 %v492_v4  ;;  %624 = vmatpush.msrb.mxu3 %v412_v9 }
  0xb6   : > { %637 = vmatpush.msrb.mxu0 %v458_v7  ;;  %681 = vmatpush.msrb.mxu2 %v514_v10 }
  0xb7   : > { %657 = vmatpush.msrb.mxu1 %v490_v8  ;;  %625 = vmatmul.f32.vlgmr.msrb.gmra.mxu3 %v407_v58 }
  0xb8   : > { %638 = vmatpush.msrb.mxu0 %v456_v11  ;;  %682 = vmatpush.msrb.mxu2 %v512_v13 }
  0xb9   : > { %658 = vmatpush.msrb.mxu1 %v488_v12  ;;  %794 = vset.pattern.permute.xlu0 %v819_v22 }
  0xba   : > { %639 = vmatpush.msrb.mxu0 %v454_v14  ;;  %683 = vmatpush.msrb.mxu2 %v510_v16 }
  0xbb   : > { %659 = vmatpush.msrb.mxu1 %v486_v15  ;;  %522 = vperm.xlu0 %794, %v519_v19  }
  0xbc   : > { %640 = vmatpush.msrb.mxu0 %v452_v17  ;;  %684 = vmatpush.msrb.mxu2 %v508_v20 }
  0xbd   : > { %660 = vmatpush.msrb.mxu1 %v484_v18  ;;  %763 = vmatmul.msk.f32.vlgmr.msrb.gmra.mxu2 %vm525_vm0, %v1183_v57 }
  0xbe   : > { %641 = vmatpush.msrb.mxu0 %v450_v21 }
  0xbf   : > { %661 = vmatpush.msrb.mxu1 %v482_v23 }
  0xc0   : > { %642 = vmatpush.msrb.mxu0 %v448_v24 }
  0xc1   : > { %662 = vmatpush.msrb.mxu1 %v480_v25 }
  0xc2   : > { %643 = vmatpush.msrb.mxu0 %v446_v26 }
  0xc3   : > { %663 = vmatpush.msrb.mxu1 %v478_v27 }
  0xc4   : > { %644 = vmatpush.msrb.mxu0 %v444_v28 }
  0xc5   : > { %664 = vmatpush.msrb.mxu1 %v476_v29  ;;  %645 = vmatmul.f32.vlgmr.msrb.gmra.mxu0 %v1195_v62 }
  0xc6   : > { %665 = vmatmul.f32.vlgmr.msrb.gmra.mxu1 %v1175_v53 }
 0x12c   : > { %v546_v30 = vpop.f32.mrf.mxu0 }
 0x12d   : > { %v523_v31 = vpop.permute.xlu0 %522  ;;  %v566_v32 = vpop.f32.mrf.mxu1 }
 0x12e   : > { %v547_v33 = vadd.f32 %v546_v30, %v523_v31  ;;  %v586_v34 = vpop.f32.mrf.mxu2 }
 0x130   : > { %v567_v35 = vadd.f32 %v566_v32, %v547_v33  ;;  %v606_v36 = vpop.f32.mrf.mxu3 }
 0x132   : > { %v587_v37 = vadd.f32 %v586_v34, %v567_v35 }
 0x134   : > { %v607_v38 = vadd.f32 %v606_v36, %v587_v37 }
 0x136   : > { %689 = vst [vmem:[%s405_s22] sm:$0x3f] %v607_v38 }
 0x13a   : > { %v626_v39 = vpop.f32.mrf.mxu3 }
 0x13b   : > { %v627_v40 = vadd.f32 %v626_v39, %v523_v31 }
 0x140   : > { %v686_v44 = vpop.f32.mrf.mxu2 }
 0x142   : > { %v646_v41 = vpop.f32.mrf.mxu0 }
 0x143   : > { %v666_v42 = vpop.f32.mrf.mxu1  ;;  %v647_v43 = vadd.f32 %v646_v41, %v627_v40 }
 0x145   : > { %v667_v45 = vadd.f32 %v666_v42, %v647_v43 }
 0x147   : > { %v687_v46 = vadd.f32 %v686_v44, %v667_v45 }
 0x149   : > { %690 = vst [vmem:[%s405_s22 + $0x8] sm:$0x3f] %v687_v46 }
 0x14a PF: > { %p10_p9 = scmp.ge.s32.totalorder %s857_s16, 4   ;;  %s1255_s12 = smov %s813_s13 }
 0x14b   : > { %s1256_s13 = smov %s866_s19  ;;  %s1257_s14 = smov %s857_s16 }
 0x14c   :  { %12 = sbr.rel (!%p10_p9) target bundleno = 2 (0x2), region = 90 }

</bundles_post_ra>
